<compile_context>
chip_gen: v7x
topology: tpu7x:2x2x1
jax: 0.10.0
libtpu: 0.0.40
codegen_flags: <defaults>
</compile_context>

<pallas_src>
import functools

import jax
import jax.numpy as jnp
from jax.experimental import pallas as pl
from jax.experimental.pallas import tpu as pltpu

_ALPHA = 0.01  # LeakyReLU negative slope


def _leaky(v):
    return jnp.where(v > 0, v, _ALPHA * v)


# ------------------------------ fused kernel ------------------------------ #
def _dqn_kernel(p1_ref, w1_ref, b1_ref, w2_ref, b2_ref, w3_ref, b3_ref,
                wf1_ref, bf1_ref, wf2_ref, bf2_ref, out_ref,
                q0_ref, q1_ref, y2_ref, xf_ref):
    bf16 = jnp.bfloat16
    f32 = jnp.float32

    # ---- conv1: 8x8 s4, 4 -> 32 ch (padded to 128 lanes).  One MXU matmul.
    # p1 rows (per sample): 4 blocks of 112 rows, block = (h%2, w%2), row in
    # block = (h//2)*10 + (w//2) (rows 100..111 zero-padded); K = (c, i, j).
    y1 = jnp.dot(p1_ref[...], w1_ref[...], preferred_element_type=f32)   # (448,128)
    y1 = _leaky(y1 + b1_ref[...]).astype(bf16)
    # Parity-packed conv1 output: q{h%2}[(h//2)*10 + w//2, (w%2)*128 + c].
    # All four stores are full-width, 8/16-row aligned.
    q0_ref[:, 0:128] = y1[0:112, :]
    q0_ref[:, 128:256] = y1[112:224, :]
    q1_ref[:, 0:128] = y1[224:336, :]
    q1_ref[:, 128:256] = y1[336:448, :]

    # ---- conv2: 4x4 s2, 32 -> 64.  Tap-accumulated (no materialized im2col).
    # Output row r = ho*10 + wo (ho in [0,9), wo in [0,10); wo=9 rows are junk
    # and never consumed by conv3).  For tap (i, j) the LHS is the contiguous
    # 96-row slice of q_{i%2} starting at (i//2)*10 + j//2 in lane half j%2.
    q_refs = (q0_ref, q1_ref)
    acc2 = None
    for i in range(4):
        for j in range(4):
            src = q_refs[i % 2]
            s = (i // 2) * 10 + (j // 2)
            lo = (j % 2) * 128
            lhs = src[s:s + 96, lo:lo + 128]                       # bf16 (96,128)
            wt = w2_ref[(i * 4 + j) * 128:(i * 4 + j + 1) * 128, :]
            d = jnp.dot(lhs, wt, preferred_element_type=f32)
            acc2 = d if acc2 is None else acc2 + d
    y2_ref[...] = _leaky(acc2 + b2_ref[...]).astype(bf16)          # (96,128) full store

    # ---- conv3: 3x3 s1, 64 -> 64.  Tap-accumulated.
    # Output row r = y*10 + x (valid for y, x in [0,7)).  For tap (ti, tj) the
    # LHS is the contiguous 72-row slice of y2 starting at ti*10 + tj.
    acc3 = None
    for ti in range(3):
        for tj in range(3):
            t = ti * 10 + tj
            lhs = y2_ref[t:t + 72, :]                              # bf16 (72,128)
            wt = w3_ref[(ti * 3 + tj) * 128:(ti * 3 + tj + 1) * 128, :]
            d = jnp.dot(lhs, wt, preferred_element_type=f32)
            acc3 = d if acc3 is None else acc3 + d
    y3 = _leaky(acc3 + b3_ref[...]).astype(bf16)                   # (72,128)

    # ---- flatten (epilogue fused into the scatter) + fc1 + fc2 ------------
    # xf[0, p*128 + c] = conv3_out[p, c] with p = y*7 + x; wf1 rows were
    # permuted at init so this lane-packed order equals PyTorch's NCHW
    # .view(B, -1) flatten order.  All 49*128 lanes are written every step.
    for y in range(7):
        for x in range(7):
            p = y * 7 + x
            r = y * 10 + x
            xf_ref[0:1, p * 128:(p + 1) * 128] = y3[r:r + 1, :]
    h = jnp.dot(xf_ref[...], wf1_ref[...], preferred_element_type=f32)   # (1,512)
    h = _leaky(h + bf1_ref[...]).astype(bf16)
    o = jnp.dot(h, wf2_ref[...], preferred_element_type=f32)             # (1,128)
    out_ref[...] = jnp.broadcast_to(o + bf2_ref[...], (8, 128)).astype(out_ref.dtype)


# --------------------------- input-side im2col ----------------------------- #
def _conv1_patches(x):
    """x: (B, 4, 84, 84) NCHW -> conv1 im2col patches, bf16, (B*448, 256).

    Per-sample rows: 4 parity blocks (h%2, w%2) of 112 rows each; within a
    block, row = (h//2)*10 + (w//2) for the 100 valid conv1 output positions,
    rows 100..111 zero-padded (keeps every kernel store 8-row aligned).
    K = (cin, ki, kj), matching the torch Conv2d weight reshape."""
    B = x.shape[0]
    taps = [x[:, :, i:i + 77:4, j:j + 77:4]            # each (B, 4, 20, 20)
            for i in range(8) for j in range(8)]
    t = jnp.stack(taps, axis=0).reshape(8, 8, B, 4, 20, 20)
    t = t.reshape(8, 8, B, 4, 10, 2, 10, 2)            # (i, j, b, c, hq, hp, wq, wp)
    t = t.transpose(2, 5, 7, 4, 6, 3, 0, 1)            # (b, hp, wp, hq, wq, c, i, j)
    t = t.reshape(B, 2, 2, 100, 256)
    t = jnp.pad(t, ((0, 0), (0, 0), (0, 0), (0, 12), (0, 0)))   # 100 -> 112 rows
    return t.reshape(B * 448, 256).astype(jnp.bfloat16)


# --------------------------- parameter handling ---------------------------- #
def init_params(key, input_channels=4, n_actions=2):
    """PyTorch-layout parameters (same shapes as the nn.Module)."""
    ks = jax.random.split(key, 10)

    def uni(k, shape, fan_in):
        bound = 1.0 / jnp.sqrt(jnp.float32(fan_in))
        return jax.random.uniform(k, shape, jnp.float32, -bound, bound)

    p = {}
    p["w1"] = uni(ks[0], (32, input_channels, 8, 8), input_channels * 8 * 8)
    p["b1"] = uni(ks[1], (32,), input_channels * 8 * 8)
    p["w2"] = uni(ks[2], (64, 32, 4, 4), 32 * 4 * 4)
    p["b2"] = uni(ks[3], (64,), 32 * 4 * 4)
    p["w3"] = uni(ks[4], (64, 64, 3, 3), 64 * 3 * 3)
    p["b3"] = uni(ks[5], (64,), 64 * 3 * 3)
    p["wf1"] = uni(ks[6], (512, 3136), 3136)     # torch Linear: (out, in)
    p["bf1"] = uni(ks[7], (512,), 3136)
    p["wf2"] = uni(ks[8], (n_actions, 512), 512)
    p["bf2"] = uni(ks[9], (n_actions,), 512)
    return p


def prepare_params(params):
    """One-time repack of torch-layout params into kernel-ready operands.

    Call ONCE outside the jitted forward: all transposes, zero-pads and bf16
    casts are hoisted out of the per-call path; padded rows/cols are zero so
    padded lanes stay exactly 0 end-to-end."""
    bf16, f32 = jnp.bfloat16, jnp.float32

    def pad_lanes(a, n):
        return jnp.pad(a, ((0, 0), (0, n - a.shape[1])))

    w1, b1 = params["w1"], params["b1"]
    w2, b2 = params["w2"], params["b2"]
    w3, b3 = params["w3"], params["b3"]
    wf1, bf1 = params["wf1"], params["bf1"]
    wf2, bf2 = params["wf2"], params["bf2"]
    n_actions = wf2.shape[0]

    # conv1: K = (cin, ki, kj) (== torch reshape order), cout 32 -> 128 lanes.
    w1p = pad_lanes(w1.reshape(32, 256).T, 128).astype(bf16)          # (256, 128)
    b1p = jnp.pad(b1, (0, 96)).reshape(1, 128).astype(f32)

    # conv2: 16 per-tap (128,128) blocks; rows = cin padded 32->128, cols = cout 64->128.
    w2t = jnp.transpose(w2, (2, 3, 1, 0))                              # (4,4,32,64)
    w2t = jnp.pad(w2t, ((0, 0), (0, 0), (0, 96), (0, 0))).reshape(2048, 64)
    w2p = pad_lanes(w2t, 128).astype(bf16)                             # (2048, 128)
    b2p = jnp.pad(b2, (0, 64)).reshape(1, 128).astype(f32)

    # conv3: 9 per-tap (128,128) blocks.
    w3t = jnp.transpose(w3, (2, 3, 1, 0))                              # (3,3,64,64)
    w3t = jnp.pad(w3t, ((0, 0), (0, 0), (0, 64), (0, 0))).reshape(1152, 64)
    w3p = pad_lanes(w3t, 128).astype(bf16)                             # (1152, 128)
    b3p = jnp.pad(b3, (0, 64)).reshape(1, 128).astype(f32)

    # fc1: torch flatten index f = c*49 + p (p = y*7 + x); kernel feeds rows
    # ordered (p major, 128-padded c minor), so permute the rows once here.
    wf1t = wf1.reshape(512, 64, 49)                                    # (n, c, p)
    wf1t = jnp.transpose(wf1t, (2, 1, 0))                              # (p, c, n)
    wf1t = jnp.pad(wf1t, ((0, 0), (0, 64), (0, 0))).reshape(49 * 128, 512)
    wf1p = wf1t.astype(bf16)                                           # (6272, 512)
    bf1p = bf1.reshape(1, 512).astype(f32)

    wf2p = pad_lanes(wf2.T, 128).astype(bf16)                          # (512, 128)
    bf2p = jnp.pad(bf2, (0, 128 - n_actions)).reshape(1, 128).astype(f32)

    arrays = dict(w1=w1p, b1=b1p, w2=w2p, b2=b2p, w3=w3p, b3=b3p,
                  wf1=wf1p, bf1=bf1p, wf2=wf2p, bf2=bf2p)
    return arrays, n_actions


# --------------------------------- forward --------------------------------- #
def dqn_forward(prepped, x, *, n_actions):
    # x: (B, 4, 84, 84) float32 NCHW, same as the PyTorch module.
    B = x.shape[0]
    p1 = _conv1_patches(x)                                # (B*448, 256) bf16

    out = pl.pallas_call(
        _dqn_kernel,
        out_shape=jax.ShapeDtypeStruct((B * 8, 128), jnp.float32),
        grid=(B,),
        in_specs=[
            pl.BlockSpec((448, 256), lambda b: (b, 0)),   # conv1 patches (per sample)
            pl.BlockSpec((256, 128), lambda b: (0, 0)),   # w1
            pl.BlockSpec((1, 128), lambda b: (0, 0)),     # b1
            pl.BlockSpec((2048, 128), lambda b: (0, 0)),  # w2 (16 tap blocks)
            pl.BlockSpec((1, 128), lambda b: (0, 0)),     # b2
            pl.BlockSpec((1152, 128), lambda b: (0, 0)),  # w3 (9 tap blocks)
            pl.BlockSpec((1, 128), lambda b: (0, 0)),     # b3
            pl.BlockSpec((6272, 512), lambda b: (0, 0)),  # wf1
            pl.BlockSpec((1, 512), lambda b: (0, 0)),     # bf1
            pl.BlockSpec((512, 128), lambda b: (0, 0)),   # wf2
            pl.BlockSpec((1, 128), lambda b: (0, 0)),     # bf2
        ],
        out_specs=pl.BlockSpec((8, 128), lambda b: (b, 0)),
        scratch_shapes=[
            pltpu.VMEM((112, 256), jnp.bfloat16),   # q0: conv1 out, h%2 == 0
            pltpu.VMEM((112, 256), jnp.bfloat16),   # q1: conv1 out, h%2 == 1
            pltpu.VMEM((96, 128), jnp.bfloat16),    # conv2 output (stride-10 rows)
            pltpu.VMEM((1, 6272), jnp.bfloat16),    # fc1 input (lane-packed flatten)
        ],
        compiler_params=pltpu.CompilerParams(
            dimension_semantics=("parallel",),
            vmem_limit_bytes=32 * 1024 * 1024,
        ),
    )(p1, prepped["w1"], prepped["b1"], prepped["w2"], prepped["b2"],
      prepped["w3"], prepped["b3"], prepped["wf1"], prepped["bf1"],
      prepped["wf2"], prepped["bf2"])

    return out.reshape(B, 8, 128)[:, 0, :n_actions]


if __name__ == "__main__":
    key = jax.random.PRNGKey(0)
    pkey, xkey = jax.random.split(key)

    params = init_params(pkey, input_channels=4, n_actions=2)
    prepped, n_actions = prepare_params(params)   # hoisted weight repack (once)

    # 84x84 input is implied by the module (flatten -> 3136 = 64*7*7); batch=2.
    x = jax.random.normal(xkey, (2, 4, 84, 84), dtype=jnp.float32)

    fwd = jax.jit(functools.partial(dqn_forward, n_actions=n_actions))
    out = fwd(prepped, x)
    jax.block_until_ready(out)
    assert out.shape == (2, 2) and out.dtype == jnp.float32
    assert bool(jnp.all(jnp.isfinite(out)))
    print("KERNEL_OK")
</pallas_src>

<mosaic_0001>
module attributes {stable_mosaic.version = 11 : i64} {
  func.func @_dqn_kernel(%arg0: i32, %arg1: memref<448x256xbf16, #tpu.memory_space<vmem>>, %arg2: memref<256x128xbf16, #tpu.memory_space<vmem>>, %arg3: memref<1x128xf32, #tpu.memory_space<vmem>>, %arg4: memref<2048x128xbf16, #tpu.memory_space<vmem>>, %arg5: memref<1x128xf32, #tpu.memory_space<vmem>>, %arg6: memref<1152x128xbf16, #tpu.memory_space<vmem>>, %arg7: memref<1x128xf32, #tpu.memory_space<vmem>>, %arg8: memref<6272x512xbf16, #tpu.memory_space<vmem>>, %arg9: memref<1x512xf32, #tpu.memory_space<vmem>>, %arg10: memref<512x128xbf16, #tpu.memory_space<vmem>>, %arg11: memref<1x128xf32, #tpu.memory_space<vmem>>, %arg12: memref<8x128xf32, #tpu.memory_space<vmem>>, %arg13: memref<112x256xbf16, #tpu.memory_space<vmem>>, %arg14: memref<112x256xbf16, #tpu.memory_space<vmem>>, %arg15: memref<96x128xbf16, #tpu.memory_space<vmem>>, %arg16: memref<1x6272xbf16, #tpu.memory_space<vmem>>) attributes {dimension_semantics = [#tpu.dimension_semantics<parallel>], iteration_bounds = array<i64: 2>, scalar_prefetch = 0 : i64, scratch_operands = 4 : i64, tpu.core_type = #tpu.core_type<tc>, window_params = [{transform_indices = @transform_0, window_bounds = array<i64: 448, 256>}, {pipeline_mode = #tpu.pipeline_mode<synchronous>, transform_indices = @transform_1, window_bounds = array<i64: 256, 128>}, {pipeline_mode = #tpu.pipeline_mode<synchronous>, transform_indices = @transform_2, window_bounds = array<i64: 1, 128>}, {pipeline_mode = #tpu.pipeline_mode<synchronous>, transform_indices = @transform_3, window_bounds = array<i64: 2048, 128>}, {pipeline_mode = #tpu.pipeline_mode<synchronous>, transform_indices = @transform_4, window_bounds = array<i64: 1, 128>}, {pipeline_mode = #tpu.pipeline_mode<synchronous>, transform_indices = @transform_5, window_bounds = array<i64: 1152, 128>}, {pipeline_mode = #tpu.pipeline_mode<synchronous>, transform_indices = @transform_6, window_bounds = array<i64: 1, 128>}, {pipeline_mode = #tpu.pipeline_mode<synchronous>, transform_indices = @transform_7, window_bounds = array<i64: 6272, 512>}, {pipeline_mode = #tpu.pipeline_mode<synchronous>, transform_indices = @transform_8, window_bounds = array<i64: 1, 512>}, {pipeline_mode = #tpu.pipeline_mode<synchronous>, transform_indices = @transform_9, window_bounds = array<i64: 512, 128>}, {pipeline_mode = #tpu.pipeline_mode<synchronous>, transform_indices = @transform_10, window_bounds = array<i64: 1, 128>}, {transform_indices = @transform_11, window_bounds = array<i64: 8, 128>}]} {
    %c0 = arith.constant 0 : index
    %c0_0 = arith.constant 0 : index
    %0 = vector.load %arg1[%c0, %c0_0] : memref<448x256xbf16, #tpu.memory_space<vmem>>, vector<448x256xbf16>
    %c0_1 = arith.constant 0 : index
    %c0_2 = arith.constant 0 : index
    %1 = vector.load %arg2[%c0_1, %c0_2] : memref<256x128xbf16, #tpu.memory_space<vmem>>, vector<256x128xbf16>
    %cst = arith.constant dense<0.000000e+00> : vector<448x128xf32>
    %2 = tpu.matmul %0, %1, %cst {dimension_numbers = #tpu.dot_dimension_numbers<[1], [0], [0], [1], [0, 0, 1, 1], [], []>} : vector<448x256xbf16>, vector<256x128xbf16>, vector<448x128xf32> -> vector<448x128xf32>
    %c0_3 = arith.constant 0 : index
    %c0_4 = arith.constant 0 : index
    %3 = vector.load %arg3[%c0_3, %c0_4] : memref<1x128xf32, #tpu.memory_space<vmem>>, vector<1x128xf32>
    %4 = vector.broadcast %3 : vector<1x128xf32> to vector<448x128xf32>
    %5 = arith.addf %2, %4 : vector<448x128xf32>
    %cst_5 = arith.constant 0.000000e+00 : f32
    %6 = vector.broadcast %cst_5 : f32 to vector<448x128xf32>
    %7 = arith.cmpf ogt, %5, %6 : vector<448x128xf32>
    %cst_6 = arith.constant 0.00999999977 : f32
    %8 = vector.broadcast %cst_6 : f32 to vector<448x128xf32>
    %9 = arith.mulf %8, %5 : vector<448x128xf32>
    %10 = arith.select %7, %5, %9 : vector<448x128xi1>, vector<448x128xf32>
    %11 = arith.truncf %10 : vector<448x128xf32> to vector<448x128xbf16>
    %12 = vector.extract_strided_slice %11 {offsets = [0, 0], sizes = [112, 128], strides = [1, 1]} : vector<448x128xbf16> to vector<112x128xbf16>
    %c0_7 = arith.constant 0 : index
    %c0_8 = arith.constant 0 : index
    %13 = vector.load %arg13[%c0_7, %c0_8] : memref<112x256xbf16, #tpu.memory_space<vmem>>, vector<112x128xbf16>
    tpu.vector_store %arg13[%c0_7, %c0_8], %12 {strides = array<i32>} : memref<112x256xbf16, #tpu.memory_space<vmem>>, vector<112x128xbf16>,
    %14 = vector.extract_strided_slice %11 {offsets = [112, 0], sizes = [112, 128], strides = [1, 1]} : vector<448x128xbf16> to vector<112x128xbf16>
    %c0_9 = arith.constant 0 : index
    %c128 = arith.constant 128 : index
    %15 = vector.load %arg13[%c0_9, %c128] : memref<112x256xbf16, #tpu.memory_space<vmem>>, vector<112x128xbf16>
    tpu.vector_store %arg13[%c0_9, %c128], %14 {strides = array<i32>} : memref<112x256xbf16, #tpu.memory_space<vmem>>, vector<112x128xbf16>,
    %16 = vector.extract_strided_slice %11 {offsets = [224, 0], sizes = [112, 128], strides = [1, 1]} : vector<448x128xbf16> to vector<112x128xbf16>
    %c0_10 = arith.constant 0 : index
    %c0_11 = arith.constant 0 : index
    %17 = vector.load %arg14[%c0_10, %c0_11] : memref<112x256xbf16, #tpu.memory_space<vmem>>, vector<112x128xbf16>
    tpu.vector_store %arg14[%c0_10, %c0_11], %16 {strides = array<i32>} : memref<112x256xbf16, #tpu.memory_space<vmem>>, vector<112x128xbf16>,
    %18 = vector.extract_strided_slice %11 {offsets = [336, 0], sizes = [112, 128], strides = [1, 1]} : vector<448x128xbf16> to vector<112x128xbf16>
    %c0_12 = arith.constant 0 : index
    %c128_13 = arith.constant 128 : index
    %19 = vector.load %arg14[%c0_12, %c128_13] : memref<112x256xbf16, #tpu.memory_space<vmem>>, vector<112x128xbf16>
    tpu.vector_store %arg14[%c0_12, %c128_13], %18 {strides = array<i32>} : memref<112x256xbf16, #tpu.memory_space<vmem>>, vector<112x128xbf16>,
    %c0_14 = arith.constant 0 : index
    %c0_15 = arith.constant 0 : index
    %20 = vector.load %arg13[%c0_14, %c0_15] : memref<112x256xbf16, #tpu.memory_space<vmem>>, vector<96x128xbf16>
    %c0_16 = arith.constant 0 : index
    %c0_17 = arith.constant 0 : index
    %21 = vector.load %arg4[%c0_16, %c0_17] : memref<2048x128xbf16, #tpu.memory_space<vmem>>, vector<128x128xbf16>
    %cst_18 = arith.constant dense<0.000000e+00> : vector<96x128xf32>
    %22 = tpu.matmul %20, %21, %cst_18 {dimension_numbers = #tpu.dot_dimension_numbers<[1], [0], [0], [1], [0, 0, 1, 1], [], []>} : vector<96x128xbf16>, vector<128x128xbf16>, vector<96x128xf32> -> vector<96x128xf32>
    %c0_19 = arith.constant 0 : index
    %c128_20 = arith.constant 128 : index
    %23 = vector.load %arg13[%c0_19, %c128_20] : memref<112x256xbf16, #tpu.memory_space<vmem>>, vector<96x128xbf16>
    %c128_21 = arith.constant 128 : index
    %c0_22 = arith.constant 0 : index
    %24 = vector.load %arg4[%c128_21, %c0_22] : memref<2048x128xbf16, #tpu.memory_space<vmem>>, vector<128x128xbf16>
    %cst_23 = arith.constant dense<0.000000e+00> : vector<96x128xf32>
    %25 = tpu.matmul %23, %24, %cst_23 {dimension_numbers = #tpu.dot_dimension_numbers<[1], [0], [0], [1], [0, 0, 1, 1], [], []>} : vector<96x128xbf16>, vector<128x128xbf16>, vector<96x128xf32> -> vector<96x128xf32>
    %26 = arith.addf %22, %25 : vector<96x128xf32>
    %c1 = arith.constant 1 : index
    %c0_24 = arith.constant 0 : index
    %27 = vector.load %arg13[%c1, %c0_24] : memref<112x256xbf16, #tpu.memory_space<vmem>>, vector<96x128xbf16>
    %c256 = arith.constant 256 : index
    %c0_25 = arith.constant 0 : index
    %28 = vector.load %arg4[%c256, %c0_25] : memref<2048x128xbf16, #tpu.memory_space<vmem>>, vector<128x128xbf16>
    %cst_26 = arith.constant dense<0.000000e+00> : vector<96x128xf32>
    %29 = tpu.matmul %27, %28, %cst_26 {dimension_numbers = #tpu.dot_dimension_numbers<[1], [0], [0], [1], [0, 0, 1, 1], [], []>} : vector<96x128xbf16>, vector<128x128xbf16>, vector<96x128xf32> -> vector<96x128xf32>
    %30 = arith.addf %26, %29 : vector<96x128xf32>
    %c1_27 = arith.constant 1 : index
    %c128_28 = arith.constant 128 : index
    %31 = vector.load %arg13[%c1_27, %c128_28] : memref<112x256xbf16, #tpu.memory_space<vmem>>, vector<96x128xbf16>
    %c384 = arith.constant 384 : index
    %c0_29 = arith.constant 0 : index
    %32 = vector.load %arg4[%c384, %c0_29] : memref<2048x128xbf16, #tpu.memory_space<vmem>>, vector<128x128xbf16>
    %cst_30 = arith.constant dense<0.000000e+00> : vector<96x128xf32>
    %33 = tpu.matmul %31, %32, %cst_30 {dimension_numbers = #tpu.dot_dimension_numbers<[1], [0], [0], [1], [0, 0, 1, 1], [], []>} : vector<96x128xbf16>, vector<128x128xbf16>, vector<96x128xf32> -> vector<96x128xf32>
    %34 = arith.addf %30, %33 : vector<96x128xf32>
    %c0_31 = arith.constant 0 : index
    %c0_32 = arith.constant 0 : index
    %35 = vector.load %arg14[%c0_31, %c0_32] : memref<112x256xbf16, #tpu.memory_space<vmem>>, vector<96x128xbf16>
    %c512 = arith.constant 512 : index
    %c0_33 = arith.constant 0 : index
    %36 = vector.load %arg4[%c512, %c0_33] : memref<2048x128xbf16, #tpu.memory_space<vmem>>, vector<128x128xbf16>
    %cst_34 = arith.constant dense<0.000000e+00> : vector<96x128xf32>
    %37 = tpu.matmul %35, %36, %cst_34 {dimension_numbers = #tpu.dot_dimension_numbers<[1], [0], [0], [1], [0, 0, 1, 1], [], []>} : vector<96x128xbf16>, vector<128x128xbf16>, vector<96x128xf32> -> vector<96x128xf32>
    %38 = arith.addf %34, %37 : vector<96x128xf32>
    %c0_35 = arith.constant 0 : index
    %c128_36 = arith.constant 128 : index
    %39 = vector.load %arg14[%c0_35, %c128_36] : memref<112x256xbf16, #tpu.memory_space<vmem>>, vector<96x128xbf16>
    %c640 = arith.constant 640 : index
    %c0_37 = arith.constant 0 : index
    %40 = vector.load %arg4[%c640, %c0_37] : memref<2048x128xbf16, #tpu.memory_space<vmem>>, vector<128x128xbf16>
    %cst_38 = arith.constant dense<0.000000e+00> : vector<96x128xf32>
    %41 = tpu.matmul %39, %40, %cst_38 {dimension_numbers = #tpu.dot_dimension_numbers<[1], [0], [0], [1], [0, 0, 1, 1], [], []>} : vector<96x128xbf16>, vector<128x128xbf16>, vector<96x128xf32> -> vector<96x128xf32>
    %42 = arith.addf %38, %41 : vector<96x128xf32>
    %c1_39 = arith.constant 1 : index
    %c0_40 = arith.constant 0 : index
    %43 = vector.load %arg14[%c1_39, %c0_40] : memref<112x256xbf16, #tpu.memory_space<vmem>>, vector<96x128xbf16>
    %c768 = arith.constant 768 : index
    %c0_41 = arith.constant 0 : index
    %44 = vector.load %arg4[%c768, %c0_41] : memref<2048x128xbf16, #tpu.memory_space<vmem>>, vector<128x128xbf16>
    %cst_42 = arith.constant dense<0.000000e+00> : vector<96x128xf32>
    %45 = tpu.matmul %43, %44, %cst_42 {dimension_numbers = #tpu.dot_dimension_numbers<[1], [0], [0], [1], [0, 0, 1, 1], [], []>} : vector<96x128xbf16>, vector<128x128xbf16>, vector<96x128xf32> -> vector<96x128xf32>
    %46 = arith.addf %42, %45 : vector<96x128xf32>
    %c1_43 = arith.constant 1 : index
    %c128_44 = arith.constant 128 : index
    %47 = vector.load %arg14[%c1_43, %c128_44] : memref<112x256xbf16, #tpu.memory_space<vmem>>, vector<96x128xbf16>
    %c896 = arith.constant 896 : index
    %c0_45 = arith.constant 0 : index
    %48 = vector.load %arg4[%c896, %c0_45] : memref<2048x128xbf16, #tpu.memory_space<vmem>>, vector<128x128xbf16>
    %cst_46 = arith.constant dense<0.000000e+00> : vector<96x128xf32>
    %49 = tpu.matmul %47, %48, %cst_46 {dimension_numbers = #tpu.dot_dimension_numbers<[1], [0], [0], [1], [0, 0, 1, 1], [], []>} : vector<96x128xbf16>, vector<128x128xbf16>, vector<96x128xf32> -> vector<96x128xf32>
    %50 = arith.addf %46, %49 : vector<96x128xf32>
    %c10 = arith.constant 10 : index
    %c0_47 = arith.constant 0 : index
    %51 = vector.load %arg13[%c10, %c0_47] : memref<112x256xbf16, #tpu.memory_space<vmem>>, vector<96x128xbf16>
    %c1024 = arith.constant 1024 : index
    %c0_48 = arith.constant 0 : index
    %52 = vector.load %arg4[%c1024, %c0_48] : memref<2048x128xbf16, #tpu.memory_space<vmem>>, vector<128x128xbf16>
    %cst_49 = arith.constant dense<0.000000e+00> : vector<96x128xf32>
    %53 = tpu.matmul %51, %52, %cst_49 {dimension_numbers = #tpu.dot_dimension_numbers<[1], [0], [0], [1], [0, 0, 1, 1], [], []>} : vector<96x128xbf16>, vector<128x128xbf16>, vector<96x128xf32> -> vector<96x128xf32>
    %54 = arith.addf %50, %53 : vector<96x128xf32>
    %c10_50 = arith.constant 10 : index
    %c128_51 = arith.constant 128 : index
    %55 = vector.load %arg13[%c10_50, %c128_51] : memref<112x256xbf16, #tpu.memory_space<vmem>>, vector<96x128xbf16>
    %c1152 = arith.constant 1152 : index
    %c0_52 = arith.constant 0 : index
    %56 = vector.load %arg4[%c1152, %c0_52] : memref<2048x128xbf16, #tpu.memory_space<vmem>>, vector<128x128xbf16>
    %cst_53 = arith.constant dense<0.000000e+00> : vector<96x128xf32>
    %57 = tpu.matmul %55, %56, %cst_53 {dimension_numbers = #tpu.dot_dimension_numbers<[1], [0], [0], [1], [0, 0, 1, 1], [], []>} : vector<96x128xbf16>, vector<128x128xbf16>, vector<96x128xf32> -> vector<96x128xf32>
    %58 = arith.addf %54, %57 : vector<96x128xf32>
    %c11 = arith.constant 11 : index
    %c0_54 = arith.constant 0 : index
    %59 = vector.load %arg13[%c11, %c0_54] : memref<112x256xbf16, #tpu.memory_space<vmem>>, vector<96x128xbf16>
    %c1280 = arith.constant 1280 : index
    %c0_55 = arith.constant 0 : index
    %60 = vector.load %arg4[%c1280, %c0_55] : memref<2048x128xbf16, #tpu.memory_space<vmem>>, vector<128x128xbf16>
    %cst_56 = arith.constant dense<0.000000e+00> : vector<96x128xf32>
    %61 = tpu.matmul %59, %60, %cst_56 {dimension_numbers = #tpu.dot_dimension_numbers<[1], [0], [0], [1], [0, 0, 1, 1], [], []>} : vector<96x128xbf16>, vector<128x128xbf16>, vector<96x128xf32> -> vector<96x128xf32>
    %62 = arith.addf %58, %61 : vector<96x128xf32>
    %c11_57 = arith.constant 11 : index
    %c128_58 = arith.constant 128 : index
    %63 = vector.load %arg13[%c11_57, %c128_58] : memref<112x256xbf16, #tpu.memory_space<vmem>>, vector<96x128xbf16>
    %c1408 = arith.constant 1408 : index
    %c0_59 = arith.constant 0 : index
    %64 = vector.load %arg4[%c1408, %c0_59] : memref<2048x128xbf16, #tpu.memory_space<vmem>>, vector<128x128xbf16>
    %cst_60 = arith.constant dense<0.000000e+00> : vector<96x128xf32>
    %65 = tpu.matmul %63, %64, %cst_60 {dimension_numbers = #tpu.dot_dimension_numbers<[1], [0], [0], [1], [0, 0, 1, 1], [], []>} : vector<96x128xbf16>, vector<128x128xbf16>, vector<96x128xf32> -> vector<96x128xf32>
    %66 = arith.addf %62, %65 : vector<96x128xf32>
    %c10_61 = arith.constant 10 : index
    %c0_62 = arith.constant 0 : index
    %67 = vector.load %arg14[%c10_61, %c0_62] : memref<112x256xbf16, #tpu.memory_space<vmem>>, vector<96x128xbf16>
    %c1536 = arith.constant 1536 : index
    %c0_63 = arith.constant 0 : index
    %68 = vector.load %arg4[%c1536, %c0_63] : memref<2048x128xbf16, #tpu.memory_space<vmem>>, vector<128x128xbf16>
    %cst_64 = arith.constant dense<0.000000e+00> : vector<96x128xf32>
    %69 = tpu.matmul %67, %68, %cst_64 {dimension_numbers = #tpu.dot_dimension_numbers<[1], [0], [0], [1], [0, 0, 1, 1], [], []>} : vector<96x128xbf16>, vector<128x128xbf16>, vector<96x128xf32> -> vector<96x128xf32>
    %70 = arith.addf %66, %69 : vector<96x128xf32>
    %c10_65 = arith.constant 10 : index
    %c128_66 = arith.constant 128 : index
    %71 = vector.load %arg14[%c10_65, %c128_66] : memref<112x256xbf16, #tpu.memory_space<vmem>>, vector<96x128xbf16>
    %c1664 = arith.constant 1664 : index
    %c0_67 = arith.constant 0 : index
    %72 = vector.load %arg4[%c1664, %c0_67] : memref<2048x128xbf16, #tpu.memory_space<vmem>>, vector<128x128xbf16>
    %cst_68 = arith.constant dense<0.000000e+00> : vector<96x128xf32>
    %73 = tpu.matmul %71, %72, %cst_68 {dimension_numbers = #tpu.dot_dimension_numbers<[1], [0], [0], [1], [0, 0, 1, 1], [], []>} : vector<96x128xbf16>, vector<128x128xbf16>, vector<96x128xf32> -> vector<96x128xf32>
    %74 = arith.addf %70, %73 : vector<96x128xf32>
    %c11_69 = arith.constant 11 : index
    %c0_70 = arith.constant 0 : index
    %75 = vector.load %arg14[%c11_69, %c0_70] : memref<112x256xbf16, #tpu.memory_space<vmem>>, vector<96x128xbf16>
    %c1792 = arith.constant 1792 : index
    %c0_71 = arith.constant 0 : index
    %76 = vector.load %arg4[%c1792, %c0_71] : memref<2048x128xbf16, #tpu.memory_space<vmem>>, vector<128x128xbf16>
    %cst_72 = arith.constant dense<0.000000e+00> : vector<96x128xf32>
    %77 = tpu.matmul %75, %76, %cst_72 {dimension_numbers = #tpu.dot_dimension_numbers<[1], [0], [0], [1], [0, 0, 1, 1], [], []>} : vector<96x128xbf16>, vector<128x128xbf16>, vector<96x128xf32> -> vector<96x128xf32>
    %78 = arith.addf %74, %77 : vector<96x128xf32>
    %c11_73 = arith.constant 11 : index
    %c128_74 = arith.constant 128 : index
    %79 = vector.load %arg14[%c11_73, %c128_74] : memref<112x256xbf16, #tpu.memory_space<vmem>>, vector<96x128xbf16>
    %c1920 = arith.constant 1920 : index
    %c0_75 = arith.constant 0 : index
    %80 = vector.load %arg4[%c1920, %c0_75] : memref<2048x128xbf16, #tpu.memory_space<vmem>>, vector<128x128xbf16>
    %cst_76 = arith.constant dense<0.000000e+00> : vector<96x128xf32>
    %81 = tpu.matmul %79, %80, %cst_76 {dimension_numbers = #tpu.dot_dimension_numbers<[1], [0], [0], [1], [0, 0, 1, 1], [], []>} : vector<96x128xbf16>, vector<128x128xbf16>, vector<96x128xf32> -> vector<96x128xf32>
    %82 = arith.addf %78, %81 : vector<96x128xf32>
    %c0_77 = arith.constant 0 : index
    %c0_78 = arith.constant 0 : index
    %83 = vector.load %arg5[%c0_77, %c0_78] : memref<1x128xf32, #tpu.memory_space<vmem>>, vector<1x128xf32>
    %84 = vector.broadcast %83 : vector<1x128xf32> to vector<96x128xf32>
    %85 = arith.addf %82, %84 : vector<96x128xf32>
    %cst_79 = arith.constant 0.000000e+00 : f32
    %86 = vector.broadcast %cst_79 : f32 to vector<96x128xf32>
    %87 = arith.cmpf ogt, %85, %86 : vector<96x128xf32>
    %cst_80 = arith.constant 0.00999999977 : f32
    %88 = vector.broadcast %cst_80 : f32 to vector<96x128xf32>
    %89 = arith.mulf %88, %85 : vector<96x128xf32>
    %90 = arith.select %87, %85, %89 : vector<96x128xi1>, vector<96x128xf32>
    %91 = arith.truncf %90 : vector<96x128xf32> to vector<96x128xbf16>
    %c0_81 = arith.constant 0 : index
    %c0_82 = arith.constant 0 : index
    %92 = vector.load %arg15[%c0_81, %c0_82] : memref<96x128xbf16, #tpu.memory_space<vmem>>, vector<96x128xbf16>
    tpu.vector_store %arg15[%c0_81, %c0_82], %91 {strides = array<i32>} : memref<96x128xbf16, #tpu.memory_space<vmem>>, vector<96x128xbf16>,
    %c0_83 = arith.constant 0 : index
    %c0_84 = arith.constant 0 : index
    %93 = vector.load %arg15[%c0_83, %c0_84] : memref<96x128xbf16, #tpu.memory_space<vmem>>, vector<72x128xbf16>
    %c0_85 = arith.constant 0 : index
    %c0_86 = arith.constant 0 : index
    %94 = vector.load %arg6[%c0_85, %c0_86] : memref<1152x128xbf16, #tpu.memory_space<vmem>>, vector<128x128xbf16>
    %cst_87 = arith.constant dense<0.000000e+00> : vector<72x128xf32>
    %95 = tpu.matmul %93, %94, %cst_87 {dimension_numbers = #tpu.dot_dimension_numbers<[1], [0], [0], [1], [0, 0, 1, 1], [], []>} : vector<72x128xbf16>, vector<128x128xbf16>, vector<72x128xf32> -> vector<72x128xf32>
    %c1_88 = arith.constant 1 : index
    %c0_89 = arith.constant 0 : index
    %96 = vector.load %arg15[%c1_88, %c0_89] : memref<96x128xbf16, #tpu.memory_space<vmem>>, vector<72x128xbf16>
    %c128_90 = arith.constant 128 : index
    %c0_91 = arith.constant 0 : index
    %97 = vector.load %arg6[%c128_90, %c0_91] : memref<1152x128xbf16, #tpu.memory_space<vmem>>, vector<128x128xbf16>
    %cst_92 = arith.constant dense<0.000000e+00> : vector<72x128xf32>
    %98 = tpu.matmul %96, %97, %cst_92 {dimension_numbers = #tpu.dot_dimension_numbers<[1], [0], [0], [1], [0, 0, 1, 1], [], []>} : vector<72x128xbf16>, vector<128x128xbf16>, vector<72x128xf32> -> vector<72x128xf32>
    %99 = arith.addf %95, %98 : vector<72x128xf32>
    %c2 = arith.constant 2 : index
    %c0_93 = arith.constant 0 : index
    %100 = vector.load %arg15[%c2, %c0_93] : memref<96x128xbf16, #tpu.memory_space<vmem>>, vector<72x128xbf16>
    %c256_94 = arith.constant 256 : index
    %c0_95 = arith.constant 0 : index
    %101 = vector.load %arg6[%c256_94, %c0_95] : memref<1152x128xbf16, #tpu.memory_space<vmem>>, vector<128x128xbf16>
    %cst_96 = arith.constant dense<0.000000e+00> : vector<72x128xf32>
    %102 = tpu.matmul %100, %101, %cst_96 {dimension_numbers = #tpu.dot_dimension_numbers<[1], [0], [0], [1], [0, 0, 1, 1], [], []>} : vector<72x128xbf16>, vector<128x128xbf16>, vector<72x128xf32> -> vector<72x128xf32>
    %103 = arith.addf %99, %102 : vector<72x128xf32>
    %c10_97 = arith.constant 10 : index
    %c0_98 = arith.constant 0 : index
    %104 = vector.load %arg15[%c10_97, %c0_98] : memref<96x128xbf16, #tpu.memory_space<vmem>>, vector<72x128xbf16>
    %c384_99 = arith.constant 384 : index
    %c0_100 = arith.constant 0 : index
    %105 = vector.load %arg6[%c384_99, %c0_100] : memref<1152x128xbf16, #tpu.memory_space<vmem>>, vector<128x128xbf16>
    %cst_101 = arith.constant dense<0.000000e+00> : vector<72x128xf32>
    %106 = tpu.matmul %104, %105, %cst_101 {dimension_numbers = #tpu.dot_dimension_numbers<[1], [0], [0], [1], [0, 0, 1, 1], [], []>} : vector<72x128xbf16>, vector<128x128xbf16>, vector<72x128xf32> -> vector<72x128xf32>
    %107 = arith.addf %103, %106 : vector<72x128xf32>
    %c11_102 = arith.constant 11 : index
    %c0_103 = arith.constant 0 : index
    %108 = vector.load %arg15[%c11_102, %c0_103] : memref<96x128xbf16, #tpu.memory_space<vmem>>, vector<72x128xbf16>
    %c512_104 = arith.constant 512 : index
    %c0_105 = arith.constant 0 : index
    %109 = vector.load %arg6[%c512_104, %c0_105] : memref<1152x128xbf16, #tpu.memory_space<vmem>>, vector<128x128xbf16>
    %cst_106 = arith.constant dense<0.000000e+00> : vector<72x128xf32>
    %110 = tpu.matmul %108, %109, %cst_106 {dimension_numbers = #tpu.dot_dimension_numbers<[1], [0], [0], [1], [0, 0, 1, 1], [], []>} : vector<72x128xbf16>, vector<128x128xbf16>, vector<72x128xf32> -> vector<72x128xf32>
    %111 = arith.addf %107, %110 : vector<72x128xf32>
    %c12 = arith.constant 12 : index
    %c0_107 = arith.constant 0 : index
    %112 = vector.load %arg15[%c12, %c0_107] : memref<96x128xbf16, #tpu.memory_space<vmem>>, vector<72x128xbf16>
    %c640_108 = arith.constant 640 : index
    %c0_109 = arith.constant 0 : index
    %113 = vector.load %arg6[%c640_108, %c0_109] : memref<1152x128xbf16, #tpu.memory_space<vmem>>, vector<128x128xbf16>
    %cst_110 = arith.constant dense<0.000000e+00> : vector<72x128xf32>
    %114 = tpu.matmul %112, %113, %cst_110 {dimension_numbers = #tpu.dot_dimension_numbers<[1], [0], [0], [1], [0, 0, 1, 1], [], []>} : vector<72x128xbf16>, vector<128x128xbf16>, vector<72x128xf32> -> vector<72x128xf32>
    %115 = arith.addf %111, %114 : vector<72x128xf32>
    %c20 = arith.constant 20 : index
    %c0_111 = arith.constant 0 : index
    %116 = vector.load %arg15[%c20, %c0_111] : memref<96x128xbf16, #tpu.memory_space<vmem>>, vector<72x128xbf16>
    %c768_112 = arith.constant 768 : index
    %c0_113 = arith.constant 0 : index
    %117 = vector.load %arg6[%c768_112, %c0_113] : memref<1152x128xbf16, #tpu.memory_space<vmem>>, vector<128x128xbf16>
    %cst_114 = arith.constant dense<0.000000e+00> : vector<72x128xf32>
    %118 = tpu.matmul %116, %117, %cst_114 {dimension_numbers = #tpu.dot_dimension_numbers<[1], [0], [0], [1], [0, 0, 1, 1], [], []>} : vector<72x128xbf16>, vector<128x128xbf16>, vector<72x128xf32> -> vector<72x128xf32>
    %119 = arith.addf %115, %118 : vector<72x128xf32>
    %c21 = arith.constant 21 : index
    %c0_115 = arith.constant 0 : index
    %120 = vector.load %arg15[%c21, %c0_115] : memref<96x128xbf16, #tpu.memory_space<vmem>>, vector<72x128xbf16>
    %c896_116 = arith.constant 896 : index
    %c0_117 = arith.constant 0 : index
    %121 = vector.load %arg6[%c896_116, %c0_117] : memref<1152x128xbf16, #tpu.memory_space<vmem>>, vector<128x128xbf16>
    %cst_118 = arith.constant dense<0.000000e+00> : vector<72x128xf32>
    %122 = tpu.matmul %120, %121, %cst_118 {dimension_numbers = #tpu.dot_dimension_numbers<[1], [0], [0], [1], [0, 0, 1, 1], [], []>} : vector<72x128xbf16>, vector<128x128xbf16>, vector<72x128xf32> -> vector<72x128xf32>
    %123 = arith.addf %119, %122 : vector<72x128xf32>
    %c22 = arith.constant 22 : index
    %c0_119 = arith.constant 0 : index
    %124 = vector.load %arg15[%c22, %c0_119] : memref<96x128xbf16, #tpu.memory_space<vmem>>, vector<72x128xbf16>
    %c1024_120 = arith.constant 1024 : index
    %c0_121 = arith.constant 0 : index
    %125 = vector.load %arg6[%c1024_120, %c0_121] : memref<1152x128xbf16, #tpu.memory_space<vmem>>, vector<128x128xbf16>
    %cst_122 = arith.constant dense<0.000000e+00> : vector<72x128xf32>
    %126 = tpu.matmul %124, %125, %cst_122 {dimension_numbers = #tpu.dot_dimension_numbers<[1], [0], [0], [1], [0, 0, 1, 1], [], []>} : vector<72x128xbf16>, vector<128x128xbf16>, vector<72x128xf32> -> vector<72x128xf32>
    %127 = arith.addf %123, %126 : vector<72x128xf32>
    %c0_123 = arith.constant 0 : index
    %c0_124 = arith.constant 0 : index
    %128 = vector.load %arg7[%c0_123, %c0_124] : memref<1x128xf32, #tpu.memory_space<vmem>>, vector<1x128xf32>
    %129 = vector.broadcast %128 : vector<1x128xf32> to vector<72x128xf32>
    %130 = arith.addf %127, %129 : vector<72x128xf32>
    %cst_125 = arith.constant 0.000000e+00 : f32
    %131 = vector.broadcast %cst_125 : f32 to vector<72x128xf32>
    %132 = arith.cmpf ogt, %130, %131 : vector<72x128xf32>
    %cst_126 = arith.constant 0.00999999977 : f32
    %133 = vector.broadcast %cst_126 : f32 to vector<72x128xf32>
    %134 = arith.mulf %133, %130 : vector<72x128xf32>
    %135 = arith.select %132, %130, %134 : vector<72x128xi1>, vector<72x128xf32>
    %136 = arith.truncf %135 : vector<72x128xf32> to vector<72x128xbf16>
    %137 = vector.extract_strided_slice %136 {offsets = [0, 0], sizes = [1, 128], strides = [1, 1]} : vector<72x128xbf16> to vector<1x128xbf16>
    %c0_127 = arith.constant 0 : index
    %c0_128 = arith.constant 0 : index
    %138 = vector.load %arg16[%c0_127, %c0_128] : memref<1x6272xbf16, #tpu.memory_space<vmem>>, vector<1x128xbf16>
    tpu.vector_store %arg16[%c0_127, %c0_128], %137 {strides = array<i32>} : memref<1x6272xbf16, #tpu.memory_space<vmem>>, vector<1x128xbf16>,
    %139 = vector.extract_strided_slice %136 {offsets = [1, 0], sizes = [1, 128], strides = [1, 1]} : vector<72x128xbf16> to vector<1x128xbf16>
    %c0_129 = arith.constant 0 : index
    %c128_130 = arith.constant 128 : index
    %140 = vector.load %arg16[%c0_129, %c128_130] : memref<1x6272xbf16, #tpu.memory_space<vmem>>, vector<1x128xbf16>
    tpu.vector_store %arg16[%c0_129, %c128_130], %139 {strides = array<i32>} : memref<1x6272xbf16, #tpu.memory_space<vmem>>, vector<1x128xbf16>,
    %141 = vector.extract_strided_slice %136 {offsets = [2, 0], sizes = [1, 128], strides = [1, 1]} : vector<72x128xbf16> to vector<1x128xbf16>
    %c0_131 = arith.constant 0 : index
    %c256_132 = arith.constant 256 : index
    %142 = vector.load %arg16[%c0_131, %c256_132] : memref<1x6272xbf16, #tpu.memory_space<vmem>>, vector<1x128xbf16>
    tpu.vector_store %arg16[%c0_131, %c256_132], %141 {strides = array<i32>} : memref<1x6272xbf16, #tpu.memory_space<vmem>>, vector<1x128xbf16>,
    %143 = vector.extract_strided_slice %136 {offsets = [3, 0], sizes = [1, 128], strides = [1, 1]} : vector<72x128xbf16> to vector<1x128xbf16>
    %c0_133 = arith.constant 0 : index
    %c384_134 = arith.constant 384 : index
    %144 = vector.load %arg16[%c0_133, %c384_134] : memref<1x6272xbf16, #tpu.memory_space<vmem>>, vector<1x128xbf16>
    tpu.vector_store %arg16[%c0_133, %c384_134], %143 {strides = array<i32>} : memref<1x6272xbf16, #tpu.memory_space<vmem>>, vector<1x128xbf16>,
    %145 = vector.extract_strided_slice %136 {offsets = [4, 0], sizes = [1, 128], strides = [1, 1]} : vector<72x128xbf16> to vector<1x128xbf16>
    %c0_135 = arith.constant 0 : index
    %c512_136 = arith.constant 512 : index
    %146 = vector.load %arg16[%c0_135, %c512_136] : memref<1x6272xbf16, #tpu.memory_space<vmem>>, vector<1x128xbf16>
    tpu.vector_store %arg16[%c0_135, %c512_136], %145 {strides = array<i32>} : memref<1x6272xbf16, #tpu.memory_space<vmem>>, vector<1x128xbf16>,
    %147 = vector.extract_strided_slice %136 {offsets = [5, 0], sizes = [1, 128], strides = [1, 1]} : vector<72x128xbf16> to vector<1x128xbf16>
    %c0_137 = arith.constant 0 : index
    %c640_138 = arith.constant 640 : index
    %148 = vector.load %arg16[%c0_137, %c640_138] : memref<1x6272xbf16, #tpu.memory_space<vmem>>, vector<1x128xbf16>
    tpu.vector_store %arg16[%c0_137, %c640_138], %147 {strides = array<i32>} : memref<1x6272xbf16, #tpu.memory_space<vmem>>, vector<1x128xbf16>,
    %149 = vector.extract_strided_slice %136 {offsets = [6, 0], sizes = [1, 128], strides = [1, 1]} : vector<72x128xbf16> to vector<1x128xbf16>
    %c0_139 = arith.constant 0 : index
    %c768_140 = arith.constant 768 : index
    %150 = vector.load %arg16[%c0_139, %c768_140] : memref<1x6272xbf16, #tpu.memory_space<vmem>>, vector<1x128xbf16>
    tpu.vector_store %arg16[%c0_139, %c768_140], %149 {strides = array<i32>} : memref<1x6272xbf16, #tpu.memory_space<vmem>>, vector<1x128xbf16>,
    %151 = vector.extract_strided_slice %136 {offsets = [10, 0], sizes = [1, 128], strides = [1, 1]} : vector<72x128xbf16> to vector<1x128xbf16>
    %c0_141 = arith.constant 0 : index
    %c896_142 = arith.constant 896 : index
    %152 = vector.load %arg16[%c0_141, %c896_142] : memref<1x6272xbf16, #tpu.memory_space<vmem>>, vector<1x128xbf16>
    tpu.vector_store %arg16[%c0_141, %c896_142], %151 {strides = array<i32>} : memref<1x6272xbf16, #tpu.memory_space<vmem>>, vector<1x128xbf16>,
    %153 = vector.extract_strided_slice %136 {offsets = [11, 0], sizes = [1, 128], strides = [1, 1]} : vector<72x128xbf16> to vector<1x128xbf16>
    %c0_143 = arith.constant 0 : index
    %c1024_144 = arith.constant 1024 : index
    %154 = vector.load %arg16[%c0_143, %c1024_144] : memref<1x6272xbf16, #tpu.memory_space<vmem>>, vector<1x128xbf16>
    tpu.vector_store %arg16[%c0_143, %c1024_144], %153 {strides = array<i32>} : memref<1x6272xbf16, #tpu.memory_space<vmem>>, vector<1x128xbf16>,
    %155 = vector.extract_strided_slice %136 {offsets = [12, 0], sizes = [1, 128], strides = [1, 1]} : vector<72x128xbf16> to vector<1x128xbf16>
    %c0_145 = arith.constant 0 : index
    %c1152_146 = arith.constant 1152 : index
    %156 = vector.load %arg16[%c0_145, %c1152_146] : memref<1x6272xbf16, #tpu.memory_space<vmem>>, vector<1x128xbf16>
    tpu.vector_store %arg16[%c0_145, %c1152_146], %155 {strides = array<i32>} : memref<1x6272xbf16, #tpu.memory_space<vmem>>, vector<1x128xbf16>,
    %157 = vector.extract_strided_slice %136 {offsets = [13, 0], sizes = [1, 128], strides = [1, 1]} : vector<72x128xbf16> to vector<1x128xbf16>
    %c0_147 = arith.constant 0 : index
    %c1280_148 = arith.constant 1280 : index
    %158 = vector.load %arg16[%c0_147, %c1280_148] : memref<1x6272xbf16, #tpu.memory_space<vmem>>, vector<1x128xbf16>
    tpu.vector_store %arg16[%c0_147, %c1280_148], %157 {strides = array<i32>} : memref<1x6272xbf16, #tpu.memory_space<vmem>>, vector<1x128xbf16>,
    %159 = vector.extract_strided_slice %136 {offsets = [14, 0], sizes = [1, 128], strides = [1, 1]} : vector<72x128xbf16> to vector<1x128xbf16>
    %c0_149 = arith.constant 0 : index
    %c1408_150 = arith.constant 1408 : index
    %160 = vector.load %arg16[%c0_149, %c1408_150] : memref<1x6272xbf16, #tpu.memory_space<vmem>>, vector<1x128xbf16>
    tpu.vector_store %arg16[%c0_149, %c1408_150], %159 {strides = array<i32>} : memref<1x6272xbf16, #tpu.memory_space<vmem>>, vector<1x128xbf16>,
    %161 = vector.extract_strided_slice %136 {offsets = [15, 0], sizes = [1, 128], strides = [1, 1]} : vector<72x128xbf16> to vector<1x128xbf16>
    %c0_151 = arith.constant 0 : index
    %c1536_152 = arith.constant 1536 : index
    %162 = vector.load %arg16[%c0_151, %c1536_152] : memref<1x6272xbf16, #tpu.memory_space<vmem>>, vector<1x128xbf16>
    tpu.vector_store %arg16[%c0_151, %c1536_152], %161 {strides = array<i32>} : memref<1x6272xbf16, #tpu.memory_space<vmem>>, vector<1x128xbf16>,
    %163 = vector.extract_strided_slice %136 {offsets = [16, 0], sizes = [1, 128], strides = [1, 1]} : vector<72x128xbf16> to vector<1x128xbf16>
    %c0_153 = arith.constant 0 : index
    %c1664_154 = arith.constant 1664 : index
    %164 = vector.load %arg16[%c0_153, %c1664_154] : memref<1x6272xbf16, #tpu.memory_space<vmem>>, vector<1x128xbf16>
    tpu.vector_store %arg16[%c0_153, %c1664_154], %163 {strides = array<i32>} : memref<1x6272xbf16, #tpu.memory_space<vmem>>, vector<1x128xbf16>,
    %165 = vector.extract_strided_slice %136 {offsets = [20, 0], sizes = [1, 128], strides = [1, 1]} : vector<72x128xbf16> to vector<1x128xbf16>
    %c0_155 = arith.constant 0 : index
    %c1792_156 = arith.constant 1792 : index
    %166 = vector.load %arg16[%c0_155, %c1792_156] : memref<1x6272xbf16, #tpu.memory_space<vmem>>, vector<1x128xbf16>
    tpu.vector_store %arg16[%c0_155, %c1792_156], %165 {strides = array<i32>} : memref<1x6272xbf16, #tpu.memory_space<vmem>>, vector<1x128xbf16>,
    %167 = vector.extract_strided_slice %136 {offsets = [21, 0], sizes = [1, 128], strides = [1, 1]} : vector<72x128xbf16> to vector<1x128xbf16>
    %c0_157 = arith.constant 0 : index
    %c1920_158 = arith.constant 1920 : index
    %168 = vector.load %arg16[%c0_157, %c1920_158] : memref<1x6272xbf16, #tpu.memory_space<vmem>>, vector<1x128xbf16>
    tpu.vector_store %arg16[%c0_157, %c1920_158], %167 {strides = array<i32>} : memref<1x6272xbf16, #tpu.memory_space<vmem>>, vector<1x128xbf16>,
    %169 = vector.extract_strided_slice %136 {offsets = [22, 0], sizes = [1, 128], strides = [1, 1]} : vector<72x128xbf16> to vector<1x128xbf16>
    %c0_159 = arith.constant 0 : index
    %c2048 = arith.constant 2048 : index
    %170 = vector.load %arg16[%c0_159, %c2048] : memref<1x6272xbf16, #tpu.memory_space<vmem>>, vector<1x128xbf16>
    tpu.vector_store %arg16[%c0_159, %c2048], %169 {strides = array<i32>} : memref<1x6272xbf16, #tpu.memory_space<vmem>>, vector<1x128xbf16>,
    %171 = vector.extract_strided_slice %136 {offsets = [23, 0], sizes = [1, 128], strides = [1, 1]} : vector<72x128xbf16> to vector<1x128xbf16>
    %c0_160 = arith.constant 0 : index
    %c2176 = arith.constant 2176 : index
    %172 = vector.load %arg16[%c0_160, %c2176] : memref<1x6272xbf16, #tpu.memory_space<vmem>>, vector<1x128xbf16>
    tpu.vector_store %arg16[%c0_160, %c2176], %171 {strides = array<i32>} : memref<1x6272xbf16, #tpu.memory_space<vmem>>, vector<1x128xbf16>,
    %173 = vector.extract_strided_slice %136 {offsets = [24, 0], sizes = [1, 128], strides = [1, 1]} : vector<72x128xbf16> to vector<1x128xbf16>
    %c0_161 = arith.constant 0 : index
    %c2304 = arith.constant 2304 : index
    %174 = vector.load %arg16[%c0_161, %c2304] : memref<1x6272xbf16, #tpu.memory_space<vmem>>, vector<1x128xbf16>
    tpu.vector_store %arg16[%c0_161, %c2304], %173 {strides = array<i32>} : memref<1x6272xbf16, #tpu.memory_space<vmem>>, vector<1x128xbf16>,
    %175 = vector.extract_strided_slice %136 {offsets = [25, 0], sizes = [1, 128], strides = [1, 1]} : vector<72x128xbf16> to vector<1x128xbf16>
    %c0_162 = arith.constant 0 : index
    %c2432 = arith.constant 2432 : index
    %176 = vector.load %arg16[%c0_162, %c2432] : memref<1x6272xbf16, #tpu.memory_space<vmem>>, vector<1x128xbf16>
    tpu.vector_store %arg16[%c0_162, %c2432], %175 {strides = array<i32>} : memref<1x6272xbf16, #tpu.memory_space<vmem>>, vector<1x128xbf16>,
    %177 = vector.extract_strided_slice %136 {offsets = [26, 0], sizes = [1, 128], strides = [1, 1]} : vector<72x128xbf16> to vector<1x128xbf16>
    %c0_163 = arith.constant 0 : index
    %c2560 = arith.constant 2560 : index
    %178 = vector.load %arg16[%c0_163, %c2560] : memref<1x6272xbf16, #tpu.memory_space<vmem>>, vector<1x128xbf16>
    tpu.vector_store %arg16[%c0_163, %c2560], %177 {strides = array<i32>} : memref<1x6272xbf16, #tpu.memory_space<vmem>>, vector<1x128xbf16>,
    %179 = vector.extract_strided_slice %136 {offsets = [30, 0], sizes = [1, 128], strides = [1, 1]} : vector<72x128xbf16> to vector<1x128xbf16>
    %c0_164 = arith.constant 0 : index
    %c2688 = arith.constant 2688 : index
    %180 = vector.load %arg16[%c0_164, %c2688] : memref<1x6272xbf16, #tpu.memory_space<vmem>>, vector<1x128xbf16>
    tpu.vector_store %arg16[%c0_164, %c2688], %179 {strides = array<i32>} : memref<1x6272xbf16, #tpu.memory_space<vmem>>, vector<1x128xbf16>,
    %181 = vector.extract_strided_slice %136 {offsets = [31, 0], sizes = [1, 128], strides = [1, 1]} : vector<72x128xbf16> to vector<1x128xbf16>
    %c0_165 = arith.constant 0 : index
    %c2816 = arith.constant 2816 : index
    %182 = vector.load %arg16[%c0_165, %c2816] : memref<1x6272xbf16, #tpu.memory_space<vmem>>, vector<1x128xbf16>
    tpu.vector_store %arg16[%c0_165, %c2816], %181 {strides = array<i32>} : memref<1x6272xbf16, #tpu.memory_space<vmem>>, vector<1x128xbf16>,
    %183 = vector.extract_strided_slice %136 {offsets = [32, 0], sizes = [1, 128], strides = [1, 1]} : vector<72x128xbf16> to vector<1x128xbf16>
    %c0_166 = arith.constant 0 : index
    %c2944 = arith.constant 2944 : index
    %184 = vector.load %arg16[%c0_166, %c2944] : memref<1x6272xbf16, #tpu.memory_space<vmem>>, vector<1x128xbf16>
    tpu.vector_store %arg16[%c0_166, %c2944], %183 {strides = array<i32>} : memref<1x6272xbf16, #tpu.memory_space<vmem>>, vector<1x128xbf16>,
    %185 = vector.extract_strided_slice %136 {offsets = [33, 0], sizes = [1, 128], strides = [1, 1]} : vector<72x128xbf16> to vector<1x128xbf16>
    %c0_167 = arith.constant 0 : index
    %c3072 = arith.constant 3072 : index
    %186 = vector.load %arg16[%c0_167, %c3072] : memref<1x6272xbf16, #tpu.memory_space<vmem>>, vector<1x128xbf16>
    tpu.vector_store %arg16[%c0_167, %c3072], %185 {strides = array<i32>} : memref<1x6272xbf16, #tpu.memory_space<vmem>>, vector<1x128xbf16>,
    %187 = vector.extract_strided_slice %136 {offsets = [34, 0], sizes = [1, 128], strides = [1, 1]} : vector<72x128xbf16> to vector<1x128xbf16>
    %c0_168 = arith.constant 0 : index
    %c3200 = arith.constant 3200 : index
    %188 = vector.load %arg16[%c0_168, %c3200] : memref<1x6272xbf16, #tpu.memory_space<vmem>>, vector<1x128xbf16>
    tpu.vector_store %arg16[%c0_168, %c3200], %187 {strides = array<i32>} : memref<1x6272xbf16, #tpu.memory_space<vmem>>, vector<1x128xbf16>,
    %189 = vector.extract_strided_slice %136 {offsets = [35, 0], sizes = [1, 128], strides = [1, 1]} : vector<72x128xbf16> to vector<1x128xbf16>
    %c0_169 = arith.constant 0 : index
    %c3328 = arith.constant 3328 : index
    %190 = vector.load %arg16[%c0_169, %c3328] : memref<1x6272xbf16, #tpu.memory_space<vmem>>, vector<1x128xbf16>
    tpu.vector_store %arg16[%c0_169, %c3328], %189 {strides = array<i32>} : memref<1x6272xbf16, #tpu.memory_space<vmem>>, vector<1x128xbf16>,
    %191 = vector.extract_strided_slice %136 {offsets = [36, 0], sizes = [1, 128], strides = [1, 1]} : vector<72x128xbf16> to vector<1x128xbf16>
    %c0_170 = arith.constant 0 : index
    %c3456 = arith.constant 3456 : index
    %192 = vector.load %arg16[%c0_170, %c3456] : memref<1x6272xbf16, #tpu.memory_space<vmem>>, vector<1x128xbf16>
    tpu.vector_store %arg16[%c0_170, %c3456], %191 {strides = array<i32>} : memref<1x6272xbf16, #tpu.memory_space<vmem>>, vector<1x128xbf16>,
    %193 = vector.extract_strided_slice %136 {offsets = [40, 0], sizes = [1, 128], strides = [1, 1]} : vector<72x128xbf16> to vector<1x128xbf16>
    %c0_171 = arith.constant 0 : index
    %c3584 = arith.constant 3584 : index
    %194 = vector.load %arg16[%c0_171, %c3584] : memref<1x6272xbf16, #tpu.memory_space<vmem>>, vector<1x128xbf16>
    tpu.vector_store %arg16[%c0_171, %c3584], %193 {strides = array<i32>} : memref<1x6272xbf16, #tpu.memory_space<vmem>>, vector<1x128xbf16>,
    %195 = vector.extract_strided_slice %136 {offsets = [41, 0], sizes = [1, 128], strides = [1, 1]} : vector<72x128xbf16> to vector<1x128xbf16>
    %c0_172 = arith.constant 0 : index
    %c3712 = arith.constant 3712 : index
    %196 = vector.load %arg16[%c0_172, %c3712] : memref<1x6272xbf16, #tpu.memory_space<vmem>>, vector<1x128xbf16>
    tpu.vector_store %arg16[%c0_172, %c3712], %195 {strides = array<i32>} : memref<1x6272xbf16, #tpu.memory_space<vmem>>, vector<1x128xbf16>,
    %197 = vector.extract_strided_slice %136 {offsets = [42, 0], sizes = [1, 128], strides = [1, 1]} : vector<72x128xbf16> to vector<1x128xbf16>
    %c0_173 = arith.constant 0 : index
    %c3840 = arith.constant 3840 : index
    %198 = vector.load %arg16[%c0_173, %c3840] : memref<1x6272xbf16, #tpu.memory_space<vmem>>, vector<1x128xbf16>
    tpu.vector_store %arg16[%c0_173, %c3840], %197 {strides = array<i32>} : memref<1x6272xbf16, #tpu.memory_space<vmem>>, vector<1x128xbf16>,
    %199 = vector.extract_strided_slice %136 {offsets = [43, 0], sizes = [1, 128], strides = [1, 1]} : vector<72x128xbf16> to vector<1x128xbf16>
    %c0_174 = arith.constant 0 : index
    %c3968 = arith.constant 3968 : index
    %200 = vector.load %arg16[%c0_174, %c3968] : memref<1x6272xbf16, #tpu.memory_space<vmem>>, vector<1x128xbf16>
    tpu.vector_store %arg16[%c0_174, %c3968], %199 {strides = array<i32>} : memref<1x6272xbf16, #tpu.memory_space<vmem>>, vector<1x128xbf16>,
    %201 = vector.extract_strided_slice %136 {offsets = [44, 0], sizes = [1, 128], strides = [1, 1]} : vector<72x128xbf16> to vector<1x128xbf16>
    %c0_175 = arith.constant 0 : index
    %c4096 = arith.constant 4096 : index
    %202 = vector.load %arg16[%c0_175, %c4096] : memref<1x6272xbf16, #tpu.memory_space<vmem>>, vector<1x128xbf16>
    tpu.vector_store %arg16[%c0_175, %c4096], %201 {strides = array<i32>} : memref<1x6272xbf16, #tpu.memory_space<vmem>>, vector<1x128xbf16>,
    %203 = vector.extract_strided_slice %136 {offsets = [45, 0], sizes = [1, 128], strides = [1, 1]} : vector<72x128xbf16> to vector<1x128xbf16>
    %c0_176 = arith.constant 0 : index
    %c4224 = arith.constant 4224 : index
    %204 = vector.load %arg16[%c0_176, %c4224] : memref<1x6272xbf16, #tpu.memory_space<vmem>>, vector<1x128xbf16>
    tpu.vector_store %arg16[%c0_176, %c4224], %203 {strides = array<i32>} : memref<1x6272xbf16, #tpu.memory_space<vmem>>, vector<1x128xbf16>,
    %205 = vector.extract_strided_slice %136 {offsets = [46, 0], sizes = [1, 128], strides = [1, 1]} : vector<72x128xbf16> to vector<1x128xbf16>
    %c0_177 = arith.constant 0 : index
    %c4352 = arith.constant 4352 : index
    %206 = vector.load %arg16[%c0_177, %c4352] : memref<1x6272xbf16, #tpu.memory_space<vmem>>, vector<1x128xbf16>
    tpu.vector_store %arg16[%c0_177, %c4352], %205 {strides = array<i32>} : memref<1x6272xbf16, #tpu.memory_space<vmem>>, vector<1x128xbf16>,
    %207 = vector.extract_strided_slice %136 {offsets = [50, 0], sizes = [1, 128], strides = [1, 1]} : vector<72x128xbf16> to vector<1x128xbf16>
    %c0_178 = arith.constant 0 : index
    %c4480 = arith.constant 4480 : index
    %208 = vector.load %arg16[%c0_178, %c4480] : memref<1x6272xbf16, #tpu.memory_space<vmem>>, vector<1x128xbf16>
    tpu.vector_store %arg16[%c0_178, %c4480], %207 {strides = array<i32>} : memref<1x6272xbf16, #tpu.memory_space<vmem>>, vector<1x128xbf16>,
    %209 = vector.extract_strided_slice %136 {offsets = [51, 0], sizes = [1, 128], strides = [1, 1]} : vector<72x128xbf16> to vector<1x128xbf16>
    %c0_179 = arith.constant 0 : index
    %c4608 = arith.constant 4608 : index
    %210 = vector.load %arg16[%c0_179, %c4608] : memref<1x6272xbf16, #tpu.memory_space<vmem>>, vector<1x128xbf16>
    tpu.vector_store %arg16[%c0_179, %c4608], %209 {strides = array<i32>} : memref<1x6272xbf16, #tpu.memory_space<vmem>>, vector<1x128xbf16>,
    %211 = vector.extract_strided_slice %136 {offsets = [52, 0], sizes = [1, 128], strides = [1, 1]} : vector<72x128xbf16> to vector<1x128xbf16>
    %c0_180 = arith.constant 0 : index
    %c4736 = arith.constant 4736 : index
    %212 = vector.load %arg16[%c0_180, %c4736] : memref<1x6272xbf16, #tpu.memory_space<vmem>>, vector<1x128xbf16>
    tpu.vector_store %arg16[%c0_180, %c4736], %211 {strides = array<i32>} : memref<1x6272xbf16, #tpu.memory_space<vmem>>, vector<1x128xbf16>,
    %213 = vector.extract_strided_slice %136 {offsets = [53, 0], sizes = [1, 128], strides = [1, 1]} : vector<72x128xbf16> to vector<1x128xbf16>
    %c0_181 = arith.constant 0 : index
    %c4864 = arith.constant 4864 : index
    %214 = vector.load %arg16[%c0_181, %c4864] : memref<1x6272xbf16, #tpu.memory_space<vmem>>, vector<1x128xbf16>
    tpu.vector_store %arg16[%c0_181, %c4864], %213 {strides = array<i32>} : memref<1x6272xbf16, #tpu.memory_space<vmem>>, vector<1x128xbf16>,
    %215 = vector.extract_strided_slice %136 {offsets = [54, 0], sizes = [1, 128], strides = [1, 1]} : vector<72x128xbf16> to vector<1x128xbf16>
    %c0_182 = arith.constant 0 : index
    %c4992 = arith.constant 4992 : index
    %216 = vector.load %arg16[%c0_182, %c4992] : memref<1x6272xbf16, #tpu.memory_space<vmem>>, vector<1x128xbf16>
    tpu.vector_store %arg16[%c0_182, %c4992], %215 {strides = array<i32>} : memref<1x6272xbf16, #tpu.memory_space<vmem>>, vector<1x128xbf16>,
    %217 = vector.extract_strided_slice %136 {offsets = [55, 0], sizes = [1, 128], strides = [1, 1]} : vector<72x128xbf16> to vector<1x128xbf16>
    %c0_183 = arith.constant 0 : index
    %c5120 = arith.constant 5120 : index
    %218 = vector.load %arg16[%c0_183, %c5120] : memref<1x6272xbf16, #tpu.memory_space<vmem>>, vector<1x128xbf16>
    tpu.vector_store %arg16[%c0_183, %c5120], %217 {strides = array<i32>} : memref<1x6272xbf16, #tpu.memory_space<vmem>>, vector<1x128xbf16>,
    %219 = vector.extract_strided_slice %136 {offsets = [56, 0], sizes = [1, 128], strides = [1, 1]} : vector<72x128xbf16> to vector<1x128xbf16>
    %c0_184 = arith.constant 0 : index
    %c5248 = arith.constant 5248 : index
    %220 = vector.load %arg16[%c0_184, %c5248] : memref<1x6272xbf16, #tpu.memory_space<vmem>>, vector<1x128xbf16>
    tpu.vector_store %arg16[%c0_184, %c5248], %219 {strides = array<i32>} : memref<1x6272xbf16, #tpu.memory_space<vmem>>, vector<1x128xbf16>,
    %221 = vector.extract_strided_slice %136 {offsets = [60, 0], sizes = [1, 128], strides = [1, 1]} : vector<72x128xbf16> to vector<1x128xbf16>
    %c0_185 = arith.constant 0 : index
    %c5376 = arith.constant 5376 : index
    %222 = vector.load %arg16[%c0_185, %c5376] : memref<1x6272xbf16, #tpu.memory_space<vmem>>, vector<1x128xbf16>
    tpu.vector_store %arg16[%c0_185, %c5376], %221 {strides = array<i32>} : memref<1x6272xbf16, #tpu.memory_space<vmem>>, vector<1x128xbf16>,
    %223 = vector.extract_strided_slice %136 {offsets = [61, 0], sizes = [1, 128], strides = [1, 1]} : vector<72x128xbf16> to vector<1x128xbf16>
    %c0_186 = arith.constant 0 : index
    %c5504 = arith.constant 5504 : index
    %224 = vector.load %arg16[%c0_186, %c5504] : memref<1x6272xbf16, #tpu.memory_space<vmem>>, vector<1x128xbf16>
    tpu.vector_store %arg16[%c0_186, %c5504], %223 {strides = array<i32>} : memref<1x6272xbf16, #tpu.memory_space<vmem>>, vector<1x128xbf16>,
    %225 = vector.extract_strided_slice %136 {offsets = [62, 0], sizes = [1, 128], strides = [1, 1]} : vector<72x128xbf16> to vector<1x128xbf16>
    %c0_187 = arith.constant 0 : index
    %c5632 = arith.constant 5632 : index
    %226 = vector.load %arg16[%c0_187, %c5632] : memref<1x6272xbf16, #tpu.memory_space<vmem>>, vector<1x128xbf16>
    tpu.vector_store %arg16[%c0_187, %c5632], %225 {strides = array<i32>} : memref<1x6272xbf16, #tpu.memory_space<vmem>>, vector<1x128xbf16>,
    %227 = vector.extract_strided_slice %136 {offsets = [63, 0], sizes = [1, 128], strides = [1, 1]} : vector<72x128xbf16> to vector<1x128xbf16>
    %c0_188 = arith.constant 0 : index
    %c5760 = arith.constant 5760 : index
    %228 = vector.load %arg16[%c0_188, %c5760] : memref<1x6272xbf16, #tpu.memory_space<vmem>>, vector<1x128xbf16>
    tpu.vector_store %arg16[%c0_188, %c5760], %227 {strides = array<i32>} : memref<1x6272xbf16, #tpu.memory_space<vmem>>, vector<1x128xbf16>,
    %229 = vector.extract_strided_slice %136 {offsets = [64, 0], sizes = [1, 128], strides = [1, 1]} : vector<72x128xbf16> to vector<1x128xbf16>
    %c0_189 = arith.constant 0 : index
    %c5888 = arith.constant 5888 : index
    %230 = vector.load %arg16[%c0_189, %c5888] : memref<1x6272xbf16, #tpu.memory_space<vmem>>, vector<1x128xbf16>
    tpu.vector_store %arg16[%c0_189, %c5888], %229 {strides = array<i32>} : memref<1x6272xbf16, #tpu.memory_space<vmem>>, vector<1x128xbf16>,
    %231 = vector.extract_strided_slice %136 {offsets = [65, 0], sizes = [1, 128], strides = [1, 1]} : vector<72x128xbf16> to vector<1x128xbf16>
    %c0_190 = arith.constant 0 : index
    %c6016 = arith.constant 6016 : index
    %232 = vector.load %arg16[%c0_190, %c6016] : memref<1x6272xbf16, #tpu.memory_space<vmem>>, vector<1x128xbf16>
    tpu.vector_store %arg16[%c0_190, %c6016], %231 {strides = array<i32>} : memref<1x6272xbf16, #tpu.memory_space<vmem>>, vector<1x128xbf16>,
    %233 = vector.extract_strided_slice %136 {offsets = [66, 0], sizes = [1, 128], strides = [1, 1]} : vector<72x128xbf16> to vector<1x128xbf16>
    %c0_191 = arith.constant 0 : index
    %c6144 = arith.constant 6144 : index
    %234 = vector.load %arg16[%c0_191, %c6144] : memref<1x6272xbf16, #tpu.memory_space<vmem>>, vector<1x128xbf16>
    tpu.vector_store %arg16[%c0_191, %c6144], %233 {strides = array<i32>} : memref<1x6272xbf16, #tpu.memory_space<vmem>>, vector<1x128xbf16>,
    %c0_192 = arith.constant 0 : index
    %c0_193 = arith.constant 0 : index
    %235 = vector.load %arg16[%c0_192, %c0_193] : memref<1x6272xbf16, #tpu.memory_space<vmem>>, vector<1x6272xbf16>
    %c0_194 = arith.constant 0 : index
    %c0_195 = arith.constant 0 : index
    %236 = vector.load %arg8[%c0_194, %c0_195] : memref<6272x512xbf16, #tpu.memory_space<vmem>>, vector<6272x512xbf16>
    %cst_196 = arith.constant dense<0.000000e+00> : vector<1x512xf32>
    %237 = tpu.matmul %235, %236, %cst_196 {dimension_numbers = #tpu.dot_dimension_numbers<[1], [0], [0], [1], [0, 0, 1, 1], [], []>} : vector<1x6272xbf16>, vector<6272x512xbf16>, vector<1x512xf32> -> vector<1x512xf32>
    %c0_197 = arith.constant 0 : index
    %c0_198 = arith.constant 0 : index
    %238 = vector.load %arg9[%c0_197, %c0_198] : memref<1x512xf32, #tpu.memory_space<vmem>>, vector<1x512xf32>
    %239 = arith.addf %237, %238 : vector<1x512xf32>
    %cst_199 = arith.constant 0.000000e+00 : f32
    %240 = vector.broadcast %cst_199 : f32 to vector<1x512xf32>
    %241 = arith.cmpf ogt, %239, %240 : vector<1x512xf32>
    %cst_200 = arith.constant 0.00999999977 : f32
    %242 = vector.broadcast %cst_200 : f32 to vector<1x512xf32>
    %243 = arith.mulf %242, %239 : vector<1x512xf32>
    %244 = arith.select %241, %239, %243 : vector<1x512xi1>, vector<1x512xf32>
    %245 = arith.truncf %244 : vector<1x512xf32> to vector<1x512xbf16>
    %c0_201 = arith.constant 0 : index
    %c0_202 = arith.constant 0 : index
    %246 = vector.load %arg10[%c0_201, %c0_202] : memref<512x128xbf16, #tpu.memory_space<vmem>>, vector<512x128xbf16>
    %cst_203 = arith.constant dense<0.000000e+00> : vector<1x128xf32>
    %247 = tpu.matmul %245, %246, %cst_203 {dimension_numbers = #tpu.dot_dimension_numbers<[1], [0], [0], [1], [0, 0, 1, 1], [], []>} : vector<1x512xbf16>, vector<512x128xbf16>, vector<1x128xf32> -> vector<1x128xf32>
    %c0_204 = arith.constant 0 : index
    %c0_205 = arith.constant 0 : index
    %248 = vector.load %arg11[%c0_204, %c0_205] : memref<1x128xf32, #tpu.memory_space<vmem>>, vector<1x128xf32>
    %249 = arith.addf %247, %248 : vector<1x128xf32>
    %250 = vector.shape_cast %249 : vector<1x128xf32> to vector<1x128xf32>
    %251 = vector.broadcast %250 : vector<1x128xf32> to vector<8x128xf32>
    %c0_206 = arith.constant 0 : index
    %c0_207 = arith.constant 0 : index
    %252 = vector.load %arg12[%c0_206, %c0_207] : memref<8x128xf32, #tpu.memory_space<vmem>>, vector<8x128xf32>
    tpu.vector_store %arg12[%c0_206, %c0_207], %251 {strides = array<i32>} : memref<8x128xf32, #tpu.memory_space<vmem>>, vector<8x128xf32>,
    return
  }
  func.func @transform_0(%arg0: i32) -> (i32, i32) {
    %c0_i32 = arith.constant 0 : i32
    %c0_i32_0 = arith.constant 0 : i32
    return %arg0, %c0_i32 : i32, i32
  }
  func.func @transform_1(%arg0: i32) -> (i32, i32) {
    %c0_i32 = arith.constant 0 : i32
    %c0_i32_0 = arith.constant 0 : i32
    %c0_i32_1 = arith.constant 0 : i32
    return %c0_i32, %c0_i32_0 : i32, i32
  }
  func.func @transform_2(%arg0: i32) -> (i32, i32) {
    %c0_i32 = arith.constant 0 : i32
    %c0_i32_0 = arith.constant 0 : i32
    %c0_i32_1 = arith.constant 0 : i32
    return %c0_i32, %c0_i32_0 : i32, i32
  }
  func.func @transform_3(%arg0: i32) -> (i32, i32) {
    %c0_i32 = arith.constant 0 : i32
    %c0_i32_0 = arith.constant 0 : i32
    %c0_i32_1 = arith.constant 0 : i32
    return %c0_i32, %c0_i32_0 : i32, i32
  }
  func.func @transform_4(%arg0: i32) -> (i32, i32) {
    %c0_i32 = arith.constant 0 : i32
    %c0_i32_0 = arith.constant 0 : i32
    %c0_i32_1 = arith.constant 0 : i32
    return %c0_i32, %c0_i32_0 : i32, i32
  }
  func.func @transform_5(%arg0: i32) -> (i32, i32) {
    %c0_i32 = arith.constant 0 : i32
    %c0_i32_0 = arith.constant 0 : i32
    %c0_i32_1 = arith.constant 0 : i32
    return %c0_i32, %c0_i32_0 : i32, i32
  }
  func.func @transform_6(%arg0: i32) -> (i32, i32) {
    %c0_i32 = arith.constant 0 : i32
    %c0_i32_0 = arith.constant 0 : i32
    %c0_i32_1 = arith.constant 0 : i32
    return %c0_i32, %c0_i32_0 : i32, i32
  }
  func.func @transform_7(%arg0: i32) -> (i32, i32) {
    %c0_i32 = arith.constant 0 : i32
    %c0_i32_0 = arith.constant 0 : i32
    %c0_i32_1 = arith.constant 0 : i32
    return %c0_i32, %c0_i32_0 : i32, i32
  }
  func.func @transform_8(%arg0: i32) -> (i32, i32) {
    %c0_i32 = arith.constant 0 : i32
    %c0_i32_0 = arith.constant 0 : i32
    %c0_i32_1 = arith.constant 0 : i32
    return %c0_i32, %c0_i32_0 : i32, i32
  }
  func.func @transform_9(%arg0: i32) -> (i32, i32) {
    %c0_i32 = arith.constant 0 : i32
    %c0_i32_0 = arith.constant 0 : i32
    %c0_i32_1 = arith.constant 0 : i32
    return %c0_i32, %c0_i32_0 : i32, i32
  }
  func.func @transform_10(%arg0: i32) -> (i32, i32) {
    %c0_i32 = arith.constant 0 : i32
    %c0_i32_0 = arith.constant 0 : i32
    %c0_i32_1 = arith.constant 0 : i32
    return %c0_i32, %c0_i32_0 : i32, i32
  }
  func.func @transform_11(%arg0: i32) -> (i32, i32) {
    %c0_i32 = arith.constant 0 : i32
    %c0_i32_0 = arith.constant 0 : i32
    return %arg0, %c0_i32 : i32, i32
  }
}

</mosaic_0001>

<bundles_post_ra>
// kernel: dqn_forward.1
= control target key start
LH: loop header
LB: loop body
LE: loop exit
PB: predicated region body
PF: predicated region fallthrough
CT: control target
= control target key end

     0   :  { %s25077_s17 = smov 0   ;;  %s32072_s0 = inlined_call_operand.vmem [shape: bf16[896,256], index: 0, kind: input, shape index: {}]   ;;  %s32073_s1 = inlined_call_operand.vmem [shape: bf16[256,128], index: 1, kind: input, shape index: {}]   ;;  %s32074_s2 = inlined_call_operand.vmem [shape: f32[1,128], index: 2, kind: input, shape index: {}]   ;;  %s32075_s3 = inlined_call_operand.vmem [shape: bf16[2048,128], index: 3, kind: input, shape index: {}]   ;;  %s32076_s4 = inlined_call_operand.vmem [shape: f32[1,128], index: 4, kind: input, shape index: {}]   ;;  %s32077_s5 = inlined_call_operand.vmem [shape: bf16[1152,128], index: 5, kind: input, shape index: {}]   ;;  %s32078_s6 = inlined_call_operand.vmem [shape: f32[1,128], index: 6, kind: input, shape index: {}]   ;;  %s32079_s7 = inlined_call_operand.vmem [shape: bf16[6272,512], index: 7, kind: input, shape index: {}]   ;;  %s32080_s8 = inlined_call_operand.vmem [shape: f32[1,512], index: 8, kind: input, shape index: {}]   ;;  %s32081_s9 = inlined_call_operand.vmem [shape: bf16[512,128], index: 9, kind: input, shape index: {}]   ;;  %s32082_s10 = inlined_call_operand.vmem [shape: f32[1,128], index: 10, kind: input, shape index: {}]   ;;  %s32083_s11 = inlined_call_operand.vmem [shape: f32[16,128], index: 11, kind: output, shape index: {}]  }
   0x1 LB: > { %s25083_s18 = sadd.s32 4294967295, %s25011_s17   ;;  %p18846_p0 = scmp.ge.s32.totalorder %s25011_s17, 1  ;;  %s25011_s17 = sphi %s25077_s17, %s21_s17  }
   0x2   : > { %p339_p1 = scmp.lt.s32.totalorder %s25011_s17, 3 }
   0x4   : > { %p340_p2 = pnand %p18846_p0, %p339_p1 }
   0x6   : > { %343 = sbr.rel (%p340_p2) target bundleno = 3569 (0xdf1), region = 64 }
   0xd   : > { %v22299_v0 = vld [vmem:[%s32073_s1] sm:$0xff]   ;;  %v32084_v1 = vmov 0   ;;  %s379_s21 = smul.u32 56, %s25083_s18  ;;  %v22300_v2 = vld [vmem:[%s32073_s1 + $0x8] sm:$0xff]   ;;  %v22301_v3 = vld [vmem:[%s32073_s1 + $0x10] sm:$0xff]   ;;  %p386_p4 = scmp.lt.s32.totalorder %s25083_s18, 1 }
   0xe   : > { %862 = vmatprep.subr.bf16.mxu0 %v32084_v1  ;;  %v22302_v4 = vld [vmem:[%s32073_s1 + $0x18] sm:$0xff]   ;;  %v22303_v5 = vld [vmem:[%s32073_s1 + $0x20] sm:$0xff]   ;;  %v22304_v7 = vld [vmem:[%s32073_s1 + $0x28] sm:$0xff]   ;;  %vm3248_vm8 = vsmask.f32 2304 }
   0xf   : > { %863 = vmatpush1.bf16.msra.mxu0 %v22299_v0  ;;  %p380_p3 = scmp.lt.s32.totalorder %s379_s21, 111  ;;  %v22305_v8 = vld [vmem:[%s32073_s1 + $0x30] sm:$0xff]   ;;  %v22306_v9 = vld [vmem:[%s32073_s1 + $0x38] sm:$0xff]   ;;  %v22307_v10 = vld [vmem:[%s32073_s1 + $0x40] sm:$0xff]   ;;  %s32124_s18 = smov (!%p386_p4, %s25083_s18), 1 }
  0x10   : > { %864 = vmatprep.subr.bf16.mxu0 %v32084_v1  ;;  %v22308_v11 = vld [vmem:[%s32073_s1 + $0x48] sm:$0xff]   ;;  %v22309_v12 = vld [vmem:[%s32073_s1 + $0x50] sm:$0xff]   ;;  %v22310_v13 = vld [vmem:[%s32073_s1 + $0x58] sm:$0xff]   ;;  %s18849_s19 = sshll.u32 %s32124_s18, 3 }
  0x11   : > { %s32122_s21 = smov (!%p380_p3, %s379_s21), 111  ;;  %v22311_v14 = vld [vmem:[%s32073_s1 + $0x60] sm:$0xff]   ;;  %v22312_v15 = vld [vmem:[%s32073_s1 + $0x68] sm:$0xff]   ;;  %v22313_v16 = vld [vmem:[%s32073_s1 + $0x70] sm:$0xff]   ;;  %s389_s22 = scalar_lea.vmem %s32083_s11, %s18849_s19 }
  0x12   : > { %s20753_s28 = sshll.u32 %s32122_s21, 3  ;;  %v22314_v17 = vld [vmem:[%s32073_s1 + $0x78] sm:$0xff]   ;;  %v22399_v52 = vld [vmem:[%s32075_s3 + $0x40] sm:$0xff]   ;;  %v22400_v53 = vld [vmem:[%s32075_s3 + $0x48] sm:$0xff]  }
  0x13   : > { %865 = vmatpush1.bf16.msra.mxu0 %v22300_v2  ;;  %s25110_s14 = scalar_lea.vmem %s32072_s0, %s20753_s28  ;;  %21139 = vmatprep.subr.bf16.mxu1 %v22399_v52  ;;  %v22401_v56 = vld [vmem:[%s32075_s3 + $0x50] sm:$0xff]   ;;  %v22402_v57 = vld [vmem:[%s32075_s3 + $0x58] sm:$0xff]   ;;  %v22403_v60 = vld [vmem:[%s32075_s3 + $0x60] sm:$0xff]  }
  0x14   : > { %866 = vmatprep.subr.bf16.mxu0 %v32084_v1  ;;  %v22317_v6 = vld [vmem:[%s25110_s14 + $0x4] ss:$8 sps:$4 sm:$0xff]   ;;  %v22315_v18 = vld [vmem:[%s25110_s14] ss:$8 sps:$4 sm:$0xff]   ;;  %v22318_v19 = vld [vmem:[%s25110_s14 + $0x14] ss:$8 sps:$4 sm:$0xff]   ;;  %21140 = vmatpush3.bf16.msra.mxu1 %v22399_v52 }
  0x15   : > { %894 = vmatprep.mubr.bf16.mxu0 %v22317_v6  ;;  %v22320_v20 = vld [vmem:[%s25110_s14 + $0x10] ss:$8 sps:$4 sm:$0xff]   ;;  %v22321_v21 = vld [vmem:[%s25110_s14 + $0x24] ss:$8 sps:$4 sm:$0xff]   ;;  %v22323_v22 = vld [vmem:[%s25110_s14 + $0x20] ss:$8 sps:$4 sm:$0xff]   ;;  %21141 = vmatprep.subr.bf16.mxu1 %v22400_v53 }
  0x16   : > { %v22324_v23 = vld [vmem:[%s25110_s14 + $0x34] ss:$8 sps:$4 sm:$0xff]   ;;  %v22326_v24 = vld [vmem:[%s25110_s14 + $0x30] ss:$8 sps:$4 sm:$0xff]   ;;  %v22327_v25 = vld [vmem:[%s25110_s14 + $0x44] ss:$8 sps:$4 sm:$0xff]  }
  0x17   : > { %867 = vmatpush1.bf16.msra.mxu0 %v22301_v3  ;;  %v22329_v26 = vld [vmem:[%s25110_s14 + $0x40] ss:$8 sps:$4 sm:$0xff]   ;;  %v22330_v27 = vld [vmem:[%s25110_s14 + $0x54] ss:$8 sps:$4 sm:$0xff]   ;;  %v22332_v28 = vld [vmem:[%s25110_s14 + $0x50] ss:$8 sps:$4 sm:$0xff]  }
  0x18   : > { %868 = vmatprep.subr.bf16.mxu0 %v32084_v1  ;;  %v22333_v29 = vld [vmem:[%s25110_s14 + $0x64] ss:$8 sps:$4 sm:$0xff]   ;;  %v22335_v30 = vld [vmem:[%s25110_s14 + $0x60] ss:$8 sps:$4 sm:$0xff]   ;;  %v22336_v31 = vld [vmem:[%s25110_s14 + $0x74] ss:$8 sps:$4 sm:$0xff]   ;;  %21142 = vmatpush3.bf16.msra.mxu1 %v22400_v53 }
  0x19   : > { %v22338_v32 = vld [vmem:[%s25110_s14 + $0x70] ss:$8 sps:$4 sm:$0xff]   ;;  %v22339_v33 = vld [vmem:[%s25110_s14 + $0x84] ss:$8 sps:$4 sm:$0xff]   ;;  %v22341_v34 = vld [vmem:[%s25110_s14 + $0x80] ss:$8 sps:$4 sm:$0xff]   ;;  %21143 = vmatprep.subr.bf16.mxu1 %v22401_v56 }
  0x1a   : > { %v22342_v35 = vld [vmem:[%s25110_s14 + $0x94] ss:$8 sps:$4 sm:$0xff]   ;;  %v22344_v36 = vld [vmem:[%s25110_s14 + $0x90] ss:$8 sps:$4 sm:$0xff]   ;;  %v22345_v37 = vld [vmem:[%s25110_s14 + $0xa4] ss:$8 sps:$4 sm:$0xff]  }
  0x1b   : > { %869 = vmatpush1.bf16.msra.mxu0 %v22302_v4  ;;  %v22347_v38 = vld [vmem:[%s25110_s14 + $0xa0] ss:$8 sps:$4 sm:$0xff]   ;;  %v22348_v39 = vld [vmem:[%s25110_s14 + $0xb4] ss:$8 sps:$4 sm:$0xff]   ;;  %v22350_v40 = vld [vmem:[%s25110_s14 + $0xb0] ss:$8 sps:$4 sm:$0xff]  }
  0x1c   : > { %870 = vmatprep.subr.bf16.mxu0 %v32084_v1  ;;  %v22351_v41 = vld [vmem:[%s25110_s14 + $0xc4] ss:$8 sps:$4 sm:$0xff]   ;;  %v22353_v42 = vld [vmem:[%s25110_s14 + $0xc0] ss:$8 sps:$4 sm:$0xff]   ;;  %v22354_v43 = vld [vmem:[%s25110_s14 + $0xd4] ss:$8 sps:$4 sm:$0xff]   ;;  %21144 = vmatpush3.bf16.msra.mxu1 %v22401_v56 }
  0x1d   : > { %v22356_v44 = vld [vmem:[%s25110_s14 + $0xd0] ss:$8 sps:$4 sm:$0xff]   ;;  %v22357_v45 = vld [vmem:[%s25110_s14 + $0xe4] ss:$8 sps:$4 sm:$0xff]   ;;  %v22359_v46 = vld [vmem:[%s25110_s14 + $0xe0] ss:$8 sps:$4 sm:$0xff]   ;;  %21145 = vmatprep.subr.bf16.mxu1 %v22402_v57 }
  0x1e   : > { %v22360_v47 = vld [vmem:[%s25110_s14 + $0xf4] ss:$8 sps:$4 sm:$0xff]   ;;  %v22362_v48 = vld [vmem:[%s25110_s14 + $0xf0] ss:$8 sps:$4 sm:$0xff]   ;;  %v22363_v49 = vld [vmem:[%s25110_s14 + $0x104] ss:$8 sps:$4 sm:$0xff]  }
  0x1f   : > { %871 = vmatpush1.bf16.msra.mxu0 %v22303_v5  ;;  %v22365_v50 = vld [vmem:[%s25110_s14 + $0x100] ss:$8 sps:$4 sm:$0xff]   ;;  %v22366_v51 = vld [vmem:[%s25110_s14 + $0x114] ss:$8 sps:$4 sm:$0xff]   ;;  %v22368_v54 = vld [vmem:[%s25110_s14 + $0x110] ss:$8 sps:$4 sm:$0xff]  }
  0x20   : > { %872 = vmatprep.subr.bf16.mxu0 %v32084_v1  ;;  %v22369_v55 = vld [vmem:[%s25110_s14 + $0x124] ss:$8 sps:$4 sm:$0xff]   ;;  %v22371_v58 = vld [vmem:[%s25110_s14 + $0x120] ss:$8 sps:$4 sm:$0xff]   ;;  %21146 = vmatpush3.bf16.msra.mxu1 %v22402_v57  ;;  %v22372_v59 = vld [vmem:[%s25110_s14 + $0x134] ss:$8 sps:$4 sm:$0xff]  }
  0x21   : > { %21147 = vmatprep.subr.bf16.mxu1 %v22403_v60  ;;  %v22404_v61 = vld [vmem:[%s32075_s3 + $0x68] sm:$0xff]   ;;  %v22374_v62 = vld [vmem:[%s25110_s14 + $0x130] ss:$8 sps:$4 sm:$0xff]   ;;  %v22378_v4 = vld [vmem:[%s25110_s14 + $0x154] ss:$8 sps:$4 sm:$0xff]  }
  0x22   : > { %v22375_v63 = vld [vmem:[%s25110_s14 + $0x144] ss:$8 sps:$4 sm:$0xff]   ;;  %v22405_v0 = vld [vmem:[%s32075_s3 + $0x70] sm:$0xff]   ;;  %v22406_v2 = vld [vmem:[%s32075_s3 + $0x78] sm:$0xff]  }
  0x23   : > { %873 = vmatpush1.bf16.msra.mxu0 %v22304_v7  ;;  %v22377_v3 = vld [vmem:[%s25110_s14 + $0x140] ss:$8 sps:$4 sm:$0xff]   ;;  %v22380_v5 = vld [vmem:[%s25110_s14 + $0x150] ss:$8 sps:$4 sm:$0xff]   ;;  %v22381_v7 = vld [vmem:[%s25110_s14 + $0x164] ss:$8 sps:$4 sm:$0xff]  }
  0x24   : > { %874 = vmatprep.subr.bf16.mxu0 %v32084_v1  ;;  %21148 = vmatpush3.bf16.msra.mxu1 %v22403_v60  ;;  %v22407_v6 = vld [vmem:[%s32075_s3] sm:$0xff]  }
  0x25   : > { %21149 = vmatprep.subr.bf16.mxu1 %v22404_v61 }
  0x27   : > { %875 = vmatpush1.bf16.msra.mxu0 %v22305_v8  ;;  %v22383_v8 = vld [vmem:[%s25110_s14 + $0x160] ss:$8 sps:$4 sm:$0xff]  }
  0x28   : > { %876 = vmatprep.subr.bf16.mxu0 %v32084_v1  ;;  %21150 = vmatpush3.bf16.msra.mxu1 %v22404_v61 }
  0x29   : > { %21151 = vmatprep.subr.bf16.mxu1 %v22405_v0 }
  0x2b   : > { %877 = vmatpush1.bf16.msra.mxu0 %v22306_v9  ;;  %v22384_v9 = vld [vmem:[%s25110_s14 + $0x174] ss:$8 sps:$4 sm:$0xff]  }
  0x2c   : > { %878 = vmatprep.subr.bf16.mxu0 %v32084_v1  ;;  %21152 = vmatpush3.bf16.msra.mxu1 %v22405_v0 }
  0x2d   : > { %21153 = vmatprep.subr.bf16.mxu1 %v22406_v2 }
  0x2f   : > { %879 = vmatpush1.bf16.msra.mxu0 %v22307_v10  ;;  %v22386_v10 = vld [vmem:[%s25110_s14 + $0x170] ss:$8 sps:$4 sm:$0xff]  }
  0x30   : > { %880 = vmatprep.subr.bf16.mxu0 %v32084_v1  ;;  %21154 = vmatpush3.bf16.msra.mxu1 %v22406_v2 }
  0x31   : > { %21167 = vmatprep.subr.bf16.mxu1 %v22407_v6 }
  0x33   : > { %881 = vmatpush1.bf16.msra.mxu0 %v22308_v11  ;;  %v22387_v11 = vld [vmem:[%s25110_s14 + $0x184] ss:$8 sps:$4 sm:$0xff]  }
  0x34   : > { %882 = vmatprep.subr.bf16.mxu0 %v32084_v1 }
  0x37   : > { %883 = vmatpush1.bf16.msra.mxu0 %v22309_v12  ;;  %v22389_v12 = vld [vmem:[%s25110_s14 + $0x180] ss:$8 sps:$4 sm:$0xff]  }
  0x38   : > { %884 = vmatprep.subr.bf16.mxu0 %v32084_v1 }
  0x3b   : > { %885 = vmatpush1.bf16.msra.mxu0 %v22310_v13  ;;  %v22390_v13 = vld [vmem:[%s25110_s14 + $0x194] ss:$8 sps:$4 sm:$0xff]  }
  0x3c   : > { %886 = vmatprep.subr.bf16.mxu0 %v32084_v1 }
  0x3f   : > { %887 = vmatpush1.bf16.msra.mxu0 %v22311_v14  ;;  %v22392_v14 = vld [vmem:[%s25110_s14 + $0x190] ss:$8 sps:$4 sm:$0xff]  }
  0x40   : > { %888 = vmatprep.subr.bf16.mxu0 %v32084_v1 }
  0x43   : > { %889 = vmatpush1.bf16.msra.mxu0 %v22312_v15  ;;  %v22393_v15 = vld [vmem:[%s25110_s14 + $0x1a4] ss:$8 sps:$4 sm:$0xff]  }
  0x44   : > { %890 = vmatprep.subr.bf16.mxu0 %v32084_v1 }
  0x47   : > { %891 = vmatpush1.bf16.msra.mxu0 %v22313_v16  ;;  %v22395_v16 = vld [vmem:[%s25110_s14 + $0x1a0] ss:$8 sps:$4 sm:$0xff]  }
  0x48   : > { %892 = vmatprep.subr.bf16.mxu0 %v32084_v1 }
  0x4b   : > { %893 = vmatpush1.bf16.msra.mxu0 %v22314_v17  ;;  %v22396_v17 = vld [vmem:[%s25110_s14 + $0x1b4] ss:$8 sps:$4 sm:$0xff]  }
  0x4e   : > { %895 = vmatmul.mubr.bf16.vlgmr.msra.gmra.mrb[0].mxu0 %v22315_v18  ;;  %v25242_v18 = vld [vmem:[%s32074_s2] ss:$0 sm:$0xff] }
  0x4f   : > { %902 = vmatprep.mubr.bf16.mxu0 %v22318_v19  ;;  %v22398_v19 = vld [vmem:[%s25110_s14 + $0x1b0] ss:$8 sps:$4 sm:$0xff]  }
  0x56   : > { %903 = vmatmul.mubr.bf16.gmra.mrb[4].mxu0 %v22320_v20 }
  0x57   : > { %910 = vmatprep.mubr.bf16.mxu0 %v22321_v21 }
  0x5e   : > { %911 = vmatmul.mubr.bf16.gmra.mrb[8].mxu0 %v22323_v22 }
  0x5f   : > { %918 = vmatprep.mubr.bf16.mxu0 %v22324_v23 }
  0x66   : > { %919 = vmatmul.mubr.bf16.gmra.mrb[12].mxu0 %v22326_v24 }
  0x67   : > { %926 = vmatprep.mubr.bf16.mxu0 %v22327_v25 }
  0x6e   : > { %927 = vmatmul.mubr.bf16.gmra.mrb[16].mxu0 %v22329_v26 }
  0x6f   : > { %934 = vmatprep.mubr.bf16.mxu0 %v22330_v27 }
  0x76   : > { %935 = vmatmul.mubr.bf16.gmra.mrb[20].mxu0 %v22332_v28 }
  0x77   : > { %942 = vmatprep.mubr.bf16.mxu0 %v22333_v29 }
  0x7e   : > { %943 = vmatmul.mubr.bf16.gmra.mrb[24].mxu0 %v22335_v30 }
  0x7f   : > { %950 = vmatprep.mubr.bf16.mxu0 %v22336_v31 }
  0x86   : > { %951 = vmatmul.mubr.bf16.gmra.mrb[28].mxu0 %v22338_v32 }
  0x87   : > { %958 = vmatprep.mubr.bf16.mxu0 %v22339_v33 }
  0x8e   : > { %959 = vmatmul.mubr.bf16.gmra.mrb[32].mxu0 %v22341_v34 }
  0x8f   : > { %966 = vmatprep.mubr.bf16.mxu0 %v22342_v35 }
  0x96   : > { %967 = vmatmul.mubr.bf16.gmra.mrb[36].mxu0 %v22344_v36 }
  0x97   : > { %974 = vmatprep.mubr.bf16.mxu0 %v22345_v37 }
  0x9e   : > { %975 = vmatmul.mubr.bf16.gmra.mrb[40].mxu0 %v22347_v38 }
  0x9f   : > { %982 = vmatprep.mubr.bf16.mxu0 %v22348_v39 }
  0xa6   : > { %983 = vmatmul.mubr.bf16.gmra.mrb[44].mxu0 %v22350_v40 }
  0xa7   : > { %990 = vmatprep.mubr.bf16.mxu0 %v22351_v41 }
  0xae   : > { %991 = vmatmul.mubr.bf16.gmra.mrb[48].mxu0 %v22353_v42 }
  0xaf   : > { %998 = vmatprep.mubr.bf16.mxu0 %v22354_v43 }
  0xb6   : > { %999 = vmatmul.mubr.bf16.gmra.mrb[52].mxu0 %v22356_v44 }
  0xb7   : > { %1006 = vmatprep.mubr.bf16.mxu0 %v22357_v45 }
  0xbe   : > { %1007 = vmatmul.mubr.bf16.gmra.mrb[56].mxu0 %v22359_v46 }
  0xbf   : > { %1014 = vmatprep.mubr.bf16.mxu0 %v22360_v47 }
  0xc6   : > { %1015 = vmatmul.mubr.bf16.gmra.mrb[60].mxu0 %v22362_v48 }
  0xc7   : > { %1022 = vmatprep.mubr.bf16.mxu0 %v22363_v49 }
  0xce   : > { %1023 = vmatmul.mubr.bf16.gmra.mrb[64].mxu0 %v22365_v50 }
  0xcf   : > { %1030 = vmatprep.mubr.bf16.mxu0 %v22366_v51 }
  0xd6   : > { %1031 = vmatmul.mubr.bf16.gmra.mrb[68].mxu0 %v22368_v54 }
  0xd7   : > { %1038 = vmatprep.mubr.bf16.mxu0 %v22369_v55 }
  0xde   : > { %1039 = vmatmul.mubr.bf16.gmra.mrb[72].mxu0 %v22371_v58 }
  0xdf   : > { %1046 = vmatprep.mubr.bf16.mxu0 %v22372_v59 }
  0xe6   : > { %1047 = vmatmul.mubr.bf16.gmra.mrb[76].mxu0 %v22374_v62 }
  0xe7   : > { %1054 = vmatprep.mubr.bf16.mxu0 %v22375_v63 }
  0xee   : > { %1055 = vmatmul.mubr.bf16.gmra.mrb[80].mxu0 %v22377_v3 }
  0xef   : > { %1062 = vmatprep.mubr.bf16.mxu0 %v22378_v4 }
  0xf6   : > { %1063 = vmatmul.mubr.bf16.gmra.mrb[84].mxu0 %v22380_v5 }
  0xf7   : > { %1070 = vmatprep.mubr.bf16.mxu0 %v22381_v7 }
  0xfe   : > { %1071 = vmatmul.mubr.bf16.gmra.mrb[88].mxu0 %v22383_v8 }
  0xff   : > { %1078 = vmatprep.mubr.bf16.mxu0 %v22384_v9 }
 0x106   : > { %1079 = vmatmul.mubr.bf16.gmra.mrb[92].mxu0 %v22386_v10 }
 0x107   : > { %1086 = vmatprep.mubr.bf16.mxu0 %v22387_v11 }
 0x10e   : > { %1087 = vmatmul.mubr.bf16.gmra.mrb[96].mxu0 %v22389_v12 }
 0x10f   : > { %1094 = vmatprep.mubr.bf16.mxu0 %v22390_v13 }
 0x116   : > { %1095 = vmatmul.mubr.bf16.gmra.mrb[100].mxu0 %v22392_v14 }
 0x117   : > { %1102 = vmatprep.mubr.bf16.mxu0 %v22393_v15 }
 0x11e   : > { %1103 = vmatmul.mubr.bf16.gmra.mrb[104].mxu0 %v22395_v16 }
 0x11f   : > { %1110 = vmatprep.mubr.bf16.mxu0 %v22396_v17 }
 0x121   : > { %v896_v20 = vpop.f32.mrb[0].mxu0 }
 0x122   : > { %v897_v21 = vadd.f32 %v25242_v18, %v896_v20  ;;  %v898_v22 = vpop.f32.mrb[1].mxu0 }
 0x123   : > { %v899_v23 = vpop.f32.mrb[2].mxu0 }
 0x124   : > { %v1175_v24 = vmul.f32 0.01, %v897_v21  ;;  %v900_v25 = vadd.f32 %v25242_v18, %v899_v23  ;;  %v901_v26 = vpop.f32.mrb[3].mxu0  ;;  %vm1119_vm0 = vcmp.gt.f32.partialorder %v897_v21, 0.0 }
 0x126   : > { %vm1120_vm1 = vcmp.gt.f32.partialorder %v900_v25, 0.0  ;;  %v1176_v27 = vmul.f32 0.01, %v900_v25  ;;  %1111 = vmatmul.mubr.bf16.gmra.mrb[108].mxu0 %v22398_v19  ;;  %v1231_v28 = vsel %vm1119_vm0, %v897_v21, %v1175_v24 }
 0x128   : > { %v1232_v29 = vsel %vm1120_vm1, %v900_v25, %v1176_v27 }
 0x129   : > { %v1287_v30 = vpack.c.bf16 %v1232_v29, %v1231_v28  ;;  %v904_v31 = vpop.f32.mrb[4].mxu0 }
 0x12a   : > { %v905_v32 = vadd.f32 %v25242_v18, %v904_v31  ;;  %v906_v33 = vpop.f32.mrb[5].mxu0 }
 0x12b   : > { %1315 = vst [vmem:[#allocation2] sm:$0xff] %v1287_v30  ;;  %v907_v34 = vpop.f32.mrb[6].mxu0 }
 0x12c   : > { %v1177_v35 = vmul.f32 0.01, %v905_v32  ;;  %v908_v36 = vadd.f32 %v25242_v18, %v907_v34  ;;  %v909_v37 = vpop.f32.mrb[7].mxu0  ;;  %vm1121_vm2 = vcmp.gt.f32.partialorder %v905_v32, 0.0 }
 0x12e   : > { %vm1122_vm3 = vcmp.gt.f32.partialorder %v908_v36, 0.0  ;;  %v1178_v38 = vmul.f32 0.01, %v908_v36  ;;  %v1233_v39 = vsel %vm1121_vm2, %v905_v32, %v1177_v35 }
 0x130   : > { %v1234_v40 = vsel %vm1122_vm3, %v908_v36, %v1178_v38  ;;  %vm1668_vm3 = vsmask.f32 7424 }
 0x131   : > { %v25249_v41 = vpack.c.bf16 %v1234_v40, %v1233_v39  ;;  %v912_v42 = vpop.f32.mrb[8].mxu0 }
 0x132   : > { %v913_v43 = vadd.f32 %v25242_v18, %v912_v42  ;;  %v914_v44 = vpop.f32.mrb[9].mxu0 }
 0x133   : > { %1316 = vst [vmem:[#allocation2 + $0x10] sm:$0xff] %v25249_v41  ;;  %v915_v45 = vpop.f32.mrb[10].mxu0  ;;  %v1677_v46 = vshll.u32 %v25249_v41, 16  ;;  %v1681_v47 = vshrl.u32 %v25249_v41, 16 }
 0x134   : > { %v1179_v48 = vmul.f32 0.01, %v913_v43  ;;  %v916_v49 = vadd.f32 %v25242_v18, %v915_v45  ;;  %v917_v50 = vpop.f32.mrb[11].mxu0  ;;  %vm1123_vm4 = vcmp.gt.f32.partialorder %v913_v43, 0.0 }
 0x135   : > { %v3257_v51 = vrot.slane %v1681_v47, 5  ;;  %v3258_v53 = vrot.slane %v1677_v46, 6 }
 0x136   : > { %vm1124_vm5 = vcmp.gt.f32.partialorder %v916_v49, 0.0  ;;  %v1180_v52 = vmul.f32 0.01, %v916_v49  ;;  %v1235_v54 = vsel %vm1123_vm4, %v913_v43, %v1179_v48 }
 0x137   : > { %v25262_v58 = vor.u32 %v3258_v53, %v3257_v51 }
 0x138   : > { %v1236_v55 = vsel %vm1124_vm5, %v916_v49, %v1180_v52 }
 0x139   : > { %v25260_v56 = vpack.c.bf16 %v1236_v55, %v1235_v54  ;;  %v920_v57 = vpop.f32.mrb[12].mxu0 }
 0x13a   : > { %v921_v59 = vadd.f32 %v25242_v18, %v920_v57  ;;  %v922_v60 = vpop.f32.mrb[13].mxu0 }
 0x13b   : > { %1317 = vst [vmem:[#allocation2 + $0x20] sm:$0xff] %v25260_v56  ;;  %v923_v61 = vpop.f32.mrb[14].mxu0  ;;  %v1685_v62 = vshll.u32 %v25260_v56, 16  ;;  %v1689_v63 = vshrl.u32 %v25260_v56, 16 }
 0x13c   : > { %v1181_v0 = vmul.f32 0.01, %v921_v59  ;;  %v924_v2 = vadd.f32 %v25242_v18, %v923_v61  ;;  %v925_v3 = vpop.f32.mrb[15].mxu0  ;;  %vm1125_vm6 = vcmp.gt.f32.partialorder %v921_v59, 0.0 }
 0x13d   : > { %v3261_v4 = vrot.slane %v1689_v63, 5  ;;  %v3262_v5 = vrot.slane %v1685_v62, 6 }
 0x13e   : > { %vm1126_vm7 = vcmp.gt.f32.partialorder %v924_v2, 0.0  ;;  %v1182_v6 = vmul.f32 0.01, %v924_v2  ;;  %v1237_v8 = vsel %vm1125_vm6, %v921_v59, %v1181_v0  ;;  %vm2885_vm6 = vcmask 1042432  }
 0x13f   : > { %v3263_v7 = vor.u32 %v3262_v5, %v3261_v4 }
 0x140   : > { %v1238_v9 = vsel %vm1126_vm7, %v924_v2, %v1182_v6 }
 0x141   : > { %v25273_v10 = vpack.c.bf16 %v1238_v9, %v1237_v8  ;;  %v928_v11 = vpop.f32.mrb[16].mxu0  ;;  %v25277_v12 = vsel %vm3248_vm8, %v25262_v58, %v3263_v7 }
 0x142   : > { %v930_v13 = vpop.f32.mrb[17].mxu0  ;;  %v929_v14 = vadd.f32 %v25242_v18, %v928_v11 }
 0x143   : > { %1318 = vst [vmem:[#allocation2 + $0x30] sm:$0xff] %v25273_v10  ;;  %v931_v15 = vpop.f32.mrb[18].mxu0  ;;  %v1693_v16 = vshll.u32 %v25273_v10, 16  ;;  %v1697_v17 = vshrl.u32 %v25273_v10, 16 }
 0x144   : > { %v933_v19 = vpop.f32.mrb[19].mxu0  ;;  %v932_v20 = vadd.f32 %v25242_v18, %v931_v15  ;;  %v1183_v21 = vmul.f32 0.01, %v929_v14  ;;  %vm1127_vm9 = vcmp.gt.f32.partialorder %v929_v14, 0.0 }
 0x145   : > { %v3265_v22 = vrot.slane %v1697_v17, 5  ;;  %v3266_v23 = vrot.slane %v1693_v16, 6  ;;  %v1695_v1 = vrot.slane %v1693_v16, 1 }
 0x146   : > { %vm1128_vm10 = vcmp.gt.f32.partialorder %v932_v20, 0.0  ;;  %v1184_v24 = vmul.f32 0.01, %v932_v20  ;;  %v1239_v26 = vsel %vm1127_vm9, %v929_v14, %v1183_v21 }
 0x147   : > { %v3267_v25 = vor.u32 %v3266_v23, %v3265_v22 }
 0x148   : > { %v1240_v27 = vsel %vm1128_vm10, %v932_v20, %v1184_v24 }
 0x149   : > { %v936_v28 = vpop.f32.mrb[20].mxu0  ;;  %v25288_v29 = vpack.c.bf16 %v1240_v27, %v1239_v26  ;;  %v25291_v30 = vsel %vm3248_vm8, %v3263_v7, %v3267_v25 }
 0x14a   : > { %v937_v31 = vadd.f32 %v25242_v18, %v936_v28  ;;  %v938_v32 = vpop.f32.mrb[21].mxu0 }
 0x14b   : > { %v939_v33 = vpop.f32.mrb[22].mxu0  ;;  %1319 = vst [vmem:[#allocation2 + $0x40] sm:$0xff] %v25288_v29  ;;  %v1701_v34 = vshll.u32 %v25288_v29, 16  ;;  %v1705_v35 = vshrl.u32 %v25288_v29, 16 }
 0x14c   : > { %v1185_v36 = vmul.f32 0.01, %v937_v31  ;;  %v940_v37 = vadd.f32 %v25242_v18, %v939_v33  ;;  %v941_v38 = vpop.f32.mrb[23].mxu0  ;;  %vm1129_vm11 = vcmp.gt.f32.partialorder %v937_v31, 0.0 }
 0x14d   : > { %v3269_v39 = vrot.slane %v1705_v35, 5  ;;  %v3270_v40 = vrot.slane %v1701_v34, 6 }
 0x14e   : > { %vm1130_vm12 = vcmp.gt.f32.partialorder %v940_v37, 0.0  ;;  %v1186_v42 = vmul.f32 0.01, %v940_v37  ;;  %v1241_v44 = vsel %vm1129_vm11, %v937_v31, %v1185_v36 }
 0x14f   : > { %v3271_v43 = vor.u32 %v3270_v40, %v3269_v39  ;;  %v22408_v39 = vld [vmem:[%s32075_s3 + $0x8] sm:$0xff]  }
 0x150   : > { %v1242_v45 = vsel %vm1130_vm12, %v940_v37, %v1186_v42 }
 0x151   : > { %v25302_v48 = vpack.c.bf16 %v1242_v45, %v1241_v44  ;;  %v944_v49 = vpop.f32.mrb[24].mxu0  ;;  %v25305_v50 = vsel %vm3248_vm8, %v3267_v25, %v3271_v43 }
 0x152   : > { %v945_v51 = vadd.f32 %v25242_v18, %v944_v49  ;;  %v946_v52 = vpop.f32.mrb[25].mxu0 }
 0x153   : > { %1320 = vst [vmem:[#allocation2 + $0x50] sm:$0xff] %v25302_v48  ;;  %v947_v53 = vpop.f32.mrb[26].mxu0  ;;  %v1709_v54 = vshll.u32 %v25302_v48, 16  ;;  %v1713_v55 = vshrl.u32 %v25302_v48, 16 }
 0x154   : > { %v1187_v57 = vmul.f32 0.01, %v945_v51  ;;  %v948_v59 = vadd.f32 %v25242_v18, %v947_v53  ;;  %v949_v60 = vpop.f32.mrb[27].mxu0  ;;  %vm1131_vm13 = vcmp.gt.f32.partialorder %v945_v51, 0.0 }
 0x155   : > { %v3273_v61 = vrot.slane %v1713_v55, 5  ;;  %v3274_v0 = vrot.slane %v1709_v54, 6  ;;  %v24989_v60 = vld [vmem:[%s32075_s3] sm:$0xff]  }
 0x156   : > { %vm1132_vm14 = vcmp.gt.f32.partialorder %v948_v59, 0.0  ;;  %v1188_v2 = vmul.f32 0.01, %v948_v59  ;;  %v1243_v4 = vsel %vm1131_vm13, %v945_v51, %v1187_v57 }
 0x157   : > { %v25316_v3 = vor.u32 %v3274_v0, %v3273_v61  ;;  %v22409_v61 = vld [vmem:[%s32075_s3 + $0x10] sm:$0xff]  }
 0x158   : > { %v1244_v5 = vsel %vm1132_vm14, %v948_v59, %v1188_v2 }
 0x159   : > { %v1293_v6 = vpack.c.bf16 %v1244_v5, %v1243_v4  ;;  %v952_v7 = vpop.f32.mrb[28].mxu0  ;;  %v25320_v8 = vsel %vm3248_vm8, %v3271_v43, %v25316_v3 }
 0x15a   : > { %v953_v9 = vadd.f32 %v25242_v18, %v952_v7  ;;  %v954_v11 = vpop.f32.mrb[29].mxu0 }
 0x15b   : > { %1321 = vst [vmem:[#allocation2 + $0x60] sm:$0xff] %v1293_v6  ;;  %v955_v13 = vpop.f32.mrb[30].mxu0 }
 0x15c   : > { %v1189_v14 = vmul.f32 0.01, %v953_v9  ;;  %v956_v15 = vadd.f32 %v25242_v18, %v955_v13  ;;  %v957_v19 = vpop.f32.mrb[31].mxu0  ;;  %vm1133_vm15 = vcmp.gt.f32.partialorder %v953_v9, 0.0 }
 0x15d   : > { %v22410_v19 = vld [vmem:[%s32075_s3 + $0x18] sm:$0xff]  }
 0x15e   : > { %vm1134_vm0 = vcmp.gt.f32.partialorder %v956_v15, 0.0  ;;  %v1190_v20 = vmul.f32 0.01, %v956_v15  ;;  %v1245_v21 = vsel %vm1133_vm15, %v953_v9, %v1189_v14 }
 0x160   : > { %v1246_v22 = vsel %vm1134_vm0, %v956_v15, %v1190_v20 }
 0x161   : > { %v1294_v23 = vpack.c.bf16 %v1246_v22, %v1245_v21  ;;  %v960_v24 = vpop.f32.mrb[32].mxu0 }
 0x162   : > { %v961_v25 = vadd.f32 %v25242_v18, %v960_v24  ;;  %v962_v26 = vpop.f32.mrb[33].mxu0 }
 0x163   : > { %1322 = vst [vmem:[#allocation2 + $0x8] sm:$0xff] %v1294_v23  ;;  %v963_v27 = vpop.f32.mrb[34].mxu0  ;;  %21155 = vmatprep.mubr.bf16.mxu1 %v1294_v23  ;;  %v1894_v33 = vshll.u32 %v1294_v23, 16  ;;  %v1892_v51 = vshrl.u32 %v1294_v23, 16 }
 0x164   : > { %v1191_v28 = vmul.f32 0.01, %v961_v25  ;;  %v964_v31 = vadd.f32 %v25242_v18, %v963_v27  ;;  %v965_v32 = vpop.f32.mrb[35].mxu0  ;;  %vm1135_vm1 = vcmp.gt.f32.partialorder %v961_v25, 0.0 }
 0x165   : > { %v1896_v43 = vrot.slane %v1894_v33, 1  ;;  %v22411_v33 = vld [vmem:[%s32075_s3 + $0x20] sm:$0xff]  }
 0x166   : > { %vm1136_vm2 = vcmp.gt.f32.partialorder %v964_v31, 0.0  ;;  %v1192_v36 = vmul.f32 0.01, %v964_v31  ;;  %v1247_v37 = vsel %vm1135_vm1, %v961_v25, %v1191_v28 }
 0x167   : > { %v1897_v2 = vor.u32 %v1896_v43, %v1892_v51 }
 0x168   : > { %v1248_v38 = vsel %vm1136_vm2, %v964_v31, %v1192_v36 }
 0x169   : > { %v25329_v40 = vpack.c.bf16 %v1248_v38, %v1247_v37  ;;  %v968_v42 = vpop.f32.mrb[36].mxu0 }
 0x16a   : > { %v969_v44 = vadd.f32 %v25242_v18, %v968_v42  ;;  %v970_v45 = vpop.f32.mrb[37].mxu0 }
 0x16b   : > { %v971_v49 = vpop.f32.mrb[38].mxu0  ;;  %21156 = vmatmul.mubr.bf16.vlgmr.msra.gmra.mrb[0].mxu1 %v25329_v40  ;;  %v1899_v52 = vshll.u32 %v25329_v40, 16  ;;  %v1903_v0 = vshrl.u32 %v25329_v40, 16  ;;  %v32087_v22 = vrot.slane %v25329_v40, 5 }
 0x16c   : > { %v1193_v53 = vmul.f32 0.01, %v969_v44  ;;  %v972_v57 = vadd.f32 %v25242_v18, %v971_v49  ;;  %v973_v59 = vpop.f32.mrb[39].mxu0  ;;  %21168 = vmatpush3.bf16.msra.mxu1 %v24989_v60  ;;  %vm1137_vm4 = vcmp.gt.f32.partialorder %v969_v44, 0.0 }
 0x16d   : > { %21169 = vmatprep.subr.bf16.mxu1 %v22408_v39  ;;  %v1901_v4 = vrot.slane %v1899_v52, 1  ;;  %v3458_v11 = vrot.slane %v1903_v0, 5  ;;  %v3459_v13 = vrot.slane %v1899_v52, 6 }
 0x16e   : > { %vm1138_vm5 = vcmp.gt.f32.partialorder %v972_v57, 0.0  ;;  %v1194_v5 = vmul.f32 0.01, %v972_v57  ;;  %v1249_v7 = vsel %vm1137_vm4, %v969_v44, %v1193_v53 }
 0x16f   : > { %v25343_v6 = vsel %vm1668_vm3, %v1897_v2, %v1901_v4  ;;  %v25350_v23 = vor.u32 %v3459_v13, %v3458_v11  ;;  %v1905_v36 = vor.u32 %v1903_v0, %v1901_v4  ;;  %v22413_v13 = vld [vmem:[%s32075_s3 + $0x30] sm:$0xff]  }
 0x170   : > { %v1250_v9 = vsel %vm1138_vm5, %v972_v57, %v1194_v5  ;;  %21170 = vmatpush3.bf16.msra.mxu1 %v22408_v39  ;;  %v22412_v57 = vld [vmem:[%s32075_s3 + $0x28] sm:$0xff]  }
 0x171   : > { %v1296_v14 = vpack.c.bf16 %v1250_v9, %v1249_v7  ;;  %v976_v15 = vpop.f32.mrb[40].mxu0  ;;  %21171 = vmatprep.subr.bf16.mxu1 %v22409_v61 }
 0x172   : > { %v977_v20 = vadd.f32 %v25242_v18, %v976_v15  ;;  %v978_v21 = vpop.f32.mrb[41].mxu0 }
 0x173   : > { %v979_v24 = vpop.f32.mrb[42].mxu0  ;;  %21159 = vmatprep.mubr.bf16.mxu1 %v1296_v14  ;;  %v1907_v25 = vshll.u32 %v1296_v14, 16  ;;  %v1911_v26 = vshrl.u32 %v1296_v14, 16  ;;  %v3074_v27 = vrot.slane %v1296_v14, 5 }
 0x174   : > { %vm1139_vm7 = vcmp.gt.f32.partialorder %v977_v20, 0.0  ;;  %v1195_v28 = vmul.f32 0.01, %v977_v20  ;;  %v980_v31 = vadd.f32 %v25242_v18, %v979_v24  ;;  %v981_v32 = vpop.f32.mrb[43].mxu0  ;;  %21172 = vmatpush3.bf16.msra.mxu1 %v22409_v61 }
 0x175   : > { %21173 = vmatprep.subr.bf16.mxu1 %v22410_v19  ;;  %v1909_v37 = vrot.slane %v1907_v25, 1  ;;  %v3462_v38 = vrot.slane %v1911_v26, 5  ;;  %v25359_v39 = vsel %vm2885_vm6, %v32087_v22, %v3074_v27  ;;  %v3463_v42 = vrot.slane %v1907_v25, 6  ;;  %v22424_v22 = vld [vmem:[%s32075_s3 + $0xc8] sm:$0xff]  }
 0x176   : > { %vm1140_vm9 = vcmp.gt.f32.partialorder %v980_v31, 0.0  ;;  %v1196_v43 = vmul.f32 0.01, %v980_v31  ;;  %v1251_v49 = vsel %vm1139_vm7, %v977_v20, %v1195_v28 }
 0x177   : > { %v25362_v44 = vsel %vm1668_vm3, %v1905_v36, %v1909_v37  ;;  %v3464_v45 = vor.u32 %v3463_v42, %v3462_v38  ;;  %v1913_v14 = vor.u32 %v1911_v26, %v1909_v37  ;;  %v22414_v26 = vld [vmem:[%s32075_s3 + $0x38] sm:$0xff]  }
 0x178   : > { %v1252_v51 = vsel %vm1140_vm9, %v980_v31, %v1196_v43  ;;  %21174 = vmatpush3.bf16.msra.mxu1 %v22410_v19 }
 0x179   : > { %v1297_v52 = vpack.c.bf16 %v1252_v51, %v1251_v49  ;;  %v984_v53 = vpop.f32.mrb[44].mxu0  ;;  %21175 = vmatprep.subr.bf16.mxu1 %v22411_v33  ;;  %v25370_v59 = vsel %vm3248_vm8, %v25350_v23, %v3464_v45 }
 0x17a   : > { %v985_v60 = vadd.f32 %v25242_v18, %v984_v53  ;;  %v986_v61 = vpop.f32.mrb[45].mxu0  ;;  %v25394_v53 = vld [vmem:[%s32074_s2] ss:$0 sm:$0xff] }
 0x17b   : > { %v987_v0 = vpop.f32.mrb[46].mxu0  ;;  %21160 = vmatmul.mubr.bf16.gmra.mrb[4].mxu1 %v1297_v52  ;;  %v1915_v2 = vshll.u32 %v1297_v52, 16  ;;  %v1919_v4 = vshrl.u32 %v1297_v52, 16  ;;  %v3076_v5 = vrot.slane %v1297_v52, 5 }
 0x17c   : > { %vm1141_vm10 = vcmp.gt.f32.partialorder %v985_v60, 0.0  ;;  %v1197_v7 = vmul.f32 0.01, %v985_v60  ;;  %v988_v9 = vadd.f32 %v25242_v18, %v987_v0  ;;  %v989_v11 = vpop.f32.mrb[47].mxu0  ;;  %21176 = vmatpush3.bf16.msra.mxu1 %v22411_v33 }
 0x17d   : > { %21177 = vmatprep.subr.bf16.mxu1 %v22412_v57  ;;  %v1917_v15 = vrot.slane %v1915_v2, 1  ;;  %v25378_v19 = vsel %vm2885_vm6, %v3074_v27, %v3076_v5  ;;  %v3466_v20 = vrot.slane %v1919_v4, 5  ;;  %v3467_v21 = vrot.slane %v1915_v2, 6 }
 0x17e   : > { %vm1142_vm11 = vcmp.gt.f32.partialorder %v988_v9, 0.0  ;;  %v1198_v24 = vmul.f32 0.01, %v988_v9  ;;  %v1253_v31 = vsel %vm1141_vm10, %v985_v60, %v1197_v7 }
 0x17f   : > { %v25381_v25 = vsel %vm1668_vm3, %v1913_v14, %v1917_v15  ;;  %v3468_v28 = vor.u32 %v3467_v21, %v3466_v20 }
 0x180   : > { %v1254_v32 = vsel %vm1142_vm11, %v988_v9, %v1198_v24  ;;  %21178 = vmatpush3.bf16.msra.mxu1 %v22412_v57 }
 0x181   : > { %v1298_v33 = vpack.c.bf16 %v1254_v32, %v1253_v31  ;;  %v992_v36 = vpop.f32.mrb[48].mxu0  ;;  %21179 = vmatprep.subr.bf16.mxu1 %v22413_v13  ;;  %v25388_v27 = vsel %vm3248_vm8, %v3464_v45, %v3468_v28  ;;  %v1921_v45 = vor.u32 %v1919_v4, %v1917_v15 }
 0x182   : > { %v993_v37 = vadd.f32 %v25242_v18, %v992_v36  ;;  %v994_v38 = vpop.f32.mrb[49].mxu0  ;;  %v22415_v18 = vld [vmem:[%s32075_s3 + $0x80] sm:$0xff]  }
 0x183   : > { %v995_v42 = vpop.f32.mrb[50].mxu0  ;;  %21163 = vmatprep.mubr.bf16.mxu1 %v1298_v33  ;;  %v1923_v43 = vshll.u32 %v1298_v33, 16  ;;  %v1927_v49 = vshrl.u32 %v1298_v33, 16  ;;  %v3078_v51 = vrot.slane %v1298_v33, 5  ;;  %v25418_v38 = vld [vmem:[#allocation2] sm:$0xff] }
 0x184   : > { %vm1143_vm12 = vcmp.gt.f32.partialorder %v993_v37, 0.0  ;;  %v1199_v52 = vmul.f32 0.01, %v993_v37  ;;  %v996_v57 = vadd.f32 %v25394_v53, %v995_v42  ;;  %v997_v60 = vpop.f32.mrb[51].mxu0  ;;  %21180 = vmatpush3.bf16.msra.mxu1 %v22413_v13 }
 0x185   : > { %21181 = vmatprep.subr.bf16.mxu1 %v22414_v26  ;;  %v1925_v61 = vrot.slane %v1923_v43, 1  ;;  %v25401_v0 = vsel %vm2885_vm6, %v3076_v5, %v3078_v51  ;;  %v3470_v2 = vrot.slane %v1927_v49, 5  ;;  %v3471_v7 = vrot.slane %v1923_v43, 6 }
 0x186   : > { %vm1144_vm13 = vcmp.gt.f32.partialorder %v996_v57, 0.0  ;;  %v1200_v9 = vmul.f32 0.01, %v996_v57  ;;  %v1255_v13 = vsel %vm1143_vm12, %v993_v37, %v1199_v52 }
 0x187   : > { %v25404_v11 = vsel %vm1668_vm3, %v1921_v45, %v1925_v61  ;;  %v3472_v14 = vor.u32 %v3471_v7, %v3470_v2  ;;  %v1929_v42 = vor.u32 %v1927_v49, %v1925_v61 }
 0x188   : > { %v1256_v20 = vsel %vm1144_vm13, %v996_v57, %v1200_v9  ;;  %21182 = vmatpush3.bf16.msra.mxu1 %v22414_v26 }
 0x189   : > { %v25407_v21 = vpack.c.bf16 %v1256_v20, %v1255_v13  ;;  %v1000_v4 = vpop.f32.mrb[52].mxu0  ;;  %21195 = vmatprep.subr.bf16.mxu1 %v22415_v18  ;;  %v25410_v15 = vsel %vm3248_vm8, %v3468_v28, %v3472_v14 }
 0x18a   : > { %v1001_v5 = vadd.f32 %v25394_v53, %v1000_v4  ;;  %v1002_v24 = vpop.f32.mrb[53].mxu0 }
 0x18b   : > { %v1003_v31 = vpop.f32.mrb[54].mxu0  ;;  %21164 = vmatmul.mubr.bf16.gmra.mrb[8].mxu1 %v25407_v21  ;;  %v1931_v32 = vshll.u32 %v25407_v21, 16  ;;  %v1935_v33 = vshrl.u32 %v25407_v21, 16  ;;  %v32086_v36 = vrot.slane %v25407_v21, 5  ;;  %v24992_v24 = vld [vmem:[#allocation2 + $0x10] sm:$0xff] }
 0x18c   : > { %vm1145_vm14 = vcmp.gt.f32.partialorder %v1001_v5, 0.0  ;;  %v1201_v26 = vmul.f32 0.01, %v1001_v5  ;;  %v1004_v37 = vadd.f32 %v25394_v53, %v1003_v31  ;;  %21183 = vmatprep.mubr.bf16.mxu1 %v25418_v38  ;;  %v1005_v28 = vpop.f32.mrb[55].mxu0 }
 0x18d   : > { %v25421_v43 = vrot.slane %v1931_v32, 1  ;;  %v25426_v52 = vsel %vm2885_vm6, %v3078_v51, %v32086_v36  ;;  %v3474_v57 = vrot.slane %v1935_v33, 5  ;;  %v3475_v60 = vrot.slane %v1931_v32, 6  ;;  %v22416_v51 = vld [vmem:[%s32075_s3 + $0x88] sm:$0xff]   ;;  %v22417_v32 = vld [vmem:[%s32075_s3 + $0x90] sm:$0xff]  }
 0x18e   : > { %v1257_v45 = vsel %vm1145_vm14, %v1001_v5, %v1201_v26  ;;  %vm1146_vm15 = vcmp.gt.f32.partialorder %v1004_v37, 0.0  ;;  %v1202_v2 = vmul.f32 0.01, %v1004_v37 }
 0x18f   : > { %v25432_v7 = vsel %vm1668_vm3, %v1929_v42, %v25421_v43  ;;  %v25434_v9 = vor.u32 %v3475_v60, %v3474_v57  ;;  %v1672_v60 = vshll.u32 %v25418_v38, 16 }
 0x190   : > { %v1258_v49 = vsel %vm1146_vm15, %v1004_v37, %v1202_v2 }
 0x191   : > { %v1300_v61 = vpack.c.bf16 %v1258_v49, %v1257_v45  ;;  %v1008_v13 = vpop.f32.mrb[56].mxu0  ;;  %v25441_v20 = vsel %vm3248_vm8, %v3472_v14, %v25434_v9 }
 0x192   : > { %v1009_v4 = vadd.f32 %v25394_v53, %v1008_v13  ;;  %v1010_v5 = vpop.f32.mrb[57].mxu0 }
 0x193   : > { %1328 = vst [vmem:[#allocation2 + $0x68] sm:$0xff] %v1300_v61  ;;  %21184 = vmatmul.mubr.bf16.vlgmr.msra.gmra.mrb[0].mxu1 %v24992_v24  ;;  %v1011_v31 = vpop.f32.mrb[58].mxu0  ;;  %v22419_v24 = vld [vmem:[%s32075_s3 + $0xa0] sm:$0xff]  }
 0x194   : > { %21196 = vmatpush3.bf16.msra.mxu1 %v22415_v18  ;;  %21187 = vmatprep.mubr.bf16.mxu1 %v25260_v56  ;;  %vm1147_vm0 = vcmp.gt.f32.partialorder %v1009_v4, 0.0  ;;  %v1203_v26 = vmul.f32 0.01, %v1009_v4  ;;  %v1012_v37 = vadd.f32 %v25394_v53, %v1011_v31  ;;  %v1013_v14 = vpop.f32.mrb[59].mxu0  ;;  %v22418_v18 = vld [vmem:[%s32075_s3 + $0x98] sm:$0xff]   ;;  %v1674_v31 = vrot.slane %v1672_v60, 1 }
 0x195   : > { %21197 = vmatprep.subr.bf16.mxu1 %v22416_v51  ;;  %v1670_v14 = vshrl.u32 %v25418_v38, 16 }
 0x196   : > { %v1259_v28 = vsel %vm1147_vm0, %v1009_v4, %v1203_v26  ;;  %vm1148_vm1 = vcmp.gt.f32.partialorder %v1012_v37, 0.0  ;;  %v1204_v42 = vmul.f32 0.01, %v1012_v37 }
 0x198   : > { %21198 = vmatpush3.bf16.msra.mxu1 %v22416_v51  ;;  %v1260_v57 = vsel %vm1148_vm1, %v1012_v37, %v1204_v42  ;;  %v1675_v42 = vor.u32 %v1674_v31, %v1670_v14 }
 0x199   : > { %21199 = vmatprep.subr.bf16.mxu1 %v22417_v32  ;;  %v25453_v45 = vpack.c.bf16 %v1260_v57, %v1259_v28  ;;  %v1016_v2 = vpop.f32.mrb[60].mxu0  ;;  %v22420_v57 = vld [vmem:[%s32075_s3 + $0xa8] sm:$0xff]  }
 0x19a   : > { %v1017_v49 = vadd.f32 %v25394_v53, %v1016_v2  ;;  %v1018_v61 = vpop.f32.mrb[61].mxu0 }
 0x19b   : > { %21188 = vmatmul.mubr.bf16.gmra.mrb[4].mxu1 %v25273_v10  ;;  %1329 = vst [vmem:[#allocation3] sm:$0xff] %v25453_v45  ;;  %v1019_v13 = vpop.f32.mrb[62].mxu0 }
 0x19c   : > { %21200 = vmatpush3.bf16.msra.mxu1 %v22417_v32  ;;  %21191 = vmatprep.mubr.bf16.mxu1 %v25288_v29  ;;  %vm1149_vm2 = vcmp.gt.f32.partialorder %v1017_v49, 0.0  ;;  %v1205_v51 = vmul.f32 0.01, %v1017_v49  ;;  %v1020_v4 = vadd.f32 %v25394_v53, %v1019_v13  ;;  %v1021_v5 = vpop.f32.mrb[63].mxu0  ;;  %v1679_v32 = vrot.slane %v1677_v46, 1 }
 0x19d   : > { %21201 = vmatprep.subr.bf16.mxu1 %v22418_v18 }
 0x19e   : > { %v1261_v26 = vsel %vm1149_vm2, %v1017_v49, %v1205_v51  ;;  %vm1150_vm4 = vcmp.gt.f32.partialorder %v1020_v4, 0.0  ;;  %v1206_v37 = vmul.f32 0.01, %v1020_v4  ;;  %v1680_v38 = vsel %vm1668_vm3, %v1675_v42, %v1679_v32 }
 0x1a0   : > { %21202 = vmatpush3.bf16.msra.mxu1 %v22418_v18  ;;  %v1262_v28 = vsel %vm1150_vm4, %v1020_v4, %v1206_v37  ;;  %v22421_v18 = vld [vmem:[%s32075_s3 + $0xb0] sm:$0xff]  }
 0x1a1   : > { %21203 = vmatprep.subr.bf16.mxu1 %v22419_v24  ;;  %v25469_v2 = vpack.c.bf16 %v1262_v28, %v1261_v26  ;;  %v1024_v61 = vpop.f32.mrb[64].mxu0 }
 0x1a2   : > { %v1025_v60 = vadd.f32 %v25394_v53, %v1024_v61  ;;  %v1026_v49 = vpop.f32.mrb[65].mxu0 }
 0x1a3   : > { %21192 = vmatmul.mubr.bf16.gmra.mrb[8].mxu1 %v25302_v48  ;;  %1330 = vst [vmem:[#allocation3 + $0x10] sm:$0xff] %v25469_v2  ;;  %v1027_v46 = vpop.f32.mrb[66].mxu0  ;;  %v32096_v5 = vshrl.u32 %v25469_v2, 16  ;;  %v32098_v31 = vshll.u32 %v25469_v2, 16 }
 0x1a4   : > { %21204 = vmatpush3.bf16.msra.mxu1 %v22419_v24  ;;  %21211 = vmatprep.mubr.bf16.mxu1 %v1680_v38  ;;  %vm1151_vm5 = vcmp.gt.f32.partialorder %v1025_v60, 0.0  ;;  %v1207_v13 = vmul.f32 0.01, %v1025_v60  ;;  %v1028_v51 = vadd.f32 %v25394_v53, %v1027_v46  ;;  %v1029_v4 = vpop.f32.mrb[67].mxu0  ;;  %v22422_v24 = vld [vmem:[%s32075_s3 + $0xb8] sm:$0xff]  }
 0x1a5   : > { %21205 = vmatprep.subr.bf16.mxu1 %v22420_v57  ;;  %v4029_v28 = vrot.slane %v32096_v5, 5  ;;  %v4030_v42 = vrot.slane %v32098_v31, 6  ;;  %v22423_v4 = vld [vmem:[%s32075_s3 + $0xc0] sm:$0xff]  }
 0x1a6   : > { %v1263_v26 = vsel %vm1151_vm5, %v1025_v60, %v1207_v13  ;;  %vm1152_vm7 = vcmp.gt.f32.partialorder %v1028_v51, 0.0  ;;  %v1208_v37 = vmul.f32 0.01, %v1028_v51 }
 0x1a7   : > { %v25491_v46 = vor.u32 %v4030_v42, %v4029_v28  ;;  %v1687_v28 = vrot.slane %v1685_v62, 1 }
 0x1a8   : > { %21206 = vmatpush3.bf16.msra.mxu1 %v22420_v57  ;;  %v1264_v14 = vsel %vm1152_vm7, %v1028_v51, %v1208_v37 }
 0x1a9   : > { %21207 = vmatprep.subr.bf16.mxu1 %v22421_v18  ;;  %v25488_v61 = vpack.c.bf16 %v1264_v14, %v1263_v26  ;;  %v1032_v49 = vpop.f32.mrb[68].mxu0  ;;  %v1691_v62 = vor.u32 %v1689_v63, %v1687_v28 }
 0x1aa   : > { %v1033_v60 = vadd.f32 %v25394_v53, %v1032_v49  ;;  %v1034_v38 = vpop.f32.mrb[69].mxu0 }
 0x1ab   : > { %1331 = vst [vmem:[#allocation3 + $0x20] sm:$0xff] %v25488_v61  ;;  %v1035_v57 = vpop.f32.mrb[70].mxu0  ;;  %v32097_v13 = vshll.u32 %v25488_v61, 16  ;;  %v32095_v51 = vshrl.u32 %v25488_v61, 16  ;;  %v1696_v56 = vsel %vm1668_vm3, %v1691_v62, %v1695_v1 }
 0x1ac   : > { %21208 = vmatpush3.bf16.msra.mxu1 %v22421_v18  ;;  %vm1153_vm9 = vcmp.gt.f32.partialorder %v1033_v60, 0.0  ;;  %v1209_v26 = vmul.f32 0.01, %v1033_v60  ;;  %v1036_v37 = vadd.f32 %v25394_v53, %v1035_v57  ;;  %v1037_v14 = vpop.f32.mrb[71].mxu0  ;;  %v1683_v57 = vor.u32 %v1681_v47, %v1679_v32 }
 0x1ad   : > { %21209 = vmatprep.subr.bf16.mxu1 %v22422_v24  ;;  %v4033_v42 = vrot.slane %v32095_v51, 5  ;;  %v4034_v49 = vrot.slane %v32097_v13, 6 }
 0x1ae   : > { %v1265_v18 = vsel %vm1153_vm9, %v1033_v60, %v1209_v26  ;;  %vm1154_vm10 = vcmp.gt.f32.partialorder %v1036_v37, 0.0  ;;  %v1210_v38 = vmul.f32 0.01, %v1036_v37  ;;  %v1688_v41 = vsel %vm1668_vm3, %v1683_v57, %v1687_v28  ;;  %v1651_v28 = vld [vmem:[#allocation2 + $0x60] sm:$0x1] }
 0x1af   : > { %v4035_v36 = vor.u32 %v4034_v49, %v4033_v42  ;;  %v22425_v42 = vld [vmem:[%s32075_s3 + $0xd0] sm:$0xff]   ;;  %v1703_v57 = vrot.slane %v1701_v34, 1 }
 0x1b0   : > { %21210 = vmatpush3.bf16.msra.mxu1 %v22422_v24  ;;  %v1266_v14 = vsel %vm1154_vm10, %v1036_v37, %v1210_v38 }
 0x1b1   : > { %21223 = vmatprep.subr.bf16.mxu1 %v22423_v4  ;;  %v25515_v60 = vpack.c.bf16 %v1266_v14, %v1265_v18  ;;  %v1040_v26 = vpop.f32.mrb[72].mxu0  ;;  %v25519_v16 = vsel %vm3248_vm8, %v25491_v46, %v4035_v36  ;;  %v1707_v34 = vor.u32 %v1705_v35, %v1703_v57 }
 0x1b2   : > { %v1041_v47 = vadd.f32 %v25394_v53, %v1040_v26  ;;  %v1042_v32 = vpop.f32.mrb[73].mxu0 }
 0x1b3   : > { %21212 = vmatmul.mubr.bf16.vlgmr.msra.gmra.mrb[0].mxu1 %v1688_v41  ;;  %1332 = vst [vmem:[#allocation3 + $0x30] sm:$0xff] %v25515_v60  ;;  %v1043_v63 = vpop.f32.mrb[74].mxu0  ;;  %v32094_v24 = vshll.u32 %v25515_v60, 16  ;;  %v32088_v37 = vshrl.u32 %v25515_v60, 16  ;;  %v1711_v41 = vrot.slane %v1709_v54, 1 }
 0x1b4   : > { %21215 = vmatprep.mubr.bf16.mxu1 %v1696_v56  ;;  %21224 = vmatpush3.bf16.msra.mxu1 %v22423_v4  ;;  %vm1155_vm11 = vcmp.gt.f32.partialorder %v1041_v47, 0.0  ;;  %v1211_v49 = vmul.f32 0.01, %v1041_v47  ;;  %v1044_v18 = vadd.f32 %v25394_v53, %v1043_v63  ;;  %v1045_v38 = vpop.f32.mrb[75].mxu0  ;;  %v1699_v56 = vor.u32 %v1697_v17, %v1695_v1 }
 0x1b5   : > { %21225 = vmatprep.subr.bf16.mxu1 %v22424_v22  ;;  %v4037_v14 = vrot.slane %v32088_v37, 5  ;;  %v4038_v4 = vrot.slane %v32094_v24, 6  ;;  %v22426_v38 = vld [vmem:[%s32075_s3 + $0xd8] sm:$0xff]   ;;  %v1712_v17 = vsel %vm1668_vm3, %v1707_v34, %v1711_v41 }
 0x1b6   : > { %v1267_v62 = vsel %vm1155_vm11, %v1041_v47, %v1211_v49  ;;  %vm1156_vm12 = vcmp.gt.f32.partialorder %v1044_v18, 0.0  ;;  %v1212_v26 = vmul.f32 0.01, %v1044_v18  ;;  %v1717_v47 = vshll.u32 %v1651_v28, 16 }
 0x1b7   : > { %v4039_v32 = vor.u32 %v4038_v4, %v4037_v14 }
 0x1b8   : > { %21226 = vmatpush3.bf16.msra.mxu1 %v22424_v22  ;;  %v1268_v63 = vsel %vm1156_vm12, %v1044_v18, %v1212_v26  ;;  %v1704_v22 = vsel %vm1668_vm3, %v1699_v56, %v1703_v57  ;;  %v1719_v14 = vrot.slane %v1717_v47, 1  ;;  %v22428_v47 = vld [vmem:[%s32075_s3 + $0xe8] sm:$0xff]  }
 0x1b9   : > { %21227 = vmatprep.subr.bf16.mxu1 %v22425_v42  ;;  %v25546_v49 = vpack.c.bf16 %v1268_v63, %v1267_v62  ;;  %v1048_v37 = vpop.f32.mrb[76].mxu0  ;;  %v25549_v54 = vsel %vm3248_vm8, %v4035_v36, %v4039_v32  ;;  %v22427_v36 = vld [vmem:[%s32075_s3 + $0xe0] sm:$0xff]   ;;  %v1715_v63 = vor.u32 %v1713_v55, %v1711_v41 }
 0x1ba   : > { %v1049_v1 = vadd.f32 %v25394_v53, %v1048_v37  ;;  %v1050_v10 = vpop.f32.mrb[77].mxu0 }
 0x1bb   : > { %21216 = vmatmul.mubr.bf16.gmra.mrb[4].mxu1 %v1704_v22  ;;  %1333 = vst [vmem:[#allocation3 + $0x40] sm:$0xff] %v25546_v49  ;;  %v1051_v29 = vpop.f32.mrb[78].mxu0  ;;  %v32093_v35 = vshll.u32 %v25546_v49, 16  ;;  %v32092_v28 = vshrl.u32 %v25546_v49, 16 }
 0x1bc   : > { %21219 = vmatprep.mubr.bf16.mxu1 %v1712_v17  ;;  %21228 = vmatpush3.bf16.msra.mxu1 %v22425_v42  ;;  %vm1157_vm13 = vcmp.gt.f32.partialorder %v1049_v1, 0.0  ;;  %v1213_v18 = vmul.f32 0.01, %v1049_v1  ;;  %v1052_v37 = vadd.f32 %v25394_v53, %v1051_v29  ;;  %v1053_v57 = vpop.f32.mrb[79].mxu0 }
 0x1bd   : > { %21229 = vmatprep.subr.bf16.mxu1 %v22426_v38  ;;  %v4041_v4 = vrot.slane %v32092_v28, 5  ;;  %v4042_v62 = vrot.slane %v32093_v35, 6 }
 0x1be   : > { %v1269_v26 = vsel %vm1157_vm13, %v1049_v1, %v1213_v18  ;;  %vm1158_vm14 = vcmp.gt.f32.partialorder %v1052_v37, 0.0  ;;  %v1214_v42 = vmul.f32 0.01, %v1052_v37  ;;  %v1720_v1 = vsel %vm1668_vm3, %v1715_v63, %v1719_v14 }
 0x1bf   : > { %v4043_v56 = vor.u32 %v4042_v62, %v4041_v4 }
 0x1c0   : > { %21230 = vmatpush3.bf16.msra.mxu1 %v22426_v38  ;;  %v1270_v34 = vsel %vm1158_vm14, %v1052_v37, %v1214_v42 }
 0x1c1   : > { %21231 = vmatprep.subr.bf16.mxu1 %v22427_v36  ;;  %v25570_v22 = vpack.c.bf16 %v1270_v34, %v1269_v26  ;;  %v1056_v10 = vpop.f32.mrb[80].mxu0  ;;  %v25573_v17 = vsel %vm3248_vm8, %v4039_v32, %v4043_v56  ;;  %v22429_v32 = vld [vmem:[%s32075_s3 + $0xf0] sm:$0xff]   ;;  %v22430_v26 = vld [vmem:[%s32075_s3 + $0xf8] sm:$0xff]  }
 0x1c2   : > { %v1057_v29 = vadd.f32 %v25394_v53, %v1056_v10  ;;  %v1058_v38 = vpop.f32.mrb[81].mxu0 }
 0x1c3   : > { %21220 = vmatmul.mubr.bf16.gmra.mrb[8].mxu1 %v1720_v1  ;;  %1334 = vst [vmem:[#allocation3 + $0x50] sm:$0xff] %v25570_v22  ;;  %v1059_v48 = vpop.f32.mrb[82].mxu0  ;;  %v32090_v55 = vshll.u32 %v25570_v22, 16  ;;  %v32089_v41 = vshrl.u32 %v25570_v22, 16 }
 0x1c4   : > { %21232 = vmatpush3.bf16.msra.mxu1 %v22427_v36  ;;  %21239 = vmatprep.mubr.bf16.mxu1 %v25343_v6  ;;  %vm1159_vm15 = vcmp.gt.f32.partialorder %v1057_v29, 0.0  ;;  %v1215_v18 = vmul.f32 0.01, %v1057_v29  ;;  %v1060_v37 = vadd.f32 %v25394_v53, %v1059_v48  ;;  %v1061_v57 = vpop.f32.mrb[83].mxu0 }
 0x1c5   : > { %21233 = vmatprep.subr.bf16.mxu1 %v22428_v47  ;;  %v4045_v14 = vrot.slane %v32089_v41, 5  ;;  %v4046_v4 = vrot.slane %v32090_v55, 6 }
 0x1c6   : > { %v1271_v62 = vsel %vm1159_vm15, %v1057_v29, %v1215_v18  ;;  %vm1160_vm0 = vcmp.gt.f32.partialorder %v1060_v37, 0.0  ;;  %v1216_v36 = vmul.f32 0.01, %v1060_v37 }
 0x1c7   : > { %v25589_v6 = vor.u32 %v4046_v4, %v4045_v14 }
 0x1c8   : > { %21234 = vmatpush3.bf16.msra.mxu1 %v22428_v47  ;;  %v1272_v42 = vsel %vm1160_vm0, %v1060_v37, %v1216_v36  ;;  %v22431_v47 = vld [vmem:[%s32075_s3 + $0x100] sm:$0xff]  }
 0x1c9   : > { %21235 = vmatprep.subr.bf16.mxu1 %v22429_v32  ;;  %v1307_v63 = vpack.c.bf16 %v1272_v42, %v1271_v62  ;;  %v1064_v34 = vpop.f32.mrb[84].mxu0  ;;  %v25596_v10 = vsel %vm3248_vm8, %v4043_v56, %v25589_v6 }
 0x1ca   : > { %v1065_v1 = vadd.f32 %v25394_v53, %v1064_v34  ;;  %v1066_v29 = vpop.f32.mrb[85].mxu0 }
 0x1cb   : > { %1335 = vst [vmem:[#allocation3 + $0x60] sm:$0xff] %v1307_v63  ;;  %v1067_v38 = vpop.f32.mrb[86].mxu0 }
 0x1cc   : > { %21236 = vmatpush3.bf16.msra.mxu1 %v22429_v32  ;;  %vm1161_vm1 = vcmp.gt.f32.partialorder %v1065_v1, 0.0  ;;  %v1217_v48 = vmul.f32 0.01, %v1065_v1  ;;  %v1068_v18 = vadd.f32 %v25394_v53, %v1067_v38  ;;  %v1069_v37 = vpop.f32.mrb[87].mxu0  ;;  %v22432_v32 = vld [vmem:[%s32075_s3 + $0x108] sm:$0xff]  }
 0x1cd   : > { %21237 = vmatprep.subr.bf16.mxu1 %v22430_v26 }
 0x1ce   : > { %v1273_v57 = vsel %vm1161_vm1, %v1065_v1, %v1217_v48  ;;  %vm1162_vm2 = vcmp.gt.f32.partialorder %v1068_v18, 0.0  ;;  %v1218_v56 = vmul.f32 0.01, %v1068_v18  ;;  %v1874_v48 = vld [vmem:[#allocation2 + $0x68] sm:$0x1] }
 0x1d0   : > { %21238 = vmatpush3.bf16.msra.mxu1 %v22430_v26  ;;  %v1274_v14 = vsel %vm1162_vm2, %v1068_v18, %v1218_v56  ;;  %v22433_v26 = vld [vmem:[%s32075_s3 + $0x110] sm:$0xff]   ;;  %v1939_v56 = vshll.u32 %v1874_v48, 16  ;;  %vm25015_vm2 = vmmov 0  }
 0x1d1   : > { %21251 = vmatprep.subr.bf16.mxu1 %v22431_v47  ;;  %v25606_v4 = vpack.c.bf16 %v1274_v14, %v1273_v57  ;;  %v1072_v62 = vpop.f32.mrb[88].mxu0 }
 0x1d2   : > { %v1073_v36 = vadd.f32 %v25394_v53, %v1072_v62  ;;  %v1074_v42 = vpop.f32.mrb[89].mxu0 }
 0x1d3   : > { %21240 = vmatmul.mubr.bf16.vlgmr.msra.gmra.mrb[0].mxu1 %v25362_v44  ;;  %1336 = vst [vmem:[#allocation3 + $0x8] sm:$0xff] %v25606_v4  ;;  %v1075_v63 = vpop.f32.mrb[90].mxu0  ;;  %v2664_v34 = vshll.u32 %v25606_v4, 16  ;;  %v2662_v37 = vshrl.u32 %v25606_v4, 16 }
 0x1d4   : > { %21243 = vmatprep.mubr.bf16.mxu1 %v25381_v25  ;;  %21252 = vmatpush3.bf16.msra.mxu1 %v22431_v47  ;;  %vm1163_vm4 = vcmp.gt.f32.partialorder %v1073_v36, 0.0  ;;  %v1219_v1 = vmul.f32 0.01, %v1073_v36  ;;  %v1076_v29 = vadd.f32 %v25394_v53, %v1075_v63  ;;  %v1077_v38 = vpop.f32.mrb[91].mxu0  ;;  %v22434_v47 = vld [vmem:[%s32075_s3 + $0x118] sm:$0xff]  }
 0x1d5   : > { %21253 = vmatprep.subr.bf16.mxu1 %v22432_v32  ;;  %v2666_v57 = vrot.slane %v2664_v34, 1 }
 0x1d6   : > { %v1275_v44 = vsel %vm1163_vm4, %v1073_v36, %v1219_v1  ;;  %vm1164_vm5 = vcmp.gt.f32.partialorder %v1076_v29, 0.0  ;;  %v1220_v18 = vmul.f32 0.01, %v1076_v29  ;;  %v22435_v36 = vld [vmem:[%s32075_s3 + $0x120] sm:$0xff]  }
 0x1d7   : > { %v2667_v34 = vor.u32 %v2666_v57, %v2662_v37 }
 0x1d8   : > { %21254 = vmatpush3.bf16.msra.mxu1 %v22432_v32  ;;  %v1276_v25 = vsel %vm1164_vm5, %v1076_v29, %v1220_v18 }
 0x1d9   : > { %21255 = vmatprep.subr.bf16.mxu1 %v22433_v26  ;;  %v25621_v14 = vpack.c.bf16 %v1276_v25, %v1275_v44  ;;  %v1080_v62 = vpop.f32.mrb[92].mxu0  ;;  %v1941_v44 = vrot.slane %v1939_v56, 1  ;;  %v22436_v56 = vld [vmem:[%s32075_s3 + $0x128] sm:$0xff]  }
 0x1da   : > { %v1081_v42 = vadd.f32 %v25394_v53, %v1080_v62  ;;  %v1082_v63 = vpop.f32.mrb[93].mxu0  ;;  %v25633_v53 = vld [vmem:[%s32074_s2] ss:$0 sm:$0xff] }
 0x1db   : > { %21244 = vmatmul.mubr.bf16.gmra.mrb[4].mxu1 %v25404_v11  ;;  %v1083_v32 = vpop.f32.mrb[94].mxu0  ;;  %v2669_v1 = vshll.u32 %v25621_v14, 16  ;;  %v2673_v48 = vshrl.u32 %v25621_v14, 16 }
 0x1dc   : > { %21247 = vmatprep.mubr.bf16.mxu1 %v25432_v7  ;;  %21256 = vmatpush3.bf16.msra.mxu1 %v22433_v26  ;;  %vm1165_vm7 = vcmp.gt.f32.partialorder %v1081_v42, 0.0  ;;  %v1221_v29 = vmul.f32 0.01, %v1081_v42  ;;  %v1084_v11 = vadd.f32 %v25633_v53, %v1083_v32  ;;  %v1085_v38 = vpop.f32.mrb[95].mxu0  ;;  %v1937_v26 = vor.u32 %v1935_v33, %v25421_v43 }
 0x1dd   : > { %21257 = vmatprep.subr.bf16.mxu1 %v22434_v47  ;;  %v2671_v18 = vrot.slane %v2669_v1, 1  ;;  %v4230_v62 = vrot.slane %v2673_v48, 5  ;;  %v4231_v63 = vrot.slane %v2669_v1, 6 }
 0x1de   : > { %v1277_v37 = vsel %vm1165_vm7, %v1081_v42, %v1221_v29  ;;  %vm1166_vm9 = vcmp.gt.f32.partialorder %v1084_v11, 0.0  ;;  %v1222_v57 = vmul.f32 0.01, %v1084_v11  ;;  %v32091_v29 = vrot.slane %v25621_v14, 5 }
 0x1df   : > { %v25638_v7 = vsel %vm1668_vm3, %v2667_v34, %v2671_v18  ;;  %v1942_v34 = vsel %vm1668_vm3, %v1937_v26, %v1941_v44  ;;  %v25651_v41 = vor.u32 %v4231_v63, %v4230_v62  ;;  %v2675_v43 = vor.u32 %v2673_v48, %v2671_v18  ;;  %v22437_v44 = vld [vmem:[%s32075_s3 + $0x130] sm:$0xff]  }
 0x1e0   : > { %21258 = vmatpush3.bf16.msra.mxu1 %v22434_v47  ;;  %v1278_v25 = vsel %vm1166_vm9, %v1084_v11, %v1222_v57 }
 0x1e1   : > { %21259 = vmatprep.subr.bf16.mxu1 %v22435_v36  ;;  %v25646_v32 = vpack.c.bf16 %v1278_v25, %v1277_v37  ;;  %v1088_v42 = vpop.f32.mrb[96].mxu0 }
 0x1e2   : > { %v1089_v47 = vadd.f32 %v25633_v53, %v1088_v42  ;;  %v1090_v38 = vpop.f32.mrb[97].mxu0 }
 0x1e3   : > { %21248 = vmatmul.mubr.bf16.gmra.mrb[8].mxu1 %v1942_v34  ;;  %v1091_v33 = vpop.f32.mrb[98].mxu0  ;;  %v2677_v1 = vshll.u32 %v25646_v32, 16  ;;  %v2681_v11 = vshrl.u32 %v25646_v32, 16  ;;  %v3847_v37 = vrot.slane %v25646_v32, 5  ;;  %v22438_v38 = vld [vmem:[%s32075_s3 + $0x138] sm:$0xff]  }
 0x1e4   : > { %21260 = vmatpush3.bf16.msra.mxu1 %v22435_v36  ;;  %21267 = vmatprep.mubr.bf16.mxu1 %v25453_v45  ;;  %vm1167_vm10 = vcmp.gt.f32.partialorder %v1089_v47, 0.0  ;;  %v1223_v57 = vmul.f32 0.01, %v1089_v47  ;;  %v1092_v26 = vadd.f32 %v25633_v53, %v1091_v33  ;;  %v1093_v25 = vpop.f32.mrb[99].mxu0 }
 0x1e5   : > { %21261 = vmatprep.subr.bf16.mxu1 %v22436_v56  ;;  %v2679_v48 = vrot.slane %v2677_v1, 1  ;;  %v4234_v18 = vrot.slane %v2681_v11, 5  ;;  %v25664_v62 = vsel %vm2885_vm6, %v32091_v29, %v3847_v37  ;;  %v4235_v36 = vrot.slane %v2677_v1, 6 }
 0x1e6   : > { %v1279_v63 = vsel %vm1167_vm10, %v1089_v47, %v1223_v57  ;;  %vm1168_vm11 = vcmp.gt.f32.partialorder %v1092_v26, 0.0  ;;  %v1224_v45 = vmul.f32 0.01, %v1092_v26 }
 0x1e7   : > { %v25667_v42 = vsel %vm1668_vm3, %v2675_v43, %v2679_v48  ;;  %v4236_v34 = vor.u32 %v4235_v36, %v4234_v18  ;;  %v2683_v29 = vor.u32 %v2681_v11, %v2679_v48 }
 0x1e8   : > { %21262 = vmatpush3.bf16.msra.mxu1 %v22436_v56  ;;  %v1280_v33 = vsel %vm1168_vm11, %v1092_v26, %v1224_v45  ;;  %v22439_v26 = vld [vmem:[%s32075_s3 + $0x140] sm:$0xff]  }
 0x1e9   : > { %21263 = vmatprep.subr.bf16.mxu1 %v22437_v44  ;;  %v25672_v25 = vpack.c.bf16 %v1280_v33, %v1279_v63  ;;  %v1096_v55 = vpop.f32.mrb[100].mxu0  ;;  %v25676_v1 = vsel %vm3248_vm8, %v25651_v41, %v4236_v34 }
 0x1ea   : > { %32099 = vst [vmem:[#allocation6_spill] sm:$0xff] %v25676_v1  ;;  %v1097_v47 = vadd.f32 %v25633_v53, %v1096_v55  ;;  %v1098_v57 = vpop.f32.mrb[101].mxu0 }
 0x1eb   : > { %v1099_v43 = vpop.f32.mrb[102].mxu0  ;;  %v2685_v56 = vshll.u32 %v25672_v25, 16  ;;  %v2689_v18 = vshrl.u32 %v25672_v25, 16  ;;  %v3849_v36 = vrot.slane %v25672_v25, 5 }
 0x1ec   : > { %21264 = vmatpush3.bf16.msra.mxu1 %v22437_v44  ;;  %vm1169_vm12 = vcmp.gt.f32.partialorder %v1097_v47, 0.0  ;;  %v1225_v63 = vmul.f32 0.01, %v1097_v47  ;;  %v1100_v45 = vadd.f32 %v25633_v53, %v1099_v43  ;;  %v1101_v33 = vpop.f32.mrb[103].mxu0  ;;  %v22440_v43 = vld [vmem:[%s32075_s3 + $0x148] sm:$0xff]  }
 0x1ed   : > { %21265 = vmatprep.subr.bf16.mxu1 %v22438_v38  ;;  %v2687_v55 = vrot.slane %v2685_v56, 1  ;;  %v25687_v11 = vsel %vm2885_vm6, %v3847_v37, %v3849_v36  ;;  %v4238_v48 = vrot.slane %v2689_v18, 5  ;;  %v4239_v57 = vrot.slane %v2685_v56, 6 }
 0x1ee   : > { %v1281_v28 = vsel %vm1169_vm12, %v1097_v47, %v1225_v63  ;;  %vm1170_vm13 = vcmp.gt.f32.partialorder %v1100_v45, 0.0  ;;  %v1226_v35 = vmul.f32 0.01, %v1100_v45 }
 0x1ef   : > { %v25690_v44 = vsel %vm1668_vm3, %v2683_v29, %v2687_v55  ;;  %v4240_v24 = vor.u32 %v4239_v57, %v4238_v48  ;;  %v2691_v63 = vor.u32 %v2689_v18, %v2687_v55 }
 0x1f0   : > { %21266 = vmatpush3.bf16.msra.mxu1 %v22438_v38  ;;  %v1282_v51 = vsel %vm1170_vm13, %v1100_v45, %v1226_v35 }
 0x1f1   : > { %21279 = vmatprep.subr.bf16.mxu1 %v22439_v26  ;;  %v25695_v33 = vpack.c.bf16 %v1282_v51, %v1281_v28  ;;  %v1104_v37 = vpop.f32.mrb[104].mxu0  ;;  %v25698_v5 = vsel %vm3248_vm8, %v4236_v34, %v4240_v24  ;;  %v22441_v51 = vld [vmem:[%s32075_s3 + $0x150] sm:$0xff]  }
 0x1f2   : > { %32100 = vst [vmem:[#allocation7_spill] sm:$0xff] %v25698_v5  ;;  %v1105_v47 = vadd.f32 %v25633_v53, %v1104_v37  ;;  %v1106_v56 = vpop.f32.mrb[105].mxu0 }
 0x1f3   : > { %21268 = vmatmul.mubr.bf16.vlgmr.msra.gmra.mrb[0].mxu1 %v25469_v2  ;;  %v1107_v29 = vpop.f32.mrb[106].mxu0  ;;  %v2693_v35 = vshll.u32 %v25695_v33, 16  ;;  %v2697_v38 = vshrl.u32 %v25695_v33, 16  ;;  %v3851_v45 = vrot.slane %v25695_v33, 5 }
 0x1f4   : > { %21271 = vmatprep.mubr.bf16.mxu1 %v25488_v61  ;;  %21280 = vmatpush3.bf16.msra.mxu1 %v22439_v26  ;;  %vm1171_vm14 = vcmp.gt.f32.partialorder %v1105_v47, 0.0  ;;  %v1227_v28 = vmul.f32 0.01, %v1105_v47  ;;  %v1108_v34 = vadd.f32 %v25633_v53, %v1107_v29  ;;  %v1109_v48 = vpop.f32.mrb[107].mxu0  ;;  %v22442_v29 = vld [vmem:[%s32075_s3 + $0x158] sm:$0xff]  }
 0x1f5   : > { %21281 = vmatprep.subr.bf16.mxu1 %v22440_v43  ;;  %v2695_v18 = vrot.slane %v2693_v35, 1  ;;  %v25711_v55 = vsel %vm2885_vm6, %v3849_v36, %v3851_v45  ;;  %v4242_v57 = vrot.slane %v2697_v38, 5  ;;  %v4243_v37 = vrot.slane %v2693_v35, 6 }
 0x1f6   : > { %v1283_v56 = vsel %vm1171_vm14, %v1105_v47, %v1227_v28  ;;  %vm1172_vm15 = vcmp.gt.f32.partialorder %v1108_v34, 0.0  ;;  %v1228_v13 = vmul.f32 0.01, %v1108_v34  ;;  %vm5684_vm14 = vsmask.f32 5376 }
 0x1f7   : > { %v25714_v26 = vsel %vm1668_vm3, %v2691_v63, %v2695_v18  ;;  %v4244_v31 = vor.u32 %v4243_v37, %v4242_v57  ;;  %v2699_v28 = vor.u32 %v2697_v38, %v2695_v18 }
 0x1f8   : > { %21282 = vmatpush3.bf16.msra.mxu1 %v22440_v43  ;;  %v1284_v5 = vsel %vm1172_vm15, %v1108_v34, %v1228_v13  ;;  %vm4817_vm15 = vcmask 1046528  }
 0x1f9   : > { %21283 = vmatprep.subr.bf16.mxu1 %v22441_v51  ;;  %v25719_v48 = vpack.c.bf16 %v1284_v5, %v1283_v56  ;;  %v1112_v36 = vpop.f32.mrb[108].mxu0  ;;  %v25722_v1 = vsel %vm3248_vm8, %v4240_v24, %v4244_v31  ;;  %v22443_v5 = vld [vmem:[%s32075_s3 + $0x160] sm:$0xff]  }
 0x1fa   : > { %32101 = vst [vmem:[#allocation8_spill] sm:$0xff] %v25722_v1  ;;  %v1113_v47 = vadd.f32 %v25633_v53, %v1112_v36  ;;  %v1114_v35 = vpop.f32.mrb[109].mxu0 }
 0x1fb   : > { %21272 = vmatmul.mubr.bf16.gmra.mrb[4].mxu1 %v25515_v60  ;;  %v1115_v63 = vpop.f32.mrb[110].mxu0  ;;  %v2701_v13 = vshll.u32 %v25719_v48, 16  ;;  %v2705_v43 = vshrl.u32 %v25719_v48, 16  ;;  %v3853_v34 = vrot.slane %v25719_v48, 5 }
 0x1fc   : > { %21275 = vmatprep.mubr.bf16.mxu1 %v25546_v49  ;;  %21284 = vmatpush3.bf16.msra.mxu1 %v22441_v51  ;;  %vm1173_vm0 = vcmp.gt.f32.partialorder %v1113_v47, 0.0  ;;  %v1229_v24 = vmul.f32 0.01, %v1113_v47  ;;  %v1116_v57 = vadd.f32 %v25633_v53, %v1115_v63  ;;  %v1117_v37 = vpop.f32.mrb[111].mxu0 }
 0x1fd   : > { %21285 = vmatprep.subr.bf16.mxu1 %v22442_v29  ;;  %v25734_v38 = vrot.slane %v2701_v13, 1  ;;  %v25739_v18 = vsel %vm2885_vm6, %v3851_v45, %v3853_v34  ;;  %v4246_v51 = vrot.slane %v2705_v43, 5  ;;  %v4247_v56 = vrot.slane %v2701_v13, 6  ;;  %v22444_v45 = vld [vmem:[%s32075_s3 + $0x168] sm:$0xff]  }
 0x1fe   : > { %v1285_v36 = vsel %vm1173_vm0, %v1113_v47, %v1229_v24  ;;  %vm1174_vm1 = vcmp.gt.f32.partialorder %v1116_v57, 0.0  ;;  %v1230_v35 = vmul.f32 0.01, %v1116_v57  ;;  %v22446_v47 = vld [vmem:[%s32075_s3 + $0x178] sm:$0xff]  }
 0x1ff   : > { %v25745_v1 = vsel %vm1668_vm3, %v2699_v28, %v25734_v38  ;;  %v25747_v53 = vor.u32 %v4247_v56, %v4246_v51  ;;  %v22449_v28 = vld [vmem:[%s32075_s3 + $0x190] sm:$0xff]  }
 0x200   : > { %21286 = vmatpush3.bf16.msra.mxu1 %v22442_v29  ;;  %v1286_v63 = vsel %vm1174_vm1, %v1116_v57, %v1230_v35  ;;  %v22445_v29 = vld [vmem:[%s32075_s3 + $0x170] sm:$0xff]   ;;  %v22450_v57 = vld [vmem:[%s32075_s3 + $0x198] sm:$0xff]   ;;  %v32102_v35 = vshll.u32 %v25469_v2, 16 }
 0x201   : > { %21287 = vmatprep.subr.bf16.mxu1 %v22443_v5  ;;  %v1314_v37 = vpack.c.bf16 %v1286_v63, %v1285_v36  ;;  %v25754_v13 = vsel %vm3248_vm8, %v4244_v31, %v25747_v53  ;;  %v22447_v31 = vld [vmem:[%s32075_s3 + $0x180] sm:$0xff]  }
 0x202   : > { %v2449_v63 = vrot.slane %v32102_v35, 1 }
 0x203   : > { %21276 = vmatmul.mubr.bf16.gmra.mrb[8].mxu1 %v25570_v22  ;;  %1342 = vst [vmem:[#allocation3 + $0x68] sm:$0xff] %v1314_v37  ;;  %v22454_v37 = vld [vmem:[%s32075_s3 + $0x1b8] sm:$0xff]  }
 0x204   : > { %21288 = vmatpush3.bf16.msra.mxu1 %v22443_v5  ;;  %21295 = vmatprep.mubr.bf16.mxu1 %v25606_v4  ;;  %v22448_v4 = vld [vmem:[%s32075_s3 + $0x188] sm:$0xff]   ;;  %v24994_v5 = vld [vmem:[#allocation3] sm:$0xff] }
 0x205   : > { %21289 = vmatprep.subr.bf16.mxu1 %v22444_v45  ;;  %v2442_v24 = vshll.u32 %v24994_v5, 16  ;;  %v2440_v51 = vshrl.u32 %v24994_v5, 16  ;;  %v32105_v5 = vshrl.u32 %v25488_v61, 16 }
 0x207   : > { %v2444_v56 = vrot.slane %v2442_v24, 1 }
 0x208   : > { %21290 = vmatpush3.bf16.msra.mxu1 %v22444_v45 }
 0x209   : > { %21291 = vmatprep.subr.bf16.mxu1 %v22445_v29  ;;  %v2445_v36 = vor.u32 %v2444_v56, %v2440_v51  ;;  %v22456_v56 = vld [vmem:[%s32075_s3 + $0x1c8] sm:$0xff]  }
 0x20b   : > { %v2450_v45 = vsel %vm1668_vm3, %v2445_v36, %v2449_v63 }
 0x20c   : > { %21292 = vmatpush3.bf16.msra.mxu1 %v22445_v29  ;;  %v22455_v29 = vld [vmem:[%s32075_s3 + $0x1c0] sm:$0xff]  }
 0x20d   : > { %21293 = vmatprep.subr.bf16.mxu1 %v22446_v47 }
 0x210   : > { %21294 = vmatpush3.bf16.msra.mxu1 %v22446_v47  ;;  %v32103_v47 = vshll.u32 %v25488_v61, 16  ;;  %v32107_v61 = vshll.u32 %v25546_v49, 16 }
 0x211   : > { %21307 = vmatprep.subr.bf16.mxu1 %v22447_v31 }
 0x212   : > { %v2473_v35 = vrot.slane %v32107_v61, 1  ;;  %v2644_v61 = vld [vmem:[#allocation3 + $0x68] sm:$0x1] }
 0x213   : > { %21296 = vmatmul.mubr.bf16.vlgmr.msra.gmra.mrb[0].mxu1 %v25621_v14 }
 0x214   : > { %21299 = vmatprep.mubr.bf16.mxu1 %v25646_v32  ;;  %21308 = vmatpush3.bf16.msra.mxu1 %v22447_v31  ;;  %v22451_v32 = vld [vmem:[%s32075_s3 + $0x1a0] sm:$0xff]   ;;  %v2457_v31 = vrot.slane %v32103_v47, 1  ;;  %v32110_v47 = vshll.u32 %v25570_v22, 16 }
 0x215   : > { %21309 = vmatprep.subr.bf16.mxu1 %v22448_v4 }
 0x216   : > { %v2461_v24 = vor.u32 %v32105_v5, %v2457_v31 }
 0x218   : > { %21310 = vmatpush3.bf16.msra.mxu1 %v22448_v4  ;;  %v32104_v4 = vshrl.u32 %v25469_v2, 16  ;;  %v22457_v2 = vld [vmem:[%s32075_s3 + $0x1d0] sm:$0xff]  }
 0x219   : > { %21311 = vmatprep.subr.bf16.mxu1 %v22449_v28 }
 0x21b   : > { %21300 = vmatmul.mubr.bf16.gmra.mrb[4].mxu1 %v25672_v25  ;;  %v22452_v25 = vld [vmem:[%s32075_s3 + $0x1a8] sm:$0xff]  }
 0x21c   : > { %21312 = vmatpush3.bf16.msra.mxu1 %v22449_v28  ;;  %21303 = vmatprep.mubr.bf16.mxu1 %v25695_v33  ;;  %v22453_v33 = vld [vmem:[%s32075_s3 + $0x1b0] sm:$0xff]   ;;  %v2453_v28 = vor.u32 %v32104_v4, %v2449_v63 }
 0x21d   : > { %21313 = vmatprep.subr.bf16.mxu1 %v22450_v57  ;;  %v2422_v63 = vld [vmem:[#allocation3 + $0x60] sm:$0x1] }
 0x220   : > { %21314 = vmatpush3.bf16.msra.mxu1 %v22450_v57  ;;  %v32106_v57 = vshll.u32 %v25515_v60, 16 }
 0x221   : > { %21315 = vmatprep.subr.bf16.mxu1 %v22451_v32 }
 0x222   : > { %v2465_v51 = vrot.slane %v32106_v57, 1 }
 0x223   : > { %21304 = vmatmul.mubr.bf16.gmra.mrb[8].mxu1 %v25719_v48  ;;  %v22519_v48 = vld [vmem:[%s32075_s3 + $0x3c0] sm:$0xff]  }
 0x224   : > { %21316 = vmatpush3.bf16.msra.mxu1 %v22451_v32  ;;  %21323 = vmatprep.mubr.bf16.mxu1 %v2450_v45  ;;  %v2458_v32 = vsel %vm1668_vm3, %v2453_v28, %v2457_v31  ;;  %v2466_v36 = vsel %vm1668_vm3, %v2461_v24, %v2465_v51  ;;  %v2481_v31 = vrot.slane %v32110_v47, 1  ;;  %v2487_v28 = vshll.u32 %v2422_v63, 16 }
 0x225   : > { %21317 = vmatprep.subr.bf16.mxu1 %v22452_v25  ;;  %v2709_v63 = vshll.u32 %v2644_v61, 16 }
 0x226   : > { %v2489_v57 = vrot.slane %v2487_v28, 1 }
 0x228   : > { %21318 = vmatpush3.bf16.msra.mxu1 %v22452_v25  ;;  %v32108_v25 = vshrl.u32 %v25515_v60, 16  ;;  %v22459_v60 = vld [vmem:[%s32075_s3 + $0x1e0] sm:$0xff]  }
 0x229   : > { %21319 = vmatprep.subr.bf16.mxu1 %v22453_v33 }
 0x22a   : > { %v2469_v45 = vor.u32 %v32108_v25, %v2465_v51  ;;  %v22460_v51 = vld [vmem:[%s32075_s3 + $0x1e8] sm:$0xff]   ;;  %v25859_v25 = vld [vmem:[#allocation2] sm:$0xe0] }
 0x22c   : > { %21320 = vmatpush3.bf16.msra.mxu1 %v22453_v33  ;;  %v32109_v33 = vshrl.u32 %v25546_v49, 16  ;;  %v2474_v4 = vsel %vm1668_vm3, %v2469_v45, %v2473_v35  ;;  %v32111_v49 = vshrl.u32 %v25570_v22, 16  ;;  %v22462_v22 = vld [vmem:[%s32075_s3 + $0x1f8] sm:$0xff]   ;;  %v2711_v45 = vrot.slane %v2709_v63, 1  ;;  %v25896_v63 = vld [vmem:[#allocation2 + $0x8] sm:$0xe0] }
 0x22d   : > { %21321 = vmatprep.subr.bf16.mxu1 %v22454_v37 }
 0x22e   : > { %v2485_v24 = vor.u32 %v32111_v49, %v2481_v31  ;;  %v22472_v49 = vld [vmem:[%s32075_s3 + $0x248] sm:$0xff]  }
 0x230   : > { %21322 = vmatpush3.bf16.msra.mxu1 %v22454_v37  ;;  %v2477_v37 = vor.u32 %v32109_v33, %v2473_v35  ;;  %v22466_v35 = vld [vmem:[%s32075_s3 + $0x218] sm:$0xff]   ;;  %v2886_v33 = vrot.slane %v25859_v25, 5 }
 0x231   : > { %21335 = vmatprep.subr.bf16.mxu1 %v22455_v29 }
 0x232   : > { %v2482_v5 = vsel %vm1668_vm3, %v2477_v37, %v2481_v31  ;;  %v24995_v37 = vld [vmem:[#allocation2 + $0x10] sm:$0xff] }
 0x233   : > { %21324 = vmatmul.mubr.bf16.vlgmr.msra.gmra.mrb[0].mxu1 %v2458_v32  ;;  %v22461_v32 = vld [vmem:[%s32075_s3 + $0x1f0] sm:$0xff]   ;;  %v2887_v47 = vrot.slane %v24995_v37, 5 }
 0x234   : > { %21327 = vmatprep.mubr.bf16.mxu1 %v2466_v36  ;;  %21336 = vmatpush3.bf16.msra.mxu1 %v22455_v29  ;;  %v22458_v29 = vld [vmem:[%s32075_s3 + $0x1d8] sm:$0xff]   ;;  %v22463_v36 = vld [vmem:[%s32075_s3 + $0x200] sm:$0xff]  }
 0x235   : > { %21337 = vmatprep.subr.bf16.mxu1 %v22456_v56  ;;  %v2888_v31 = vsel %vm2885_vm6, %v2886_v33, %v2887_v47  ;;  %v22476_v33 = vld [vmem:[%s32075_s3 + $0x268] sm:$0xff]  }
 0x238   : > { %21338 = vmatpush3.bf16.msra.mxu1 %v22456_v56  ;;  %v2490_v56 = vsel %vm1668_vm3, %v2485_v24, %v2489_v57 }
 0x239   : > { %21339 = vmatprep.subr.bf16.mxu1 %v22457_v2 }
 0x23b   : > { %21328 = vmatmul.mubr.bf16.gmra.mrb[4].mxu1 %v2474_v4  ;;  %v24996_v4 = vld [vmem:[#allocation2 + $0x20] sm:$0xff] }
 0x23c   : > { %21331 = vmatprep.mubr.bf16.mxu1 %v2482_v5  ;;  %21340 = vmatpush3.bf16.msra.mxu1 %v22457_v2  ;;  %v22465_v2 = vld [vmem:[%s32075_s3 + $0x210] sm:$0xff]   ;;  %v2889_v28 = vrot.slane %v24996_v4, 5  ;;  %v3250_v4 = vshrl.u32 %v25859_v25, 16 }
 0x23d   : > { %21341 = vmatprep.subr.bf16.mxu1 %v22458_v29  ;;  %v24997_v5 = vld [vmem:[#allocation2 + $0x30] sm:$0xff] }
 0x23e   : > { %v2890_v24 = vsel %vm2885_vm6, %v2887_v47, %v2889_v28  ;;  %v32112_v47 = vrot.slane %v25329_v40, 5  ;;  %v22479_v40 = vld [vmem:[%s32075_s3 + $0x280] sm:$0xff]  }
 0x240   : > { %21342 = vmatpush3.bf16.msra.mxu1 %v22458_v29  ;;  %v22471_v29 = vld [vmem:[%s32075_s3 + $0x240] sm:$0xff]  }
 0x241   : > { %21343 = vmatprep.subr.bf16.mxu1 %v22459_v60 }
 0x243   : > { %21332 = vmatmul.mubr.bf16.gmra.mrb[8].mxu1 %v2490_v56  ;;  %v24998_v56 = vld [vmem:[#allocation2 + $0x40] sm:$0xff] }
 0x244   : > { %21344 = vmatpush3.bf16.msra.mxu1 %v22459_v60  ;;  %21351 = vmatprep.mubr.bf16.mxu1 %v25638_v7  ;;  %v22464_v7 = vld [vmem:[%s32075_s3 + $0x208] sm:$0xff]   ;;  %v2891_v60 = vrot.slane %v24997_v5, 5 }
 0x245   : > { %21345 = vmatprep.subr.bf16.mxu1 %v22460_v51 }
 0x246   : > { %v2892_v57 = vsel %vm2885_vm6, %v2889_v28, %v2891_v60  ;;  %v3253_v28 = vshll.u32 %v25859_v25, 16  ;;  %v22484_v25 = vld [vmem:[%s32075_s3 + $0x2a8] sm:$0xff]  }
 0x248   : > { %21346 = vmatpush3.bf16.msra.mxu1 %v22460_v51  ;;  %v22473_v51 = vld [vmem:[%s32075_s3 + $0x250] sm:$0xff]   ;;  %v3255_v5 = vrot.slane %v3253_v28, 6 }
 0x249   : > { %21347 = vmatprep.subr.bf16.mxu1 %v22461_v32  ;;  %v25998_v28 = vld [vmem:[#allocation3] sm:$0xe0] }
 0x24c   : > { %21348 = vmatpush3.bf16.msra.mxu1 %v22461_v32  ;;  %v2893_v32 = vrot.slane %v24998_v56, 5  ;;  %v22486_v56 = vld [vmem:[%s32075_s3 + $0x2b8] sm:$0xff]  }
 0x24d   : > { %21349 = vmatprep.subr.bf16.mxu1 %v22462_v22 }
 0x24e   : > { %v2894_v61 = vsel %vm2885_vm6, %v2891_v60, %v2893_v32  ;;  %v22483_v60 = vld [vmem:[%s32075_s3 + $0x2a0] sm:$0xff]  }
 0x250   : > { %21350 = vmatpush3.bf16.msra.mxu1 %v22462_v22  ;;  %v24999_v22 = vld [vmem:[#allocation2 + $0x50] sm:$0xff] }
 0x251   : > { %21363 = vmatprep.subr.bf16.mxu1 %v22463_v36 }
 0x253   : > { %21352 = vmatmul.mubr.bf16.vlgmr.msra.gmra.mrb[0].mxu1 %v25667_v42  ;;  %v22467_v42 = vld [vmem:[%s32075_s3 + $0x220] sm:$0xff]  }
 0x254   : > { %21355 = vmatprep.mubr.bf16.mxu1 %v25690_v44  ;;  %21364 = vmatpush3.bf16.msra.mxu1 %v22463_v36  ;;  %v2707_v44 = vor.u32 %v2705_v43, %v25734_v38  ;;  %v22469_v43 = vld [vmem:[%s32075_s3 + $0x230] sm:$0xff]   ;;  %v22470_v38 = vld [vmem:[%s32075_s3 + $0x238] sm:$0xff]   ;;  %v2895_v36 = vrot.slane %v24999_v22, 5 }
 0x255   : > { %21365 = vmatprep.subr.bf16.mxu1 %v22464_v7  ;;  %v22489_v22 = vld [vmem:[%s32075_s3 + $0x2d0] sm:$0xff]  }
 0x258   : > { %21366 = vmatpush3.bf16.msra.mxu1 %v22464_v7  ;;  %v22474_v7 = vld [vmem:[%s32075_s3 + $0x258] sm:$0xff]  }
 0x259   : > { %21367 = vmatprep.subr.bf16.mxu1 %v22465_v2 }
 0x25b   : > { %21356 = vmatmul.mubr.bf16.gmra.mrb[4].mxu1 %v25714_v26  ;;  %v22468_v26 = vld [vmem:[%s32075_s3 + $0x228] sm:$0xff]  }
 0x25c   : > { %21359 = vmatprep.mubr.bf16.mxu1 %v25745_v1  ;;  %21368 = vmatpush3.bf16.msra.mxu1 %v22465_v2  ;;  %v2712_v1 = vsel %vm1668_vm3, %v2707_v44, %v2711_v45  ;;  %v2861_v2 = vld [vmem:[#allocation2 + $0x60] sm:$0x1f]  ;;  %v3071_v45 = vrot.slane %v25896_v63, 5 }
 0x25d   : > { %21369 = vmatprep.subr.bf16.mxu1 %v22466_v35  ;;  %v2897_v44 = vrot.slane %v2861_v2, 5  ;;  %v22490_v2 = vld [vmem:[%s32075_s3 + $0x2d8] sm:$0xff]  }
 0x25f   : > { %v2898_v37 = vsel %vm2885_vm6, %v2895_v36, %v2897_v44 }
 0x260   : > { %21370 = vmatpush3.bf16.msra.mxu1 %v22466_v35  ;;  %v2896_v35 = vsel %vm2885_vm6, %v2893_v32, %v2895_v36  ;;  %v3231_v32 = vld [vmem:[#allocation2 + $0x60] sm:$0x3f] }
 0x261   : > { %21371 = vmatprep.subr.bf16.mxu1 %v22467_v42  ;;  %v3278_v36 = vshrl.u32 %v3231_v32, 16 }
 0x263   : > { %21360 = vmatmul.mubr.bf16.gmra.mrb[8].mxu1 %v2712_v1  ;;  %v22477_v1 = vld [vmem:[%s32075_s3 + $0x270] sm:$0xff]  }
 0x264   : > { %21372 = vmatpush3.bf16.msra.mxu1 %v22467_v42  ;;  %21379 = vmatprep.mubr.bf16.mxu1 %v2888_v31  ;;  %v22475_v42 = vld [vmem:[%s32075_s3 + $0x260] sm:$0xff]   ;;  %v22478_v31 = vld [vmem:[%s32075_s3 + $0x278] sm:$0xff]  }
 0x265   : > { %21373 = vmatprep.subr.bf16.mxu1 %v22468_v26 }
 0x268   : > { %21374 = vmatpush3.bf16.msra.mxu1 %v22468_v26  ;;  %v3073_v26 = vsel %vm2885_vm6, %v3071_v45, %v32112_v47  ;;  %v22491_v45 = vld [vmem:[%s32075_s3 + $0x2e0] sm:$0xff]   ;;  %v22493_v47 = vld [vmem:[%s32075_s3 + $0x2f0] sm:$0xff]  }
 0x269   : > { %21375 = vmatprep.subr.bf16.mxu1 %v22469_v43 }
 0x26c   : > { %21376 = vmatpush3.bf16.msra.mxu1 %v22469_v43  ;;  %v22480_v43 = vld [vmem:[%s32075_s3 + $0x288] sm:$0xff]  }
 0x26d   : > { %21377 = vmatprep.subr.bf16.mxu1 %v22470_v38 }
 0x270   : > { %21378 = vmatpush3.bf16.msra.mxu1 %v22470_v38  ;;  %v22481_v38 = vld [vmem:[%s32075_s3 + $0x290] sm:$0xff]  }
 0x271   : > { %21391 = vmatprep.subr.bf16.mxu1 %v22471_v29 }
 0x273   : > { %21380 = vmatmul.mubr.bf16.vlgmr.msra.gmra.mrb[0].mxu1 %v2890_v24 }
 0x274   : > { %21383 = vmatprep.mubr.bf16.mxu1 %v2892_v57  ;;  %21392 = vmatpush3.bf16.msra.mxu1 %v22471_v29  ;;  %v22482_v29 = vld [vmem:[%s32075_s3 + $0x298] sm:$0xff]  }
 0x275   : > { %21393 = vmatprep.subr.bf16.mxu1 %v22472_v49 }
 0x278   : > { %21394 = vmatpush3.bf16.msra.mxu1 %v22472_v49 }
 0x279   : > { %21395 = vmatprep.subr.bf16.mxu1 %v22473_v51 }
 0x27b   : > { %21384 = vmatmul.mubr.bf16.gmra.mrb[4].mxu1 %v2894_v61  ;;  %v3451_v61 = vshrl.u32 %v25896_v63, 16 }
 0x27c   : > { %21387 = vmatprep.mubr.bf16.mxu1 %v2896_v35  ;;  %21396 = vmatpush3.bf16.msra.mxu1 %v22473_v51  ;;  %v22485_v51 = vld [vmem:[%s32075_s3 + $0x2b0] sm:$0xff]   ;;  %v3454_v35 = vshll.u32 %v25896_v63, 16  ;;  %v22492_v63 = vld [vmem:[%s32075_s3 + $0x2e8] sm:$0xff]  }
 0x27d   : > { %21397 = vmatprep.subr.bf16.mxu1 %v22474_v7 }
 0x27e   : > { %v3456_v44 = vrot.slane %v3454_v35, 6  ;;  %v22505_v35 = vld [vmem:[%s32075_s3 + $0x350] sm:$0xff]  }
 0x280   : > { %21398 = vmatpush3.bf16.msra.mxu1 %v22474_v7  ;;  %v3281_v7 = vshll.u32 %v3231_v32, 16  ;;  %v25002_v32 = vld [vmem:[#allocation3 + $0x30] sm:$0xff] }
 0x281   : > { %21399 = vmatprep.subr.bf16.mxu1 %v22475_v42 }
 0x283   : > { %21388 = vmatmul.mubr.bf16.gmra.mrb[8].mxu1 %v2898_v37 }
 0x284   : > { %21400 = vmatpush3.bf16.msra.mxu1 %v22475_v42  ;;  %21407 = vmatprep.mubr.bf16.mxu1 %v3073_v26  ;;  %v3453_v42 = vrot.slane %v3451_v61, 5  ;;  %v22494_v26 = vld [vmem:[%s32075_s3 + $0x2f8] sm:$0xff]  }
 0x285   : > { %21401 = vmatprep.subr.bf16.mxu1 %v22476_v33 }
 0x286   : > { %v3457_v37 = vor.u32 %v3456_v44, %v3453_v42  ;;  %v25004_v44 = vld [vmem:[#allocation3 + $0x50] sm:$0xff] }
 0x288   : > { %21402 = vmatpush3.bf16.msra.mxu1 %v22476_v33 }
 0x289   : > { %21403 = vmatprep.subr.bf16.mxu1 %v22477_v1 }
 0x28c   : > { %21404 = vmatpush3.bf16.msra.mxu1 %v22477_v1  ;;  %v3433_v1 = vld [vmem:[#allocation2 + $0x68] sm:$0x3f] }
 0x28d   : > { %21405 = vmatprep.subr.bf16.mxu1 %v22478_v31 }
 0x290   : > { %21406 = vmatpush3.bf16.msra.mxu1 %v22478_v31  ;;  %v22497_v31 = vld [vmem:[%s32075_s3 + $0x310] sm:$0xff]  }
 0x291   : > { %21419 = vmatprep.subr.bf16.mxu1 %v22479_v40 }
 0x293   : > { %21408 = vmatmul.mubr.bf16.vlgmr.msra.gmra.mrb[0].mxu1 %v25359_v39  ;;  %v3047_v39 = vld [vmem:[#allocation2 + $0x68] sm:$0x1f] }
 0x294   : > { %21411 = vmatprep.mubr.bf16.mxu1 %v25378_v19  ;;  %21420 = vmatpush3.bf16.msra.mxu1 %v22479_v40  ;;  %v3252_v19 = vrot.slane %v3250_v4, 5  ;;  %v3082_v49 = vrot.slane %v3047_v39, 5  ;;  %v3479_v40 = vshrl.u32 %v3433_v1, 16  ;;  %v25014_v39 = vmov 0.0  }
 0x295   : > { %21421 = vmatprep.subr.bf16.mxu1 %v22480_v43  ;;  %21587 = vmatprep.subr.bf16.mxu0 %v25014_v39 }
 0x296   : > { %v3256_v24 = vor.u32 %v3255_v5, %v3252_v19  ;;  %v3659_v5 = vrot.slane %v25998_v28, 5  ;;  %21603 = vmatprep.mubr.msk.bf16.mxu0 %vm25015_vm2, %v25014_v39 }
 0x298   : > { %21422 = vmatpush3.bf16.msra.mxu1 %v22480_v43  ;;  %v3482_v43 = vshll.u32 %v3433_v1, 16  ;;  %v22508_v1 = vld [vmem:[%s32075_s3 + $0x368] sm:$0xff]  }
 0x299   : > { %21423 = vmatprep.subr.bf16.mxu1 %v22481_v38 }
 0x29a   : > { %v3484_v4 = vrot.slane %v3482_v43, 6 }
 0x29b   : > { %21412 = vmatmul.mubr.bf16.gmra.mrb[4].mxu1 %v25401_v0  ;;  %v32113_v0 = vrot.slane %v25407_v21, 5  ;;  %v22487_v21 = vld [vmem:[%s32075_s3 + $0x2c0] sm:$0xff]  }
 0x29c   : > { %21415 = vmatprep.mubr.bf16.mxu1 %v25426_v52  ;;  %21424 = vmatpush3.bf16.msra.mxu1 %v22481_v38  ;;  %v3260_v52 = vsel %vm3248_vm8, %v3256_v24, %v25262_v58  ;;  %v22488_v58 = vld [vmem:[%s32075_s3 + $0x2c8] sm:$0xff]   ;;  %v22498_v38 = vld [vmem:[%s32075_s3 + $0x318] sm:$0xff]  }
 0x29d   : > { %21425 = vmatprep.subr.bf16.mxu1 %v22482_v29  ;;  %v3083_v57 = vsel %vm2885_vm6, %v32113_v0, %v3082_v49  ;;  %v22500_v49 = vld [vmem:[%s32075_s3 + $0x328] sm:$0xff]   ;;  %v22501_v0 = vld [vmem:[%s32075_s3 + $0x330] sm:$0xff]  }
 0x2a0   : > { %21426 = vmatpush3.bf16.msra.mxu1 %v22482_v29  ;;  %v3481_v29 = vrot.slane %v3479_v40, 5  ;;  %v32114_v40 = vrot.slane %v25621_v14, 5  ;;  %v22512_v14 = vld [vmem:[%s32075_s3 + $0x388] sm:$0xff]  }
 0x2a1   : > { %21427 = vmatprep.subr.bf16.mxu1 %v22483_v60 }
 0x2a2   : > { %v3485_v19 = vor.u32 %v3484_v4, %v3481_v29  ;;  %v22510_v29 = vld [vmem:[%s32075_s3 + $0x378] sm:$0xff]   ;;  %v22511_v4 = vld [vmem:[%s32075_s3 + $0x380] sm:$0xff]  }
 0x2a3   : > { %21416 = vmatmul.mubr.bf16.gmra.mrb[8].mxu1 %v3083_v57  ;;  %v22529_v57 = vld [vmem:[%s32077_s5 + $0x50] sm:$0xff]  }
 0x2a4   : > { %21428 = vmatpush3.bf16.msra.mxu1 %v22483_v60  ;;  %21435 = vmatprep.mubr.bf16.mxu1 %v3260_v52  ;;  %v22530_v52 = vld [vmem:[%s32077_s5 + $0x58] sm:$0xff]  }
 0x2a5   : > { %21429 = vmatprep.subr.bf16.mxu1 %v22484_v25 }
 0x2a8   : > { %21430 = vmatpush3.bf16.msra.mxu1 %v22484_v25  ;;  %v22528_v25 = vld [vmem:[%s32077_s5 + $0x48] sm:$0xff]  }
 0x2a9   : > { %21431 = vmatprep.subr.bf16.mxu1 %v22485_v51 }
 0x2ac   : > { %21432 = vmatpush3.bf16.msra.mxu1 %v22485_v51  ;;  %v22503_v51 = vld [vmem:[%s32075_s3 + $0x340] sm:$0xff]  }
 0x2ad   : > { %21433 = vmatprep.subr.bf16.mxu1 %v22486_v56 }
 0x2b0   : > { %21434 = vmatpush3.bf16.msra.mxu1 %v22486_v56  ;;  %v22531_v56 = vld [vmem:[%s32077_s5 + $0x60] sm:$0xff]  }
 0x2b1   : > { %21447 = vmatprep.subr.bf16.mxu1 %v22487_v21 }
 0x2b3   : > { %21436 = vmatmul.mubr.bf16.vlgmr.msra.gmra.mrb[0].mxu1 %v25277_v12  ;;  %v3280_v12 = vrot.slane %v3278_v36, 5  ;;  %v22504_v36 = vld [vmem:[%s32075_s3 + $0x348] sm:$0xff]  }
 0x2b4   : > { %21439 = vmatprep.mubr.bf16.mxu1 %v25291_v30  ;;  %21448 = vmatpush3.bf16.msra.mxu1 %v22487_v21  ;;  %v3283_v30 = vrot.slane %v3281_v7, 6  ;;  %v25001_v21 = vld [vmem:[#allocation3 + $0x20] sm:$0xff]  ;;  %v22532_v7 = vld [vmem:[%s32077_s5 + $0x68] sm:$0xff]  }
 0x2b5   : > { %21449 = vmatprep.subr.bf16.mxu1 %v22488_v58 }
 0x2b6   : > { %v3284_v33 = vor.u32 %v3283_v30, %v3280_v12  ;;  %v22533_v12 = vld [vmem:[%s32077_s5 + $0x70] sm:$0xff]  }
 0x2b7   : > { %v25003_v30 = vld [vmem:[#allocation3 + $0x40] sm:$0xff] }
 0x2b8   : > { %21450 = vmatpush3.bf16.msra.mxu1 %v22488_v58  ;;  %v3662_v58 = vrot.slane %v25001_v21, 5  ;;  %v3666_v42 = vrot.slane %v25003_v30, 5 }
 0x2b9   : > { %21451 = vmatprep.subr.bf16.mxu1 %v22489_v22 }
 0x2bb   : > { %21440 = vmatmul.mubr.bf16.gmra.mrb[4].mxu1 %v25305_v50  ;;  %v3285_v50 = vsel %vm3248_vm8, %v25316_v3, %v3284_v33  ;;  %v22495_v3 = vld [vmem:[%s32075_s3 + $0x300] sm:$0xff]   ;;  %v22506_v33 = vld [vmem:[%s32075_s3 + $0x358] sm:$0xff]  }
 0x2bc   : > { %21443 = vmatprep.mubr.bf16.mxu1 %v25320_v8  ;;  %21452 = vmatpush3.bf16.msra.mxu1 %v22489_v22  ;;  %v3461_v8 = vsel %vm3248_vm8, %v3457_v37, %v25350_v23  ;;  %v22496_v23 = vld [vmem:[%s32075_s3 + $0x308] sm:$0xff]   ;;  %v3664_v22 = vrot.slane %v25002_v32, 5  ;;  %v22534_v37 = vld [vmem:[%s32077_s5 + $0x78] sm:$0xff]   ;;  %v22523_v32 = vld [vmem:[%s32075_s3 + $0x3e0] sm:$0xff]  }
 0x2bd   : > { %21453 = vmatprep.subr.bf16.mxu1 %v22490_v2 }
 0x2be   : > { %v3665_v61 = vsel %vm2885_vm6, %v3662_v58, %v3664_v22 }
 0x2c0   : > { %21454 = vmatpush3.bf16.msra.mxu1 %v22490_v2 }
 0x2c1   : > { %21455 = vmatprep.subr.bf16.mxu1 %v22491_v45 }
 0x2c3   : > { %21444 = vmatmul.mubr.bf16.gmra.mrb[8].mxu1 %v3285_v50  ;;  %v3667_v50 = vsel %vm2885_vm6, %v3664_v22, %v3666_v42 }
 0x2c4   : > { %21456 = vmatpush3.bf16.msra.mxu1 %v22491_v45  ;;  %21463 = vmatprep.mubr.bf16.mxu1 %v3461_v8  ;;  %v3668_v45 = vrot.slane %v25004_v44, 5  ;;  %v26064_v8 = vld [vmem:[#allocation3 + $0x8] sm:$0xe0] }
 0x2c5   : > { %21457 = vmatprep.subr.bf16.mxu1 %v22492_v63 }
 0x2c8   : > { %21458 = vmatpush3.bf16.msra.mxu1 %v22492_v63  ;;  %v3635_v63 = vld [vmem:[#allocation3 + $0x60] sm:$0x1f] }
 0x2c9   : > { %21459 = vmatprep.subr.bf16.mxu1 %v22493_v47 }
 0x2cc   : > { %21460 = vmatpush3.bf16.msra.mxu1 %v22493_v47  ;;  %v3669_v47 = vsel %vm2885_vm6, %v3666_v42, %v3668_v45 }
 0x2cd   : > { %21461 = vmatprep.subr.bf16.mxu1 %v22494_v26 }
 0x2d0   : > { %21462 = vmatpush3.bf16.msra.mxu1 %v22494_v26  ;;  %v22507_v26 = vld [vmem:[%s32075_s3 + $0x360] sm:$0xff]  }
 0x2d1   : > { %21475 = vmatprep.subr.bf16.mxu1 %v22495_v3 }
 0x2d3   : > { %21464 = vmatmul.mubr.bf16.vlgmr.msra.gmra.mrb[0].mxu1 %v25370_v59  ;;  %v22499_v59 = vld [vmem:[%s32075_s3 + $0x320] sm:$0xff]  }
 0x2d4   : > { %21467 = vmatprep.mubr.bf16.mxu1 %v25388_v27  ;;  %21476 = vmatpush3.bf16.msra.mxu1 %v22495_v3  ;;  %v22527_v27 = vld [vmem:[%s32077_s5 + $0x40] sm:$0xff]   ;;  %v3670_v3 = vrot.slane %v3635_v63, 5 }
 0x2d5   : > { %21477 = vmatprep.subr.bf16.mxu1 %v22496_v23  ;;  %21588 = vmatpush3.bf16.msra.mxu0 %v22527_v27  ;;  %v3820_v27 = vld [vmem:[#allocation3 + $0x68] sm:$0x1f]  ;;  %v22535_v63 = vld [vmem:[%s32077_s5 + $0x1c0] sm:$0xff]  }
 0x2d6   : > { %21589 = vmatprep.subr.bf16.mxu0 %v25014_v39 }
 0x2d8   : > { %21478 = vmatpush3.bf16.msra.mxu1 %v22496_v23  ;;  %v3844_v23 = vrot.slane %v26064_v8, 5 }
 0x2d9   : > { %21479 = vmatprep.subr.bf16.mxu1 %v22497_v31  ;;  %21590 = vmatpush3.bf16.msra.mxu0 %v22528_v25  ;;  %v22518_v25 = vld [vmem:[%s32075_s3 + $0x3b8] sm:$0xff]  }
 0x2da   : > { %21591 = vmatprep.subr.bf16.mxu0 %v25014_v39  ;;  %v3846_v43 = vsel %vm2885_vm6, %v3844_v23, %v32114_v40  ;;  %v26200_v23 = vld [vmem:[%s32076_s4] ss:$0 sm:$0xff] }
 0x2db   : > { %21468 = vmatmul.mubr.bf16.gmra.mrb[4].mxu1 %v25410_v15  ;;  %v25000_v15 = vld [vmem:[#allocation3 + $0x10] sm:$0xff] }
 0x2dc   : > { %21471 = vmatprep.mubr.bf16.mxu1 %v25441_v20  ;;  %21480 = vmatpush3.bf16.msra.mxu1 %v22497_v31  ;;  %v3660_v60 = vrot.slane %v25000_v15, 5  ;;  %v3486_v20 = vsel %vm3248_vm8, %v25434_v9, %v3485_v19  ;;  %v22502_v9 = vld [vmem:[%s32075_s3 + $0x338] sm:$0xff]   ;;  %v3671_v31 = vsel %vm2885_vm6, %v3668_v45, %v3670_v3  ;;  %v4022_v19 = vshrl.u32 %v25998_v28, 16 }
 0x2dd   : > { %21481 = vmatprep.subr.bf16.mxu1 %v22498_v38  ;;  %21592 = vmatpush3.bf16.msra.mxu0 %v22529_v57  ;;  %v22514_v15 = vld [vmem:[%s32075_s3 + $0x398] sm:$0xff]  }
 0x2de   : > { %v3661_v24 = vsel %vm2885_vm6, %v3659_v5, %v3660_v60  ;;  %21593 = vmatprep.subr.bf16.mxu0 %v25014_v39  ;;  %v3663_v2 = vsel %vm2885_vm6, %v3660_v60, %v3662_v58  ;;  %v4025_v5 = vshll.u32 %v25998_v28, 16  ;;  %v32117_v45 = vld [vmem:[#allocation8_spill] sm:$0xff] }
 0x2df   : > { %v22544_v3 = vld [vmem:[%s32077_s5 + $0x1f8] sm:$0xff]  }
 0x2e0   : > { %21482 = vmatpush3.bf16.msra.mxu1 %v22498_v38  ;;  %v22509_v38 = vld [vmem:[%s32075_s3 + $0x370] sm:$0xff]   ;;  %v4027_v60 = vrot.slane %v4025_v5, 6 }
 0x2e1   : > { %21483 = vmatprep.subr.bf16.mxu1 %v22499_v59  ;;  %21594 = vmatpush3.bf16.msra.mxu0 %v22530_v52  ;;  %v4223_v52 = vshrl.u32 %v26064_v8, 16 }
 0x2e2   : > { %21595 = vmatprep.subr.bf16.mxu0 %v25014_v39 }
 0x2e3   : > { %21472 = vmatmul.mubr.bf16.gmra.mrb[8].mxu1 %v3486_v20  ;;  %v22516_v20 = vld [vmem:[%s32075_s3 + $0x3a8] sm:$0xff]   ;;  %v4225_v21 = vrot.slane %v4223_v52, 5 }
 0x2e4   : > { %21484 = vmatpush3.bf16.msra.mxu1 %v22499_v59  ;;  %21491 = vmatprep.mubr.bf16.mxu1 %v3661_v24  ;;  %v22513_v59 = vld [vmem:[%s32075_s3 + $0x390] sm:$0xff]  }
 0x2e5   : > { %21485 = vmatprep.subr.bf16.mxu1 %v22500_v49  ;;  %21596 = vmatpush3.bf16.msra.mxu0 %v22531_v56 }
 0x2e6   : > { %21597 = vmatprep.subr.bf16.mxu0 %v25014_v39 }
 0x2e8   : > { %21486 = vmatpush3.bf16.msra.mxu1 %v22500_v49  ;;  %v3855_v49 = vrot.slane %v3820_v27, 5 }
 0x2e9   : > { %21487 = vmatprep.subr.bf16.mxu1 %v22501_v0  ;;  %21598 = vmatpush3.bf16.msra.mxu0 %v22532_v7  ;;  %v22524_v7 = vld [vmem:[%s32075_s3 + $0x3e8] sm:$0xff]  }
 0x2ea   : > { %21599 = vmatprep.subr.bf16.mxu0 %v25014_v39 }
 0x2ec   : > { %21488 = vmatpush3.bf16.msra.mxu1 %v22501_v0  ;;  %v22521_v0 = vld [vmem:[%s32075_s3 + $0x3d0] sm:$0xff]  }
 0x2ed   : > { %21489 = vmatprep.subr.bf16.mxu1 %v22502_v9  ;;  %21600 = vmatpush3.bf16.msra.mxu0 %v22533_v12 }
 0x2ee   : > { %21601 = vmatprep.subr.bf16.mxu0 %v25014_v39 }
 0x2f0   : > { %21490 = vmatpush3.bf16.msra.mxu1 %v22502_v9 }
 0x2f1   : > { %21503 = vmatprep.subr.bf16.mxu1 %v22503_v51  ;;  %21602 = vmatpush3.bf16.msra.mxu0 %v22534_v37 }
 0x2f2   : > { %21623 = vmatprep.subr.bf16.mxu0 %v25014_v39 }
 0x2f3   : > { %21492 = vmatmul.mubr.bf16.vlgmr.msra.gmra.mrb[0].mxu1 %v3663_v2  ;;  %v22525_v2 = vld [vmem:[%s32075_s3 + $0x3f0] sm:$0xff]  }
 0x2f4   : > { %21495 = vmatprep.mubr.bf16.mxu1 %v3665_v61  ;;  %21504 = vmatpush3.bf16.msra.mxu1 %v22503_v51  ;;  %v4226_v51 = vshll.u32 %v26064_v8, 16  ;;  %v22526_v61 = vld [vmem:[%s32075_s3 + $0x3f8] sm:$0xff]   ;;  %v22539_v8 = vld [vmem:[%s32077_s5 + $0x1e0] sm:$0xff]  }
 0x2f5   : > { %21505 = vmatprep.subr.bf16.mxu1 %v22504_v36 }
 0x2f6   : > { %v4228_v58 = vrot.slane %v4226_v51, 6 }
 0x2f8   : > { %21506 = vmatpush3.bf16.msra.mxu1 %v22504_v36  ;;  %v4229_v36 = vor.u32 %v4228_v58, %v4225_v21 }
 0x2f9   : > { %21507 = vmatprep.subr.bf16.mxu1 %v22505_v35 }
 0x2fb   : > { %21496 = vmatmul.mubr.bf16.gmra.mrb[4].mxu1 %v3667_v50  ;;  %v22536_v50 = vld [vmem:[%s32077_s5 + $0x1c8] sm:$0xff]  }
 0x2fc   : > { %21499 = vmatprep.mubr.bf16.mxu1 %v3669_v47  ;;  %21508 = vmatpush3.bf16.msra.mxu1 %v22505_v35  ;;  %v32116_v35 = vld [vmem:[#allocation7_spill] sm:$0xff] }
 0x2fd   : > { %21509 = vmatprep.subr.bf16.mxu1 %v22506_v33  ;;  %v22540_v47 = vld [vmem:[%s32077_s5 + $0x1e8] sm:$0xff]  }
 0x300   : > { %21510 = vmatpush3.bf16.msra.mxu1 %v22506_v33 }
 0x301   : > { %21511 = vmatprep.subr.bf16.mxu1 %v22507_v26 }
 0x303   : > { %21500 = vmatmul.mubr.bf16.gmra.mrb[8].mxu1 %v3671_v31 }
 0x304   : > { %21512 = vmatpush3.bf16.msra.mxu1 %v22507_v26  ;;  %21519 = vmatprep.mubr.bf16.mxu1 %v3846_v43  ;;  %v22542_v26 = vld [vmem:[%s32077_s5 + $0x1f0] sm:$0xff]  }
 0x305   : > { %21513 = vmatprep.subr.bf16.mxu1 %v22508_v1 }
 0x308   : > { %21514 = vmatpush3.bf16.msra.mxu1 %v22508_v1 }
 0x309   : > { %21515 = vmatprep.subr.bf16.mxu1 %v22509_v38 }
 0x30c   : > { %21516 = vmatpush3.bf16.msra.mxu1 %v22509_v38 }
 0x30d   : > { %21517 = vmatprep.subr.bf16.mxu1 %v22510_v29 }
 0x310   : > { %21518 = vmatpush3.bf16.msra.mxu1 %v22510_v29 }
 0x311   : > { %21531 = vmatprep.subr.bf16.mxu1 %v22511_v4 }
 0x313   : > { %21520 = vmatmul.mubr.bf16.vlgmr.msra.gmra.mrb[0].mxu1 %v25664_v62  ;;  %v4024_v62 = vrot.slane %v4022_v19, 5 }
 0x314   : > { %21523 = vmatprep.mubr.bf16.mxu1 %v25687_v11  ;;  %21532 = vmatpush3.bf16.msra.mxu1 %v22511_v4  ;;  %v22515_v11 = vld [vmem:[%s32075_s3 + $0x3a0] sm:$0xff]  }
 0x315   : > { %21533 = vmatprep.subr.bf16.mxu1 %v22512_v14  ;;  %v4028_v28 = vor.u32 %v4027_v60, %v4024_v62 }
 0x317   : > { %v4032_v24 = vsel %vm3248_vm8, %v4028_v28, %v25491_v46  ;;  %v22520_v46 = vld [vmem:[%s32075_s3 + $0x3c8] sm:$0xff]  }
 0x318   : > { %21534 = vmatpush3.bf16.msra.mxu1 %v22512_v14 }
 0x319   : > { %21535 = vmatprep.subr.bf16.mxu1 %v22513_v59 }
 0x31b   : > { %21524 = vmatmul.mubr.bf16.gmra.mrb[4].mxu1 %v25711_v55  ;;  %v3856_v55 = vsel %vm2885_vm6, %v3853_v34, %v3855_v49  ;;  %v4004_v34 = vld [vmem:[#allocation3 + $0x60] sm:$0x3f] }
 0x31c   : > { %21527 = vmatprep.mubr.bf16.mxu1 %v25739_v18  ;;  %21536 = vmatpush3.bf16.msra.mxu1 %v22513_v59  ;;  %v22517_v18 = vld [vmem:[%s32075_s3 + $0x3b0] sm:$0xff]   ;;  %v4050_v57 = vshrl.u32 %v4004_v34, 16  ;;  %v4053_v9 = vshll.u32 %v4004_v34, 16 }
 0x31d   : > { %21537 = vmatprep.subr.bf16.mxu1 %v22514_v15 }
 0x31e   : > { %v4052_v56 = vrot.slane %v4050_v57, 5 }
 0x320   : > { %21538 = vmatpush3.bf16.msra.mxu1 %v22514_v15 }
 0x321   : > { %21539 = vmatprep.subr.bf16.mxu1 %v22515_v11 }
 0x323   : > { %21528 = vmatmul.mubr.bf16.gmra.mrb[8].mxu1 %v3856_v55 }
 0x324   : > { %21540 = vmatpush3.bf16.msra.mxu1 %v22515_v11  ;;  %21547 = vmatprep.mubr.bf16.mxu1 %v4032_v24 }
 0x325   : > { %21541 = vmatprep.subr.bf16.mxu1 %v22516_v20 }
 0x328   : > { %21542 = vmatpush3.bf16.msra.mxu1 %v22516_v20 }
 0x329   : > { %21543 = vmatprep.subr.bf16.mxu1 %v22517_v18 }
 0x32c   : > { %21544 = vmatpush3.bf16.msra.mxu1 %v22517_v18 }
 0x32d   : > { %21545 = vmatprep.subr.bf16.mxu1 %v22518_v25 }
 0x330   : > { %21546 = vmatpush3.bf16.msra.mxu1 %v22518_v25 }
 0x331   : > { %21559 = vmatprep.subr.bf16.mxu1 %v22519_v48 }
 0x333   : > { %21548 = vmatmul.mubr.bf16.vlgmr.msra.gmra.mrb[0].mxu1 %v25519_v16  ;;  %v22522_v16 = vld [vmem:[%s32075_s3 + $0x3d8] sm:$0xff]  }
 0x334   : > { %21551 = vmatprep.mubr.bf16.mxu1 %v25549_v54  ;;  %21560 = vmatpush3.bf16.msra.mxu1 %v22519_v48  ;;  %v4055_v54 = vrot.slane %v4053_v9, 6 }
 0x335   : > { %21561 = vmatprep.subr.bf16.mxu1 %v22520_v46 }
 0x336   : > { %v4056_v22 = vor.u32 %v4055_v54, %v4052_v56 }
 0x338   : > { %21562 = vmatpush3.bf16.msra.mxu1 %v22520_v46 }
 0x339   : > { %21563 = vmatprep.subr.bf16.mxu1 %v22521_v0 }
 0x33b   : > { %21552 = vmatmul.mubr.bf16.gmra.mrb[4].mxu1 %v25573_v17  ;;  %v4057_v17 = vsel %vm3248_vm8, %v25589_v6, %v4056_v22  ;;  %v32115_v6 = vld [vmem:[#allocation6_spill] sm:$0xff] }
 0x33c   : > { %21555 = vmatprep.mubr.bf16.mxu1 %v25596_v10  ;;  %21564 = vmatpush3.bf16.msra.mxu1 %v22521_v0  ;;  %v4233_v10 = vsel %vm3248_vm8, %v4229_v36, %v25651_v41  ;;  %v4205_v41 = vld [vmem:[#allocation3 + $0x68] sm:$0x3f] }
 0x33d   : > { %21565 = vmatprep.subr.bf16.mxu1 %v22522_v16  ;;  %v4251_v12 = vshrl.u32 %v4205_v41, 16  ;;  %v4254_v30 = vshll.u32 %v4205_v41, 16 }
 0x33f   : > { %v4253_v42 = vrot.slane %v4251_v12, 5  ;;  %v4256_v44 = vrot.slane %v4254_v30, 6 }
 0x340   : > { %21566 = vmatpush3.bf16.msra.mxu1 %v22522_v16 }
 0x341   : > { %21567 = vmatprep.subr.bf16.mxu1 %v22523_v32  ;;  %v4257_v33 = vor.u32 %v4256_v44, %v4253_v42 }
 0x343   : > { %21556 = vmatmul.mubr.bf16.gmra.mrb[8].mxu1 %v4057_v17  ;;  %v4258_v37 = vsel %vm3248_vm8, %v25747_v53, %v4257_v33  ;;  %v22538_v53 = vld [vmem:[%s32077_s5 + $0x1d8] sm:$0xff]  }
 0x344   : > { %21568 = vmatpush3.bf16.msra.mxu1 %v22523_v32  ;;  %21575 = vmatprep.mubr.bf16.mxu1 %v4233_v10 }
 0x345   : > { %21569 = vmatprep.subr.bf16.mxu1 %v22524_v7 }
 0x348   : > { %21570 = vmatpush3.bf16.msra.mxu1 %v22524_v7 }
 0x349   : > { %21571 = vmatprep.subr.bf16.mxu1 %v22525_v2 }
 0x34c   : > { %21572 = vmatpush3.bf16.msra.mxu1 %v22525_v2  ;;  %v22541_v2 = vld [vmem:[%s32077_s5] sm:$0xff]  }
 0x34d   : > { %21573 = vmatprep.subr.bf16.mxu1 %v22526_v61 }
 0x350   : > { %21574 = vmatpush3.bf16.msra.mxu1 %v22526_v61 }
 0x351   : > { %21839 = vmatprep.subr.bf16.mxu1 %v25014_v39 }
 0x353   : > { %21576 = vmatmul.mubr.bf16.vlgmr.msra.gmra.mrb[0].mxu1 %v32115_v6 }
 0x354   : > { %21579 = vmatprep.mubr.bf16.mxu1 %v32116_v35  ;;  %21840 = vmatpush3.bf16.msra.mxu1 %v22535_v63 }
 0x355   : > { %21841 = vmatprep.subr.bf16.mxu1 %v25014_v39 }
 0x358   : > { %21842 = vmatpush3.bf16.msra.mxu1 %v22536_v50 }
 0x359   : > { %21843 = vmatprep.subr.bf16.mxu1 %v25014_v39 }
 0x35b   : > { %21580 = vmatmul.mubr.bf16.gmra.mrb[4].mxu1 %v32117_v45 }
 0x35c   : > { %21583 = vmatprep.mubr.bf16.mxu1 %v25754_v13  ;;  %v22537_v13 = vld [vmem:[%s32077_s5 + $0x1d0] sm:$0xff]  }
 0x35d   : > { %21844 = vmatpush3.bf16.msra.mxu1 %v22537_v13 }
 0x35e   : > { %21845 = vmatprep.subr.bf16.mxu1 %v25014_v39 }
 0x361   : > { %21846 = vmatpush3.bf16.msra.mxu1 %v22538_v53 }
 0x362   : > { %21847 = vmatprep.subr.bf16.mxu1 %v25014_v39 }
 0x363   : > { %21584 = vmatmul.mubr.bf16.gmra.mrb[8].mxu1 %v4258_v37 }
 0x364   : > { %21855 = vmatprep.mubr.msk.bf16.mxu1 %vm25015_vm2, %v25014_v39 }
 0x365   : > { %21848 = vmatpush3.bf16.msra.mxu1 %v22539_v8 }
 0x366   : > { %21849 = vmatprep.subr.bf16.mxu1 %v25014_v39 }
 0x369   : > { %21850 = vmatpush3.bf16.msra.mxu1 %v22540_v47  ;;  %v22543_v47 = vld [vmem:[%s32077_s5 + $0x8] sm:$0xff]  }
 0x36a   : > { %21851 = vmatprep.subr.bf16.mxu1 %v25014_v39 }
 0x36d   : > { %21852 = vmatpush3.bf16.msra.mxu1 %v22542_v26 }
 0x36e   : > { %21853 = vmatprep.subr.bf16.mxu1 %v25014_v39 }
 0x371   : > { %21854 = vmatpush3.bf16.msra.mxu1 %v22544_v3 }
 0x426   : > { %v21577_v1 = vpop.f32.mrb[0].mxu1 }
 0x427   : > { %v4415_v31 = vadd.f32 %v21577_v1, %v26200_v23  ;;  %v4347_v40 = vpop.f32.mrb[1].mxu1 }
 0x428   : > { %v4413_v43 = vadd.f32 %v26200_v23, %v4347_v40  ;;  %v21578_v38 = vpop.f32.mrb[2].mxu1 }
 0x429   : > { %v4439_v29 = vmul.f32 0.01, %v4415_v31  ;;  %v4416_v4 = vadd.f32 %v21578_v38, %v26200_v23  ;;  %v4350_v14 = vpop.f32.mrb[3].mxu1  ;;  %vm4427_vm4 = vcmp.gt.f32.partialorder %v4415_v31, 0.0 }
 0x42a   : > { %v4437_v59 = vmul.f32 0.01, %v4413_v43  ;;  %v4414_v27 = vadd.f32 %v26200_v23, %v4350_v14  ;;  %vm4425_vm5 = vcmp.gt.f32.partialorder %v4413_v43, 0.0 }
 0x42b   : > { %vm4428_vm7 = vcmp.gt.f32.partialorder %v4416_v4, 0.0  ;;  %v4440_v19 = vmul.f32 0.01, %v4416_v4  ;;  %v4451_v15 = vsel %vm4427_vm4, %v4415_v31, %v4439_v29 }
 0x42c   : > { %vm4426_vm9 = vcmp.gt.f32.partialorder %v4414_v27, 0.0  ;;  %v4438_v5 = vmul.f32 0.01, %v4414_v27  ;;  %v4449_v60 = vsel %vm4425_vm5, %v4413_v43, %v4437_v59 }
 0x42d   : > { %v4452_v62 = vsel %vm4428_vm7, %v4416_v4, %v4440_v19  ;;  %vm5357_vm7 = vcmask 1041408  }
 0x42e   : > { %v26206_v49 = vpack.c.bf16 %v4452_v62, %v4451_v15  ;;  %v4450_v11 = vsel %vm4426_vm9, %v4414_v27, %v4438_v5  ;;  %v21581_v28 = vpop.f32.mrb[4].mxu1  ;;  %v22545_v15 = vld [vmem:[%s32077_s5 + $0x10] sm:$0xff]   ;;  %vm5867_vm9 = vcmask 1044480  }
 0x42f   : > { %v26208_v20 = vpack.c.bf16 %v4450_v11, %v4449_v60  ;;  %v4419_v55 = vadd.f32 %v21581_v28, %v26200_v23  ;;  %v4363_v24 = vpop.f32.mrb[5].mxu1 }
 0x430   : > { %4468 = vst [vmem:[#allocation4 + $0x8] sm:$0xff] %v26206_v49  ;;  %v4417_v18 = vadd.f32 %v26200_v23, %v4363_v24  ;;  %v21582_v25 = vpop.f32.mrb[6].mxu1  ;;  %v4519_v0 = vshll.u32 %v26206_v49, 16  ;;  %v4523_v35 = vshrl.u32 %v26206_v49, 16  ;;  %v4819_v24 = vrot.slane %v26206_v49, 1 }
 0x431   : > { %4467 = vst [vmem:[#allocation4] sm:$0xff] %v26208_v20  ;;  %v4443_v48 = vmul.f32 0.01, %v4419_v55  ;;  %v4420_v46 = vadd.f32 %v21582_v25, %v26200_v23  ;;  %v4366_v34 = vpop.f32.mrb[7].mxu1  ;;  %vm4431_vm10 = vcmp.gt.f32.partialorder %v4419_v55, 0.0  ;;  %v4514_v52 = vshll.u32 %v26208_v20, 16 }
 0x432   : > { %v4441_v57 = vmul.f32 0.01, %v4417_v18  ;;  %v4418_v9 = vadd.f32 %v26200_v23, %v4366_v34  ;;  %vm4429_vm11 = vcmp.gt.f32.partialorder %v4417_v18, 0.0  ;;  %v4512_v56 = vshrl.u32 %v26208_v20, 16 }
 0x433   : > { %vm4432_vm12 = vcmp.gt.f32.partialorder %v4420_v46, 0.0  ;;  %v4444_v51 = vmul.f32 0.01, %v4420_v46  ;;  %v4516_v54 = vrot.slane %v4514_v52, 1  ;;  %v4455_v21 = vsel %vm4431_vm10, %v4419_v55, %v4443_v48  ;;  %v22546_v48 = vld [vmem:[%s32077_s5 + $0x18] sm:$0xff]  }
 0x434   : > { %vm4430_vm13 = vcmp.gt.f32.partialorder %v4418_v9, 0.0  ;;  %v4442_v16 = vmul.f32 0.01, %v4418_v9  ;;  %v4521_v32 = vrot.slane %v4519_v0, 1  ;;  %v4453_v22 = vsel %vm4429_vm11, %v4417_v18, %v4441_v57 }
 0x435   : > { %v4456_v58 = vsel %vm4432_vm12, %v4420_v46, %v4444_v51  ;;  %v4517_v10 = vor.u32 %v4516_v54, %v4512_v56  ;;  %v5165_v52 = vrot.slane %v4519_v0, 6  ;;  %v22547_v0 = vld [vmem:[%s32077_s5 + $0x20] sm:$0xff]  }
 0x436   : > { %v26221_v36 = vpack.c.bf16 %v4456_v58, %v4455_v21  ;;  %v4454_v7 = vsel %vm4430_vm13, %v4418_v9, %v4442_v16  ;;  %v21585_v17 = vpop.f32.mrb[8].mxu1  ;;  %v4525_v26 = vor.u32 %v4523_v35, %v4521_v32  ;;  %v5162_v9 = vrot.slane %v4523_v35, 5 }
 0x437   : > { %v26226_v61 = vpack.c.bf16 %v4454_v7, %v4453_v22  ;;  %v4423_v6 = vadd.f32 %v21585_v17, %v26200_v23  ;;  %v4379_v41 = vpop.f32.mrb[9].mxu1  ;;  %v26230_v12 = vld [vmem:[#allocation4 + $0x8] sm:$0xfc]  ;;  %v4522_v44 = vsel %vm1668_vm3, %v4517_v10, %v4521_v32  ;;  %v4990_v16 = vrot.slane %v26206_v49, 5 }
 0x438   : > { %v4421_v30 = vadd.f32 %v26200_v23, %v4379_v41  ;;  %v21586_v42 = vpop.f32.mrb[10].mxu1  ;;  %v5686_v45 = vshrl.u32 %v26230_v12, 16  ;;  %v5689_v33 = vshll.u32 %v26230_v12, 16  ;;  %21604 = vmatmul.mubr.bf16.vlgmr.msra.gmra.mrb[112].mxu0 %v4522_v44  ;;  %v26262_v11 = vshll.u32 %v26221_v36, 16 }
 0x439   : > { %vm4435_vm0 = vcmp.gt.f32.partialorder %v4423_v6, 0.0  ;;  %v4447_v37 = vmul.f32 0.01, %v4423_v6  ;;  %v4424_v63 = vadd.f32 %v21586_v42, %v26200_v23  ;;  %v4382_v50 = vpop.f32.mrb[11].mxu1  ;;  %v26238_v13 = vshll.u32 %v26226_v61, 16  ;;  %21624 = vmatpush3.bf16.msra.mxu0 %v22541_v2  ;;  %21607 = vmatprep.mubr.msk.bf16.mxu0 %vm25015_vm2, %v25014_v39 }
 0x43a   : > { %v4445_v53 = vmul.f32 0.01, %v4421_v30  ;;  %v4422_v8 = vadd.f32 %v26200_v23, %v4382_v50  ;;  %v26247_v3 = vshrl.u32 %v26226_v61, 16  ;;  %vm4433_vm1 = vcmp.gt.f32.partialorder %v4421_v30, 0.0  ;;  %21625 = vmatprep.subr.bf16.mxu0 %v25014_v39 }
 0x43b   : > { %vm4436_vm4 = vcmp.gt.f32.partialorder %v4424_v63, 0.0  ;;  %v4448_v1 = vmul.f32 0.01, %v4424_v63  ;;  %v4529_v31 = vrot.slane %v26238_v13, 1  ;;  %v4459_v23 = vsel %vm4435_vm0, %v4423_v6, %v4447_v37 }
 0x43c   : > { %vm4434_vm5 = vcmp.gt.f32.partialorder %v4422_v8, 0.0  ;;  %v4446_v40 = vmul.f32 0.01, %v4422_v8  ;;  %v5688_v43 = vrot.slane %v5686_v45, 2  ;;  %v5691_v4 = vrot.slane %v5689_v33, 3 }
 0x43d   : > { %v4460_v38 = vsel %vm4436_vm4, %v4424_v63, %v4448_v1  ;;  %v4530_v29 = vsel %vm1668_vm3, %v4525_v26, %v4529_v31  ;;  %v5693_v14 = vrot.slane %v26247_v3, 2  ;;  %v4457_v59 = vsel %vm4433_vm1, %v4421_v30, %v4445_v53  ;;  %21626 = vmatpush3.bf16.msra.mxu0 %v22543_v47  ;;  %v22548_v30 = vld [vmem:[%s32077_s5 + $0x28] sm:$0xff]   ;;  %v22549_v47 = vld [vmem:[%s32077_s5 + $0x30] sm:$0xff]  }
 0x43e   : > { %v4466_v27 = vpack.c.bf16 %v4460_v38, %v4459_v23  ;;  %v4458_v19 = vsel %vm4434_vm5, %v4422_v8, %v4446_v40  ;;  %v5694_v5 = vrot.slane %v26238_v13, 3  ;;  %v5692_v60 = vor.u32 %v5691_v4, %v5688_v43  ;;  %21627 = vmatprep.subr.bf16.mxu0 %v25014_v39 }
 0x43f   : > { %v26258_v62 = vpack.c.bf16 %v4458_v19, %v4457_v59  ;;  %v5178_v28 = vshrl.u32 %v26221_v36, 16  ;;  %v4821_v18 = vrot.slane %v26226_v61, 1  ;;  %v5698_v34 = vrot.slane %v26262_v11, 3  ;;  %v22550_v19 = vld [vmem:[%s32077_s5 + $0x38] sm:$0xff]  }
 0x440   : > { %4472 = vst [vmem:[#allocation4 + $0x28] sm:$0xff] %v4466_v27  ;;  %v5695_v55 = vor.u32 %v5694_v5, %v5693_v14  ;;  %21608 = vmatmul.mubr.bf16.gmra.mrb[116].mxu0 %v4530_v29  ;;  %v4533_v51 = vor.u32 %v26247_v3, %v4529_v31  ;;  %v4992_v56 = vrot.slane %v26226_v61, 5  ;;  %v4537_v58 = vrot.slane %v26262_v11, 1 }
 0x441   : > { %4471 = vst [vmem:[#allocation4 + $0x20] sm:$0xff] %v26258_v62  ;;  %21628 = vmatpush3.bf16.msra.mxu0 %v22545_v15  ;;  %21611 = vmatprep.mubr.msk.bf16.mxu0 %vm25015_vm2, %v25014_v39  ;;  %v5697_v46 = vrot.slane %v5178_v28, 2  ;;  %v26280_v57 = vsel %vm4817_vm15, %v4819_v24, %v4821_v18  ;;  %v5187_v54 = vshrl.u32 %v26258_v62, 16  ;;  %v5190_v21 = vshll.u32 %v26258_v62, 16 }
 0x442   : > { %v5696_v25 = vsel %vm5684_vm14, %v5692_v60, %v5695_v55  ;;  %21629 = vmatprep.subr.bf16.mxu0 %v25014_v39  ;;  %v26301_v22 = vsel %vm2885_vm6, %v4990_v16, %v4992_v56  ;;  %v26304_v7 = vor.u32 %v5165_v52, %v5162_v9  ;;  %v4538_v17 = vsel %vm1668_vm3, %v4533_v51, %v4537_v58  ;;  %v22551_v52 = vld [vmem:[%s32077_s5 + $0x80] sm:$0xff]   ;;  %v22552_v51 = vld [vmem:[%s32077_s5 + $0x88] sm:$0xff]  }
 0x443   : > { %21856 = vmatmul.mubr.bf16.vlgmr.msra.gmra.mrb[12].mxu1 %v5696_v25  ;;  %v5699_v32 = vor.u32 %v5698_v34, %v5697_v46  ;;  %v5701_v6 = vrot.slane %v5187_v54, 2  ;;  %v5702_v41 = vrot.slane %v5190_v21, 3  ;;  %v5171_v44 = vrot.slane %v26247_v3, 5 }
 0x444   : > { %21859 = vmatprep.mubr.msk.bf16.mxu1 %vm25015_vm2, %v25014_v39  ;;  %v5174_v45 = vrot.slane %v26238_v13, 6  ;;  %v5180_v37 = vrot.slane %v5178_v28, 5  ;;  %v4541_v63 = vor.u32 %v5178_v28, %v4537_v58  ;;  %v5183_v8 = vrot.slane %v26262_v11, 6  ;;  %v22556_v58 = vld [vmem:[%s32077_s5 + $0xa8] sm:$0xff]  }
 0x445   : > { %21630 = vmatpush3.bf16.msra.mxu0 %v22546_v48  ;;  %v5700_v35 = vsel %vm5684_vm14, %v5695_v55, %v5699_v32  ;;  %v5703_v50 = vor.u32 %v5702_v41, %v5701_v6  ;;  %v5189_v13 = vrot.slane %v5187_v54, 5  ;;  %v5192_v1 = vrot.slane %v5190_v21, 6  ;;  %v22553_v54 = vld [vmem:[%s32077_s5 + $0x90] sm:$0xff]   ;;  %v22555_v21 = vld [vmem:[%s32077_s5 + $0xa0] sm:$0xff]  }
 0x446   : > { %21631 = vmatprep.subr.bf16.mxu0 %v25014_v39  ;;  %v5175_v53 = vor.u32 %v5174_v45, %v5171_v44  ;;  %v5184_v23 = vor.u32 %v5183_v8, %v5180_v37  ;;  %v5359_v38 = vrot.slane %v26206_v49, 6  ;;  %v5361_v29 = vrot.slane %v26226_v61, 6  ;;  %v22559_v41 = vld [vmem:[%s32077_s5 + $0xc0] sm:$0xff]   ;;  %v22561_v44 = vld [vmem:[%s32077_s5 + $0xd0] sm:$0xff]   ;;  %v22564_v37 = vld [vmem:[%s32077_s5 + $0xe8] sm:$0xff]  }
 0x447   : > { %v26317_v42 = vld [vmem:[#allocation4 + $0x28] sm:$0x7f]  ;;  %v26335_v43 = vor.u32 %v5192_v1, %v5189_v13  ;;  %v5704_v4 = vsel %vm5684_vm14, %v5699_v32, %v5703_v50  ;;  %v5524_v60 = vrot.slane %v26230_v12, 2  ;;  %v5525_v11 = vrot.slane %v26226_v61, 2  ;;  %v22557_v32 = vld [vmem:[%s32077_s5 + $0xb0] sm:$0xff]  }
 0x448   : > { %v26307_v10 = vld [vmem:[#allocation4 + $0x20] sm:$0x1f]  ;;  %21612 = vmatmul.mubr.bf16.gmra.mrb[120].mxu0 %v4538_v17  ;;  %v5706_v26 = vshrl.u32 %v26317_v42, 16  ;;  %v5709_v3 = vshll.u32 %v26317_v42, 16  ;;  %v26332_v31 = vsel %vm3248_vm8, %v26304_v7, %v5175_v53  ;;  %v26341_v14 = vsel %vm3248_vm8, %v5175_v53, %v5184_v23  ;;  %v22566_v53 = vld [vmem:[%s32077_s5 + $0xf8] sm:$0xff]   ;;  %v22569_v13 = vld [vmem:[%s32077_s5 + $0x110] sm:$0xff]  }
 0x449   : > { %v4543_v2 = vshll.u32 %v26307_v10, 16  ;;  %21632 = vmatpush3.bf16.msra.mxu0 %v22547_v0  ;;  %21615 = vmatprep.mubr.msk.bf16.mxu0 %vm25015_vm2, %v25014_v39  ;;  %v26350_v5 = vsel %vm3248_vm8, %v5184_v23, %v26335_v43  ;;  %v26357_v15 = vsel %vm5357_vm7, %v5359_v38, %v5361_v29  ;;  %v4547_v28 = vshrl.u32 %v26307_v10, 16  ;;  %v22558_v0 = vld [vmem:[%s32077_s5 + $0xb8] sm:$0xff]   ;;  %v4477_v17 = vld [vmem:[#allocation4 + $0x20] sm:$0xf] }
 0x44a   : > { %21633 = vmatprep.subr.bf16.mxu0 %v25014_v39  ;;  %v5708_v59 = vrot.slane %v5706_v26, 2  ;;  %v5711_v27 = vrot.slane %v5709_v3, 3  ;;  %v5875_v55 = vrot.slane %v26317_v42, 3  ;;  %v5873_v12 = vrot.slane %v26258_v62, 3  ;;  %v22568_v3 = vld [vmem:[%s32077_s5 + $0x108] sm:$0xff]   ;;  %v22571_v23 = vld [vmem:[%s32077_s5 + $0x120] sm:$0xff]  }
 0x44b   : > { %21860 = vmatmul.mubr.bf16.gmra.mrb[16].mxu1 %v5700_v35  ;;  %v4545_v33 = vrot.slane %v4543_v2, 1  ;;  %v4795_v2 = vld [vmem:[#allocation4] sm:$0xfe]  ;;  %v4823_v45 = vrot.slane %v26221_v36, 1  ;;  %v4994_v1 = vrot.slane %v26221_v36, 5 }
 0x44c   : > { %21863 = vmatprep.mubr.msk.bf16.mxu1 %vm25015_vm2, %v25014_v39  ;;  %v5712_v25 = vor.u32 %v5711_v27, %v5708_v59  ;;  %v26378_v34 = vsel %vm5867_vm9, %v5873_v12, %v5875_v55  ;;  %v4818_v6 = vrot.slane %v4795_v2, 1  ;;  %v22573_v59 = vld [vmem:[%s32077_s5 + $0x130] sm:$0xff]   ;;  %v4966_v27 = vld [vmem:[#allocation4 + $0x28] sm:$0x1] }
 0x44d   : > { %21634 = vmatpush3.bf16.msra.mxu0 %v22548_v30  ;;  %v4546_v40 = vsel %vm1668_vm3, %v4541_v63, %v4545_v33  ;;  %vm5523_vm3 = vcmask 1045504   ;;  %v4549_v46 = vor.u32 %v4547_v28, %v4545_v33  ;;  %v22560_v30 = vld [vmem:[%s32077_s5 + $0xc8] sm:$0xff]   ;;  %v22563_v33 = vld [vmem:[%s32077_s5 + $0xe0] sm:$0xff]   ;;  %v4825_v63 = vrot.slane %v26307_v10, 1 }
 0x44e   : > { %21635 = vmatprep.subr.bf16.mxu0 %v25014_v39  ;;  %v26369_v48 = vsel %vm5523_vm3, %v5524_v60, %v5525_v11  ;;  %v5713_v9 = vsel %vm5684_vm14, %v5703_v50, %v5712_v25  ;;  %v4820_v35 = vsel %vm4817_vm15, %v4818_v6, %v4819_v24  ;;  %v22562_v24 = vld [vmem:[%s32077_s5 + $0xd8] sm:$0xff]   ;;  %v22565_v50 = vld [vmem:[%s32077_s5 + $0xf0] sm:$0xff]   ;;  %v4961_v10 = vld [vmem:[#allocation4] sm:$0xe0]  ;;  %v4998_v60 = vrot.slane %v4966_v27, 5 }
 0x44f   : > { %v4989_v8 = vrot.slane %v4961_v10, 5  ;;  %v5152_v28 = vshrl.u32 %v4961_v10, 16 }
 0x450   : > { %21616 = vmatmul.mubr.bf16.gmra.mrb[124].mxu0 %v4546_v40  ;;  %v22572_v40 = vld [vmem:[%s32077_s5 + $0x128] sm:$0xff]  }
 0x451   : > { %21636 = vmatpush3.bf16.msra.mxu0 %v22549_v47  ;;  %21619 = vmatprep.mubr.msk.bf16.mxu0 %vm25015_vm2, %v25014_v39  ;;  %v22567_v47 = vld [vmem:[%s32077_s5 + $0x100] sm:$0xff]   ;;  %v4991_v26 = vsel %vm2885_vm6, %v4989_v8, %v4990_v16  ;;  %v22570_v16 = vld [vmem:[%s32077_s5 + $0x118] sm:$0xff]  }
 0x452   : > { %21637 = vmatprep.subr.bf16.mxu0 %v25014_v39 }
 0x453   : > { %21864 = vmatmul.mubr.bf16.gmra.mrb[20].mxu1 %v5704_v4  ;;  %v4996_v4 = vrot.slane %v26258_v62, 5 }
 0x454   : > { %21867 = vmatprep.mubr.msk.bf16.mxu1 %vm25015_vm2, %v25014_v39 }
 0x455   : > { %21638 = vmatpush3.bf16.msra.mxu0 %v22550_v19  ;;  %v22574_v19 = vld [vmem:[%s32077_s5 + $0x138] sm:$0xff]  }
 0x456   : > { %21659 = vmatprep.subr.bf16.mxu0 %v25014_v39 }
 0x458   : > { %21620 = vmatmul.mubr.bf16.gmra.mrb[128].mxu0 %v4549_v46  ;;  %v4999_v46 = vsel %vm2885_vm6, %v4996_v4, %v4998_v60 }
 0x459   : > { %21639 = vmatprep.mubr.msk.bf16.mxu0 %vm25015_vm2, %v25014_v39 }
 0x45b   : > { %21868 = vmatmul.mubr.bf16.gmra.mrb[24].mxu1 %v5713_v9  ;;  %v5154_v9 = vrot.slane %v5152_v28, 5 }
 0x45c   : > { %21871 = vmatprep.mubr.msk.bf16.mxu1 %vm25015_vm2, %v25014_v39 }
 0x460   : > { %21640 = vmatmul.mubr.bf16.vlgmr.msra.gmra.mrb[132].mxu0 %v26208_v20  ;;  %v22554_v20 = vld [vmem:[%s32077_s5 + $0x98] sm:$0xff]  }
 0x461   : > { %21660 = vmatpush3.bf16.msra.mxu0 %v22551_v52  ;;  %21643 = vmatprep.mubr.msk.bf16.mxu0 %vm25015_vm2, %v25014_v39 }
 0x462   : > { %21661 = vmatprep.subr.bf16.mxu0 %v25014_v39 }
 0x463   : > { %21872 = vmatmul.mubr.bf16.gmra.mrb[28].mxu1 %v5712_v25  ;;  %v5155_v25 = vshll.u32 %v4961_v10, 16  ;;  %v22588_v10 = vld [vmem:[%s32077_s5 + $0x1a8] sm:$0xff]  }
 0x465   : > { %21662 = vmatpush3.bf16.msra.mxu0 %v22552_v51  ;;  %v5157_v52 = vrot.slane %v5155_v25, 6 }
 0x466   : > { %21663 = vmatprep.subr.bf16.mxu0 %v25014_v39 }
 0x467   : > { %v5158_v51 = vor.u32 %v5157_v52, %v5154_v9 }
 0x468   : > { %21644 = vmatmul.mubr.bf16.gmra.mrb[136].mxu0 %v26206_v49  ;;  %v22586_v49 = vld [vmem:[%s32077_s5 + $0x198] sm:$0xff]  }
 0x469   : > { %21664 = vmatpush3.bf16.msra.mxu0 %v22553_v54  ;;  %21647 = vmatprep.mubr.msk.bf16.mxu0 %vm25015_vm2, %v25014_v39  ;;  %v22575_v54 = vld [vmem:[%s32077_s5 + $0x140] sm:$0xff]  }
 0x46a   : > { %21665 = vmatprep.subr.bf16.mxu0 %v25014_v39 }
 0x46d   : > { %21666 = vmatpush3.bf16.msra.mxu0 %v22554_v20  ;;  %v5167_v20 = vsel %vm3248_vm8, %v5158_v51, %v26304_v7  ;;  %v22578_v7 = vld [vmem:[%s32077_s5 + $0x158] sm:$0xff]  }
 0x46e   : > { %21667 = vmatprep.subr.bf16.mxu0 %v25014_v39 }
 0x470   : > { %21648 = vmatmul.mubr.bf16.gmra.mrb[140].mxu0 %v26226_v61 }
 0x471   : > { %21668 = vmatpush3.bf16.msra.mxu0 %v22555_v21  ;;  %21651 = vmatprep.mubr.msk.bf16.mxu0 %vm25015_vm2, %v25014_v39  ;;  %v22576_v21 = vld [vmem:[%s32077_s5 + $0x148] sm:$0xff]  }
 0x472   : > { %21669 = vmatprep.subr.bf16.mxu0 %v25014_v39 }
 0x475   : > { %21670 = vmatpush3.bf16.msra.mxu0 %v22556_v58  ;;  %v22577_v58 = vld [vmem:[%s32077_s5 + $0x150] sm:$0xff]  }
 0x476   : > { %21671 = vmatprep.subr.bf16.mxu0 %v25014_v39 }
 0x478   : > { %21652 = vmatmul.mubr.bf16.gmra.mrb[144].mxu0 %v26221_v36 }
 0x479   : > { %21672 = vmatpush3.bf16.msra.mxu0 %v22557_v32  ;;  %21655 = vmatprep.mubr.msk.bf16.mxu0 %vm25015_vm2, %v25014_v39  ;;  %v22579_v32 = vld [vmem:[%s32077_s5 + $0x160] sm:$0xff]  }
 0x47a   : > { %21673 = vmatprep.subr.bf16.mxu0 %v25014_v39 }
 0x47d   : > { %21674 = vmatpush3.bf16.msra.mxu0 %v22558_v0  ;;  %v22580_v0 = vld [vmem:[%s32077_s5 + $0x168] sm:$0xff]  }
 0x47e   : > { %21695 = vmatprep.subr.bf16.mxu0 %v25014_v39 }
 0x480   : > { %21656 = vmatmul.mubr.bf16.gmra.mrb[148].mxu0 %v4477_v17 }
 0x481   : > { %21675 = vmatprep.mubr.msk.bf16.mxu0 %vm25015_vm2, %v25014_v39 }
 0x488   : > { %21676 = vmatmul.mubr.bf16.vlgmr.msra.gmra.mrb[152].mxu0 %v4820_v35  ;;  %v22582_v35 = vld [vmem:[%s32077_s5 + $0x178] sm:$0xff]  }
 0x489   : > { %21696 = vmatpush3.bf16.msra.mxu0 %v22559_v41  ;;  %21679 = vmatprep.mubr.msk.bf16.mxu0 %vm25015_vm2, %v25014_v39 }
 0x48a   : > { %21697 = vmatprep.subr.bf16.mxu0 %v25014_v39 }
 0x48d   : > { %21698 = vmatpush3.bf16.msra.mxu0 %v22560_v30 }
 0x48e   : > { %21699 = vmatprep.subr.bf16.mxu0 %v25014_v39 }
 0x490   : > { %21680 = vmatmul.mubr.bf16.gmra.mrb[156].mxu0 %v26280_v57  ;;  %v4824_v57 = vsel %vm4817_vm15, %v4821_v18, %v4823_v45  ;;  %v4826_v18 = vsel %vm4817_vm15, %v4823_v45, %v4825_v63  ;;  %v22583_v45 = vld [vmem:[%s32077_s5 + $0x180] sm:$0xff]  }
 0x491   : > { %21700 = vmatpush3.bf16.msra.mxu0 %v22561_v44  ;;  %21683 = vmatprep.mubr.msk.bf16.mxu0 %vm25015_vm2, %v25014_v39 }
 0x492   : > { %21701 = vmatprep.subr.bf16.mxu0 %v25014_v39 }
 0x495   : > { %21702 = vmatpush3.bf16.msra.mxu0 %v22562_v24  ;;  %v5338_v24 = vld [vmem:[#allocation4] sm:$0xc0] }
 0x496   : > { %21703 = vmatprep.subr.bf16.mxu0 %v25014_v39 }
 0x498   : > { %21684 = vmatmul.mubr.bf16.gmra.mrb[160].mxu0 %v4824_v57  ;;  %v22585_v57 = vld [vmem:[%s32077_s5 + $0x190] sm:$0xff]  }
 0x499   : > { %21704 = vmatpush3.bf16.msra.mxu0 %v22563_v33  ;;  %21687 = vmatprep.mubr.msk.bf16.mxu0 %vm25015_vm2, %v25014_v39 }
 0x49a   : > { %21705 = vmatprep.subr.bf16.mxu0 %v25014_v39 }
 0x49d   : > { %21706 = vmatpush3.bf16.msra.mxu0 %v22564_v37  ;;  %v5363_v37 = vrot.slane %v26221_v36, 6 }
 0x49e   : > { %21707 = vmatprep.subr.bf16.mxu0 %v25014_v39 }
 0x4a0   : > { %21688 = vmatmul.mubr.bf16.gmra.mrb[164].mxu0 %v4826_v18 }
 0x4a1   : > { %21708 = vmatpush3.bf16.msra.mxu0 %v22565_v50  ;;  %21691 = vmatprep.mubr.msk.bf16.mxu0 %vm25015_vm2, %v25014_v39 }
 0x4a2   : > { %21709 = vmatprep.subr.bf16.mxu0 %v25014_v39 }
 0x4a5   : > { %21710 = vmatpush3.bf16.msra.mxu0 %v22566_v53  ;;  %v5364_v53 = vsel %vm5357_vm7, %v5361_v29, %v5363_v37  ;;  %v22589_v29 = vld [vmem:[%s32077_s5 + $0x1b0] sm:$0xff]  }
 0x4a6   : > { %21731 = vmatprep.subr.bf16.mxu0 %v25014_v39 }
 0x4a8   : > { %21692 = vmatmul.mubr.bf16.gmra.mrb[168].mxu0 %v4825_v63 }
 0x4a9   : > { %21711 = vmatprep.mubr.msk.bf16.mxu0 %vm25015_vm2, %v25014_v39 }
 0x4b0   : > { %21712 = vmatmul.mubr.bf16.vlgmr.msra.gmra.mrb[172].mxu0 %v4991_v26 }
 0x4b1   : > { %21732 = vmatpush3.bf16.msra.mxu0 %v22567_v47  ;;  %21715 = vmatprep.mubr.msk.bf16.mxu0 %vm25015_vm2, %v25014_v39  ;;  %v5365_v47 = vrot.slane %v26258_v62, 6 }
 0x4b2   : > { %21733 = vmatprep.subr.bf16.mxu0 %v25014_v39 }
 0x4b5   : > { %21734 = vmatpush3.bf16.msra.mxu0 %v22568_v3 }
 0x4b6   : > { %21735 = vmatprep.subr.bf16.mxu0 %v25014_v39 }
 0x4b8   : > { %21716 = vmatmul.mubr.bf16.gmra.mrb[176].mxu0 %v26301_v22  ;;  %v4995_v22 = vsel %vm2885_vm6, %v4992_v56, %v4994_v1  ;;  %v4997_v56 = vsel %vm2885_vm6, %v4994_v1, %v4996_v4  ;;  %v22590_v4 = vld [vmem:[%s32077_s5 + $0x1b8] sm:$0xff]   ;;  %vm6059_vm6 = vcmask 1040384  }
 0x4b9   : > { %21736 = vmatpush3.bf16.msra.mxu0 %v22569_v13  ;;  %21719 = vmatprep.mubr.msk.bf16.mxu0 %vm25015_vm2, %v25014_v39 }
 0x4ba   : > { %21737 = vmatprep.subr.bf16.mxu0 %v25014_v39 }
 0x4bd   : > { %21738 = vmatpush3.bf16.msra.mxu0 %v22570_v16 }
 0x4be   : > { %21739 = vmatprep.subr.bf16.mxu0 %v25014_v39 }
 0x4c0   : > { %21720 = vmatmul.mubr.bf16.gmra.mrb[180].mxu0 %v4995_v22  ;;  %v5366_v22 = vsel %vm5357_vm7, %v5363_v37, %v5365_v47 }
 0x4c1   : > { %21740 = vmatpush3.bf16.msra.mxu0 %v22571_v23  ;;  %21723 = vmatprep.mubr.msk.bf16.mxu0 %vm25015_vm2, %v25014_v39 }
 0x4c2   : > { %21741 = vmatprep.subr.bf16.mxu0 %v25014_v39 }
 0x4c5   : > { %21742 = vmatpush3.bf16.msra.mxu0 %v22572_v40 }
 0x4c6   : > { %21743 = vmatprep.subr.bf16.mxu0 %v25014_v39 }
 0x4c8   : > { %21724 = vmatmul.mubr.bf16.gmra.mrb[184].mxu0 %v4997_v56 }
 0x4c9   : > { %21744 = vmatpush3.bf16.msra.mxu0 %v22573_v59  ;;  %21727 = vmatprep.mubr.msk.bf16.mxu0 %vm25015_vm2, %v25014_v39 }
 0x4ca   : > { %21745 = vmatprep.subr.bf16.mxu0 %v25014_v39 }
 0x4cd   : > { %21746 = vmatpush3.bf16.msra.mxu0 %v22574_v19 }
 0x4ce   : > { %21767 = vmatprep.subr.bf16.mxu0 %v25014_v39 }
 0x4d0   : > { %21728 = vmatmul.mubr.bf16.gmra.mrb[188].mxu0 %v4999_v46 }
 0x4d1   : > { %21747 = vmatprep.mubr.msk.bf16.mxu0 %vm25015_vm2, %v25014_v39 }
 0x4d8   : > { %21748 = vmatmul.mubr.bf16.vlgmr.msra.gmra.mrb[192].mxu0 %v5167_v20 }
 0x4d9   : > { %21768 = vmatpush3.bf16.msra.mxu0 %v22575_v54  ;;  %21751 = vmatprep.mubr.msk.bf16.mxu0 %vm25015_vm2, %v25014_v39 }
 0x4da   : > { %21769 = vmatprep.subr.bf16.mxu0 %v25014_v39 }
 0x4dd   : > { %21770 = vmatpush3.bf16.msra.mxu0 %v22576_v21 }
 0x4de   : > { %21771 = vmatprep.subr.bf16.mxu0 %v25014_v39 }
 0x4e0   : > { %21752 = vmatmul.mubr.bf16.gmra.mrb[196].mxu0 %v26332_v31  ;;  %v26563_v31 = vld [vmem:[#allocation4 + $0x28] sm:$0x3] }
 0x4e1   : > { %21772 = vmatpush3.bf16.msra.mxu0 %v22577_v58  ;;  %21755 = vmatprep.mubr.msk.bf16.mxu0 %vm25015_vm2, %v25014_v39  ;;  %v5196_v17 = vshrl.u32 %v26563_v31, 16  ;;  %v5199_v2 = vshll.u32 %v26563_v31, 16  ;;  %v5367_v56 = vrot.slane %v26563_v31, 6  ;;  %v22591_v58 = vld [vmem:[%s32077_s5 + $0x200] sm:$0xff]  }
 0x4e2   : > { %21773 = vmatprep.subr.bf16.mxu0 %v25014_v39 }
 0x4e3   : > { %v5198_v6 = vrot.slane %v5196_v17, 5  ;;  %v5201_v41 = vrot.slane %v5199_v2, 6  ;;  %v5368_v9 = vsel %vm5357_vm7, %v5365_v47, %v5367_v56  ;;  %v22592_v17 = vld [vmem:[%s32077_s5 + $0x208] sm:$0xff]   ;;  %v22597_v56 = vld [vmem:[%s32077_s5 + $0x230] sm:$0xff]  }
 0x4e5   : > { %21774 = vmatpush3.bf16.msra.mxu0 %v22578_v7  ;;  %v5202_v30 = vor.u32 %v5201_v41, %v5198_v6 }
 0x4e6   : > { %21775 = vmatprep.subr.bf16.mxu0 %v25014_v39 }
 0x4e7   : > { %v5203_v44 = vsel %vm3248_vm8, %v26335_v43, %v5202_v30  ;;  %v22584_v43 = vld [vmem:[%s32077_s5 + $0x188] sm:$0xff]  }
 0x4e8   : > { %21756 = vmatmul.mubr.bf16.gmra.mrb[200].mxu0 %v26341_v14  ;;  %v22581_v14 = vld [vmem:[%s32077_s5 + $0x170] sm:$0xff]  }
 0x4e9   : > { %21776 = vmatpush3.bf16.msra.mxu0 %v22579_v32  ;;  %21759 = vmatprep.mubr.msk.bf16.mxu0 %vm25015_vm2, %v25014_v39 }
 0x4ea   : > { %21777 = vmatprep.subr.bf16.mxu0 %v25014_v39 }
 0x4ed   : > { %21778 = vmatpush3.bf16.msra.mxu0 %v22580_v0 }
 0x4ee   : > { %21779 = vmatprep.subr.bf16.mxu0 %v25014_v39 }
 0x4f0   : > { %21760 = vmatmul.mubr.bf16.gmra.mrb[204].mxu0 %v26350_v5  ;;  %v5358_v5 = vrot.slane %v5338_v24, 6 }
 0x4f1   : > { %21780 = vmatpush3.bf16.msra.mxu0 %v22581_v14  ;;  %21763 = vmatprep.mubr.msk.bf16.mxu0 %vm25015_vm2, %v25014_v39  ;;  %v5527_v14 = vrot.slane %v26221_v36, 2 }
 0x4f2   : > { %21781 = vmatprep.subr.bf16.mxu0 %v25014_v39  ;;  %v5360_v33 = vsel %vm5357_vm7, %v5358_v5, %v5359_v38 }
 0x4f3   : > { %v5528_v5 = vsel %vm5523_vm3, %v5525_v11, %v5527_v14 }
 0x4f5   : > { %21782 = vmatpush3.bf16.msra.mxu0 %v22582_v35 }
 0x4f6   : > { %21803 = vmatprep.subr.bf16.mxu0 %v25014_v39 }
 0x4f8   : > { %21764 = vmatmul.mubr.bf16.gmra.mrb[208].mxu0 %v5203_v44 }
 0x4f9   : > { %21783 = vmatprep.mubr.msk.bf16.mxu0 %vm25015_vm2, %v25014_v39 }
 0x500   : > { %21784 = vmatmul.mubr.bf16.vlgmr.msra.gmra.mrb[212].mxu0 %v5360_v33  ;;  %v22594_v33 = vld [vmem:[%s32077_s5 + $0x218] sm:$0xff]  }
 0x501   : > { %21804 = vmatpush3.bf16.msra.mxu0 %v22583_v45  ;;  %21787 = vmatprep.mubr.msk.bf16.mxu0 %vm25015_vm2, %v25014_v39 }
 0x502   : > { %21805 = vmatprep.subr.bf16.mxu0 %v25014_v39 }
 0x505   : > { %21806 = vmatpush3.bf16.msra.mxu0 %v22584_v43 }
 0x506   : > { %21807 = vmatprep.subr.bf16.mxu0 %v25014_v39 }
 0x508   : > { %21788 = vmatmul.mubr.bf16.gmra.mrb[216].mxu0 %v26357_v15  ;;  %v22587_v15 = vld [vmem:[%s32077_s5 + $0x1a0] sm:$0xff]  }
 0x509   : > { %21808 = vmatpush3.bf16.msra.mxu0 %v22585_v57  ;;  %21791 = vmatprep.mubr.msk.bf16.mxu0 %vm25015_vm2, %v25014_v39  ;;  %v5529_v57 = vrot.slane %v26258_v62, 2 }
 0x50a   : > { %21809 = vmatprep.subr.bf16.mxu0 %v25014_v39 }
 0x50b   : > { %v26612_v38 = vpop.f32.mrb[112].mxu0 }
 0x50c   : > { %v21605_v63 = vpop.f32.mrb[113].mxu0 }
 0x50d   : > { %v26615_v50 = vpop.f32.mrb[114].mxu0  ;;  %21810 = vmatpush3.bf16.msra.mxu0 %v22586_v49 }
 0x50e   : > { %v21606_v18 = vpop.f32.mrb[115].mxu0  ;;  %21811 = vmatprep.subr.bf16.mxu0 %v25014_v39 }
 0x510   : > { %21792 = vmatmul.mubr.bf16.gmra.mrb[220].mxu0 %v5364_v53 }
 0x511   : > { %21812 = vmatpush3.bf16.msra.mxu0 %v22587_v15  ;;  %21795 = vmatprep.mubr.msk.bf16.mxu0 %vm25015_vm2, %v25014_v39  ;;  %v22595_v15 = vld [vmem:[%s32077_s5 + $0x220] sm:$0xff]  }
 0x512   : > { %21813 = vmatprep.subr.bf16.mxu0 %v25014_v39 }
 0x513   : > { %v26630_v8 = vpop.f32.mrb[116].mxu0 }
 0x514   : > { %v21609_v26 = vpop.f32.mrb[117].mxu0 }
 0x515   : > { %v26635_v13 = vpop.f32.mrb[118].mxu0  ;;  %21814 = vmatpush3.bf16.msra.mxu0 %v22588_v10  ;;  %v5530_v26 = vsel %vm5523_vm3, %v5527_v14, %v5529_v57  ;;  %v5869_v14 = vrot.slane %v26226_v61, 3 }
 0x516   : > { %v26633_v3 = vpop.f32.mrb[12].mxu1  ;;  %v21610_v1 = vpop.f32.mrb[119].mxu0  ;;  %21815 = vmatprep.subr.bf16.mxu0 %v25014_v39 }
 0x517   : > { %v21857_v16 = vpop.f32.mrb[13].mxu1 }
 0x518   : > { %v26641_v23 = vpop.f32.mrb[14].mxu1  ;;  %21796 = vmatmul.mubr.bf16.gmra.mrb[224].mxu0 %v5366_v22  ;;  %v22596_v16 = vld [vmem:[%s32077_s5 + $0x228] sm:$0xff]  }
 0x519   : > { %v21858_v40 = vpop.f32.mrb[15].mxu1  ;;  %21816 = vmatpush3.bf16.msra.mxu0 %v22589_v29  ;;  %21799 = vmatprep.mubr.msk.bf16.mxu0 %vm25015_vm2, %v25014_v39  ;;  %v5504_v29 = vld [vmem:[#allocation4 + $0x28] sm:$0x3f] }
 0x51a   : > { %21817 = vmatprep.subr.bf16.mxu0 %v25014_v39  ;;  %v5531_v1 = vrot.slane %v5504_v29, 2 }
 0x51b   : > { %v26650_v59 = vpop.f32.mrb[120].mxu0 }
 0x51c   : > { %v21613_v27 = vpop.f32.mrb[121].mxu0 }
 0x51d   : > { %v26655_v60 = vpop.f32.mrb[122].mxu0  ;;  %21818 = vmatpush3.bf16.msra.mxu0 %v22590_v4 }
 0x51e   : > { %v26653_v19 = vpop.f32.mrb[16].mxu1  ;;  %v21614_v25 = vpop.f32.mrb[123].mxu0  ;;  %21875 = vmatprep.subr.bf16.mxu0 %v25014_v39 }
 0x51f   : > { %v21861_v28 = vpop.f32.mrb[17].mxu1  ;;  %v5532_v25 = vsel %vm5523_vm3, %v5529_v57, %v5531_v1 }
 0x520   : > { %v26658_v46 = vpop.f32.mrb[18].mxu1  ;;  %21800 = vmatmul.mubr.bf16.gmra.mrb[228].mxu0 %v5368_v9 }
 0x521   : > { %v21862_v52 = vpop.f32.mrb[19].mxu1  ;;  %21819 = vmatprep.mubr.msk.bf16.mxu0 %vm25015_vm2, %v25014_v39 }
 0x523   : > { %v26663_v51 = vpop.f32.mrb[124].mxu0 }
 0x524   : > { %v21617_v54 = vpop.f32.mrb[125].mxu0 }
 0x525   : > { %v26667_v21 = vpop.f32.mrb[126].mxu0 }
 0x526   : > { %v26665_v20 = vpop.f32.mrb[20].mxu1  ;;  %v21618_v32 = vpop.f32.mrb[127].mxu0 }
 0x527   : > { %v21865_v7 = vpop.f32.mrb[21].mxu1  ;;  %v5848_v32 = vld [vmem:[#allocation4 + $0x8] sm:$0xf8] }
 0x528   : > { %v26672_v31 = vpop.f32.mrb[22].mxu1  ;;  %21820 = vmatmul.mubr.bf16.vlgmr.msra.gmra.mrb[232].mxu0 %v26369_v48  ;;  %v22593_v48 = vld [vmem:[%s32077_s5 + $0x210] sm:$0xff]  }
 0x529   : > { %v21866_v0 = vpop.f32.mrb[23].mxu1  ;;  %21876 = vmatpush3.bf16.msra.mxu0 %v22591_v58  ;;  %21823 = vmatprep.mubr.msk.bf16.mxu0 %vm25015_vm2, %v25014_v39 }
 0x52a   : > { %21877 = vmatprep.subr.bf16.mxu0 %v25014_v39 }
 0x52b   : > { %v26681_v2 = vpop.f32.mrb[128].mxu0 }
 0x52c   : > { %v21621_v6 = vpop.f32.mrb[129].mxu0 }
 0x52d   : > { %v4672_v35 = vpop.f32.mrb[130].mxu0  ;;  %21878 = vmatpush3.bf16.msra.mxu0 %v22592_v17  ;;  %v5868_v17 = vrot.slane %v5848_v32, 3  ;;  %v22602_v32 = vld [vmem:[%s32079_s7 + $0x8] ss:$16 sps:$4 sm:$0xff]  }
 0x52e   : > { %v26684_v41 = vpop.f32.mrb[24].mxu1  ;;  %v21622_v44 = vpop.f32.mrb[131].mxu0  ;;  %21879 = vmatprep.subr.bf16.mxu0 %v25014_v39 }
 0x52f   : > { %v21869_v30 = vpop.f32.mrb[25].mxu1  ;;  %v5870_v44 = vsel %vm5867_vm9, %v5868_v17, %v5869_v14  ;;  %v22607_v17 = vld [vmem:[%s32079_s7 + $0x24] ss:$16 sps:$4 sm:$0xff]  }
 0x530   : > { %v26690_v24 = vpop.f32.mrb[26].mxu1  ;;  %21824 = vmatmul.mubr.bf16.gmra.mrb[236].mxu0 %v5528_v5  ;;  %v5871_v5 = vrot.slane %v26221_v36, 3 }
 0x531   : > { %v21870_v45 = vpop.f32.mrb[27].mxu1  ;;  %21880 = vmatpush3.bf16.msra.mxu0 %v22593_v48  ;;  %21827 = vmatprep.mubr.msk.bf16.mxu0 %vm25015_vm2, %v25014_v39 }
 0x532   : > { %21881 = vmatprep.subr.bf16.mxu0 %v25014_v39  ;;  %v5874_v36 = vsel %vm5867_vm9, %v5871_v5, %v5873_v12 }
 0x533   : > { %v4757_v43 = vpop.f32.mrb[132].mxu0 }
 0x534   : > { %v26703_v49 = vadd.f32 %v4757_v43, %v26612_v38  ;;  %v21641_v37 = vpop.f32.mrb[133].mxu0 }
 0x535   : > { %v4760_v63 = vpop.f32.mrb[134].mxu0  ;;  %21882 = vmatpush3.bf16.msra.mxu0 %v22594_v33 }
 0x536   : > { %v26705_v11 = vpop.f32.mrb[28].mxu1  ;;  %v4761_v53 = vadd.f32 %v4760_v63, %v26615_v50  ;;  %v21642_v10 = vpop.f32.mrb[135].mxu0  ;;  %21883 = vmatprep.subr.bf16.mxu0 %v25014_v39 }
 0x537   : > { %v21873_v18 = vpop.f32.mrb[29].mxu1 }
 0x538   : > { %v5836_v47 = vpop.f32.mrb[30].mxu1  ;;  %21828 = vmatmul.mubr.bf16.gmra.mrb[240].mxu0 %v5530_v26 }
 0x539   : > { %v21874_v38 = vpop.f32.mrb[31].mxu1  ;;  %21884 = vmatpush3.bf16.msra.mxu0 %v22595_v15  ;;  %21831 = vmatprep.mubr.msk.bf16.mxu0 %vm25015_vm2, %v25014_v39 }
 0x53a   : > { %21885 = vmatprep.subr.bf16.mxu0 %v25014_v39 }
 0x53b   : > { %v4765_v50 = vpop.f32.mrb[136].mxu0 }
 0x53c   : > { %v4766_v22 = vadd.f32 %v4765_v50, %v26630_v8  ;;  %v21645_v40 = vpop.f32.mrb[137].mxu0  ;;  %v22598_v8 = vld [vmem:[%s32077_s5 + $0x238] sm:$0xff]  }
 0x53d   : > { %v4768_v4 = vpop.f32.mrb[138].mxu0  ;;  %21886 = vmatpush3.bf16.msra.mxu0 %v22596_v16 }
 0x53e   : > { %v4769_v27 = vadd.f32 %v4768_v4, %v26635_v13  ;;  %v21646_v28 = vpop.f32.mrb[139].mxu0  ;;  %21887 = vmatprep.subr.bf16.mxu0 %v25014_v39 }
 0x540   : > { %21832 = vmatmul.mubr.bf16.gmra.mrb[244].mxu0 %v5532_v25 }
 0x541   : > { %21888 = vmatpush3.bf16.msra.mxu0 %v22597_v56  ;;  %21835 = vmatprep.mubr.msk.bf16.mxu0 %vm25015_vm2, %v25014_v39 }
 0x542   : > { %21889 = vmatprep.subr.bf16.mxu0 %v25014_v39 }
 0x543   : > { %v4773_v9 = vpop.f32.mrb[140].mxu0 }
 0x544   : > { %v4774_v52 = vadd.f32 %v4773_v9, %v26650_v59  ;;  %v21649_v13 = vpop.f32.mrb[141].mxu0 }
 0x545   : > { %v4776_v54 = vpop.f32.mrb[142].mxu0  ;;  %21890 = vmatpush3.bf16.msra.mxu0 %v22598_v8 }
 0x546   : > { %v4777_v58 = vadd.f32 %v4776_v54, %v26655_v60  ;;  %v21650_v7 = vpop.f32.mrb[143].mxu0 }
 0x547   : > { %v22601_v7 = vld [vmem:[%s32079_s7 + $0x4] ss:$16 sps:$4 sm:$0xff]  }
 0x548   : > { %21836 = vmatmul.mubr.bf16.gmra.mrb[248].mxu0 %v5531_v1  ;;  %16381 = vmatprep.subr.bf16.mxu1 %v22601_v7 }
 0x549   : > { %21891 = vmatprep.mubr.msk.bf16.mxu0 %vm25015_vm2, %v25014_v39 }
 0x54b   : > { %v4781_v0 = vpop.f32.mrb[144].mxu0 }
 0x54c   : > { %v4782_v6 = vadd.f32 %v4781_v0, %v26663_v51  ;;  %v21653_v35 = vpop.f32.mrb[145].mxu0  ;;  %v5872_v51 = vsel %vm5867_vm9, %v5869_v14, %v5871_v5  ;;  %v22604_v0 = vld [vmem:[%s32079_s7 + $0xc] ss:$16 sps:$4 sm:$0xff]  }
 0x54d   : > { %v4784_v48 = vpop.f32.mrb[146].mxu0  ;;  %v22610_v14 = vld [vmem:[%s32079_s7 + $0x2c] ss:$16 sps:$4 sm:$0xff]   ;;  %17406 = vmatprep.subr.bf16.mxu0 %v22604_v0  ;;  %v22608_v35 = vld [vmem:[%s32079_s7 + $0x28] ss:$16 sps:$4 sm:$0xff]  }
 0x54e   : > { %v4785_v59 = vadd.f32 %v4784_v48, %v26667_v21  ;;  %v21654_v30 = vpop.f32.mrb[147].mxu0 }
 0x550   : > { %21892 = vmatmul.mubr.bf16.vlgmr.msra.gmra.mrb[252].mxu0 %v5870_v44 }
 0x551   : > { %21895 = vmatprep.mubr.msk.bf16.mxu0 %vm25015_vm2, %v25014_v39  ;;  %17407 = vmatpush1.bf16.msra.mxu0 %v22602_v32 }
 0x552   : > { %17408 = vmatprep.subr.bf16.mxu0 %v22610_v14 }
 0x553   : > { %v4789_v60 = vpop.f32.mrb[148].mxu0 }
 0x554   : > { %v4790_v45 = vadd.f32 %v4789_v60, %v26681_v2  ;;  %v21657_v33 = vpop.f32.mrb[149].mxu0 }
 0x555   : > { %v4792_v61 = vpop.f32.mrb[150].mxu0  ;;  %17409 = vmatpush1.bf16.msra.mxu0 %v22608_v35  ;;  %v22613_v33 = vld [vmem:[%s32079_s7 + $0x44] ss:$16 sps:$4 sm:$0xff]  }
 0x556   : > { %v21658_v43 = vpop.f32.mrb[151].mxu0  ;;  %v22614_v61 = vld [vmem:[%s32079_s7 + $0x48] ss:$16 sps:$4 sm:$0xff]  }
 0x557   : > { %v22616_v43 = vld [vmem:[%s32079_s7 + $0x4c] ss:$16 sps:$4 sm:$0xff]  }
 0x558   : > { %21896 = vmatmul.mubr.bf16.gmra.mrb[0].mxu0 %v5872_v51  ;;  %v22619_v51 = vld [vmem:[%s32079_s7 + $0x64] ss:$16 sps:$4 sm:$0xff]   ;;  %17410 = vmatprep.subr.bf16.mxu0 %v22616_v43 }
 0x559   : > { %21899 = vmatprep.mubr.msk.bf16.mxu0 %vm25015_vm2, %v25014_v39  ;;  %17411 = vmatpush1.bf16.msra.mxu0 %v22614_v61 }
 0x55b   : > { %v4914_v21 = vpop.f32.mrb[152].mxu0 }
 0x55c   : > { %v4952_v57 = vadd.f32 %v4914_v21, %v26703_v49  ;;  %v21677_v37 = vpop.f32.mrb[153].mxu0  ;;  %v22622_v21 = vld [vmem:[%s32079_s7 + $0x6c] ss:$16 sps:$4 sm:$0xff]  }
 0x55d   : > { %v4917_v63 = vpop.f32.mrb[154].mxu0  ;;  %v22620_v37 = vld [vmem:[%s32079_s7 + $0x68] ss:$16 sps:$4 sm:$0xff]   ;;  %17412 = vmatprep.subr.bf16.mxu0 %v22622_v21  ;;  %v22652_v21 = vld [vmem:[%s32079_s7 + $0x10c] ss:$16 sps:$4 sm:$0xff]  }
 0x55e   : > { %v4953_v15 = vadd.f32 %v4917_v63, %v4761_v53  ;;  %v21678_v18 = vpop.f32.mrb[155].mxu0  ;;  %17413 = vmatpush1.bf16.msra.mxu0 %v22620_v37 }
 0x560   : > { %21900 = vmatmul.mubr.bf16.gmra.mrb[4].mxu0 %v5874_v36 }
 0x561   : > { %21903 = vmatprep.mubr.msk.bf16.mxu0 %vm25015_vm2, %v25014_v39 }
 0x563   : > { %v4922_v2 = vpop.f32.mrb[156].mxu0 }
 0x564   : > { %v4954_v10 = vadd.f32 %v4922_v2, %v4766_v22  ;;  %v21681_v47 = vpop.f32.mrb[157].mxu0 }
 0x565   : > { %v4925_v26 = vpop.f32.mrb[158].mxu0  ;;  %v22623_v47 = vld [vmem:[%s32079_s7 + $0x80] ss:$16 sps:$4 sm:$0xff]  }
 0x566   : > { %v4955_v38 = vadd.f32 %v4925_v26, %v4769_v27  ;;  %v21682_v29 = vpop.f32.mrb[159].mxu0  ;;  %v22625_v26 = vld [vmem:[%s32079_s7 + $0x84] ss:$16 sps:$4 sm:$0xff]  }
 0x567   : > { %v22628_v29 = vld [vmem:[%s32079_s7 + $0x8c] ss:$16 sps:$4 sm:$0xff]  }
 0x568   : > { %21904 = vmatmul.mubr.bf16.gmra.mrb[8].mxu0 %v26378_v34  ;;  %17414 = vmatprep.subr.bf16.mxu0 %v22628_v29 }
 0x569   : > { %21907 = vmatprep.mubr.msk.bf16.mxu0 %vm25015_vm2, %v25014_v39  ;;  %vm6060_vm2 = vsmask.f32 256 }
 0x56a   : > { %vm27041_vm11 = vmand %vm6059_vm6, %vm6060_vm2 }
 0x56b   : > { %v4930_v49 = vpop.f32.mrb[160].mxu0 }
 0x56c   : > { %v4956_v53 = vadd.f32 %v4930_v49, %v4774_v52  ;;  %v21685_v62 = vpop.f32.mrb[161].mxu0  ;;  %v22631_v49 = vld [vmem:[%s32079_s7 + $0xa4] ss:$16 sps:$4 sm:$0xff]  }
 0x56d   : > { %v4933_v16 = vpop.f32.mrb[162].mxu0  ;;  %v22629_v62 = vld [vmem:[%s32079_s7 + $0xa0] ss:$16 sps:$4 sm:$0xff]  }
 0x56e   : > { %v4957_v12 = vadd.f32 %v4933_v16, %v4777_v58  ;;  %v21686_v50 = vpop.f32.mrb[163].mxu0  ;;  %v22599_v58 = vld [vmem:[%s32079_s7] ss:$16 sps:$4 sm:$0xff]   ;;  %v22632_v16 = vld [vmem:[%s32079_s7 + $0xa8] ss:$16 sps:$4 sm:$0xff]  }
 0x56f   : > { %16382 = vmatpush1.bf16.msra.mxu1 %v22599_v58 }
 0x570   : > { %21908 = vmatmul.mubr.bf16.gmra.mrb[12].mxu0 %v5875_v55  ;;  %16383 = vmatprep.subr.bf16.mxu1 %v22607_v17 }
 0x573   : > { %v4938_v1 = vpop.f32.mrb[164].mxu0 }
 0x574   : > { %v26758_v22 = vadd.f32 %v4938_v1, %v4782_v6  ;;  %v21689_v40 = vpop.f32.mrb[165].mxu0  ;;  %v22605_v6 = vld [vmem:[%s32079_s7 + $0x20] ss:$16 sps:$4 sm:$0xff]  }
 0x575   : > { %v4941_v4 = vpop.f32.mrb[166].mxu0  ;;  %16384 = vmatpush1.bf16.msra.mxu1 %v22605_v6 }
 0x576   : > { %v26760_v56 = vadd.f32 %v4941_v4, %v4785_v59  ;;  %v21690_v34 = vpop.f32.mrb[167].mxu0  ;;  %16385 = vmatprep.subr.bf16.mxu1 %v22613_v33 }
 0x57b   : > { %v4946_v27 = vpop.f32.mrb[168].mxu0 }
 0x57c   : > { %v26762_v28 = vadd.f32 %v4946_v27, %v4790_v45  ;;  %v21693_v39 = vpop.f32.mrb[169].mxu0  ;;  %v22611_v45 = vld [vmem:[%s32079_s7 + $0x40] ss:$16 sps:$4 sm:$0xff]  }
 0x57d   : > { %v4949_v25 = vpop.f32.mrb[170].mxu0  ;;  %16386 = vmatpush1.bf16.msra.mxu1 %v22611_v45  ;;  %v22635_v27 = vld [vmem:[%s32079_s7 + $0xc0] ss:$16 sps:$4 sm:$0xff]   ;;  %v22637_v39 = vld [vmem:[%s32079_s7 + $0xc4] ss:$16 sps:$4 sm:$0xff]  }
 0x57e   : > { %v21694_v8 = vpop.f32.mrb[171].mxu0  ;;  %16387 = vmatprep.subr.bf16.mxu1 %v22619_v51  ;;  %v22638_v25 = vld [vmem:[%s32079_s7 + $0xc8] ss:$16 sps:$4 sm:$0xff]  }
 0x57f   : > { %v22646_v8 = vld [vmem:[%s32079_s7 + $0xec] ss:$16 sps:$4 sm:$0xff]  }
 0x583   : > { %v5087_v9 = vpop.f32.mrb[172].mxu0 }
 0x584   : > { %v26764_v52 = vadd.f32 %v5087_v9, %v4952_v57  ;;  %v21713_v13 = vpop.f32.mrb[173].mxu0  ;;  %v22617_v57 = vld [vmem:[%s32079_s7 + $0x60] ss:$16 sps:$4 sm:$0xff]  }
 0x585   : > { %v5090_v42 = vpop.f32.mrb[174].mxu0  ;;  %16388 = vmatpush1.bf16.msra.mxu1 %v22617_v57  ;;  %v22641_v9 = vld [vmem:[%s32079_s7 + $0xe0] ss:$16 sps:$4 sm:$0xff]   ;;  %v22644_v13 = vld [vmem:[%s32079_s7 + $0xe8] ss:$16 sps:$4 sm:$0xff]  }
 0x586   : > { %v26766_v55 = vadd.f32 %v5090_v42, %v4953_v15  ;;  %v21714_v54 = vpop.f32.mrb[175].mxu0  ;;  %16389 = vmatprep.subr.bf16.mxu1 %v22625_v26 }
 0x589   : > { %16390 = vmatpush1.bf16.msra.mxu1 %v22623_v47 }
 0x58a   : > { %16391 = vmatprep.subr.bf16.mxu1 %v22631_v49  ;;  %v22659_v49 = vld [vmem:[%s32079_s7 + $0x140] ss:$16 sps:$4 sm:$0xff]  }
 0x58b   : > { %v5095_v48 = vpop.f32.mrb[176].mxu0 }
 0x58c   : > { %v26792_v59 = vadd.f32 %v5095_v48, %v4954_v10  ;;  %v21717_v30 = vpop.f32.mrb[177].mxu0 }
 0x58d   : > { %v5098_v44 = vpop.f32.mrb[178].mxu0  ;;  %16392 = vmatpush1.bf16.msra.mxu1 %v22629_v62  ;;  %v22662_v62 = vld [vmem:[%s32079_s7 + $0x148] ss:$16 sps:$4 sm:$0xff]  }
 0x58e   : > { %v26794_v60 = vadd.f32 %v5098_v44, %v4955_v38  ;;  %v21718_v5 = vpop.f32.mrb[179].mxu0  ;;  %v22626_v38 = vld [vmem:[%s32079_s7 + $0x88] ss:$16 sps:$4 sm:$0xff]   ;;  %16393 = vmatprep.subr.bf16.mxu1 %v22637_v39 }
 0x58f   : > { %17415 = vmatpush1.bf16.msra.mxu0 %v22626_v38 }
 0x591   : > { %16394 = vmatpush1.bf16.msra.mxu1 %v22635_v27 }
 0x593   : > { %v5103_v63 = vpop.f32.mrb[180].mxu0 }
 0x594   : > { %v26820_v15 = vadd.f32 %v5103_v63, %v4956_v53  ;;  %v21721_v18 = vpop.f32.mrb[181].mxu0  ;;  %v22634_v53 = vld [vmem:[%s32079_s7 + $0xac] ss:$16 sps:$4 sm:$0xff]   ;;  %v22655_v63 = vld [vmem:[%s32079_s7 + $0x124] ss:$16 sps:$4 sm:$0xff]  }
 0x595   : > { %v5106_v36 = vpop.f32.mrb[182].mxu0  ;;  %17416 = vmatprep.subr.bf16.mxu0 %v22634_v53  ;;  %v22658_v18 = vld [vmem:[%s32079_s7 + $0x12c] ss:$16 sps:$4 sm:$0xff]   ;;  %v22661_v53 = vld [vmem:[%s32079_s7 + $0x144] ss:$16 sps:$4 sm:$0xff]  }
 0x596   : > { %v26822_v2 = vadd.f32 %v5106_v36, %v4957_v12  ;;  %v21722_v10 = vpop.f32.mrb[183].mxu0  ;;  %17417 = vmatpush1.bf16.msra.mxu0 %v22632_v16  ;;  %v22656_v36 = vld [vmem:[%s32079_s7 + $0x128] ss:$16 sps:$4 sm:$0xff]   ;;  %v22664_v16 = vld [vmem:[%s32079_s7 + $0x14c] ss:$16 sps:$4 sm:$0xff]  }
 0x59b   : > { %v5111_v12 = vpop.f32.mrb[184].mxu0 }
 0x59c   : > { %v5131_v50 = vadd.f32 %v5111_v12, %v26758_v22  ;;  %v21725_v1 = vpop.f32.mrb[185].mxu0  ;;  %v22640_v22 = vld [vmem:[%s32079_s7 + $0xcc] ss:$16 sps:$4 sm:$0xff]   ;;  %v22667_v12 = vld [vmem:[%s32079_s7 + $0x164] ss:$16 sps:$4 sm:$0xff]  }
 0x59d   : > { %v5114_v40 = vpop.f32.mrb[186].mxu0  ;;  %17418 = vmatprep.subr.bf16.mxu0 %v22640_v22  ;;  %v22665_v1 = vld [vmem:[%s32079_s7 + $0x160] ss:$16 sps:$4 sm:$0xff]  }
 0x59e   : > { %v5132_v4 = vadd.f32 %v5114_v40, %v26760_v56  ;;  %v21726_v34 = vpop.f32.mrb[187].mxu0  ;;  %v22643_v56 = vld [vmem:[%s32079_s7 + $0xe4] ss:$16 sps:$4 sm:$0xff]   ;;  %17419 = vmatpush1.bf16.msra.mxu0 %v22638_v25  ;;  %v22671_v22 = vld [vmem:[%s32079_s7 + $0x180] ss:$16 sps:$4 sm:$0xff]  }
 0x59f   : > { %16395 = vmatprep.subr.bf16.mxu1 %v22643_v56  ;;  %17420 = vmatprep.subr.bf16.mxu0 %v22646_v8  ;;  %v22673_v56 = vld [vmem:[%s32079_s7 + $0x184] ss:$16 sps:$4 sm:$0xff]   ;;  %v22674_v8 = vld [vmem:[%s32079_s7 + $0x188] ss:$16 sps:$4 sm:$0xff]  }
 0x5a0   : > { %16396 = vmatpush1.bf16.msra.mxu1 %v22641_v9  ;;  %v22676_v9 = vld [vmem:[%s32079_s7 + $0x18c] ss:$16 sps:$4 sm:$0xff]  }
 0x5a2   : > { %17421 = vmatpush1.bf16.msra.mxu0 %v22644_v13  ;;  %v22679_v13 = vld [vmem:[%s32079_s7 + $0x1a4] ss:$16 sps:$4 sm:$0xff]  }
 0x5a3   : > { %v5119_v42 = vpop.f32.mrb[188].mxu0  ;;  %17422 = vmatprep.subr.bf16.mxu0 %v22652_v21  ;;  %v22692_v21 = vld [vmem:[%s32079_s7 + $0x1e8] ss:$16 sps:$4 sm:$0xff]  }
 0x5a4   : > { %v5133_v54 = vadd.f32 %v5119_v42, %v26762_v28  ;;  %v21729_v58 = vpop.f32.mrb[189].mxu0 }
 0x5a5   : > { %v5122_v7 = vpop.f32.mrb[190].mxu0 }
 0x5a6   : > { %v21730_v32 = vpop.f32.mrb[191].mxu0 }
 0x5a7   : > { %v22677_v32 = vld [vmem:[%s32079_s7 + $0x1a0] ss:$16 sps:$4 sm:$0xff]  }
 0x5ab   : > { %v5291_v0 = vpop.f32.mrb[192].mxu0 }
 0x5ac   : > { %v26876_v17 = vadd.f32 %v5291_v0, %v26764_v52  ;;  %v21749_v14 = vpop.f32.mrb[193].mxu0 }
 0x5ad   : > { %v5294_v6 = vpop.f32.mrb[194].mxu0  ;;  %v22680_v14 = vld [vmem:[%s32079_s7 + $0x1a8] ss:$16 sps:$4 sm:$0xff]  }
 0x5ae   : > { %v26879_v35 = vadd.f32 %v5294_v6, %v26766_v55  ;;  %v21750_v48 = vpop.f32.mrb[195].mxu0  ;;  %v22647_v55 = vld [vmem:[%s32079_s7 + $0x100] ss:$16 sps:$4 sm:$0xff]  }
 0x5b3   : > { %v5299_v30 = vpop.f32.mrb[196].mxu0 }
 0x5b4   : > { %v26882_v44 = vadd.f32 %v5299_v30, %v26792_v59  ;;  %v21753_v28 = vpop.f32.mrb[197].mxu0  ;;  %v22649_v59 = vld [vmem:[%s32079_s7 + $0x104] ss:$16 sps:$4 sm:$0xff]  }
 0x5b5   : > { %v5302_v5 = vpop.f32.mrb[198].mxu0  ;;  %16397 = vmatprep.subr.bf16.mxu1 %v22649_v59  ;;  %v22685_v28 = vld [vmem:[%s32079_s7 + $0x1c4] ss:$16 sps:$4 sm:$0xff]  }
 0x5b6   : > { %v26885_v45 = vadd.f32 %v5302_v5, %v26794_v60  ;;  %v21754_v33 = vpop.f32.mrb[199].mxu0  ;;  %v22650_v60 = vld [vmem:[%s32079_s7 + $0x108] ss:$16 sps:$4 sm:$0xff]   ;;  %16398 = vmatpush1.bf16.msra.mxu1 %v22647_v55  ;;  %v22691_v55 = vld [vmem:[%s32079_s7 + $0x1e4] ss:$16 sps:$4 sm:$0xff]  }
 0x5b7   : > { %17423 = vmatpush1.bf16.msra.mxu0 %v22650_v60  ;;  %16399 = vmatprep.subr.bf16.mxu1 %v22655_v63  ;;  %v22686_v5 = vld [vmem:[%s32079_s7 + $0x1c8] ss:$16 sps:$4 sm:$0xff]   ;;  %v22694_v60 = vld [vmem:[%s32079_s7 + $0x1ec] ss:$16 sps:$4 sm:$0xff]  }
 0x5b8   : > { %17424 = vmatprep.subr.bf16.mxu0 %v22658_v18 }
 0x5bb   : > { %v5307_v61 = vpop.f32.mrb[200].mxu0  ;;  %17425 = vmatpush1.bf16.msra.mxu0 %v22656_v36 }
 0x5bc   : > { %v26888_v52 = vadd.f32 %v5307_v61, %v26820_v15  ;;  %v21757_v43 = vpop.f32.mrb[201].mxu0  ;;  %v22653_v15 = vld [vmem:[%s32079_s7 + $0x120] ss:$16 sps:$4 sm:$0xff]   ;;  %17426 = vmatprep.subr.bf16.mxu0 %v22664_v16  ;;  %v22688_v61 = vld [vmem:[%s32079_s7 + $0x1cc] ss:$16 sps:$4 sm:$0xff]  }
 0x5bd   : > { %v5310_v51 = vpop.f32.mrb[202].mxu0  ;;  %16400 = vmatpush1.bf16.msra.mxu1 %v22653_v15 }
 0x5be   : > { %v26903_v57 = vadd.f32 %v5310_v51, %v26822_v2  ;;  %v21758_v37 = vpop.f32.mrb[203].mxu0  ;;  %16401 = vmatprep.subr.bf16.mxu1 %v22661_v53 }
 0x5bf   : > { %17427 = vmatpush1.bf16.msra.mxu0 %v22662_v62  ;;  %v22700_v37 = vld [vmem:[%s32079_s7 + $0x20c] ss:$16 sps:$4 sm:$0xff]  }
 0x5c1   : > { %16402 = vmatpush1.bf16.msra.mxu1 %v22659_v49 }
 0x5c2   : > { %16403 = vmatprep.subr.bf16.mxu1 %v22667_v12 }
 0x5c3   : > { %v5315_v2 = vpop.f32.mrb[204].mxu0 }
 0x5c4   : > { %v26917_v10 = vadd.f32 %v5315_v2, %v5131_v50  ;;  %v21761_v47 = vpop.f32.mrb[205].mxu0  ;;  %v22670_v50 = vld [vmem:[%s32079_s7 + $0x16c] ss:$16 sps:$4 sm:$0xff]  }
 0x5c5   : > { %v5318_v26 = vpop.f32.mrb[206].mxu0  ;;  %17428 = vmatprep.subr.bf16.mxu0 %v22670_v50  ;;  %16404 = vmatpush1.bf16.msra.mxu1 %v22665_v1 }
 0x5c6   : > { %v26919_v38 = vadd.f32 %v5318_v26, %v5132_v4  ;;  %v21762_v29 = vpop.f32.mrb[207].mxu0  ;;  %v22668_v4 = vld [vmem:[%s32079_s7 + $0x168] ss:$16 sps:$4 sm:$0xff]   ;;  %16405 = vmatprep.subr.bf16.mxu1 %v22673_v56 }
 0x5c7   : > { %17429 = vmatpush1.bf16.msra.mxu0 %v22668_v4 }
 0x5c8   : > { %17430 = vmatprep.subr.bf16.mxu0 %v22676_v9 }
 0x5c9   : > { %16406 = vmatpush1.bf16.msra.mxu1 %v22671_v22 }
 0x5ca   : > { %16407 = vmatprep.subr.bf16.mxu1 %v22679_v13 }
 0x5cb   : > { %v5323_v40 = vpop.f32.mrb[208].mxu0  ;;  %17431 = vmatpush1.bf16.msra.mxu0 %v22674_v8 }
 0x5cc   : > { %v26945_v34 = vadd.f32 %v5323_v40, %v5133_v54  ;;  %v21765_v27 = vpop.f32.mrb[209].mxu0  ;;  %v22682_v54 = vld [vmem:[%s32079_s7 + $0x1ac] ss:$16 sps:$4 sm:$0xff]  }
 0x5cd   : > { %v5326_v39 = vpop.f32.mrb[210].mxu0  ;;  %17432 = vmatprep.subr.bf16.mxu0 %v22682_v54  ;;  %16408 = vmatpush1.bf16.msra.mxu1 %v22677_v32 }
 0x5ce   : > { %v21766_v25 = vpop.f32.mrb[211].mxu0  ;;  %16409 = vmatprep.subr.bf16.mxu1 %v22685_v28 }
 0x5cf   : > { %17433 = vmatpush1.bf16.msra.mxu0 %v22680_v14 }
 0x5d0   : > { %17434 = vmatprep.subr.bf16.mxu0 %v22688_v61 }
 0x5d3   : > { %v5456_v42 = vpop.f32.mrb[212].mxu0  ;;  %17435 = vmatpush1.bf16.msra.mxu0 %v22686_v5 }
 0x5d4   : > { %v5494_v58 = vadd.f32 %v5456_v42, %v26876_v17  ;;  %v21785_v7 = vpop.f32.mrb[213].mxu0  ;;  %v22683_v17 = vld [vmem:[%s32079_s7 + $0x1c0] ss:$16 sps:$4 sm:$0xff]   ;;  %17436 = vmatprep.subr.bf16.mxu0 %v22694_v60  ;;  %v25016_v60 = vmov 1966171168  }
 0x5d5   : > { %v5459_v0 = vpop.f32.mrb[214].mxu0  ;;  %16410 = vmatpush1.bf16.msra.mxu1 %v22683_v17 }
 0x5d6   : > { %v5495_v6 = vadd.f32 %v5459_v0, %v26879_v35  ;;  %v21786_v48 = vpop.f32.mrb[215].mxu0  ;;  %16411 = vmatprep.subr.bf16.mxu1 %v22691_v55 }
 0x5d7   : > { %17437 = vmatpush1.bf16.msra.mxu0 %v22692_v21  ;;  %v6069_v21 = vlaneseq }
 0x5d8   : > { %17447 = vmatprep.subr.bf16.mxu0 %v22700_v37 }
 0x5db   : > { %v5464_v30 = vpop.f32.mrb[216].mxu0 }
 0x5dc   : > { %v5496_v33 = vadd.f32 %v5464_v30, %v26882_v44  ;;  %v21789_v35 = vpop.f32.mrb[217].mxu0  ;;  %v22689_v44 = vld [vmem:[%s32079_s7 + $0x1e0] ss:$16 sps:$4 sm:$0xff]  }
 0x5dd   : > { %v5467_v43 = vpop.f32.mrb[218].mxu0  ;;  %16412 = vmatpush1.bf16.msra.mxu1 %v22689_v44  ;;  %v27032_v44 = vld [vmem:[%s32078_s6] ss:$0 sm:$0xff] }
 0x5de   : > { %v5497_v59 = vadd.f32 %v5467_v43, %v26885_v45  ;;  %v21790_v51 = vpop.f32.mrb[219].mxu0  ;;  %v22697_v45 = vld [vmem:[%s32079_s7 + $0x204] ss:$16 sps:$4 sm:$0xff]  }
 0x5df   : > { %16422 = vmatprep.subr.bf16.mxu1 %v22697_v45 }
 0x5e3   : > { %v5472_v63 = vpop.f32.mrb[220].mxu0 }
 0x5e4   : > { %v5498_v15 = vadd.f32 %v5472_v63, %v26888_v52  ;;  %v21793_v18 = vpop.f32.mrb[221].mxu0 }
 0x5e5   : > { %v5475_v36 = vpop.f32.mrb[222].mxu0 }
 0x5e6   : > { %v5499_v2 = vadd.f32 %v5475_v36, %v26903_v57  ;;  %v21794_v47 = vpop.f32.mrb[223].mxu0 }
 0x5eb   : > { %v5480_v26 = vpop.f32.mrb[224].mxu0 }
 0x5ec   : > { %v5500_v29 = vadd.f32 %v5480_v26, %v26917_v10  ;;  %v21797_v49 = vpop.f32.mrb[225].mxu0 }
 0x5ed   : > { %v5483_v53 = vpop.f32.mrb[226].mxu0 }
 0x5ee   : > { %v5501_v62 = vadd.f32 %v5483_v53, %v26919_v38  ;;  %v21798_v16 = vpop.f32.mrb[227].mxu0 }
 0x5ef   : > { %v22715_v16 = vld [vmem:[%s32079_s7 + $0x264] ss:$16 sps:$4 sm:$0xff]  }
 0x5f3   : > { %v5488_v12 = vpop.f32.mrb[228].mxu0 }
 0x5f4   : > { %v5502_v50 = vadd.f32 %v5488_v12, %v26945_v34  ;;  %v21801_v1 = vpop.f32.mrb[229].mxu0  ;;  %v6062_v12 = vld [vmem:[#allocation5] sm:$0x1] }
 0x5f5   : > { %v5491_v40 = vpop.f32.mrb[230].mxu0 }
 0x5f6   : > { %v21802_v52 = vpop.f32.mrb[231].mxu0 }
 0x5fb   : > { %v5620_v4 = vpop.f32.mrb[232].mxu0 }
 0x5fc   : > { %v5658_v27 = vadd.f32 %v5620_v4, %v5494_v58  ;;  %v21821_v39 = vpop.f32.mrb[233].mxu0 }
 0x5fd   : > { %v5623_v25 = vpop.f32.mrb[234].mxu0 }
 0x5fe   : > { %v5659_v57 = vadd.f32 %v5623_v25, %v5495_v6  ;;  %v21822_v22 = vpop.f32.mrb[235].mxu0  ;;  %v5839_v56 = vadd.f32 %v26633_v3, %v5658_v27 }
 0x600   : > { %v5840_v10 = vadd.f32 %v26641_v23, %v5659_v57 }
 0x603   : > { %v5628_v8 = vpop.f32.mrb[236].mxu0 }
 0x604   : > { %v5660_v9 = vadd.f32 %v5628_v8, %v5496_v33  ;;  %v21825_v38 = vpop.f32.mrb[237].mxu0 }
 0x605   : > { %v5631_v13 = vpop.f32.mrb[238].mxu0  ;;  %v6086_v38 = vld [vmem:[#allocation5 + $0x1] sm:$0x1] }
 0x606   : > { %v5661_v42 = vadd.f32 %v5631_v13, %v5497_v59  ;;  %v21826_v54 = vpop.f32.mrb[239].mxu0  ;;  %v5841_v34 = vadd.f32 %v26653_v19, %v5660_v9 }
 0x608   : > { %v5842_v7 = vadd.f32 %v26658_v46, %v5661_v42  ;;  %v6098_v42 = vld [vmem:[#allocation5 + $0x2] sm:$0x1] }
 0x60b   : > { %v5636_v32 = vpop.f32.mrb[240].mxu0 }
 0x60c   : > { %v5662_v58 = vadd.f32 %v5636_v32, %v5498_v15  ;;  %v21829_v0 = vpop.f32.mrb[241].mxu0  ;;  %v6112_v32 = vld [vmem:[#allocation5 + $0x4] sm:$0x1] }
 0x60d   : > { %v5639_v14 = vpop.f32.mrb[242].mxu0 }
 0x60e   : > { %v5663_v6 = vadd.f32 %v5639_v14, %v5499_v2  ;;  %v21830_v48 = vpop.f32.mrb[243].mxu0  ;;  %v27015_v3 = vadd.f32 %v26665_v20, %v5662_v58  ;;  %v27035_v2 = vshrl.u32 %v6069_v21, 7  ;;  %v6155_v21 = vld [vmem:[#allocation5 + $0x8] sm:$0x1] }
 0x60f   : > { %v6121_v48 = vld [vmem:[#allocation5 + $0x5] sm:$0x1] }
 0x610   : > { %v27018_v23 = vadd.f32 %v26672_v31, %v5663_v6 }
 0x613   : > { %v5644_v17 = vpop.f32.mrb[244].mxu0 }
 0x614   : > { %v5664_v30 = vadd.f32 %v5644_v17, %v5500_v29  ;;  %v21833_v28 = vpop.f32.mrb[245].mxu0 }
 0x615   : > { %v5647_v5 = vpop.f32.mrb[246].mxu0 }
 0x616   : > { %v5665_v33 = vadd.f32 %v5647_v5, %v5501_v62  ;;  %v21834_v19 = vpop.f32.mrb[247].mxu0  ;;  %v27021_v46 = vadd.f32 %v26684_v41, %v5664_v30  ;;  %v6067_v41 = vunpack.c.l.s4 %v25016_v60  ;;  %v6146_v30 = vld [vmem:[#allocation5 + $0x7] sm:$0x1]  ;;  %v6126_v5 = vld [vmem:[#allocation5 + $0x6] sm:$0x1] }
 0x617   : > { %v6167_v19 = vld [vmem:[#allocation5 + $0x9] sm:$0x1] }
 0x618   : > { %v27024_v35 = vadd.f32 %v26690_v24, %v5665_v33  ;;  %v6068_v36 = vunpack.c.0.s8 %v6067_v41 }
 0x61a   : > { %v27039_v29 = vsub.s32 %v6068_v36, %v27035_v2 }
 0x61b   : > { %v5652_v61 = vpop.f32.mrb[248].mxu0 }
 0x61c   : > { %v5666_v43 = vadd.f32 %v5652_v61, %v5502_v50  ;;  %v21837_v55 = vpop.f32.mrb[249].mxu0 }
 0x61d   : > { %v5655_v20 = vpop.f32.mrb[250].mxu0 }
 0x61e   : > { %v21838_v59 = vpop.f32.mrb[251].mxu0  ;;  %v27027_v31 = vadd.f32 %v26705_v11, %v5666_v43 }
 0x623   : > { %v5964_v51 = vpop.f32.mrb[252].mxu0 }
 0x624   : > { %v6002_v45 = vadd.f32 %v5964_v51, %v5839_v56  ;;  %v21893_v24 = vpop.f32.mrb[253].mxu0 }
 0x625   : > { %v5967_v37 = vpop.f32.mrb[254].mxu0 }
 0x626   : > { %v6018_v63 = vadd.f32 %v27032_v44, %v6002_v45  ;;  %v6003_v15 = vadd.f32 %v5967_v37, %v5840_v10  ;;  %v21894_v18 = vpop.f32.mrb[255].mxu0  ;;  %v6176_v45 = vld [vmem:[#allocation5 + $0xa] sm:$0x1] }
 0x627   : > { %v6181_v18 = vld [vmem:[#allocation5 + $0xb] sm:$0x1] }
 0x628   : > { %v6036_v11 = vmul.f32 0.01, %v6018_v63  ;;  %v6019_v47 = vadd.f32 %v27032_v44, %v6003_v15  ;;  %vm6027_vm8 = vcmp.gt.f32.partialorder %v6018_v63, 0.0 }
 0x62a   : > { %vm6028_vm10 = vcmp.gt.f32.partialorder %v6019_v47, 0.0  ;;  %v6037_v26 = vmul.f32 0.01, %v6019_v47  ;;  %v6045_v53 = vsel %vm6027_vm8, %v6018_v63, %v6036_v11 }
 0x62b   : > { %v5972_v49 = vpop.f32.mrb[0].mxu0 }
 0x62c   : > { %v6046_v62 = vsel %vm6028_vm10, %v6019_v47, %v6037_v26  ;;  %v6004_v50 = vadd.f32 %v5972_v49, %v5841_v34  ;;  %v21897_v1 = vpop.f32.mrb[1].mxu0 }
 0x62d   : > { %v6054_v40 = vpack.c.bf16 %v6046_v62, %v6045_v53  ;;  %v19128_v52 = vpack.c.bf16 %v6046_v62, %v6046_v62  ;;  %v5975_v4 = vpop.f32.mrb[2].mxu0  ;;  %v6193_v53 = vld [vmem:[#allocation5 + $0xd] sm:$0x1]  ;;  %v6190_v1 = vld [vmem:[#allocation5 + $0xc] sm:$0x1] }
 0x62e   : > { %v6020_v27 = vadd.f32 %v27032_v44, %v6004_v50  ;;  %v6005_v39 = vadd.f32 %v5975_v4, %v5842_v7  ;;  %v21898_v25 = vpop.f32.mrb[3].mxu0  ;;  %v6107_v7 = vld [vmem:[#allocation5 + $0x3] sm:$0x1] }
 0x62f   : > { %v6063_v57 = vsel %vm27041_vm11, %v6054_v40, %v6062_v12  ;;  %v6072_v22 = vrot.slane %v6054_v40, %v27039_v29  ;;  %v6136_v56 = vrot.slane %v19128_v52, %v27039_v29 }
 0x630   : > { %6064 = vst [vmem:[#allocation5] sm:$0x1] %v6063_v57  ;;  %vm6029_vm12 = vcmp.gt.f32.partialorder %v6020_v27, 0.0  ;;  %v6038_v10 = vmul.f32 0.01, %v6020_v27  ;;  %v6021_v8 = vadd.f32 %v27032_v44, %v6005_v39 }
 0x631   : > { %v6079_v9 = vrot.slane %v6072_v22, %v27039_v29  ;;  %v6089_v13 = vcombine.high %v6072_v22, %v6072_v22  ;;  %v6137_v54 = vcombine.high %v6136_v56, %v6136_v56  ;;  %v6164_v34 = vrot.slane %v6136_v56, %v27039_v29 }
 0x632   : > { %vm6030_vm13 = vcmp.gt.f32.partialorder %v6021_v8, 0.0  ;;  %v6039_v58 = vmul.f32 0.01, %v6021_v8  ;;  %v6047_v61 = vsel %vm6029_vm12, %v6020_v27, %v6038_v10 }
 0x633   : > { %v6081_v0 = vshrl.u32 %v6079_v9, 16  ;;  %v6096_v14 = vrot.slane %v6089_v13, %v27039_v29  ;;  %v6110_v6 = vcombine.high %v6079_v9, %v6079_v9  ;;  %v6144_v17 = vrot.slane %v6137_v54, %v27039_v29  ;;  %v5980_v28 = vpop.f32.mrb[4].mxu0 }
 0x634   : > { %v6165_v33 = vcombine.high %v6164_v34, %v6164_v34  ;;  %v6048_v43 = vsel %vm6030_vm13, %v6021_v8, %v6039_v58  ;;  %v6006_v55 = vadd.f32 %v5980_v28, %v27015_v3  ;;  %v21901_v20 = vpop.f32.mrb[5].mxu0 }
 0x635   : > { %v6087_v59 = vsel %vm27041_vm11, %v6081_v0, %v6086_v38  ;;  %v6099_v51 = vsel %vm27041_vm11, %v6096_v14, %v6098_v42  ;;  %v6102_v60 = vshrl.u32 %v6096_v14, 16  ;;  %v6113_v41 = vsel %vm27041_vm11, %v6110_v6, %v6112_v32  ;;  %v5983_v24 = vpop.f32.mrb[6].mxu0  ;;  %v6263_v42 = vld [vmem:[#allocation5 + $0x12] sm:$0x1] }
 0x636   : > { %6088 = vst [vmem:[#allocation5 + $0x1] sm:$0x1] %v6087_v59  ;;  %6100 = vst [vmem:[#allocation5 + $0x2] sm:$0x1] %v6099_v51  ;;  %v6116_v37 = vshrl.u32 %v6110_v6, 16  ;;  %v6124_v63 = vcombine.high %v6096_v14, %v6096_v14  ;;  %v6147_v3 = vsel %vm27041_vm11, %v6144_v17, %v6146_v30  ;;  %v6150_v15 = vshrl.u32 %v6144_v17, 16 }
 0x637   : > { %6114 = vst [vmem:[#allocation5 + $0x4] sm:$0x1] %v6113_v41  ;;  %v21902_v36 = vpop.f32.mrb[7].mxu0  ;;  %v6108_v11 = vsel %vm27041_vm11, %v6102_v60, %v6107_v7  ;;  %6148 = vst [vmem:[#allocation5 + $0x7] sm:$0x1] %v6147_v3  ;;  %v6168_v47 = vsel %vm27041_vm11, %v6165_v33, %v6167_v19  ;;  %v6171_v26 = vshrl.u32 %v6165_v33, 16  ;;  %v6179_v49 = vcombine.high %v6144_v17, %v6144_v17 }
 0x638   : > { %6109 = vst [vmem:[#allocation5 + $0x3] sm:$0x1] %v6108_v11  ;;  %v6122_v62 = vsel %vm27041_vm11, %v6116_v37, %v6121_v48  ;;  %v6127_v12 = vsel %vm27041_vm11, %v6124_v63, %v6126_v5  ;;  %v6156_v50 = vsel %vm27041_vm11, %v6150_v15, %v6155_v21  ;;  %6169 = vst [vmem:[#allocation5 + $0x9] sm:$0x1] %v6168_v47  ;;  %v6213_v7 = vld [vmem:[#allocation5 + $0xe] sm:$0x1] }
 0x639   : > { %v6055_v40 = vpack.c.bf16 %v6048_v43, %v6047_v61  ;;  %6123 = vst [vmem:[#allocation5 + $0x5] sm:$0x1] %v6122_v62  ;;  %6128 = vst [vmem:[#allocation5 + $0x6] sm:$0x1] %v6127_v12  ;;  %v6177_v52 = vsel %vm27041_vm11, %v6171_v26, %v6176_v45  ;;  %v6182_v4 = vsel %vm27041_vm11, %v6179_v49, %v6181_v18  ;;  %v6185_v27 = vshrl.u32 %v6179_v49, 16 }
 0x63a   : > { %6157 = vst [vmem:[#allocation5 + $0x8] sm:$0x1] %v6156_v50  ;;  %v19134_v39 = vpack.c.bf16 %v6048_v43, %v6048_v43  ;;  %6178 = vst [vmem:[#allocation5 + $0xa] sm:$0x1] %v6177_v52  ;;  %v6022_v22 = vadd.f32 %v27032_v44, %v6006_v55  ;;  %v6007_v56 = vadd.f32 %v5983_v24, %v27018_v23  ;;  %v6272_v17 = vld [vmem:[#allocation5 + $0x13] sm:$0x1] }
 0x63b   : > { %6183 = vst [vmem:[#allocation5 + $0xb] sm:$0x1] %v6182_v4  ;;  %v6194_v25 = vsel %vm27041_vm11, %v6055_v40, %v6193_v53  ;;  %v6203_v57 = vrot.slane %v6055_v40, %v27039_v29  ;;  %v6191_v10 = vsel %vm27041_vm11, %v6185_v27, %v6190_v1  ;;  %v5988_v9 = vpop.f32.mrb[8].mxu0  ;;  %v6284_v30 = vld [vmem:[#allocation5 + $0x14] sm:$0x1] }
 0x63c   : > { %6195 = vst [vmem:[#allocation5 + $0xd] sm:$0x1] %v6194_v25  ;;  %v6254_v8 = vrot.slane %v19134_v39, %v27039_v29  ;;  %6192 = vst [vmem:[#allocation5 + $0xc] sm:$0x1] %v6191_v10  ;;  %vm6031_vm14 = vcmp.gt.f32.partialorder %v6022_v22, 0.0  ;;  %v21905_v34 = vpop.f32.mrb[9].mxu0  ;;  %v6023_v23 = vadd.f32 %v27032_v44, %v6007_v56  ;;  %v6008_v0 = vadd.f32 %v5988_v9, %v27021_v46 }
 0x63d   : > { %v6210_v38 = vrot.slane %v6203_v57, %v27039_v29  ;;  %v6225_v13 = vcombine.high %v6203_v57, %v6203_v57  ;;  %v6040_v54 = vmul.f32 0.01, %v6022_v22  ;;  %v5991_v14 = vpop.f32.mrb[10].mxu0  ;;  %v6222_v19 = vld [vmem:[#allocation5 + $0xf] sm:$0x1] }
 0x63e   : > { %v6261_v32 = vrot.slane %v6254_v8, %v27039_v29  ;;  %v6275_v58 = vcombine.high %v6254_v8, %v6254_v8  ;;  %v6009_v5 = vadd.f32 %v5991_v14, %v27024_v35  ;;  %v21906_v33 = vpop.f32.mrb[11].mxu0  ;;  %v6235_v61 = vld [vmem:[#allocation5 + $0x10] sm:$0x1]  ;;  %vm6032_vm15 = vcmp.gt.f32.partialorder %v6023_v23, 0.0  ;;  %v6289_v60 = vld [vmem:[#allocation5 + $0x15] sm:$0x1] }
 0x63f   : > { %v6211_v6 = vcombine.high %v6210_v38, %v6210_v38  ;;  %v6232_v48 = vrot.slane %v6225_v13, %v27039_v29  ;;  %v6049_v28 = vsel %vm6031_vm14, %v6022_v22, %v6040_v54  ;;  %v6041_v41 = vmul.f32 0.01, %v6023_v23  ;;  %v6244_v35 = vld [vmem:[#allocation5 + $0x11] sm:$0x1]  ;;  %v6298_v18 = vld [vmem:[#allocation5 + $0x16] sm:$0x1] }
 0x640   : > { %v6264_v43 = vsel %vm27041_vm11, %v6261_v32, %v6263_v42  ;;  %v6267_v55 = vshrl.u32 %v6261_v32, 16  ;;  %v6282_v20 = vrot.slane %v6275_v58, %v27039_v29  ;;  %v6024_v37 = vadd.f32 %v27032_v44, %v6008_v0  ;;  %v6301_v11 = vld [vmem:[#allocation5 + $0x17] sm:$0x1]  ;;  %v27119_v57 = vld [vmem:[#allocation5] sm:$0xff]  ;;  %v6370_v22 = vld [vmem:[#allocation5 + $0x1c] sm:$0x1] }
 0x641   : > { %v6214_v46 = vsel %vm27041_vm11, %v6211_v6, %v6213_v7  ;;  %v6217_v59 = vshrl.u32 %v6211_v6, 16  ;;  %v6233_v51 = vcombine.high %v6232_v48, %v6232_v48  ;;  %6265 = vst [vmem:[#allocation5 + $0x12] sm:$0x1] %v6264_v43  ;;  %v6050_v36 = vsel %vm6032_vm15, %v6023_v23, %v6041_v41  ;;  %v6325_v38 = vld [vmem:[#allocation5 + $0x18] sm:$0x1] }
 0x642   : > { %6215 = vst [vmem:[#allocation5 + $0xe] sm:$0x1] %v6214_v46  ;;  %v6273_v21 = vsel %vm27041_vm11, %v6267_v55, %v6272_v17  ;;  %v6285_v45 = vsel %vm27041_vm11, %v6282_v20, %v6284_v30  ;;  %v6287_v24 = vcombine.high %v6282_v20, %v6282_v20  ;;  %v6056_v49 = vpack.c.bf16 %v6050_v36, %v6049_v28  ;;  %v6337_v34 = vld [vmem:[#allocation5 + $0x19] sm:$0x1]  ;;  %v6351_v7 = vld [vmem:[#allocation5 + $0x1b] sm:$0x1] }
 0x643   : > { %v6223_v63 = vsel %vm27041_vm11, %v6217_v59, %v6222_v19  ;;  %v6236_v3 = vsel %vm27041_vm11, %v6233_v51, %v6235_v61  ;;  %v6239_v15 = vshrl.u32 %v6233_v51, 16  ;;  %6274 = vst [vmem:[#allocation5 + $0x13] sm:$0x1] %v6273_v21  ;;  %6286 = vst [vmem:[#allocation5 + $0x14] sm:$0x1] %v6285_v45  ;;  %v19139_v53 = vpack.c.bf16 %v6050_v36, %v6050_v36  ;;  %v5996_v62 = vpop.f32.mrb[12].mxu0 }
 0x644   : > { %6224 = vst [vmem:[#allocation5 + $0xf] sm:$0x1] %v6223_v63  ;;  %6237 = vst [vmem:[#allocation5 + $0x10] sm:$0x1] %v6236_v3  ;;  %v6290_v47 = vsel %vm27041_vm11, %v6287_v24, %v6289_v60  ;;  %v6293_v26 = vshrl.u32 %v6287_v24, 16  ;;  %vm6033_vm0 = vcmp.gt.f32.partialorder %v6024_v37, 0.0  ;;  %v6025_v1 = vadd.f32 %v27032_v44, %v6009_v5 }
 0x645   : > { %v6245_v12 = vsel %vm27041_vm11, %v6239_v15, %v6244_v35  ;;  %6291 = vst [vmem:[#allocation5 + $0x15] sm:$0x1] %v6290_v47  ;;  %v6042_v50 = vmul.f32 0.01, %v6024_v37  ;;  %v21909_v40 = vpop.f32.mrb[13].mxu0  ;;  %v6302_v4 = vsel %vm27041_vm11, %v6056_v49, %v6301_v11  ;;  %v6311_v27 = vrot.slane %v6056_v49, %v27039_v29 }
 0x646   : > { %6246 = vst [vmem:[#allocation5 + $0x11] sm:$0x1] %v6245_v12  ;;  %v6299_v52 = vsel %vm27041_vm11, %v6293_v26, %v6298_v18  ;;  %v6361_v39 = vrot.slane %v19139_v53, %v27039_v29  ;;  %v5999_v25 = vpop.f32.mrb[14].mxu0  ;;  %6303 = vst [vmem:[#allocation5 + $0x17] sm:$0x1] %v6302_v4  ;;  %vm6034_vm1 = vcmp.gt.f32.partialorder %v6025_v1, 0.0  ;;  %v6010_v10 = vadd.f32 %v5996_v62, %v27027_v31 }
 0x647   : > { %6300 = vst [vmem:[#allocation5 + $0x16] sm:$0x1] %v6299_v52  ;;  %v6043_v56 = vmul.f32 0.01, %v6025_v1  ;;  %v21910_v8 = vpop.f32.mrb[15].mxu0  ;;  %v6318_v9 = vrot.slane %v6311_v27, %v27039_v29  ;;  %v6328_v13 = vcombine.high %v6311_v27, %v6311_v27  ;;  %v6051_v58 = vsel %vm6033_vm0, %v6024_v37, %v6042_v50 }
 0x648   : > { %v6368_v42 = vrot.slane %v6361_v39, %v27039_v29  ;;  %v6382_v54 = vcombine.high %v6361_v39, %v6361_v39  ;;  %v6379_v32 = vld [vmem:[#allocation5 + $0x1d] sm:$0x1]  ;;  %v6026_v0 = vadd.f32 %v27032_v44, %v6010_v10  ;;  %v27128_v14 = vrot.slane %v27119_v57, %v27039_v29  ;;  %v6391_v30 = vld [vmem:[#allocation5 + $0x1e] sm:$0x1]  ;;  %v6405_v28 = vld [vmem:[#allocation5 + $0x20] sm:$0x1] }
 0x649   : > { %v6052_v23 = vsel %vm6034_vm1, %v6025_v1, %v6043_v56  ;;  %v6320_v31 = vshrl.u32 %v6318_v9, 16  ;;  %v6335_v6 = vrot.slane %v6328_v13, %v27039_v29  ;;  %v6349_v48 = vcombine.high %v6318_v9, %v6318_v9  ;;  %v6346_v5 = vld [vmem:[#allocation5 + $0x1a] sm:$0x1]  ;;  %v6400_v59 = vld [vmem:[#allocation5 + $0x1f] sm:$0x1] }
 0x64a   : > { %v6371_v17 = vsel %vm27041_vm11, %v6368_v42, %v6370_v22  ;;  %v6374_v33 = vshrl.u32 %v6368_v42, 16  ;;  %v6389_v19 = vrot.slane %v6382_v54, %v27039_v29  ;;  %v6403_v61 = vcombine.high %v6368_v42, %v6368_v42  ;;  %v6414_v21 = vld [vmem:[#allocation5 + $0x21] sm:$0x1]  ;;  %v6419_v45 = vld [vmem:[#allocation5 + $0x22] sm:$0x1] }
 0x64b   : > { %6372 = vst [vmem:[#allocation5 + $0x1c] sm:$0x1] %v6371_v17  ;;  %v6057_v44 = vpack.c.bf16 %v6052_v23, %v6051_v58  ;;  %v6326_v43 = vsel %vm27041_vm11, %v6320_v31, %v6325_v38  ;;  %v6338_v55 = vsel %vm27041_vm11, %v6335_v6, %v6337_v34  ;;  %v6341_v20 = vshrl.u32 %v6335_v6, 16  ;;  %v6446_v53 = vld [vmem:[#allocation5 + $0x23] sm:$0x1] }
 0x64c   : > { %v6352_v46 = vsel %vm27041_vm11, %v6349_v48, %v6351_v7  ;;  %6327 = vst [vmem:[#allocation5 + $0x18] sm:$0x1] %v6326_v43  ;;  %6339 = vst [vmem:[#allocation5 + $0x19] sm:$0x1] %v6338_v55  ;;  %v6380_v51 = vsel %vm27041_vm11, %v6374_v33, %v6379_v32  ;;  %v6392_v60 = vsel %vm27041_vm11, %v6389_v19, %v6391_v30  ;;  %v6395_v41 = vshrl.u32 %v6389_v19, 16 }
 0x64d   : > { %6353 = vst [vmem:[#allocation5 + $0x1b] sm:$0x1] %v6352_v46  ;;  %v6406_v35 = vsel %vm27041_vm11, %v6403_v61, %v6405_v28  ;;  %v6347_v24 = vsel %vm27041_vm11, %v6341_v20, %v6346_v5  ;;  %6381 = vst [vmem:[#allocation5 + $0x1d] sm:$0x1] %v6380_v51  ;;  %v6409_v37 = vshrl.u32 %v6403_v61, 16  ;;  %v6417_v63 = vcombine.high %v6389_v19, %v6389_v19 }
 0x64e   : > { %6393 = vst [vmem:[#allocation5 + $0x1e] sm:$0x1] %v6392_v60  ;;  %6407 = vst [vmem:[#allocation5 + $0x20] sm:$0x1] %v6406_v35  ;;  %v6429_v3 = vrot.slane %v6057_v44, %v27039_v29  ;;  %v6401_v15 = vsel %vm27041_vm11, %v6395_v41, %v6400_v59  ;;  %v19146_v18 = vpack.c.bf16 %v6052_v23, %v6052_v23  ;;  %vm6035_vm4 = vcmp.gt.f32.partialorder %v6026_v0, 0.0 }
 0x64f   : > { %6348 = vst [vmem:[#allocation5 + $0x1a] sm:$0x1] %v6347_v24  ;;  %v6044_v36 = vmul.f32 0.01, %v6026_v0  ;;  %6402 = vst [vmem:[#allocation5 + $0x1f] sm:$0x1] %v6401_v15  ;;  %v6415_v11 = vsel %vm27041_vm11, %v6409_v37, %v6414_v21  ;;  %v6420_v47 = vsel %vm27041_vm11, %v6417_v63, %v6419_v45  ;;  %v8178_v1 = vcombine.high %v27128_v14, %v27128_v14 }
 0x650   : > { %v6430_v26 = vcombine.high %v6429_v3, %v6429_v3  ;;  %v6437_v49 = vrot.slane %v6429_v3, %v27039_v29  ;;  %6416 = vst [vmem:[#allocation5 + $0x21] sm:$0x1] %v6415_v11  ;;  %6421 = vst [vmem:[#allocation5 + $0x22] sm:$0x1] %v6420_v47  ;;  %v6460_v62 = vld [vmem:[#allocation5 + $0x25] sm:$0x1]  ;;  %v6493_v12 = vrot.slane %v19146_v18, %v27039_v29 }
 0x651   : > { %v6053_v50 = vsel %vm6035_vm4, %v6026_v0, %v6044_v36  ;;  %v6455_v52 = vld [vmem:[#allocation5 + $0x24] sm:$0x1]  ;;  %v6469_v27 = vld [vmem:[#allocation5 + $0x26] sm:$0x1]  ;;  %v6502_v39 = vld [vmem:[#allocation5 + $0x29] sm:$0x1]  ;;  %v27163_v38 = vrot.slane %v27128_v14, %v27039_v29  ;;  %v8200_v13 = vrot.slane %v8178_v1, %v27039_v29 }
 0x652   : > { %v6444_v40 = vrot.slane %v6430_v26, %v27039_v29  ;;  %v6458_v4 = vcombine.high %v6437_v49, %v6437_v49  ;;  %v6058_v25 = vpack.c.bf16 %v6053_v50, %v6053_v50  ;;  %v6474_v22 = vld [vmem:[#allocation5 + $0x27] sm:$0x1]  ;;  %v6500_v56 = vrot.slane %v6493_v12, %v27039_v29  ;;  %v6507_v10 = vld [vmem:[#allocation5 + $0x2a] sm:$0x1]  ;;  %v6541_v9 = vld [vmem:[#allocation5 + $0x2e] sm:$0x1] }
 0x653   : > { %v6519_v8 = vcombine.high %v6493_v12, %v6493_v12  ;;  %v22695_v32 = vld [vmem:[%s32079_s7 + $0x200] ss:$16 sps:$4 sm:$0xff]   ;;  %v22698_v58 = vld [vmem:[%s32079_s7 + $0x208] ss:$16 sps:$4 sm:$0xff]   ;;  %16413 = vmatprep.mubr.bf16.mxu1 %v8200_v13  ;;  %v22703_v6 = vld [vmem:[%s32079_s7 + $0x224] ss:$16 sps:$4 sm:$0xff]   ;;  %17438 = vmatprep.mubr.bf16.mxu0 %v8200_v13  ;;  %v8210_v63 = vcombine.high %v8200_v13, %v8200_v13 }
 0x654   : > { %v6447_v42 = vsel %vm27041_vm11, %v6444_v40, %v6446_v53  ;;  %v6450_v54 = vshrl.u32 %v6444_v40, 16  ;;  %v6461_v34 = vsel %vm27041_vm11, %v6458_v4, %v6460_v62  ;;  %v6464_v7 = vshrl.u32 %v6458_v4, 16  ;;  %v22706_v48 = vld [vmem:[%s32079_s7 + $0x22c] ss:$16 sps:$4 sm:$0xff]   ;;  %v6483_v28 = vld [vmem:[#allocation5 + $0x28] sm:$0x1]  ;;  %16414 = vmatmul.mubr.bf16.vlgmr.msra.gmra.mrb[32].mxu1 %v27163_v38  ;;  %17439 = vmatmul.mubr.bf16.vlgmr.msra.gmra.mrb[16].mxu0 %v27163_v38 }
 0x655   : > { %6448 = vst [vmem:[#allocation5 + $0x23] sm:$0x1] %v6447_v42  ;;  %6462 = vst [vmem:[#allocation5 + $0x25] sm:$0x1] %v6461_v34  ;;  %v6472_v23 = vcombine.high %v6444_v40, %v6444_v40  ;;  %v6503_v0 = vsel %vm27041_vm11, %v6500_v56, %v6502_v39  ;;  %v6505_v14 = vcombine.high %v6500_v56, %v6500_v56  ;;  %v6516_v5 = vld [vmem:[#allocation5 + $0x2b] sm:$0x1]  ;;  %16423 = vmatpush1.bf16.msra.mxu1 %v22695_v32 }
 0x656   : > { %v6526_v31 = vrot.slane %v6519_v8, %v27039_v29  ;;  %v6456_v17 = vsel %vm27041_vm11, %v6450_v54, %v6455_v52  ;;  %v6470_v30 = vsel %vm27041_vm11, %v6464_v7, %v6469_v27  ;;  %6504 = vst [vmem:[#allocation5 + $0x29] sm:$0x1] %v6503_v0  ;;  %v6542_v33 = vsel %vm27041_vm11, %v6058_v25, %v6541_v9  ;;  %v6529_v20 = vld [vmem:[#allocation5 + $0x2c] sm:$0x1]  ;;  %v6538_v46 = vld [vmem:[#allocation5 + $0x2d] sm:$0x1] }
 0x657   : > { %v6551_v19 = vrot.slane %v6058_v25, %v27039_v29  ;;  %6457 = vst [vmem:[#allocation5 + $0x24] sm:$0x1] %v6456_v17  ;;  %6471 = vst [vmem:[#allocation5 + $0x26] sm:$0x1] %v6470_v30  ;;  %v6475_v61 = vsel %vm27041_vm11, %v6472_v23, %v6474_v22  ;;  %v6478_v44 = vshrl.u32 %v6472_v23, 16  ;;  %v6508_v43 = vsel %vm27041_vm11, %v6505_v14, %v6507_v10 }
 0x658   : > { %v6511_v55 = vshrl.u32 %v6505_v14, 16  ;;  %6543 = vst [vmem:[#allocation5 + $0x2e] sm:$0x1] %v6542_v33  ;;  %6476 = vst [vmem:[#allocation5 + $0x27] sm:$0x1] %v6475_v61  ;;  %v6527_v59 = vcombine.high %v6526_v31, %v6526_v31  ;;  %17448 = vmatpush1.bf16.msra.mxu0 %v22698_v58  ;;  %16424 = vmatprep.subr.bf16.mxu1 %v22703_v6 }
 0x659   : > { %6509 = vst [vmem:[#allocation5 + $0x2a] sm:$0x1] %v6508_v43  ;;  %v6558_v51 = vrot.slane %v6551_v19, %v27039_v29  ;;  %v6565_v60 = vld [vmem:[#allocation5 + $0x2f] sm:$0x1]  ;;  %v6568_v41 = vcombine.high %v6551_v19, %v6551_v19  ;;  %v22701_v35 = vld [vmem:[%s32079_s7 + $0x220] ss:$16 sps:$4 sm:$0xff]   ;;  %v6484_v45 = vsel %vm27041_vm11, %v6478_v44, %v6483_v28  ;;  %17449 = vmatprep.subr.bf16.mxu0 %v22706_v48 }
 0x65a   : > { %v22704_v21 = vld [vmem:[%s32079_s7 + $0x228] ss:$16 sps:$4 sm:$0xff]   ;;  %v6517_v24 = vsel %vm27041_vm11, %v6511_v55, %v6516_v5  ;;  %v6577_v37 = vld [vmem:[#allocation5 + $0x30] sm:$0x1]  ;;  %v22709_v3 = vld [vmem:[%s32079_s7 + $0x244] ss:$16 sps:$4 sm:$0xff]   ;;  %v6530_v18 = vsel %vm27041_vm11, %v6527_v59, %v6529_v20  ;;  %16454 = vmatprep.mubr.bf16.mxu1 %v8210_v63  ;;  %17479 = vmatprep.mubr.bf16.mxu0 %v8210_v63 }
 0x65b   : > { %v22712_v15 = vld [vmem:[%s32079_s7 + $0x24c] ss:$16 sps:$4 sm:$0xff]   ;;  %6485 = vst [vmem:[#allocation5 + $0x28] sm:$0x1] %v6484_v45  ;;  %6518 = vst [vmem:[#allocation5 + $0x2b] sm:$0x1] %v6517_v24  ;;  %v6575_v47 = vrot.slane %v6568_v41, %v27039_v29  ;;  %16425 = vmatpush1.bf16.msra.mxu1 %v22701_v35  ;;  %v8163_v24 = vcombine.high %v27119_v57, %v27119_v57 }
 0x65c   : > { %v6533_v36 = vshrl.u32 %v6527_v59, 16  ;;  %v6560_v11 = vshrl.u32 %v6558_v51, 16  ;;  %6531 = vst [vmem:[#allocation5 + $0x2c] sm:$0x1] %v6530_v18  ;;  %17450 = vmatpush1.bf16.msra.mxu0 %v22704_v21  ;;  %v22707_v62 = vld [vmem:[%s32079_s7 + $0x240] ss:$16 sps:$4 sm:$0xff]   ;;  %16426 = vmatprep.subr.bf16.mxu1 %v22709_v3 }
 0x65d   : > { %v6578_v53 = vsel %vm27041_vm11, %v6575_v47, %v6577_v37  ;;  %v22710_v12 = vld [vmem:[%s32079_s7 + $0x248] ss:$16 sps:$4 sm:$0xff]   ;;  %17451 = vmatprep.subr.bf16.mxu0 %v22712_v15  ;;  %v22718_v50 = vld [vmem:[%s32079_s7 + $0x26c] ss:$16 sps:$4 sm:$0xff]   ;;  %v22713_v1 = vld [vmem:[%s32079_s7 + $0x260] ss:$16 sps:$4 sm:$0xff]   ;;  %v27383_v15 = vrot.slane %v8163_v24, %v27039_v29 }
 0x65e   : > { %v6539_v26 = vsel %vm27041_vm11, %v6533_v36, %v6538_v46  ;;  %v6566_v49 = vsel %vm27041_vm11, %v6560_v11, %v6565_v60  ;;  %6579 = vst [vmem:[#allocation5 + $0x30] sm:$0x1] %v6578_v53  ;;  %v22716_v40 = vld [vmem:[%s32079_s7 + $0x268] ss:$16 sps:$4 sm:$0xff]   ;;  %v22721_v52 = vld [vmem:[%s32079_s7 + $0x284] ss:$16 sps:$4 sm:$0xff]   ;;  %v8208_v53 = vcombine.high %v27163_v38, %v27163_v38 }
 0x65f   : > { %6540 = vst [vmem:[#allocation5 + $0x2d] sm:$0x1] %v6539_v26  ;;  %6567 = vst [vmem:[#allocation5 + $0x2f] sm:$0x1] %v6566_v49  ;;  %16427 = vmatpush1.bf16.msra.mxu1 %v22707_v62  ;;  %v22724_v4 = vld [vmem:[%s32079_s7 + $0x28c] ss:$16 sps:$4 sm:$0xff]   ;;  %v8179_v26 = vcombine.high %v27383_v15, %v27383_v15 }
 0x660   : > { %17452 = vmatpush1.bf16.msra.mxu0 %v22710_v12  ;;  %16428 = vmatprep.subr.bf16.mxu1 %v22715_v16  ;;  %v22719_v27 = vld [vmem:[%s32079_s7 + $0x280] ss:$16 sps:$4 sm:$0xff]   ;;  %v22722_v39 = vld [vmem:[%s32079_s7 + $0x288] ss:$16 sps:$4 sm:$0xff]   ;;  %v22727_v25 = vld [vmem:[%s32079_s7 + $0x2a4] ss:$16 sps:$4 sm:$0xff]  }
 0x661   : > { %17453 = vmatprep.subr.bf16.mxu0 %v22718_v50  ;;  %v22730_v22 = vld [vmem:[%s32079_s7 + $0x2ac] ss:$16 sps:$4 sm:$0xff]   ;;  %v22725_v56 = vld [vmem:[%s32079_s7 + $0x2a0] ss:$16 sps:$4 sm:$0xff]   ;;  %v22728_v10 = vld [vmem:[%s32079_s7 + $0x2a8] ss:$16 sps:$4 sm:$0xff]   ;;  %v27408_v12 = vrot.slane %v8179_v26, %v27039_v29 }
 0x662   : > { %v22733_v8 = vld [vmem:[%s32079_s7 + $0x2c4] ss:$16 sps:$4 sm:$0xff]   ;;  %v22736_v9 = vld [vmem:[%s32079_s7 + $0x2cc] ss:$16 sps:$4 sm:$0xff]   ;;  %v22731_v13 = vld [vmem:[%s32079_s7 + $0x2c0] ss:$16 sps:$4 sm:$0xff]  }
 0x663   : > { %16429 = vmatpush1.bf16.msra.mxu1 %v22713_v1  ;;  %v22734_v42 = vld [vmem:[%s32079_s7 + $0x2c8] ss:$16 sps:$4 sm:$0xff]   ;;  %v22739_v54 = vld [vmem:[%s32079_s7 + $0x2e4] ss:$16 sps:$4 sm:$0xff]   ;;  %v22742_v34 = vld [vmem:[%s32079_s7 + $0x2ec] ss:$16 sps:$4 sm:$0xff]  }
 0x664   : > { %17454 = vmatpush1.bf16.msra.mxu0 %v22716_v40  ;;  %16430 = vmatprep.subr.bf16.mxu1 %v22721_v52  ;;  %v22737_v7 = vld [vmem:[%s32079_s7 + $0x2e0] ss:$16 sps:$4 sm:$0xff]   ;;  %v22740_v32 = vld [vmem:[%s32079_s7 + $0x2e8] ss:$16 sps:$4 sm:$0xff]   ;;  %v22745_v58 = vld [vmem:[%s32079_s7 + $0x304] ss:$16 sps:$4 sm:$0xff]  }
 0x665   : > { %17455 = vmatprep.subr.bf16.mxu0 %v22724_v4  ;;  %v22748_v23 = vld [vmem:[%s32079_s7 + $0x30c] ss:$16 sps:$4 sm:$0xff]   ;;  %v22743_v0 = vld [vmem:[%s32079_s7 + $0x300] ss:$16 sps:$4 sm:$0xff]   ;;  %v22746_v14 = vld [vmem:[%s32079_s7 + $0x308] ss:$16 sps:$4 sm:$0xff]  }
 0x666   : > { %v22751_v31 = vld [vmem:[%s32079_s7 + $0x324] ss:$16 sps:$4 sm:$0xff]   ;;  %v22754_v6 = vld [vmem:[%s32079_s7 + $0x32c] ss:$16 sps:$4 sm:$0xff]   ;;  %v22749_v48 = vld [vmem:[%s32079_s7 + $0x320] ss:$16 sps:$4 sm:$0xff]  }
 0x667   : > { %16431 = vmatpush1.bf16.msra.mxu1 %v22719_v27  ;;  %v22752_v17 = vld [vmem:[%s32079_s7 + $0x328] ss:$16 sps:$4 sm:$0xff]   ;;  %v22757_v30 = vld [vmem:[%s32079_s7 + $0x344] ss:$16 sps:$4 sm:$0xff]   ;;  %v22760_v28 = vld [vmem:[%s32079_s7 + $0x34c] ss:$16 sps:$4 sm:$0xff]  }
 0x668   : > { %17456 = vmatpush1.bf16.msra.mxu0 %v22722_v39  ;;  %16432 = vmatprep.subr.bf16.mxu1 %v22727_v25  ;;  %v22755_v5 = vld [vmem:[%s32079_s7 + $0x340] ss:$16 sps:$4 sm:$0xff]   ;;  %v22758_v33 = vld [vmem:[%s32079_s7 + $0x348] ss:$16 sps:$4 sm:$0xff]   ;;  %v22763_v19 = vld [vmem:[%s32079_s7 + $0x364] ss:$16 sps:$4 sm:$0xff]  }
 0x669   : > { %17457 = vmatprep.subr.bf16.mxu0 %v22730_v22  ;;  %v22766_v61 = vld [vmem:[%s32079_s7 + $0x36c] ss:$16 sps:$4 sm:$0xff]   ;;  %v22761_v44 = vld [vmem:[%s32079_s7 + $0x360] ss:$16 sps:$4 sm:$0xff]   ;;  %v22764_v43 = vld [vmem:[%s32079_s7 + $0x368] ss:$16 sps:$4 sm:$0xff]  }
 0x66a   : > { %v22769_v55 = vld [vmem:[%s32079_s7 + $0x384] ss:$16 sps:$4 sm:$0xff]   ;;  %v22772_v20 = vld [vmem:[%s32079_s7 + $0x38c] ss:$16 sps:$4 sm:$0xff]   ;;  %v22767_v46 = vld [vmem:[%s32079_s7 + $0x380] ss:$16 sps:$4 sm:$0xff]  }
 0x66b   : > { %16433 = vmatpush1.bf16.msra.mxu1 %v22725_v56  ;;  %v22770_v59 = vld [vmem:[%s32079_s7 + $0x388] ss:$16 sps:$4 sm:$0xff]   ;;  %v22775_v51 = vld [vmem:[%s32079_s7 + $0x3a4] ss:$16 sps:$4 sm:$0xff]   ;;  %v22778_v60 = vld [vmem:[%s32079_s7 + $0x3ac] ss:$16 sps:$4 sm:$0xff]  }
 0x66c   : > { %17458 = vmatpush1.bf16.msra.mxu0 %v22728_v10  ;;  %16434 = vmatprep.subr.bf16.mxu1 %v22733_v8  ;;  %v22773_v41 = vld [vmem:[%s32079_s7 + $0x3a0] ss:$16 sps:$4 sm:$0xff]   ;;  %v22776_v35 = vld [vmem:[%s32079_s7 + $0x3a8] ss:$16 sps:$4 sm:$0xff]   ;;  %v22781_v21 = vld [vmem:[%s32079_s7 + $0x3c4] ss:$16 sps:$4 sm:$0xff]  }
 0x66d   : > { %17459 = vmatprep.subr.bf16.mxu0 %v22736_v9  ;;  %v22784_v45 = vld [vmem:[%s32079_s7 + $0x3cc] ss:$16 sps:$4 sm:$0xff]   ;;  %v22779_v37 = vld [vmem:[%s32079_s7 + $0x3c0] ss:$16 sps:$4 sm:$0xff]   ;;  %v22782_v63 = vld [vmem:[%s32079_s7 + $0x3c8] ss:$16 sps:$4 sm:$0xff]  }
 0x66e   : > { %v22787_v3 = vld [vmem:[%s32079_s7 + $0x3e4] ss:$16 sps:$4 sm:$0xff]   ;;  %v22790_v57 = vld [vmem:[%s32079_s7 + $0x3ec] ss:$16 sps:$4 sm:$0xff]   ;;  %v22785_v18 = vld [vmem:[%s32079_s7 + $0x3e0] ss:$16 sps:$4 sm:$0xff]  }
 0x66f   : > { %16435 = vmatpush1.bf16.msra.mxu1 %v22731_v13  ;;  %v22788_v36 = vld [vmem:[%s32079_s7 + $0x3e8] ss:$16 sps:$4 sm:$0xff]   ;;  %v22793_v11 = vld [vmem:[%s32079_s7 + $0x404] ss:$16 sps:$4 sm:$0xff]   ;;  %v22796_v47 = vld [vmem:[%s32079_s7 + $0x40c] ss:$16 sps:$4 sm:$0xff]  }
 0x670   : > { %17460 = vmatpush1.bf16.msra.mxu0 %v22734_v42  ;;  %16436 = vmatprep.subr.bf16.mxu1 %v22739_v54  ;;  %v22791_v49 = vld [vmem:[%s32079_s7 + $0x400] ss:$16 sps:$4 sm:$0xff]   ;;  %v22794_v62 = vld [vmem:[%s32079_s7 + $0x408] ss:$16 sps:$4 sm:$0xff]   ;;  %v22800_v16 = vld [vmem:[%s32079_s7 + $0x424] ss:$16 sps:$4 sm:$0xff]  }
 0x671   : > { %17461 = vmatprep.subr.bf16.mxu0 %v22742_v34  ;;  %v22803_v50 = vld [vmem:[%s32079_s7 + $0x42c] ss:$16 sps:$4 sm:$0xff]   ;;  %v22798_v38 = vld [vmem:[%s32079_s7 + $0x420] ss:$16 sps:$4 sm:$0xff]   ;;  %v22801_v1 = vld [vmem:[%s32079_s7 + $0x428] ss:$16 sps:$4 sm:$0xff]  }
 0x672   : > { %v22806_v40 = vld [vmem:[%s32079_s7 + $0x444] ss:$16 sps:$4 sm:$0xff]   ;;  %v22809_v52 = vld [vmem:[%s32079_s7 + $0x44c] ss:$16 sps:$4 sm:$0xff]   ;;  %v22804_v4 = vld [vmem:[%s32079_s7 + $0x440] ss:$16 sps:$4 sm:$0xff]  }
 0x673   : > { %16437 = vmatpush1.bf16.msra.mxu1 %v22737_v7  ;;  %v22807_v27 = vld [vmem:[%s32079_s7 + $0x448] ss:$16 sps:$4 sm:$0xff]   ;;  %v22812_v39 = vld [vmem:[%s32079_s7 + $0x464] ss:$16 sps:$4 sm:$0xff]   ;;  %v22815_v25 = vld [vmem:[%s32079_s7 + $0x46c] ss:$16 sps:$4 sm:$0xff]  }
 0x674   : > { %17462 = vmatpush1.bf16.msra.mxu0 %v22740_v32  ;;  %16438 = vmatprep.subr.bf16.mxu1 %v22745_v58  ;;  %v22810_v22 = vld [vmem:[%s32079_s7 + $0x460] ss:$16 sps:$4 sm:$0xff]   ;;  %v22813_v56 = vld [vmem:[%s32079_s7 + $0x468] ss:$16 sps:$4 sm:$0xff]   ;;  %v22818_v10 = vld [vmem:[%s32079_s7 + $0x484] ss:$16 sps:$4 sm:$0xff]  }
 0x675   : > { %17463 = vmatprep.subr.bf16.mxu0 %v22748_v23  ;;  %v22821_v8 = vld [vmem:[%s32079_s7 + $0x48c] ss:$16 sps:$4 sm:$0xff]   ;;  %v22816_v9 = vld [vmem:[%s32079_s7 + $0x480] ss:$16 sps:$4 sm:$0xff]   ;;  %v22819_v13 = vld [vmem:[%s32079_s7 + $0x488] ss:$16 sps:$4 sm:$0xff]  }
 0x676   : > { %v22824_v42 = vld [vmem:[%s32079_s7 + $0x4a4] ss:$16 sps:$4 sm:$0xff]   ;;  %v22827_v54 = vld [vmem:[%s32079_s7 + $0x4ac] ss:$16 sps:$4 sm:$0xff]   ;;  %v22822_v34 = vld [vmem:[%s32079_s7 + $0x4a0] ss:$16 sps:$4 sm:$0xff]  }
 0x677   : > { %16439 = vmatpush1.bf16.msra.mxu1 %v22743_v0  ;;  %v22825_v7 = vld [vmem:[%s32079_s7 + $0x4a8] ss:$16 sps:$4 sm:$0xff]   ;;  %v22830_v32 = vld [vmem:[%s32079_s7 + $0x4c4] ss:$16 sps:$4 sm:$0xff]   ;;  %v22833_v58 = vld [vmem:[%s32079_s7 + $0x4cc] ss:$16 sps:$4 sm:$0xff]  }
 0x678   : > { %17464 = vmatpush1.bf16.msra.mxu0 %v22746_v14  ;;  %16440 = vmatprep.subr.bf16.mxu1 %v22751_v31  ;;  %v22828_v23 = vld [vmem:[%s32079_s7 + $0x4c0] ss:$16 sps:$4 sm:$0xff]   ;;  %v22831_v0 = vld [vmem:[%s32079_s7 + $0x4c8] ss:$16 sps:$4 sm:$0xff]   ;;  %v22836_v14 = vld [vmem:[%s32079_s7 + $0x4e4] ss:$16 sps:$4 sm:$0xff]  }
 0x679   : > { %17465 = vmatprep.subr.bf16.mxu0 %v22754_v6  ;;  %v22839_v31 = vld [vmem:[%s32079_s7 + $0x4ec] ss:$16 sps:$4 sm:$0xff]   ;;  %v22834_v6 = vld [vmem:[%s32079_s7 + $0x4e0] ss:$16 sps:$4 sm:$0xff]   ;;  %v22867_v24 = vld [vmem:[%s32079_s7 + $0x588] ss:$16 sps:$4 sm:$0xff]  }
 0x67a   : > { %v22884_v26 = vld [vmem:[%s32079_s7 + $0x5e4] ss:$16 sps:$4 sm:$0xff]  }
 0x67b   : > { %16441 = vmatpush1.bf16.msra.mxu1 %v22749_v48  ;;  %v22837_v48 = vld [vmem:[%s32079_s7 + $0x4e8] ss:$16 sps:$4 sm:$0xff]  }
 0x67c   : > { %17466 = vmatpush1.bf16.msra.mxu0 %v22752_v17  ;;  %16442 = vmatprep.subr.bf16.mxu1 %v22757_v30  ;;  %v22842_v17 = vld [vmem:[%s32079_s7 + $0x504] ss:$16 sps:$4 sm:$0xff]   ;;  %v22845_v30 = vld [vmem:[%s32079_s7 + $0x50c] ss:$16 sps:$4 sm:$0xff]  }
 0x67d   : > { %17467 = vmatprep.subr.bf16.mxu0 %v22760_v28  ;;  %v22840_v28 = vld [vmem:[%s32079_s7 + $0x500] ss:$16 sps:$4 sm:$0xff]  }
 0x67f   : > { %16443 = vmatpush1.bf16.msra.mxu1 %v22755_v5  ;;  %v22843_v5 = vld [vmem:[%s32079_s7 + $0x508] ss:$16 sps:$4 sm:$0xff]  }
 0x680   : > { %17468 = vmatpush1.bf16.msra.mxu0 %v22758_v33  ;;  %16444 = vmatprep.subr.bf16.mxu1 %v22763_v19  ;;  %v22848_v33 = vld [vmem:[%s32079_s7 + $0x524] ss:$16 sps:$4 sm:$0xff]   ;;  %v22851_v19 = vld [vmem:[%s32079_s7 + $0x52c] ss:$16 sps:$4 sm:$0xff]  }
 0x681   : > { %17469 = vmatprep.subr.bf16.mxu0 %v22766_v61  ;;  %v22846_v61 = vld [vmem:[%s32079_s7 + $0x520] ss:$16 sps:$4 sm:$0xff]  }
 0x683   : > { %16445 = vmatpush1.bf16.msra.mxu1 %v22761_v44  ;;  %v22849_v44 = vld [vmem:[%s32079_s7 + $0x528] ss:$16 sps:$4 sm:$0xff]  }
 0x684   : > { %17470 = vmatpush1.bf16.msra.mxu0 %v22764_v43  ;;  %16446 = vmatprep.subr.bf16.mxu1 %v22769_v55  ;;  %v22854_v43 = vld [vmem:[%s32079_s7 + $0x544] ss:$16 sps:$4 sm:$0xff]   ;;  %v22857_v55 = vld [vmem:[%s32079_s7 + $0x54c] ss:$16 sps:$4 sm:$0xff]  }
 0x685   : > { %17471 = vmatprep.subr.bf16.mxu0 %v22772_v20  ;;  %v22852_v20 = vld [vmem:[%s32079_s7 + $0x540] ss:$16 sps:$4 sm:$0xff]  }
 0x687   : > { %16447 = vmatpush1.bf16.msra.mxu1 %v22767_v46  ;;  %v22855_v46 = vld [vmem:[%s32079_s7 + $0x548] ss:$16 sps:$4 sm:$0xff]  }
 0x688   : > { %17472 = vmatpush1.bf16.msra.mxu0 %v22770_v59  ;;  %16448 = vmatprep.subr.bf16.mxu1 %v22775_v51  ;;  %v22860_v59 = vld [vmem:[%s32079_s7 + $0x564] ss:$16 sps:$4 sm:$0xff]   ;;  %v22863_v51 = vld [vmem:[%s32079_s7 + $0x56c] ss:$16 sps:$4 sm:$0xff]  }
 0x689   : > { %17473 = vmatprep.subr.bf16.mxu0 %v22778_v60  ;;  %v22858_v60 = vld [vmem:[%s32079_s7 + $0x560] ss:$16 sps:$4 sm:$0xff]  }
 0x68b   : > { %16449 = vmatpush1.bf16.msra.mxu1 %v22773_v41  ;;  %v22861_v41 = vld [vmem:[%s32079_s7 + $0x568] ss:$16 sps:$4 sm:$0xff]  }
 0x68c   : > { %17474 = vmatpush1.bf16.msra.mxu0 %v22776_v35  ;;  %16450 = vmatprep.subr.bf16.mxu1 %v22781_v21  ;;  %v22866_v35 = vld [vmem:[%s32079_s7 + $0x584] ss:$16 sps:$4 sm:$0xff]   ;;  %v22869_v21 = vld [vmem:[%s32079_s7 + $0x58c] ss:$16 sps:$4 sm:$0xff]  }
 0x68d   : > { %17475 = vmatprep.subr.bf16.mxu0 %v22784_v45  ;;  %v22864_v45 = vld [vmem:[%s32079_s7 + $0x580] ss:$16 sps:$4 sm:$0xff]  }
 0x68f   : > { %16451 = vmatpush1.bf16.msra.mxu1 %v22779_v37  ;;  %v22872_v37 = vld [vmem:[%s32079_s7 + $0x5a4] ss:$16 sps:$4 sm:$0xff]  }
 0x690   : > { %17476 = vmatpush1.bf16.msra.mxu0 %v22782_v63  ;;  %16452 = vmatprep.subr.bf16.mxu1 %v22787_v3  ;;  %v22875_v63 = vld [vmem:[%s32079_s7 + $0x5ac] ss:$16 sps:$4 sm:$0xff]   ;;  %v22870_v3 = vld [vmem:[%s32079_s7 + $0x5a0] ss:$16 sps:$4 sm:$0xff]  }
 0x691   : > { %17477 = vmatprep.subr.bf16.mxu0 %v22790_v57  ;;  %v22873_v57 = vld [vmem:[%s32079_s7 + $0x5a8] ss:$16 sps:$4 sm:$0xff]  }
 0x693   : > { %16453 = vmatpush1.bf16.msra.mxu1 %v22785_v18  ;;  %v22878_v18 = vld [vmem:[%s32079_s7 + $0x5c4] ss:$16 sps:$4 sm:$0xff]  }
 0x694   : > { %17478 = vmatpush1.bf16.msra.mxu0 %v22788_v36  ;;  %16463 = vmatprep.subr.bf16.mxu1 %v22793_v11  ;;  %v22881_v36 = vld [vmem:[%s32079_s7 + $0x5cc] ss:$16 sps:$4 sm:$0xff]   ;;  %v22876_v11 = vld [vmem:[%s32079_s7 + $0x5c0] ss:$16 sps:$4 sm:$0xff]  }
 0x695   : > { %17488 = vmatprep.subr.bf16.mxu0 %v22796_v47  ;;  %v22879_v47 = vld [vmem:[%s32079_s7 + $0x5c8] ss:$16 sps:$4 sm:$0xff]  }
 0x696   : > { %16455 = vmatmul.mubr.bf16.vlgmr.msra.gmra.mrb[32].mxu1 %v8208_v53 }
 0x697   : > { %17480 = vmatmul.mubr.bf16.vlgmr.msra.gmra.mrb[16].mxu0 %v8208_v53  ;;  %16464 = vmatpush1.bf16.msra.mxu1 %v22791_v49  ;;  %v22887_v49 = vld [vmem:[%s32079_s7 + $0x5ec] ss:$16 sps:$4 sm:$0xff]   ;;  %v22882_v53 = vld [vmem:[%s32079_s7 + $0x5e0] ss:$16 sps:$4 sm:$0xff]  }
 0x698   : > { %16495 = vmatprep.mubr.bf16.mxu1 %v27408_v12  ;;  %17489 = vmatpush1.bf16.msra.mxu0 %v22794_v62  ;;  %v22885_v62 = vld [vmem:[%s32079_s7 + $0x5e8] ss:$16 sps:$4 sm:$0xff]  }
 0x699   : > { %17520 = vmatprep.mubr.bf16.mxu0 %v27408_v12  ;;  %16465 = vmatprep.subr.bf16.mxu1 %v22800_v16  ;;  %v22890_v16 = vld [vmem:[%s32079_s7 + $0x604] ss:$16 sps:$4 sm:$0xff]  }
 0x69a   : > { %17490 = vmatprep.subr.bf16.mxu0 %v22803_v50  ;;  %v22893_v50 = vld [vmem:[%s32079_s7 + $0x60c] ss:$16 sps:$4 sm:$0xff]  }
 0x69b   : > { %16466 = vmatpush1.bf16.msra.mxu1 %v22798_v38  ;;  %v22888_v38 = vld [vmem:[%s32079_s7 + $0x600] ss:$16 sps:$4 sm:$0xff]  }
 0x69c   : > { %17491 = vmatpush1.bf16.msra.mxu0 %v22801_v1  ;;  %16467 = vmatprep.subr.bf16.mxu1 %v22806_v40  ;;  %v27603_v1 = vrot.slane %v27383_v15, %v27039_v29  ;;  %v22891_v40 = vld [vmem:[%s32079_s7 + $0x608] ss:$16 sps:$4 sm:$0xff]   ;;  %v22899_v15 = vld [vmem:[%s32079_s7 + $0x62c] ss:$16 sps:$4 sm:$0xff]  }
 0x69d   : > { %17492 = vmatprep.subr.bf16.mxu0 %v22809_v52  ;;  %v22896_v52 = vld [vmem:[%s32079_s7 + $0x624] ss:$16 sps:$4 sm:$0xff]  }
 0x69f   : > { %16468 = vmatpush1.bf16.msra.mxu1 %v22804_v4  ;;  %v8211_v4 = vcombine.high %v27408_v12, %v27408_v12  ;;  %v22902_v12 = vld [vmem:[%s32079_s7 + $0x644] ss:$16 sps:$4 sm:$0xff]  }
 0x6a0   : > { %17493 = vmatpush1.bf16.msra.mxu0 %v22807_v27  ;;  %16469 = vmatprep.subr.bf16.mxu1 %v22812_v39  ;;  %v22894_v27 = vld [vmem:[%s32079_s7 + $0x620] ss:$16 sps:$4 sm:$0xff]   ;;  %v22897_v39 = vld [vmem:[%s32079_s7 + $0x628] ss:$16 sps:$4 sm:$0xff]  }
 0x6a1   : > { %17494 = vmatprep.subr.bf16.mxu0 %v22815_v25  ;;  %v22905_v25 = vld [vmem:[%s32079_s7 + $0x64c] ss:$16 sps:$4 sm:$0xff]  }
 0x6a3   : > { %16470 = vmatpush1.bf16.msra.mxu1 %v22810_v22  ;;  %v22900_v22 = vld [vmem:[%s32079_s7 + $0x640] ss:$16 sps:$4 sm:$0xff]  }
 0x6a4   : > { %17495 = vmatpush1.bf16.msra.mxu0 %v22813_v56  ;;  %16471 = vmatprep.subr.bf16.mxu1 %v22818_v10  ;;  %v22903_v56 = vld [vmem:[%s32079_s7 + $0x648] ss:$16 sps:$4 sm:$0xff]   ;;  %v22908_v10 = vld [vmem:[%s32079_s7 + $0x664] ss:$16 sps:$4 sm:$0xff]  }
 0x6a5   : > { %17496 = vmatprep.subr.bf16.mxu0 %v22821_v8  ;;  %v22911_v8 = vld [vmem:[%s32079_s7 + $0x66c] ss:$16 sps:$4 sm:$0xff]  }
 0x6a7   : > { %16472 = vmatpush1.bf16.msra.mxu1 %v22816_v9  ;;  %v22906_v9 = vld [vmem:[%s32079_s7 + $0x660] ss:$16 sps:$4 sm:$0xff]  }
 0x6a8   : > { %17497 = vmatpush1.bf16.msra.mxu0 %v22819_v13  ;;  %16473 = vmatprep.subr.bf16.mxu1 %v22824_v42  ;;  %v22909_v13 = vld [vmem:[%s32079_s7 + $0x668] ss:$16 sps:$4 sm:$0xff]   ;;  %v22914_v42 = vld [vmem:[%s32079_s7 + $0x684] ss:$16 sps:$4 sm:$0xff]  }
 0x6a9   : > { %17498 = vmatprep.subr.bf16.mxu0 %v22827_v54  ;;  %v22917_v54 = vld [vmem:[%s32079_s7 + $0x68c] ss:$16 sps:$4 sm:$0xff]  }
 0x6ab   : > { %16474 = vmatpush1.bf16.msra.mxu1 %v22822_v34  ;;  %v22912_v34 = vld [vmem:[%s32079_s7 + $0x680] ss:$16 sps:$4 sm:$0xff]  }
 0x6ac   : > { %17499 = vmatpush1.bf16.msra.mxu0 %v22825_v7  ;;  %16475 = vmatprep.subr.bf16.mxu1 %v22830_v32  ;;  %v22915_v7 = vld [vmem:[%s32079_s7 + $0x688] ss:$16 sps:$4 sm:$0xff]   ;;  %v22920_v32 = vld [vmem:[%s32079_s7 + $0x6a4] ss:$16 sps:$4 sm:$0xff]  }
 0x6ad   : > { %17500 = vmatprep.subr.bf16.mxu0 %v22833_v58  ;;  %v22923_v58 = vld [vmem:[%s32079_s7 + $0x6ac] ss:$16 sps:$4 sm:$0xff]  }
 0x6af   : > { %16476 = vmatpush1.bf16.msra.mxu1 %v22828_v23  ;;  %v22918_v23 = vld [vmem:[%s32079_s7 + $0x6a0] ss:$16 sps:$4 sm:$0xff]  }
 0x6b0   : > { %17501 = vmatpush1.bf16.msra.mxu0 %v22831_v0  ;;  %16477 = vmatprep.subr.bf16.mxu1 %v22836_v14  ;;  %v22921_v0 = vld [vmem:[%s32079_s7 + $0x6a8] ss:$16 sps:$4 sm:$0xff]   ;;  %v22926_v14 = vld [vmem:[%s32079_s7 + $0x6c4] ss:$16 sps:$4 sm:$0xff]  }
 0x6b1   : > { %17502 = vmatprep.subr.bf16.mxu0 %v22839_v31  ;;  %v22929_v31 = vld [vmem:[%s32079_s7 + $0x6cc] ss:$16 sps:$4 sm:$0xff]  }
 0x6b3   : > { %16478 = vmatpush1.bf16.msra.mxu1 %v22834_v6  ;;  %v22924_v6 = vld [vmem:[%s32079_s7 + $0x6c0] ss:$16 sps:$4 sm:$0xff]  }
 0x6b4   : > { %17503 = vmatpush1.bf16.msra.mxu0 %v22837_v48  ;;  %16479 = vmatprep.subr.bf16.mxu1 %v22842_v17  ;;  %v22927_v48 = vld [vmem:[%s32079_s7 + $0x6c8] ss:$16 sps:$4 sm:$0xff]   ;;  %v22932_v17 = vld [vmem:[%s32079_s7 + $0x6e4] ss:$16 sps:$4 sm:$0xff]  }
 0x6b5   : > { %17504 = vmatprep.subr.bf16.mxu0 %v22845_v30  ;;  %v22935_v30 = vld [vmem:[%s32079_s7 + $0x6ec] ss:$16 sps:$4 sm:$0xff]  }
 0x6b7   : > { %16480 = vmatpush1.bf16.msra.mxu1 %v22840_v28  ;;  %v22930_v28 = vld [vmem:[%s32079_s7 + $0x6e0] ss:$16 sps:$4 sm:$0xff]  }
 0x6b8   : > { %17505 = vmatpush1.bf16.msra.mxu0 %v22843_v5  ;;  %16481 = vmatprep.subr.bf16.mxu1 %v22848_v33  ;;  %v22933_v5 = vld [vmem:[%s32079_s7 + $0x6e8] ss:$16 sps:$4 sm:$0xff]   ;;  %v22938_v33 = vld [vmem:[%s32079_s7 + $0x704] ss:$16 sps:$4 sm:$0xff]  }
 0x6b9   : > { %17506 = vmatprep.subr.bf16.mxu0 %v22851_v19  ;;  %v22941_v19 = vld [vmem:[%s32079_s7 + $0x70c] ss:$16 sps:$4 sm:$0xff]  }
 0x6bb   : > { %16482 = vmatpush1.bf16.msra.mxu1 %v22846_v61  ;;  %v22936_v61 = vld [vmem:[%s32079_s7 + $0x700] ss:$16 sps:$4 sm:$0xff]  }
 0x6bc   : > { %17507 = vmatpush1.bf16.msra.mxu0 %v22849_v44  ;;  %16483 = vmatprep.subr.bf16.mxu1 %v22854_v43  ;;  %v22939_v44 = vld [vmem:[%s32079_s7 + $0x708] ss:$16 sps:$4 sm:$0xff]   ;;  %v22944_v43 = vld [vmem:[%s32079_s7 + $0x724] ss:$16 sps:$4 sm:$0xff]  }
 0x6bd   : > { %17508 = vmatprep.subr.bf16.mxu0 %v22857_v55  ;;  %v22947_v55 = vld [vmem:[%s32079_s7 + $0x72c] ss:$16 sps:$4 sm:$0xff]  }
 0x6bf   : > { %16484 = vmatpush1.bf16.msra.mxu1 %v22852_v20  ;;  %v22942_v20 = vld [vmem:[%s32079_s7 + $0x720] ss:$16 sps:$4 sm:$0xff]  }
 0x6c0   : > { %17509 = vmatpush1.bf16.msra.mxu0 %v22855_v46  ;;  %16485 = vmatprep.subr.bf16.mxu1 %v22860_v59  ;;  %v22945_v46 = vld [vmem:[%s32079_s7 + $0x728] ss:$16 sps:$4 sm:$0xff]   ;;  %v22950_v59 = vld [vmem:[%s32079_s7 + $0x744] ss:$16 sps:$4 sm:$0xff]  }
 0x6c1   : > { %17510 = vmatprep.subr.bf16.mxu0 %v22863_v51  ;;  %v22953_v51 = vld [vmem:[%s32079_s7 + $0x74c] ss:$16 sps:$4 sm:$0xff]  }
 0x6c3   : > { %16486 = vmatpush1.bf16.msra.mxu1 %v22858_v60  ;;  %v22948_v60 = vld [vmem:[%s32079_s7 + $0x740] ss:$16 sps:$4 sm:$0xff]  }
 0x6c4   : > { %17511 = vmatpush1.bf16.msra.mxu0 %v22861_v41  ;;  %16487 = vmatprep.subr.bf16.mxu1 %v22866_v35  ;;  %v22951_v41 = vld [vmem:[%s32079_s7 + $0x748] ss:$16 sps:$4 sm:$0xff]   ;;  %v22956_v35 = vld [vmem:[%s32079_s7 + $0x764] ss:$16 sps:$4 sm:$0xff]  }
 0x6c5   : > { %17512 = vmatprep.subr.bf16.mxu0 %v22869_v21  ;;  %v22959_v21 = vld [vmem:[%s32079_s7 + $0x76c] ss:$16 sps:$4 sm:$0xff]  }
 0x6c7   : > { %16488 = vmatpush1.bf16.msra.mxu1 %v22864_v45  ;;  %v22954_v45 = vld [vmem:[%s32079_s7 + $0x760] ss:$16 sps:$4 sm:$0xff]  }
 0x6c8   : > { %17513 = vmatpush1.bf16.msra.mxu0 %v22867_v24  ;;  %16489 = vmatprep.subr.bf16.mxu1 %v22872_v37  ;;  %v22957_v24 = vld [vmem:[%s32079_s7 + $0x768] ss:$16 sps:$4 sm:$0xff]   ;;  %v22962_v37 = vld [vmem:[%s32079_s7 + $0x784] ss:$16 sps:$4 sm:$0xff]  }
 0x6c9   : > { %17514 = vmatprep.subr.bf16.mxu0 %v22875_v63  ;;  %v22965_v63 = vld [vmem:[%s32079_s7 + $0x78c] ss:$16 sps:$4 sm:$0xff]  }
 0x6cb   : > { %16490 = vmatpush1.bf16.msra.mxu1 %v22870_v3  ;;  %v22960_v3 = vld [vmem:[%s32079_s7 + $0x780] ss:$16 sps:$4 sm:$0xff]  }
 0x6cc   : > { %17515 = vmatpush1.bf16.msra.mxu0 %v22873_v57  ;;  %16491 = vmatprep.subr.bf16.mxu1 %v22878_v18  ;;  %v22963_v57 = vld [vmem:[%s32079_s7 + $0x788] ss:$16 sps:$4 sm:$0xff]   ;;  %v22968_v18 = vld [vmem:[%s32079_s7 + $0x7a4] ss:$16 sps:$4 sm:$0xff]  }
 0x6cd   : > { %17516 = vmatprep.subr.bf16.mxu0 %v22881_v36  ;;  %v22971_v36 = vld [vmem:[%s32079_s7 + $0x7ac] ss:$16 sps:$4 sm:$0xff]  }
 0x6cf   : > { %16492 = vmatpush1.bf16.msra.mxu1 %v22876_v11  ;;  %v22966_v11 = vld [vmem:[%s32079_s7 + $0x7a0] ss:$16 sps:$4 sm:$0xff]  }
 0x6d0   : > { %17517 = vmatpush1.bf16.msra.mxu0 %v22879_v47  ;;  %16493 = vmatprep.subr.bf16.mxu1 %v22884_v26  ;;  %v22969_v47 = vld [vmem:[%s32079_s7 + $0x7a8] ss:$16 sps:$4 sm:$0xff]   ;;  %v22974_v26 = vld [vmem:[%s32079_s7 + $0x7c4] ss:$16 sps:$4 sm:$0xff]  }
 0x6d1   : > { %17518 = vmatprep.subr.bf16.mxu0 %v22887_v49  ;;  %v22977_v49 = vld [vmem:[%s32079_s7 + $0x7cc] ss:$16 sps:$4 sm:$0xff]  }
 0x6d3   : > { %16494 = vmatpush1.bf16.msra.mxu1 %v22882_v53  ;;  %v22972_v53 = vld [vmem:[%s32079_s7 + $0x7c0] ss:$16 sps:$4 sm:$0xff]  }
 0x6d4   : > { %17519 = vmatpush1.bf16.msra.mxu0 %v22885_v62  ;;  %16504 = vmatprep.subr.bf16.mxu1 %v22890_v16  ;;  %v27777_v62 = vld [vmem:[#allocation5 + $0x8] sm:$0xff] }
 0x6d5   : > { %17529 = vmatprep.subr.bf16.mxu0 %v22893_v50  ;;  %v22975_v16 = vld [vmem:[%s32079_s7 + $0x7c8] ss:$16 sps:$4 sm:$0xff]   ;;  %v22980_v50 = vld [vmem:[%s32079_s7 + $0x7e4] ss:$16 sps:$4 sm:$0xff]  }
 0x6d6   : > { %16496 = vmatmul.mubr.bf16.vlgmr.msra.gmra.mrb[32].mxu1 %v27603_v1 }
 0x6d7   : > { %17521 = vmatmul.mubr.bf16.vlgmr.msra.gmra.mrb[16].mxu0 %v27603_v1  ;;  %16505 = vmatpush1.bf16.msra.mxu1 %v22888_v38  ;;  %v22983_v38 = vld [vmem:[%s32079_s7 + $0x7ec] ss:$16 sps:$4 sm:$0xff]  }
 0x6d8   : > { %16536 = vmatprep.mubr.bf16.mxu1 %v8211_v4  ;;  %17530 = vmatpush1.bf16.msra.mxu0 %v22891_v40  ;;  %v27790_v40 = vrot.slane %v27777_v62, %v27039_v29 }
 0x6d9   : > { %17561 = vmatprep.mubr.bf16.mxu0 %v8211_v4  ;;  %16506 = vmatprep.subr.bf16.mxu1 %v22896_v52  ;;  %v22978_v52 = vld [vmem:[%s32079_s7 + $0x7e0] ss:$16 sps:$4 sm:$0xff]   ;;  %v22981_v4 = vld [vmem:[%s32079_s7 + $0x7e8] ss:$16 sps:$4 sm:$0xff]  }
 0x6da   : > { %17531 = vmatprep.subr.bf16.mxu0 %v22899_v15  ;;  %v22986_v15 = vld [vmem:[%s32079_s7 + $0x804] ss:$16 sps:$4 sm:$0xff]  }
 0x6db   : > { %16507 = vmatpush1.bf16.msra.mxu1 %v22894_v27  ;;  %v22989_v27 = vld [vmem:[%s32079_s7 + $0x80c] ss:$16 sps:$4 sm:$0xff]  }
 0x6dc   : > { %17532 = vmatpush1.bf16.msra.mxu0 %v22897_v39  ;;  %16508 = vmatprep.subr.bf16.mxu1 %v22902_v12  ;;  %v8227_v39 = vcombine.high %v27790_v40, %v27790_v40  ;;  %v22984_v12 = vld [vmem:[%s32079_s7 + $0x800] ss:$16 sps:$4 sm:$0xff]  }
 0x6dd   : > { %17533 = vmatprep.subr.bf16.mxu0 %v22905_v25  ;;  %v8209_v25 = vcombine.high %v27603_v1, %v27603_v1  ;;  %v22990_v1 = vld [vmem:[%s32079_s7 + $0x820] ss:$16 sps:$4 sm:$0xff]  }
 0x6df   : > { %16509 = vmatpush1.bf16.msra.mxu1 %v22900_v22  ;;  %v22987_v22 = vld [vmem:[%s32079_s7 + $0x808] ss:$16 sps:$4 sm:$0xff]  }
 0x6e0   : > { %17534 = vmatpush1.bf16.msra.mxu0 %v22903_v56  ;;  %16510 = vmatprep.subr.bf16.mxu1 %v22908_v10  ;;  %v22992_v56 = vld [vmem:[%s32079_s7 + $0x824] ss:$16 sps:$4 sm:$0xff]   ;;  %v27818_v10 = vrot.slane %v8227_v39, %v27039_v29  ;;  %v23071_v39 = vld [vmem:[%s32079_s7 + $0x9c8] ss:$16 sps:$4 sm:$0xff]  }
 0x6e1   : > { %17535 = vmatprep.subr.bf16.mxu0 %v22911_v8  ;;  %v22995_v8 = vld [vmem:[%s32079_s7 + $0x82c] ss:$16 sps:$4 sm:$0xff]  }
 0x6e3   : > { %16511 = vmatpush1.bf16.msra.mxu1 %v22906_v9  ;;  %v22993_v9 = vld [vmem:[%s32079_s7 + $0x828] ss:$16 sps:$4 sm:$0xff]  }
 0x6e4   : > { %17536 = vmatpush1.bf16.msra.mxu0 %v22909_v13  ;;  %16512 = vmatprep.subr.bf16.mxu1 %v22914_v42  ;;  %v22998_v13 = vld [vmem:[%s32079_s7 + $0x844] ss:$16 sps:$4 sm:$0xff]   ;;  %v23001_v42 = vld [vmem:[%s32079_s7 + $0x84c] ss:$16 sps:$4 sm:$0xff]  }
 0x6e5   : > { %17537 = vmatprep.subr.bf16.mxu0 %v22917_v54  ;;  %v22996_v54 = vld [vmem:[%s32079_s7 + $0x840] ss:$16 sps:$4 sm:$0xff]  }
 0x6e7   : > { %16513 = vmatpush1.bf16.msra.mxu1 %v22912_v34  ;;  %v22999_v34 = vld [vmem:[%s32079_s7 + $0x848] ss:$16 sps:$4 sm:$0xff]  }
 0x6e8   : > { %17538 = vmatpush1.bf16.msra.mxu0 %v22915_v7  ;;  %16514 = vmatprep.subr.bf16.mxu1 %v22920_v32  ;;  %v23004_v7 = vld [vmem:[%s32079_s7 + $0x864] ss:$16 sps:$4 sm:$0xff]   ;;  %v23007_v32 = vld [vmem:[%s32079_s7 + $0x86c] ss:$16 sps:$4 sm:$0xff]  }
 0x6e9   : > { %17539 = vmatprep.subr.bf16.mxu0 %v22923_v58  ;;  %v23002_v58 = vld [vmem:[%s32079_s7 + $0x860] ss:$16 sps:$4 sm:$0xff]  }
 0x6eb   : > { %16515 = vmatpush1.bf16.msra.mxu1 %v22918_v23  ;;  %v23005_v23 = vld [vmem:[%s32079_s7 + $0x868] ss:$16 sps:$4 sm:$0xff]  }
 0x6ec   : > { %17540 = vmatpush1.bf16.msra.mxu0 %v22921_v0  ;;  %16516 = vmatprep.subr.bf16.mxu1 %v22926_v14  ;;  %v23010_v0 = vld [vmem:[%s32079_s7 + $0x884] ss:$16 sps:$4 sm:$0xff]   ;;  %v23013_v14 = vld [vmem:[%s32079_s7 + $0x88c] ss:$16 sps:$4 sm:$0xff]  }
 0x6ed   : > { %17541 = vmatprep.subr.bf16.mxu0 %v22929_v31  ;;  %v23008_v31 = vld [vmem:[%s32079_s7 + $0x880] ss:$16 sps:$4 sm:$0xff]  }
 0x6ef   : > { %16517 = vmatpush1.bf16.msra.mxu1 %v22924_v6  ;;  %v23011_v6 = vld [vmem:[%s32079_s7 + $0x888] ss:$16 sps:$4 sm:$0xff]  }
 0x6f0   : > { %17542 = vmatpush1.bf16.msra.mxu0 %v22927_v48  ;;  %16518 = vmatprep.subr.bf16.mxu1 %v22932_v17  ;;  %v23016_v48 = vld [vmem:[%s32079_s7 + $0x8a4] ss:$16 sps:$4 sm:$0xff]   ;;  %v23019_v17 = vld [vmem:[%s32079_s7 + $0x8ac] ss:$16 sps:$4 sm:$0xff]  }
 0x6f1   : > { %17543 = vmatprep.subr.bf16.mxu0 %v22935_v30  ;;  %v23014_v30 = vld [vmem:[%s32079_s7 + $0x8a0] ss:$16 sps:$4 sm:$0xff]  }
 0x6f3   : > { %16519 = vmatpush1.bf16.msra.mxu1 %v22930_v28  ;;  %v23017_v28 = vld [vmem:[%s32079_s7 + $0x8a8] ss:$16 sps:$4 sm:$0xff]  }
 0x6f4   : > { %17544 = vmatpush1.bf16.msra.mxu0 %v22933_v5  ;;  %16520 = vmatprep.subr.bf16.mxu1 %v22938_v33  ;;  %v23022_v5 = vld [vmem:[%s32079_s7 + $0x8c4] ss:$16 sps:$4 sm:$0xff]   ;;  %v23025_v33 = vld [vmem:[%s32079_s7 + $0x8cc] ss:$16 sps:$4 sm:$0xff]  }
 0x6f5   : > { %17545 = vmatprep.subr.bf16.mxu0 %v22941_v19  ;;  %v23020_v19 = vld [vmem:[%s32079_s7 + $0x8c0] ss:$16 sps:$4 sm:$0xff]  }
 0x6f7   : > { %16521 = vmatpush1.bf16.msra.mxu1 %v22936_v61  ;;  %v23023_v61 = vld [vmem:[%s32079_s7 + $0x8c8] ss:$16 sps:$4 sm:$0xff]  }
 0x6f8   : > { %17546 = vmatpush1.bf16.msra.mxu0 %v22939_v44  ;;  %16522 = vmatprep.subr.bf16.mxu1 %v22944_v43  ;;  %v23028_v44 = vld [vmem:[%s32079_s7 + $0x8e4] ss:$16 sps:$4 sm:$0xff]   ;;  %v23031_v43 = vld [vmem:[%s32079_s7 + $0x8ec] ss:$16 sps:$4 sm:$0xff]  }
 0x6f9   : > { %17547 = vmatprep.subr.bf16.mxu0 %v22947_v55  ;;  %v23026_v55 = vld [vmem:[%s32079_s7 + $0x8e0] ss:$16 sps:$4 sm:$0xff]  }
 0x6fb   : > { %16523 = vmatpush1.bf16.msra.mxu1 %v22942_v20  ;;  %v23029_v20 = vld [vmem:[%s32079_s7 + $0x8e8] ss:$16 sps:$4 sm:$0xff]  }
 0x6fc   : > { %17548 = vmatpush1.bf16.msra.mxu0 %v22945_v46  ;;  %16524 = vmatprep.subr.bf16.mxu1 %v22950_v59  ;;  %v23034_v46 = vld [vmem:[%s32079_s7 + $0x904] ss:$16 sps:$4 sm:$0xff]   ;;  %v23037_v59 = vld [vmem:[%s32079_s7 + $0x90c] ss:$16 sps:$4 sm:$0xff]  }
 0x6fd   : > { %17549 = vmatprep.subr.bf16.mxu0 %v22953_v51  ;;  %v23032_v51 = vld [vmem:[%s32079_s7 + $0x900] ss:$16 sps:$4 sm:$0xff]  }
 0x6ff   : > { %16525 = vmatpush1.bf16.msra.mxu1 %v22948_v60  ;;  %v23035_v60 = vld [vmem:[%s32079_s7 + $0x908] ss:$16 sps:$4 sm:$0xff]  }
 0x700   : > { %17550 = vmatpush1.bf16.msra.mxu0 %v22951_v41  ;;  %16526 = vmatprep.subr.bf16.mxu1 %v22956_v35  ;;  %v23040_v41 = vld [vmem:[%s32079_s7 + $0x924] ss:$16 sps:$4 sm:$0xff]   ;;  %v23043_v35 = vld [vmem:[%s32079_s7 + $0x92c] ss:$16 sps:$4 sm:$0xff]  }
 0x701   : > { %17551 = vmatprep.subr.bf16.mxu0 %v22959_v21  ;;  %v23038_v21 = vld [vmem:[%s32079_s7 + $0x920] ss:$16 sps:$4 sm:$0xff]  }
 0x703   : > { %16527 = vmatpush1.bf16.msra.mxu1 %v22954_v45  ;;  %v23041_v45 = vld [vmem:[%s32079_s7 + $0x928] ss:$16 sps:$4 sm:$0xff]  }
 0x704   : > { %17552 = vmatpush1.bf16.msra.mxu0 %v22957_v24  ;;  %16528 = vmatprep.subr.bf16.mxu1 %v22962_v37  ;;  %v23046_v24 = vld [vmem:[%s32079_s7 + $0x944] ss:$16 sps:$4 sm:$0xff]   ;;  %v23049_v37 = vld [vmem:[%s32079_s7 + $0x94c] ss:$16 sps:$4 sm:$0xff]  }
 0x705   : > { %17553 = vmatprep.subr.bf16.mxu0 %v22965_v63  ;;  %v23044_v63 = vld [vmem:[%s32079_s7 + $0x940] ss:$16 sps:$4 sm:$0xff]  }
 0x707   : > { %16529 = vmatpush1.bf16.msra.mxu1 %v22960_v3  ;;  %v23047_v3 = vld [vmem:[%s32079_s7 + $0x948] ss:$16 sps:$4 sm:$0xff]  }
 0x708   : > { %17554 = vmatpush1.bf16.msra.mxu0 %v22963_v57  ;;  %16530 = vmatprep.subr.bf16.mxu1 %v22968_v18  ;;  %v23052_v57 = vld [vmem:[%s32079_s7 + $0x964] ss:$16 sps:$4 sm:$0xff]   ;;  %v23055_v18 = vld [vmem:[%s32079_s7 + $0x96c] ss:$16 sps:$4 sm:$0xff]  }
 0x709   : > { %17555 = vmatprep.subr.bf16.mxu0 %v22971_v36  ;;  %v23050_v36 = vld [vmem:[%s32079_s7 + $0x960] ss:$16 sps:$4 sm:$0xff]  }
 0x70b   : > { %16531 = vmatpush1.bf16.msra.mxu1 %v22966_v11  ;;  %v23053_v11 = vld [vmem:[%s32079_s7 + $0x968] ss:$16 sps:$4 sm:$0xff]  }
 0x70c   : > { %17556 = vmatpush1.bf16.msra.mxu0 %v22969_v47  ;;  %16532 = vmatprep.subr.bf16.mxu1 %v22974_v26  ;;  %v23058_v47 = vld [vmem:[%s32079_s7 + $0x984] ss:$16 sps:$4 sm:$0xff]   ;;  %v23061_v26 = vld [vmem:[%s32079_s7 + $0x98c] ss:$16 sps:$4 sm:$0xff]  }
 0x70d   : > { %17557 = vmatprep.subr.bf16.mxu0 %v22977_v49  ;;  %v23056_v49 = vld [vmem:[%s32079_s7 + $0x980] ss:$16 sps:$4 sm:$0xff]  }
 0x70f   : > { %16533 = vmatpush1.bf16.msra.mxu1 %v22972_v53  ;;  %v23059_v53 = vld [vmem:[%s32079_s7 + $0x988] ss:$16 sps:$4 sm:$0xff]  }
 0x710   : > { %17558 = vmatpush1.bf16.msra.mxu0 %v22975_v16  ;;  %16534 = vmatprep.subr.bf16.mxu1 %v22980_v50  ;;  %v23064_v16 = vld [vmem:[%s32079_s7 + $0x9a4] ss:$16 sps:$4 sm:$0xff]   ;;  %v23067_v50 = vld [vmem:[%s32079_s7 + $0x9ac] ss:$16 sps:$4 sm:$0xff]  }
 0x711   : > { %17559 = vmatprep.subr.bf16.mxu0 %v22983_v38  ;;  %v23062_v38 = vld [vmem:[%s32079_s7 + $0x9a0] ss:$16 sps:$4 sm:$0xff]  }
 0x713   : > { %16535 = vmatpush1.bf16.msra.mxu1 %v22978_v52  ;;  %v23065_v52 = vld [vmem:[%s32079_s7 + $0x9a8] ss:$16 sps:$4 sm:$0xff]  }
 0x714   : > { %17560 = vmatpush1.bf16.msra.mxu0 %v22981_v4  ;;  %16545 = vmatprep.subr.bf16.mxu1 %v22986_v15  ;;  %v23070_v4 = vld [vmem:[%s32079_s7 + $0x9c4] ss:$16 sps:$4 sm:$0xff]   ;;  %v23073_v15 = vld [vmem:[%s32079_s7 + $0x9cc] ss:$16 sps:$4 sm:$0xff]  }
 0x715   : > { %17570 = vmatprep.subr.bf16.mxu0 %v22989_v27  ;;  %v23068_v27 = vld [vmem:[%s32079_s7 + $0x9c0] ss:$16 sps:$4 sm:$0xff]  }
 0x716   : > { %16537 = vmatmul.mubr.bf16.vlgmr.msra.gmra.mrb[32].mxu1 %v8209_v25 }
 0x717   : > { %17562 = vmatmul.mubr.bf16.vlgmr.msra.gmra.mrb[16].mxu0 %v8209_v25  ;;  %16546 = vmatpush1.bf16.msra.mxu1 %v22984_v12  ;;  %v23076_v12 = vld [vmem:[%s32079_s7 + $0x9e4] ss:$16 sps:$4 sm:$0xff]   ;;  %v23079_v25 = vld [vmem:[%s32079_s7 + $0x9ec] ss:$16 sps:$4 sm:$0xff]  }
 0x718   : > { %16577 = vmatprep.mubr.bf16.mxu1 %v27818_v10  ;;  %17571 = vmatpush1.bf16.msra.mxu0 %v22987_v22  ;;  %v23074_v22 = vld [vmem:[%s32079_s7 + $0x9e0] ss:$16 sps:$4 sm:$0xff]  }
 0x719   : > { %17602 = vmatprep.mubr.bf16.mxu0 %v27818_v10  ;;  %16547 = vmatprep.subr.bf16.mxu1 %v22992_v56  ;;  %v23077_v56 = vld [vmem:[%s32079_s7 + $0x9e8] ss:$16 sps:$4 sm:$0xff]  }
 0x71a   : > { %17572 = vmatprep.subr.bf16.mxu0 %v22995_v8  ;;  %v23082_v8 = vld [vmem:[%s32079_s7 + $0xa04] ss:$16 sps:$4 sm:$0xff]  }
 0x71b   : > { %16548 = vmatpush1.bf16.msra.mxu1 %v22990_v1  ;;  %v23085_v1 = vld [vmem:[%s32079_s7 + $0xa0c] ss:$16 sps:$4 sm:$0xff]  }
 0x71c   : > { %17573 = vmatpush1.bf16.msra.mxu0 %v22993_v9  ;;  %16549 = vmatprep.subr.bf16.mxu1 %v22998_v13  ;;  %v23080_v9 = vld [vmem:[%s32079_s7 + $0xa00] ss:$16 sps:$4 sm:$0xff]   ;;  %v28010_v13 = vrot.slane %v27790_v40, %v27039_v29  ;;  %v23091_v40 = vld [vmem:[%s32079_s7 + $0xa2c] ss:$16 sps:$4 sm:$0xff]  }
 0x71d   : > { %17574 = vmatprep.subr.bf16.mxu0 %v23001_v42  ;;  %v23083_v42 = vld [vmem:[%s32079_s7 + $0xa08] ss:$16 sps:$4 sm:$0xff]  }
 0x71f   : > { %16550 = vmatpush1.bf16.msra.mxu1 %v22996_v54  ;;  %v23088_v54 = vld [vmem:[%s32079_s7 + $0xa24] ss:$16 sps:$4 sm:$0xff]  }
 0x720   : > { %17575 = vmatpush1.bf16.msra.mxu0 %v22999_v34  ;;  %16551 = vmatprep.subr.bf16.mxu1 %v23004_v7  ;;  %v8259_v34 = vcombine.high %v27818_v10, %v27818_v10  ;;  %v23086_v7 = vld [vmem:[%s32079_s7 + $0xa20] ss:$16 sps:$4 sm:$0xff]   ;;  %v23094_v10 = vld [vmem:[%s32079_s7 + $0xa44] ss:$16 sps:$4 sm:$0xff]  }
 0x721   : > { %17576 = vmatprep.subr.bf16.mxu0 %v23007_v32  ;;  %v23089_v32 = vld [vmem:[%s32079_s7 + $0xa28] ss:$16 sps:$4 sm:$0xff]  }
 0x723   : > { %16552 = vmatpush1.bf16.msra.mxu1 %v23002_v58  ;;  %v23097_v58 = vld [vmem:[%s32079_s7 + $0xa4c] ss:$16 sps:$4 sm:$0xff]  }
 0x724   : > { %17577 = vmatpush1.bf16.msra.mxu0 %v23005_v23  ;;  %16553 = vmatprep.subr.bf16.mxu1 %v23010_v0  ;;  %v23092_v23 = vld [vmem:[%s32079_s7 + $0xa40] ss:$16 sps:$4 sm:$0xff]   ;;  %v23095_v0 = vld [vmem:[%s32079_s7 + $0xa48] ss:$16 sps:$4 sm:$0xff]  }
 0x725   : > { %17578 = vmatprep.subr.bf16.mxu0 %v23013_v14  ;;  %v23100_v14 = vld [vmem:[%s32079_s7 + $0xa64] ss:$16 sps:$4 sm:$0xff]  }
 0x727   : > { %16554 = vmatpush1.bf16.msra.mxu1 %v23008_v31  ;;  %v23103_v31 = vld [vmem:[%s32079_s7 + $0xa6c] ss:$16 sps:$4 sm:$0xff]  }
 0x728   : > { %17579 = vmatpush1.bf16.msra.mxu0 %v23011_v6  ;;  %16555 = vmatprep.subr.bf16.mxu1 %v23016_v48  ;;  %v23098_v6 = vld [vmem:[%s32079_s7 + $0xa60] ss:$16 sps:$4 sm:$0xff]   ;;  %v23101_v48 = vld [vmem:[%s32079_s7 + $0xa68] ss:$16 sps:$4 sm:$0xff]  }
 0x729   : > { %17580 = vmatprep.subr.bf16.mxu0 %v23019_v17  ;;  %v23106_v17 = vld [vmem:[%s32079_s7 + $0xa84] ss:$16 sps:$4 sm:$0xff]  }
 0x72b   : > { %16556 = vmatpush1.bf16.msra.mxu1 %v23014_v30  ;;  %v23109_v30 = vld [vmem:[%s32079_s7 + $0xa8c] ss:$16 sps:$4 sm:$0xff]  }
 0x72c   : > { %17581 = vmatpush1.bf16.msra.mxu0 %v23017_v28  ;;  %16557 = vmatprep.subr.bf16.mxu1 %v23022_v5  ;;  %v23104_v28 = vld [vmem:[%s32079_s7 + $0xa80] ss:$16 sps:$4 sm:$0xff]   ;;  %v23107_v5 = vld [vmem:[%s32079_s7 + $0xa88] ss:$16 sps:$4 sm:$0xff]  }
 0x72d   : > { %17582 = vmatprep.subr.bf16.mxu0 %v23025_v33  ;;  %v23112_v33 = vld [vmem:[%s32079_s7 + $0xaa4] ss:$16 sps:$4 sm:$0xff]  }
 0x72f   : > { %16558 = vmatpush1.bf16.msra.mxu1 %v23020_v19  ;;  %v23115_v19 = vld [vmem:[%s32079_s7 + $0xaac] ss:$16 sps:$4 sm:$0xff]  }
 0x730   : > { %17583 = vmatpush1.bf16.msra.mxu0 %v23023_v61  ;;  %16559 = vmatprep.subr.bf16.mxu1 %v23028_v44  ;;  %v23110_v61 = vld [vmem:[%s32079_s7 + $0xaa0] ss:$16 sps:$4 sm:$0xff]   ;;  %v23113_v44 = vld [vmem:[%s32079_s7 + $0xaa8] ss:$16 sps:$4 sm:$0xff]  }
 0x731   : > { %17584 = vmatprep.subr.bf16.mxu0 %v23031_v43  ;;  %v23118_v43 = vld [vmem:[%s32079_s7 + $0xac4] ss:$16 sps:$4 sm:$0xff]  }
 0x733   : > { %16560 = vmatpush1.bf16.msra.mxu1 %v23026_v55  ;;  %v23121_v55 = vld [vmem:[%s32079_s7 + $0xacc] ss:$16 sps:$4 sm:$0xff]  }
 0x734   : > { %17585 = vmatpush1.bf16.msra.mxu0 %v23029_v20  ;;  %16561 = vmatprep.subr.bf16.mxu1 %v23034_v46  ;;  %v23116_v20 = vld [vmem:[%s32079_s7 + $0xac0] ss:$16 sps:$4 sm:$0xff]   ;;  %v23119_v46 = vld [vmem:[%s32079_s7 + $0xac8] ss:$16 sps:$4 sm:$0xff]  }
 0x735   : > { %17586 = vmatprep.subr.bf16.mxu0 %v23037_v59  ;;  %v23124_v59 = vld [vmem:[%s32079_s7 + $0xae4] ss:$16 sps:$4 sm:$0xff]  }
 0x737   : > { %16562 = vmatpush1.bf16.msra.mxu1 %v23032_v51  ;;  %v23127_v51 = vld [vmem:[%s32079_s7 + $0xaec] ss:$16 sps:$4 sm:$0xff]  }
 0x738   : > { %17587 = vmatpush1.bf16.msra.mxu0 %v23035_v60  ;;  %16563 = vmatprep.subr.bf16.mxu1 %v23040_v41  ;;  %v23122_v60 = vld [vmem:[%s32079_s7 + $0xae0] ss:$16 sps:$4 sm:$0xff]   ;;  %v23125_v41 = vld [vmem:[%s32079_s7 + $0xae8] ss:$16 sps:$4 sm:$0xff]  }
 0x739   : > { %17588 = vmatprep.subr.bf16.mxu0 %v23043_v35  ;;  %v23130_v35 = vld [vmem:[%s32079_s7 + $0xb04] ss:$16 sps:$4 sm:$0xff]  }
 0x73b   : > { %16564 = vmatpush1.bf16.msra.mxu1 %v23038_v21  ;;  %v23133_v21 = vld [vmem:[%s32079_s7 + $0xb0c] ss:$16 sps:$4 sm:$0xff]  }
 0x73c   : > { %17589 = vmatpush1.bf16.msra.mxu0 %v23041_v45  ;;  %16565 = vmatprep.subr.bf16.mxu1 %v23046_v24  ;;  %v23128_v45 = vld [vmem:[%s32079_s7 + $0xb00] ss:$16 sps:$4 sm:$0xff]   ;;  %v23131_v24 = vld [vmem:[%s32079_s7 + $0xb08] ss:$16 sps:$4 sm:$0xff]  }
 0x73d   : > { %17590 = vmatprep.subr.bf16.mxu0 %v23049_v37  ;;  %v23136_v37 = vld [vmem:[%s32079_s7 + $0xb24] ss:$16 sps:$4 sm:$0xff]  }
 0x73f   : > { %16566 = vmatpush1.bf16.msra.mxu1 %v23044_v63  ;;  %v23139_v63 = vld [vmem:[%s32079_s7 + $0xb2c] ss:$16 sps:$4 sm:$0xff]  }
 0x740   : > { %17591 = vmatpush1.bf16.msra.mxu0 %v23047_v3  ;;  %16567 = vmatprep.subr.bf16.mxu1 %v23052_v57  ;;  %v23134_v3 = vld [vmem:[%s32079_s7 + $0xb20] ss:$16 sps:$4 sm:$0xff]   ;;  %v23137_v57 = vld [vmem:[%s32079_s7 + $0xb28] ss:$16 sps:$4 sm:$0xff]  }
 0x741   : > { %17592 = vmatprep.subr.bf16.mxu0 %v23055_v18  ;;  %v23142_v18 = vld [vmem:[%s32079_s7 + $0xb44] ss:$16 sps:$4 sm:$0xff]  }
 0x743   : > { %16568 = vmatpush1.bf16.msra.mxu1 %v23050_v36  ;;  %v23145_v36 = vld [vmem:[%s32079_s7 + $0xb4c] ss:$16 sps:$4 sm:$0xff]  }
 0x744   : > { %17593 = vmatpush1.bf16.msra.mxu0 %v23053_v11  ;;  %16569 = vmatprep.subr.bf16.mxu1 %v23058_v47  ;;  %v23140_v11 = vld [vmem:[%s32079_s7 + $0xb40] ss:$16 sps:$4 sm:$0xff]   ;;  %v23143_v47 = vld [vmem:[%s32079_s7 + $0xb48] ss:$16 sps:$4 sm:$0xff]  }
 0x745   : > { %17594 = vmatprep.subr.bf16.mxu0 %v23061_v26  ;;  %v23148_v26 = vld [vmem:[%s32079_s7 + $0xb64] ss:$16 sps:$4 sm:$0xff]  }
 0x747   : > { %16570 = vmatpush1.bf16.msra.mxu1 %v23056_v49  ;;  %v23151_v49 = vld [vmem:[%s32079_s7 + $0xb6c] ss:$16 sps:$4 sm:$0xff]  }
 0x748   : > { %17595 = vmatpush1.bf16.msra.mxu0 %v23059_v53  ;;  %16571 = vmatprep.subr.bf16.mxu1 %v23064_v16  ;;  %v23146_v53 = vld [vmem:[%s32079_s7 + $0xb60] ss:$16 sps:$4 sm:$0xff]   ;;  %v23149_v16 = vld [vmem:[%s32079_s7 + $0xb68] ss:$16 sps:$4 sm:$0xff]  }
 0x749   : > { %17596 = vmatprep.subr.bf16.mxu0 %v23067_v50  ;;  %v23154_v50 = vld [vmem:[%s32079_s7 + $0xb84] ss:$16 sps:$4 sm:$0xff]  }
 0x74b   : > { %16572 = vmatpush1.bf16.msra.mxu1 %v23062_v38  ;;  %v23157_v38 = vld [vmem:[%s32079_s7 + $0xb8c] ss:$16 sps:$4 sm:$0xff]  }
 0x74c   : > { %17597 = vmatpush1.bf16.msra.mxu0 %v23065_v52  ;;  %16573 = vmatprep.subr.bf16.mxu1 %v23070_v4  ;;  %v23152_v52 = vld [vmem:[%s32079_s7 + $0xb80] ss:$16 sps:$4 sm:$0xff]   ;;  %v23155_v4 = vld [vmem:[%s32079_s7 + $0xb88] ss:$16 sps:$4 sm:$0xff]  }
 0x74d   : > { %17598 = vmatprep.subr.bf16.mxu0 %v23073_v15  ;;  %v23160_v15 = vld [vmem:[%s32079_s7 + $0xba4] ss:$16 sps:$4 sm:$0xff]  }
 0x74f   : > { %16574 = vmatpush1.bf16.msra.mxu1 %v23068_v27  ;;  %v23163_v27 = vld [vmem:[%s32079_s7 + $0xbac] ss:$16 sps:$4 sm:$0xff]  }
 0x750   : > { %17599 = vmatpush1.bf16.msra.mxu0 %v23071_v39  ;;  %16575 = vmatprep.subr.bf16.mxu1 %v23076_v12  ;;  %v23158_v39 = vld [vmem:[%s32079_s7 + $0xba0] ss:$16 sps:$4 sm:$0xff]   ;;  %v23161_v12 = vld [vmem:[%s32079_s7 + $0xba8] ss:$16 sps:$4 sm:$0xff]  }
 0x751   : > { %17600 = vmatprep.subr.bf16.mxu0 %v23079_v25  ;;  %v23166_v25 = vld [vmem:[%s32079_s7 + $0xbc4] ss:$16 sps:$4 sm:$0xff]  }
 0x753   : > { %16576 = vmatpush1.bf16.msra.mxu1 %v23074_v22  ;;  %v23169_v22 = vld [vmem:[%s32079_s7 + $0xbcc] ss:$16 sps:$4 sm:$0xff]  }
 0x754   : > { %17601 = vmatpush1.bf16.msra.mxu0 %v23077_v56  ;;  %16586 = vmatprep.subr.bf16.mxu1 %v23082_v8  ;;  %v8212_v56 = vcombine.high %v27777_v62, %v27777_v62  ;;  %v23164_v8 = vld [vmem:[%s32079_s7 + $0xbc0] ss:$16 sps:$4 sm:$0xff]   ;;  %v23175_v62 = vld [vmem:[%s32079_s7 + $0xbec] ss:$16 sps:$4 sm:$0xff]  }
 0x755   : > { %17611 = vmatprep.subr.bf16.mxu0 %v23085_v1  ;;  %v23167_v1 = vld [vmem:[%s32079_s7 + $0xbc8] ss:$16 sps:$4 sm:$0xff]  }
 0x756   : > { %16578 = vmatmul.mubr.bf16.vlgmr.msra.gmra.mrb[32].mxu1 %v28010_v13 }
 0x757   : > { %17603 = vmatmul.mubr.bf16.vlgmr.msra.gmra.mrb[16].mxu0 %v28010_v13  ;;  %16587 = vmatpush1.bf16.msra.mxu1 %v23080_v9  ;;  %v23172_v9 = vld [vmem:[%s32079_s7 + $0xbe4] ss:$16 sps:$4 sm:$0xff]  }
 0x758   : > { %16618 = vmatprep.mubr.bf16.mxu1 %v8259_v34  ;;  %17612 = vmatpush1.bf16.msra.mxu0 %v23083_v42  ;;  %v28196_v42 = vrot.slane %v8212_v56, %v27039_v29  ;;  %v23252_v56 = vld [vmem:[%s32079_s7 + $0xd88] ss:$16 sps:$4 sm:$0xff]  }
 0x759   : > { %17643 = vmatprep.mubr.bf16.mxu0 %v8259_v34  ;;  %16588 = vmatprep.subr.bf16.mxu1 %v23088_v54  ;;  %v23170_v54 = vld [vmem:[%s32079_s7 + $0xbe0] ss:$16 sps:$4 sm:$0xff]   ;;  %v23173_v34 = vld [vmem:[%s32079_s7 + $0xbe8] ss:$16 sps:$4 sm:$0xff]  }
 0x75a   : > { %17613 = vmatprep.subr.bf16.mxu0 %v23091_v40  ;;  %v23178_v40 = vld [vmem:[%s32079_s7 + $0xc04] ss:$16 sps:$4 sm:$0xff]  }
 0x75b   : > { %16589 = vmatpush1.bf16.msra.mxu1 %v23086_v7  ;;  %v23181_v7 = vld [vmem:[%s32079_s7 + $0xc0c] ss:$16 sps:$4 sm:$0xff]  }
 0x75c   : > { %17614 = vmatpush1.bf16.msra.mxu0 %v23089_v32  ;;  %16590 = vmatprep.subr.bf16.mxu1 %v23094_v10  ;;  %v8228_v32 = vcombine.high %v28196_v42, %v28196_v42  ;;  %v23176_v10 = vld [vmem:[%s32079_s7 + $0xc00] ss:$16 sps:$4 sm:$0xff]  }
 0x75d   : > { %17615 = vmatprep.subr.bf16.mxu0 %v23097_v58  ;;  %v8257_v58 = vcombine.high %v28010_v13, %v28010_v13  ;;  %v23183_v13 = vld [vmem:[%s32079_s7 + $0xc20] ss:$16 sps:$4 sm:$0xff]  }
 0x75f   : > { %16591 = vmatpush1.bf16.msra.mxu1 %v23092_v23  ;;  %v23179_v23 = vld [vmem:[%s32079_s7 + $0xc08] ss:$16 sps:$4 sm:$0xff]  }
 0x760   : > { %17616 = vmatpush1.bf16.msra.mxu0 %v23095_v0  ;;  %16592 = vmatprep.subr.bf16.mxu1 %v23100_v14  ;;  %v23185_v0 = vld [vmem:[%s32079_s7 + $0xc24] ss:$16 sps:$4 sm:$0xff]   ;;  %v28224_v14 = vrot.slane %v8228_v32, %v27039_v29 }
 0x761   : > { %17617 = vmatprep.subr.bf16.mxu0 %v23103_v31  ;;  %v23188_v31 = vld [vmem:[%s32079_s7 + $0xc2c] ss:$16 sps:$4 sm:$0xff]   ;;  %v23269_v32 = vld [vmem:[%s32079_s7 + $0xde4] ss:$16 sps:$4 sm:$0xff]  }
 0x763   : > { %16593 = vmatpush1.bf16.msra.mxu1 %v23098_v6  ;;  %v23186_v6 = vld [vmem:[%s32079_s7 + $0xc28] ss:$16 sps:$4 sm:$0xff]  }
 0x764   : > { %17618 = vmatpush1.bf16.msra.mxu0 %v23101_v48  ;;  %16594 = vmatprep.subr.bf16.mxu1 %v23106_v17  ;;  %v23191_v48 = vld [vmem:[%s32079_s7 + $0xc44] ss:$16 sps:$4 sm:$0xff]   ;;  %v23194_v17 = vld [vmem:[%s32079_s7 + $0xc4c] ss:$16 sps:$4 sm:$0xff]  }
 0x765   : > { %17619 = vmatprep.subr.bf16.mxu0 %v23109_v30  ;;  %v23189_v30 = vld [vmem:[%s32079_s7 + $0xc40] ss:$16 sps:$4 sm:$0xff]  }
 0x767   : > { %16595 = vmatpush1.bf16.msra.mxu1 %v23104_v28  ;;  %v23192_v28 = vld [vmem:[%s32079_s7 + $0xc48] ss:$16 sps:$4 sm:$0xff]  }
 0x768   : > { %17620 = vmatpush1.bf16.msra.mxu0 %v23107_v5  ;;  %16596 = vmatprep.subr.bf16.mxu1 %v23112_v33  ;;  %v23197_v5 = vld [vmem:[%s32079_s7 + $0xc64] ss:$16 sps:$4 sm:$0xff]   ;;  %v23200_v33 = vld [vmem:[%s32079_s7 + $0xc6c] ss:$16 sps:$4 sm:$0xff]  }
 0x769   : > { %17621 = vmatprep.subr.bf16.mxu0 %v23115_v19  ;;  %v23195_v19 = vld [vmem:[%s32079_s7 + $0xc60] ss:$16 sps:$4 sm:$0xff]  }
 0x76b   : > { %16597 = vmatpush1.bf16.msra.mxu1 %v23110_v61  ;;  %v23198_v61 = vld [vmem:[%s32079_s7 + $0xc68] ss:$16 sps:$4 sm:$0xff]  }
 0x76c   : > { %17622 = vmatpush1.bf16.msra.mxu0 %v23113_v44  ;;  %16598 = vmatprep.subr.bf16.mxu1 %v23118_v43  ;;  %v23203_v44 = vld [vmem:[%s32079_s7 + $0xc84] ss:$16 sps:$4 sm:$0xff]   ;;  %v23206_v43 = vld [vmem:[%s32079_s7 + $0xc8c] ss:$16 sps:$4 sm:$0xff]  }
 0x76d   : > { %17623 = vmatprep.subr.bf16.mxu0 %v23121_v55  ;;  %v23201_v55 = vld [vmem:[%s32079_s7 + $0xc80] ss:$16 sps:$4 sm:$0xff]  }
 0x76f   : > { %16599 = vmatpush1.bf16.msra.mxu1 %v23116_v20  ;;  %v23204_v20 = vld [vmem:[%s32079_s7 + $0xc88] ss:$16 sps:$4 sm:$0xff]  }
 0x770   : > { %17624 = vmatpush1.bf16.msra.mxu0 %v23119_v46  ;;  %16600 = vmatprep.subr.bf16.mxu1 %v23124_v59  ;;  %v23209_v46 = vld [vmem:[%s32079_s7 + $0xca4] ss:$16 sps:$4 sm:$0xff]   ;;  %v23212_v59 = vld [vmem:[%s32079_s7 + $0xcac] ss:$16 sps:$4 sm:$0xff]  }
 0x771   : > { %17625 = vmatprep.subr.bf16.mxu0 %v23127_v51  ;;  %v23207_v51 = vld [vmem:[%s32079_s7 + $0xca0] ss:$16 sps:$4 sm:$0xff]  }
 0x773   : > { %16601 = vmatpush1.bf16.msra.mxu1 %v23122_v60  ;;  %v23210_v60 = vld [vmem:[%s32079_s7 + $0xca8] ss:$16 sps:$4 sm:$0xff]  }
 0x774   : > { %17626 = vmatpush1.bf16.msra.mxu0 %v23125_v41  ;;  %16602 = vmatprep.subr.bf16.mxu1 %v23130_v35  ;;  %v23215_v41 = vld [vmem:[%s32079_s7 + $0xcc4] ss:$16 sps:$4 sm:$0xff]   ;;  %v23218_v35 = vld [vmem:[%s32079_s7 + $0xccc] ss:$16 sps:$4 sm:$0xff]  }
 0x775   : > { %17627 = vmatprep.subr.bf16.mxu0 %v23133_v21  ;;  %v23213_v21 = vld [vmem:[%s32079_s7 + $0xcc0] ss:$16 sps:$4 sm:$0xff]  }
 0x777   : > { %16603 = vmatpush1.bf16.msra.mxu1 %v23128_v45  ;;  %v23216_v45 = vld [vmem:[%s32079_s7 + $0xcc8] ss:$16 sps:$4 sm:$0xff]  }
 0x778   : > { %17628 = vmatpush1.bf16.msra.mxu0 %v23131_v24  ;;  %16604 = vmatprep.subr.bf16.mxu1 %v23136_v37  ;;  %v23221_v24 = vld [vmem:[%s32079_s7 + $0xce4] ss:$16 sps:$4 sm:$0xff]   ;;  %v23224_v37 = vld [vmem:[%s32079_s7 + $0xcec] ss:$16 sps:$4 sm:$0xff]  }
 0x779   : > { %17629 = vmatprep.subr.bf16.mxu0 %v23139_v63  ;;  %v23219_v63 = vld [vmem:[%s32079_s7 + $0xce0] ss:$16 sps:$4 sm:$0xff]  }
 0x77b   : > { %16605 = vmatpush1.bf16.msra.mxu1 %v23134_v3  ;;  %v23222_v3 = vld [vmem:[%s32079_s7 + $0xce8] ss:$16 sps:$4 sm:$0xff]  }
 0x77c   : > { %17630 = vmatpush1.bf16.msra.mxu0 %v23137_v57  ;;  %16606 = vmatprep.subr.bf16.mxu1 %v23142_v18  ;;  %v23227_v57 = vld [vmem:[%s32079_s7 + $0xd04] ss:$16 sps:$4 sm:$0xff]   ;;  %v23230_v18 = vld [vmem:[%s32079_s7 + $0xd0c] ss:$16 sps:$4 sm:$0xff]  }
 0x77d   : > { %17631 = vmatprep.subr.bf16.mxu0 %v23145_v36  ;;  %v23225_v36 = vld [vmem:[%s32079_s7 + $0xd00] ss:$16 sps:$4 sm:$0xff]  }
 0x77f   : > { %16607 = vmatpush1.bf16.msra.mxu1 %v23140_v11  ;;  %v23228_v11 = vld [vmem:[%s32079_s7 + $0xd08] ss:$16 sps:$4 sm:$0xff]  }
 0x780   : > { %17632 = vmatpush1.bf16.msra.mxu0 %v23143_v47  ;;  %16608 = vmatprep.subr.bf16.mxu1 %v23148_v26  ;;  %v23233_v47 = vld [vmem:[%s32079_s7 + $0xd24] ss:$16 sps:$4 sm:$0xff]   ;;  %v23236_v26 = vld [vmem:[%s32079_s7 + $0xd2c] ss:$16 sps:$4 sm:$0xff]  }
 0x781   : > { %17633 = vmatprep.subr.bf16.mxu0 %v23151_v49  ;;  %v23231_v49 = vld [vmem:[%s32079_s7 + $0xd20] ss:$16 sps:$4 sm:$0xff]  }
 0x783   : > { %16609 = vmatpush1.bf16.msra.mxu1 %v23146_v53  ;;  %v23234_v53 = vld [vmem:[%s32079_s7 + $0xd28] ss:$16 sps:$4 sm:$0xff]  }
 0x784   : > { %17634 = vmatpush1.bf16.msra.mxu0 %v23149_v16  ;;  %16610 = vmatprep.subr.bf16.mxu1 %v23154_v50  ;;  %v23239_v16 = vld [vmem:[%s32079_s7 + $0xd44] ss:$16 sps:$4 sm:$0xff]   ;;  %v23242_v50 = vld [vmem:[%s32079_s7 + $0xd4c] ss:$16 sps:$4 sm:$0xff]  }
 0x785   : > { %17635 = vmatprep.subr.bf16.mxu0 %v23157_v38  ;;  %v23237_v38 = vld [vmem:[%s32079_s7 + $0xd40] ss:$16 sps:$4 sm:$0xff]  }
 0x787   : > { %16611 = vmatpush1.bf16.msra.mxu1 %v23152_v52  ;;  %v23240_v52 = vld [vmem:[%s32079_s7 + $0xd48] ss:$16 sps:$4 sm:$0xff]  }
 0x788   : > { %17636 = vmatpush1.bf16.msra.mxu0 %v23155_v4  ;;  %16612 = vmatprep.subr.bf16.mxu1 %v23160_v15  ;;  %v23245_v4 = vld [vmem:[%s32079_s7 + $0xd64] ss:$16 sps:$4 sm:$0xff]   ;;  %v23248_v15 = vld [vmem:[%s32079_s7 + $0xd6c] ss:$16 sps:$4 sm:$0xff]  }
 0x789   : > { %17637 = vmatprep.subr.bf16.mxu0 %v23163_v27  ;;  %v23243_v27 = vld [vmem:[%s32079_s7 + $0xd60] ss:$16 sps:$4 sm:$0xff]  }
 0x78b   : > { %16613 = vmatpush1.bf16.msra.mxu1 %v23158_v39  ;;  %v23246_v39 = vld [vmem:[%s32079_s7 + $0xd68] ss:$16 sps:$4 sm:$0xff]  }
 0x78c   : > { %17638 = vmatpush1.bf16.msra.mxu0 %v23161_v12  ;;  %16614 = vmatprep.subr.bf16.mxu1 %v23166_v25  ;;  %v23251_v12 = vld [vmem:[%s32079_s7 + $0xd84] ss:$16 sps:$4 sm:$0xff]   ;;  %v23254_v25 = vld [vmem:[%s32079_s7 + $0xd8c] ss:$16 sps:$4 sm:$0xff]  }
 0x78d   : > { %17639 = vmatprep.subr.bf16.mxu0 %v23169_v22  ;;  %v23249_v22 = vld [vmem:[%s32079_s7 + $0xd80] ss:$16 sps:$4 sm:$0xff]  }
 0x78f   : > { %16615 = vmatpush1.bf16.msra.mxu1 %v23164_v8  ;;  %v23257_v8 = vld [vmem:[%s32079_s7 + $0xda4] ss:$16 sps:$4 sm:$0xff]  }
 0x790   : > { %17640 = vmatpush1.bf16.msra.mxu0 %v23167_v1  ;;  %16616 = vmatprep.subr.bf16.mxu1 %v23172_v9  ;;  %v23260_v1 = vld [vmem:[%s32079_s7 + $0xdac] ss:$16 sps:$4 sm:$0xff]   ;;  %v23255_v9 = vld [vmem:[%s32079_s7 + $0xda0] ss:$16 sps:$4 sm:$0xff]  }
 0x791   : > { %17641 = vmatprep.subr.bf16.mxu0 %v23175_v62  ;;  %v23258_v62 = vld [vmem:[%s32079_s7 + $0xda8] ss:$16 sps:$4 sm:$0xff]  }
 0x793   : > { %16617 = vmatpush1.bf16.msra.mxu1 %v23170_v54  ;;  %v23263_v54 = vld [vmem:[%s32079_s7 + $0xdc4] ss:$16 sps:$4 sm:$0xff]  }
 0x794   : > { %17642 = vmatpush1.bf16.msra.mxu0 %v23173_v34  ;;  %16627 = vmatprep.subr.bf16.mxu1 %v23178_v40  ;;  %v23266_v34 = vld [vmem:[%s32079_s7 + $0xdcc] ss:$16 sps:$4 sm:$0xff]   ;;  %v23261_v40 = vld [vmem:[%s32079_s7 + $0xdc0] ss:$16 sps:$4 sm:$0xff]  }
 0x795   : > { %17652 = vmatprep.subr.bf16.mxu0 %v23181_v7  ;;  %v23264_v7 = vld [vmem:[%s32079_s7 + $0xdc8] ss:$16 sps:$4 sm:$0xff]  }
 0x796   : > { %16619 = vmatmul.mubr.bf16.vlgmr.msra.gmra.mrb[32].mxu1 %v8257_v58 }
 0x797   : > { %17644 = vmatmul.mubr.bf16.vlgmr.msra.gmra.mrb[16].mxu0 %v8257_v58  ;;  %16628 = vmatpush1.bf16.msra.mxu1 %v23176_v10  ;;  %v23272_v10 = vld [vmem:[%s32079_s7 + $0xdec] ss:$16 sps:$4 sm:$0xff]   ;;  %v23267_v58 = vld [vmem:[%s32079_s7 + $0xde0] ss:$16 sps:$4 sm:$0xff]  }
 0x798   : > { %16659 = vmatprep.mubr.bf16.mxu1 %v28224_v14  ;;  %17653 = vmatpush1.bf16.msra.mxu0 %v23179_v23  ;;  %v23270_v23 = vld [vmem:[%s32079_s7 + $0xde8] ss:$16 sps:$4 sm:$0xff]  }
 0x799   : > { %17684 = vmatprep.mubr.bf16.mxu0 %v28224_v14  ;;  %16629 = vmatprep.subr.bf16.mxu1 %v23185_v0  ;;  %v23275_v0 = vld [vmem:[%s32079_s7 + $0xe04] ss:$16 sps:$4 sm:$0xff]  }
 0x79a   : > { %17654 = vmatprep.subr.bf16.mxu0 %v23188_v31  ;;  %v23278_v31 = vld [vmem:[%s32079_s7 + $0xe0c] ss:$16 sps:$4 sm:$0xff]  }
 0x79b   : > { %16630 = vmatpush1.bf16.msra.mxu1 %v23183_v13  ;;  %v23273_v13 = vld [vmem:[%s32079_s7 + $0xe00] ss:$16 sps:$4 sm:$0xff]  }
 0x79c   : > { %17655 = vmatpush1.bf16.msra.mxu0 %v23186_v6  ;;  %16631 = vmatprep.subr.bf16.mxu1 %v23191_v48  ;;  %v28416_v6 = vrot.slane %v28196_v42, %v27039_v29  ;;  %v23276_v48 = vld [vmem:[%s32079_s7 + $0xe08] ss:$16 sps:$4 sm:$0xff]   ;;  %v23284_v42 = vld [vmem:[%s32079_s7 + $0xe2c] ss:$16 sps:$4 sm:$0xff]  }
 0x79d   : > { %17656 = vmatprep.subr.bf16.mxu0 %v23194_v17  ;;  %v23281_v17 = vld [vmem:[%s32079_s7 + $0xe24] ss:$16 sps:$4 sm:$0xff]  }
 0x79f   : > { %16632 = vmatpush1.bf16.msra.mxu1 %v23189_v30  ;;  %v8260_v30 = vcombine.high %v28224_v14, %v28224_v14  ;;  %v23287_v14 = vld [vmem:[%s32079_s7 + $0xe44] ss:$16 sps:$4 sm:$0xff]  }
 0x7a0   : > { %17657 = vmatpush1.bf16.msra.mxu0 %v23192_v28  ;;  %16633 = vmatprep.subr.bf16.mxu1 %v23197_v5  ;;  %v23279_v28 = vld [vmem:[%s32079_s7 + $0xe20] ss:$16 sps:$4 sm:$0xff]   ;;  %v23282_v5 = vld [vmem:[%s32079_s7 + $0xe28] ss:$16 sps:$4 sm:$0xff]  }
 0x7a1   : > { %17658 = vmatprep.subr.bf16.mxu0 %v23200_v33  ;;  %v23290_v33 = vld [vmem:[%s32079_s7 + $0xe4c] ss:$16 sps:$4 sm:$0xff]  }
 0x7a3   : > { %16634 = vmatpush1.bf16.msra.mxu1 %v23195_v19  ;;  %v23285_v19 = vld [vmem:[%s32079_s7 + $0xe40] ss:$16 sps:$4 sm:$0xff]  }
 0x7a4   : > { %17659 = vmatpush1.bf16.msra.mxu0 %v23198_v61  ;;  %16635 = vmatprep.subr.bf16.mxu1 %v23203_v44  ;;  %v23288_v61 = vld [vmem:[%s32079_s7 + $0xe48] ss:$16 sps:$4 sm:$0xff]   ;;  %v23293_v44 = vld [vmem:[%s32079_s7 + $0xe64] ss:$16 sps:$4 sm:$0xff]  }
 0x7a5   : > { %17660 = vmatprep.subr.bf16.mxu0 %v23206_v43  ;;  %v23296_v43 = vld [vmem:[%s32079_s7 + $0xe6c] ss:$16 sps:$4 sm:$0xff]  }
 0x7a7   : > { %16636 = vmatpush1.bf16.msra.mxu1 %v23201_v55  ;;  %v23291_v55 = vld [vmem:[%s32079_s7 + $0xe60] ss:$16 sps:$4 sm:$0xff]  }
 0x7a8   : > { %17661 = vmatpush1.bf16.msra.mxu0 %v23204_v20  ;;  %16637 = vmatprep.subr.bf16.mxu1 %v23209_v46  ;;  %v23294_v20 = vld [vmem:[%s32079_s7 + $0xe68] ss:$16 sps:$4 sm:$0xff]   ;;  %v23299_v46 = vld [vmem:[%s32079_s7 + $0xe84] ss:$16 sps:$4 sm:$0xff]  }
 0x7a9   : > { %17662 = vmatprep.subr.bf16.mxu0 %v23212_v59  ;;  %v23302_v59 = vld [vmem:[%s32079_s7 + $0xe8c] ss:$16 sps:$4 sm:$0xff]  }
 0x7ab   : > { %16638 = vmatpush1.bf16.msra.mxu1 %v23207_v51  ;;  %v23297_v51 = vld [vmem:[%s32079_s7 + $0xe80] ss:$16 sps:$4 sm:$0xff]  }
 0x7ac   : > { %17663 = vmatpush1.bf16.msra.mxu0 %v23210_v60  ;;  %16639 = vmatprep.subr.bf16.mxu1 %v23215_v41  ;;  %v23300_v60 = vld [vmem:[%s32079_s7 + $0xe88] ss:$16 sps:$4 sm:$0xff]   ;;  %v23305_v41 = vld [vmem:[%s32079_s7 + $0xea4] ss:$16 sps:$4 sm:$0xff]  }
 0x7ad   : > { %17664 = vmatprep.subr.bf16.mxu0 %v23218_v35  ;;  %v23308_v35 = vld [vmem:[%s32079_s7 + $0xeac] ss:$16 sps:$4 sm:$0xff]  }
 0x7af   : > { %16640 = vmatpush1.bf16.msra.mxu1 %v23213_v21  ;;  %v23303_v21 = vld [vmem:[%s32079_s7 + $0xea0] ss:$16 sps:$4 sm:$0xff]  }
 0x7b0   : > { %17665 = vmatpush1.bf16.msra.mxu0 %v23216_v45  ;;  %16641 = vmatprep.subr.bf16.mxu1 %v23221_v24  ;;  %v23306_v45 = vld [vmem:[%s32079_s7 + $0xea8] ss:$16 sps:$4 sm:$0xff]   ;;  %v23311_v24 = vld [vmem:[%s32079_s7 + $0xec4] ss:$16 sps:$4 sm:$0xff]  }
 0x7b1   : > { %17666 = vmatprep.subr.bf16.mxu0 %v23224_v37  ;;  %v23314_v37 = vld [vmem:[%s32079_s7 + $0xecc] ss:$16 sps:$4 sm:$0xff]  }
 0x7b3   : > { %16642 = vmatpush1.bf16.msra.mxu1 %v23219_v63  ;;  %v23309_v63 = vld [vmem:[%s32079_s7 + $0xec0] ss:$16 sps:$4 sm:$0xff]  }
 0x7b4   : > { %17667 = vmatpush1.bf16.msra.mxu0 %v23222_v3  ;;  %16643 = vmatprep.subr.bf16.mxu1 %v23227_v57  ;;  %v23312_v3 = vld [vmem:[%s32079_s7 + $0xec8] ss:$16 sps:$4 sm:$0xff]   ;;  %v23317_v57 = vld [vmem:[%s32079_s7 + $0xee4] ss:$16 sps:$4 sm:$0xff]  }
 0x7b5   : > { %17668 = vmatprep.subr.bf16.mxu0 %v23230_v18  ;;  %v23320_v18 = vld [vmem:[%s32079_s7 + $0xeec] ss:$16 sps:$4 sm:$0xff]  }
 0x7b7   : > { %16644 = vmatpush1.bf16.msra.mxu1 %v23225_v36  ;;  %v23315_v36 = vld [vmem:[%s32079_s7 + $0xee0] ss:$16 sps:$4 sm:$0xff]  }
 0x7b8   : > { %17669 = vmatpush1.bf16.msra.mxu0 %v23228_v11  ;;  %16645 = vmatprep.subr.bf16.mxu1 %v23233_v47  ;;  %v23318_v11 = vld [vmem:[%s32079_s7 + $0xee8] ss:$16 sps:$4 sm:$0xff]   ;;  %v23323_v47 = vld [vmem:[%s32079_s7 + $0xf04] ss:$16 sps:$4 sm:$0xff]  }
 0x7b9   : > { %17670 = vmatprep.subr.bf16.mxu0 %v23236_v26  ;;  %v23326_v26 = vld [vmem:[%s32079_s7 + $0xf0c] ss:$16 sps:$4 sm:$0xff]  }
 0x7bb   : > { %16646 = vmatpush1.bf16.msra.mxu1 %v23231_v49  ;;  %v23321_v49 = vld [vmem:[%s32079_s7 + $0xf00] ss:$16 sps:$4 sm:$0xff]  }
 0x7bc   : > { %17671 = vmatpush1.bf16.msra.mxu0 %v23234_v53  ;;  %16647 = vmatprep.subr.bf16.mxu1 %v23239_v16  ;;  %v23324_v53 = vld [vmem:[%s32079_s7 + $0xf08] ss:$16 sps:$4 sm:$0xff]   ;;  %v23329_v16 = vld [vmem:[%s32079_s7 + $0xf24] ss:$16 sps:$4 sm:$0xff]  }
 0x7bd   : > { %17672 = vmatprep.subr.bf16.mxu0 %v23242_v50  ;;  %v23332_v50 = vld [vmem:[%s32079_s7 + $0xf2c] ss:$16 sps:$4 sm:$0xff]  }
 0x7bf   : > { %16648 = vmatpush1.bf16.msra.mxu1 %v23237_v38  ;;  %v23327_v38 = vld [vmem:[%s32079_s7 + $0xf20] ss:$16 sps:$4 sm:$0xff]  }
 0x7c0   : > { %17673 = vmatpush1.bf16.msra.mxu0 %v23240_v52  ;;  %16649 = vmatprep.subr.bf16.mxu1 %v23245_v4  ;;  %v23330_v52 = vld [vmem:[%s32079_s7 + $0xf28] ss:$16 sps:$4 sm:$0xff]   ;;  %v23335_v4 = vld [vmem:[%s32079_s7 + $0xf44] ss:$16 sps:$4 sm:$0xff]  }
 0x7c1   : > { %17674 = vmatprep.subr.bf16.mxu0 %v23248_v15  ;;  %v23338_v15 = vld [vmem:[%s32079_s7 + $0xf4c] ss:$16 sps:$4 sm:$0xff]  }
 0x7c3   : > { %16650 = vmatpush1.bf16.msra.mxu1 %v23243_v27  ;;  %v23333_v27 = vld [vmem:[%s32079_s7 + $0xf40] ss:$16 sps:$4 sm:$0xff]  }
 0x7c4   : > { %17675 = vmatpush1.bf16.msra.mxu0 %v23246_v39  ;;  %16651 = vmatprep.subr.bf16.mxu1 %v23251_v12  ;;  %v23336_v39 = vld [vmem:[%s32079_s7 + $0xf48] ss:$16 sps:$4 sm:$0xff]   ;;  %v23341_v12 = vld [vmem:[%s32079_s7 + $0xf64] ss:$16 sps:$4 sm:$0xff]  }
 0x7c5   : > { %17676 = vmatprep.subr.bf16.mxu0 %v23254_v25  ;;  %v23344_v25 = vld [vmem:[%s32079_s7 + $0xf6c] ss:$16 sps:$4 sm:$0xff]  }
 0x7c7   : > { %16652 = vmatpush1.bf16.msra.mxu1 %v23249_v22  ;;  %v23339_v22 = vld [vmem:[%s32079_s7 + $0xf60] ss:$16 sps:$4 sm:$0xff]  }
 0x7c8   : > { %17677 = vmatpush1.bf16.msra.mxu0 %v23252_v56  ;;  %16653 = vmatprep.subr.bf16.mxu1 %v23257_v8  ;;  %v23342_v56 = vld [vmem:[%s32079_s7 + $0xf68] ss:$16 sps:$4 sm:$0xff]   ;;  %v23347_v8 = vld [vmem:[%s32079_s7 + $0xf84] ss:$16 sps:$4 sm:$0xff]  }
 0x7c9   : > { %17678 = vmatprep.subr.bf16.mxu0 %v23260_v1  ;;  %v23350_v1 = vld [vmem:[%s32079_s7 + $0xf8c] ss:$16 sps:$4 sm:$0xff]  }
 0x7cb   : > { %16654 = vmatpush1.bf16.msra.mxu1 %v23255_v9  ;;  %v23345_v9 = vld [vmem:[%s32079_s7 + $0xf80] ss:$16 sps:$4 sm:$0xff]  }
 0x7cc   : > { %17679 = vmatpush1.bf16.msra.mxu0 %v23258_v62  ;;  %16655 = vmatprep.subr.bf16.mxu1 %v23263_v54  ;;  %v23348_v62 = vld [vmem:[%s32079_s7 + $0xf88] ss:$16 sps:$4 sm:$0xff]   ;;  %v23353_v54 = vld [vmem:[%s32079_s7 + $0xfa4] ss:$16 sps:$4 sm:$0xff]  }
 0x7cd   : > { %17680 = vmatprep.subr.bf16.mxu0 %v23266_v34  ;;  %v23356_v34 = vld [vmem:[%s32079_s7 + $0xfac] ss:$16 sps:$4 sm:$0xff]  }
 0x7cf   : > { %16656 = vmatpush1.bf16.msra.mxu1 %v23261_v40  ;;  %v23351_v40 = vld [vmem:[%s32079_s7 + $0xfa0] ss:$16 sps:$4 sm:$0xff]  }
 0x7d0   : > { %17681 = vmatpush1.bf16.msra.mxu0 %v23264_v7  ;;  %16657 = vmatprep.subr.bf16.mxu1 %v23269_v32  ;;  %v23354_v7 = vld [vmem:[%s32079_s7 + $0xfa8] ss:$16 sps:$4 sm:$0xff]   ;;  %v23359_v32 = vld [vmem:[%s32079_s7 + $0xfc4] ss:$16 sps:$4 sm:$0xff]  }
 0x7d1   : > { %17682 = vmatprep.subr.bf16.mxu0 %v23272_v10  ;;  %v23362_v10 = vld [vmem:[%s32079_s7 + $0xfcc] ss:$16 sps:$4 sm:$0xff]  }
 0x7d3   : > { %16658 = vmatpush1.bf16.msra.mxu1 %v23267_v58  ;;  %v23357_v58 = vld [vmem:[%s32079_s7 + $0xfc0] ss:$16 sps:$4 sm:$0xff]  }
 0x7d4   : > { %17683 = vmatpush1.bf16.msra.mxu0 %v23270_v23  ;;  %16668 = vmatprep.subr.bf16.mxu1 %v23275_v0  ;;  %v28590_v23 = vld [vmem:[#allocation5 + $0x10] sm:$0xff]  ;;  %v23360_v0 = vld [vmem:[%s32079_s7 + $0xfc8] ss:$16 sps:$4 sm:$0xff]  }
 0x7d5   : > { %17693 = vmatprep.subr.bf16.mxu0 %v23278_v31  ;;  %v23365_v31 = vld [vmem:[%s32079_s7 + $0xfe4] ss:$16 sps:$4 sm:$0xff]  }
 0x7d6   : > { %16660 = vmatmul.mubr.bf16.vlgmr.msra.gmra.mrb[32].mxu1 %v28416_v6 }
 0x7d7   : > { %17685 = vmatmul.mubr.bf16.vlgmr.msra.gmra.mrb[16].mxu0 %v28416_v6  ;;  %16669 = vmatpush1.bf16.msra.mxu1 %v23273_v13  ;;  %v23368_v13 = vld [vmem:[%s32079_s7 + $0xfec] ss:$16 sps:$4 sm:$0xff]  }
 0x7d8   : > { %16700 = vmatprep.mubr.bf16.mxu1 %v8260_v30  ;;  %17694 = vmatpush1.bf16.msra.mxu0 %v23276_v48  ;;  %v28603_v48 = vrot.slane %v28590_v23, %v27039_v29 }
 0x7d9   : > { %17725 = vmatprep.mubr.bf16.mxu0 %v8260_v30  ;;  %16670 = vmatprep.subr.bf16.mxu1 %v23281_v17  ;;  %v23363_v17 = vld [vmem:[%s32079_s7 + $0xfe0] ss:$16 sps:$4 sm:$0xff]   ;;  %v23366_v30 = vld [vmem:[%s32079_s7 + $0xfe8] ss:$16 sps:$4 sm:$0xff]  }
 0x7da   : > { %17695 = vmatprep.subr.bf16.mxu0 %v23284_v42  ;;  %v23371_v42 = vld [vmem:[%s32079_s7 + $0x1004] ss:$16 sps:$4 sm:$0xff]  }
 0x7db   : > { %16671 = vmatpush1.bf16.msra.mxu1 %v23279_v28  ;;  %v23374_v28 = vld [vmem:[%s32079_s7 + $0x100c] ss:$16 sps:$4 sm:$0xff]  }
 0x7dc   : > { %17696 = vmatpush1.bf16.msra.mxu0 %v23282_v5  ;;  %16672 = vmatprep.subr.bf16.mxu1 %v23287_v14  ;;  %v8276_v5 = vcombine.high %v28603_v48, %v28603_v48  ;;  %v23369_v14 = vld [vmem:[%s32079_s7 + $0x1000] ss:$16 sps:$4 sm:$0xff]  }
 0x7dd   : > { %17697 = vmatprep.subr.bf16.mxu0 %v23290_v33  ;;  %v8258_v33 = vcombine.high %v28416_v6, %v28416_v6  ;;  %v23375_v6 = vld [vmem:[%s32079_s7 + $0x1020] ss:$16 sps:$4 sm:$0xff]  }
 0x7df   : > { %16673 = vmatpush1.bf16.msra.mxu1 %v23285_v19  ;;  %v23372_v19 = vld [vmem:[%s32079_s7 + $0x1008] ss:$16 sps:$4 sm:$0xff]  }
 0x7e0   : > { %17698 = vmatpush1.bf16.msra.mxu0 %v23288_v61  ;;  %16674 = vmatprep.subr.bf16.mxu1 %v23293_v44  ;;  %v23377_v61 = vld [vmem:[%s32079_s7 + $0x1024] ss:$16 sps:$4 sm:$0xff]   ;;  %v28631_v44 = vrot.slane %v8276_v5, %v27039_v29  ;;  %v23456_v5 = vld [vmem:[%s32079_s7 + $0x11c8] ss:$16 sps:$4 sm:$0xff]  }
 0x7e1   : > { %17699 = vmatprep.subr.bf16.mxu0 %v23296_v43  ;;  %v23380_v43 = vld [vmem:[%s32079_s7 + $0x102c] ss:$16 sps:$4 sm:$0xff]  }
 0x7e3   : > { %16675 = vmatpush1.bf16.msra.mxu1 %v23291_v55  ;;  %v23378_v55 = vld [vmem:[%s32079_s7 + $0x1028] ss:$16 sps:$4 sm:$0xff]  }
 0x7e4   : > { %17700 = vmatpush1.bf16.msra.mxu0 %v23294_v20  ;;  %16676 = vmatprep.subr.bf16.mxu1 %v23299_v46  ;;  %v23383_v20 = vld [vmem:[%s32079_s7 + $0x1044] ss:$16 sps:$4 sm:$0xff]   ;;  %v23386_v46 = vld [vmem:[%s32079_s7 + $0x104c] ss:$16 sps:$4 sm:$0xff]  }
 0x7e5   : > { %17701 = vmatprep.subr.bf16.mxu0 %v23302_v59  ;;  %v23381_v59 = vld [vmem:[%s32079_s7 + $0x1040] ss:$16 sps:$4 sm:$0xff]  }
 0x7e7   : > { %16677 = vmatpush1.bf16.msra.mxu1 %v23297_v51  ;;  %v23384_v51 = vld [vmem:[%s32079_s7 + $0x1048] ss:$16 sps:$4 sm:$0xff]  }
 0x7e8   : > { %17702 = vmatpush1.bf16.msra.mxu0 %v23300_v60  ;;  %16678 = vmatprep.subr.bf16.mxu1 %v23305_v41  ;;  %v23389_v60 = vld [vmem:[%s32079_s7 + $0x1064] ss:$16 sps:$4 sm:$0xff]   ;;  %v23392_v41 = vld [vmem:[%s32079_s7 + $0x106c] ss:$16 sps:$4 sm:$0xff]  }
 0x7e9   : > { %17703 = vmatprep.subr.bf16.mxu0 %v23308_v35  ;;  %v23387_v35 = vld [vmem:[%s32079_s7 + $0x1060] ss:$16 sps:$4 sm:$0xff]  }
 0x7eb   : > { %16679 = vmatpush1.bf16.msra.mxu1 %v23303_v21  ;;  %v23390_v21 = vld [vmem:[%s32079_s7 + $0x1068] ss:$16 sps:$4 sm:$0xff]  }
 0x7ec   : > { %17704 = vmatpush1.bf16.msra.mxu0 %v23306_v45  ;;  %16680 = vmatprep.subr.bf16.mxu1 %v23311_v24  ;;  %v23395_v45 = vld [vmem:[%s32079_s7 + $0x1084] ss:$16 sps:$4 sm:$0xff]   ;;  %v23398_v24 = vld [vmem:[%s32079_s7 + $0x108c] ss:$16 sps:$4 sm:$0xff]  }
 0x7ed   : > { %17705 = vmatprep.subr.bf16.mxu0 %v23314_v37  ;;  %v23393_v37 = vld [vmem:[%s32079_s7 + $0x1080] ss:$16 sps:$4 sm:$0xff]  }
 0x7ef   : > { %16681 = vmatpush1.bf16.msra.mxu1 %v23309_v63  ;;  %v23396_v63 = vld [vmem:[%s32079_s7 + $0x1088] ss:$16 sps:$4 sm:$0xff]  }
 0x7f0   : > { %17706 = vmatpush1.bf16.msra.mxu0 %v23312_v3  ;;  %16682 = vmatprep.subr.bf16.mxu1 %v23317_v57  ;;  %v23401_v3 = vld [vmem:[%s32079_s7 + $0x10a4] ss:$16 sps:$4 sm:$0xff]   ;;  %v23404_v57 = vld [vmem:[%s32079_s7 + $0x10ac] ss:$16 sps:$4 sm:$0xff]  }
 0x7f1   : > { %17707 = vmatprep.subr.bf16.mxu0 %v23320_v18  ;;  %v23399_v18 = vld [vmem:[%s32079_s7 + $0x10a0] ss:$16 sps:$4 sm:$0xff]  }
 0x7f3   : > { %16683 = vmatpush1.bf16.msra.mxu1 %v23315_v36  ;;  %v23402_v36 = vld [vmem:[%s32079_s7 + $0x10a8] ss:$16 sps:$4 sm:$0xff]  }
 0x7f4   : > { %17708 = vmatpush1.bf16.msra.mxu0 %v23318_v11  ;;  %16684 = vmatprep.subr.bf16.mxu1 %v23323_v47  ;;  %v23407_v11 = vld [vmem:[%s32079_s7 + $0x10c4] ss:$16 sps:$4 sm:$0xff]   ;;  %v23410_v47 = vld [vmem:[%s32079_s7 + $0x10cc] ss:$16 sps:$4 sm:$0xff]  }
 0x7f5   : > { %17709 = vmatprep.subr.bf16.mxu0 %v23326_v26  ;;  %v23405_v26 = vld [vmem:[%s32079_s7 + $0x10c0] ss:$16 sps:$4 sm:$0xff]  }
 0x7f7   : > { %16685 = vmatpush1.bf16.msra.mxu1 %v23321_v49  ;;  %v23408_v49 = vld [vmem:[%s32079_s7 + $0x10c8] ss:$16 sps:$4 sm:$0xff]  }
 0x7f8   : > { %17710 = vmatpush1.bf16.msra.mxu0 %v23324_v53  ;;  %16686 = vmatprep.subr.bf16.mxu1 %v23329_v16  ;;  %v23413_v53 = vld [vmem:[%s32079_s7 + $0x10e4] ss:$16 sps:$4 sm:$0xff]   ;;  %v23416_v16 = vld [vmem:[%s32079_s7 + $0x10ec] ss:$16 sps:$4 sm:$0xff]  }
 0x7f9   : > { %17711 = vmatprep.subr.bf16.mxu0 %v23332_v50  ;;  %v23411_v50 = vld [vmem:[%s32079_s7 + $0x10e0] ss:$16 sps:$4 sm:$0xff]  }
 0x7fb   : > { %16687 = vmatpush1.bf16.msra.mxu1 %v23327_v38  ;;  %v23414_v38 = vld [vmem:[%s32079_s7 + $0x10e8] ss:$16 sps:$4 sm:$0xff]  }
 0x7fc   : > { %17712 = vmatpush1.bf16.msra.mxu0 %v23330_v52  ;;  %16688 = vmatprep.subr.bf16.mxu1 %v23335_v4  ;;  %v23419_v52 = vld [vmem:[%s32079_s7 + $0x1104] ss:$16 sps:$4 sm:$0xff]   ;;  %v23422_v4 = vld [vmem:[%s32079_s7 + $0x110c] ss:$16 sps:$4 sm:$0xff]  }
 0x7fd   : > { %17713 = vmatprep.subr.bf16.mxu0 %v23338_v15  ;;  %v23417_v15 = vld [vmem:[%s32079_s7 + $0x1100] ss:$16 sps:$4 sm:$0xff]  }
 0x7ff   : > { %16689 = vmatpush1.bf16.msra.mxu1 %v23333_v27  ;;  %v23420_v27 = vld [vmem:[%s32079_s7 + $0x1108] ss:$16 sps:$4 sm:$0xff]  }
 0x800   : > { %17714 = vmatpush1.bf16.msra.mxu0 %v23336_v39  ;;  %16690 = vmatprep.subr.bf16.mxu1 %v23341_v12  ;;  %v23425_v39 = vld [vmem:[%s32079_s7 + $0x1124] ss:$16 sps:$4 sm:$0xff]   ;;  %v23428_v12 = vld [vmem:[%s32079_s7 + $0x112c] ss:$16 sps:$4 sm:$0xff]  }
 0x801   : > { %17715 = vmatprep.subr.bf16.mxu0 %v23344_v25  ;;  %v23423_v25 = vld [vmem:[%s32079_s7 + $0x1120] ss:$16 sps:$4 sm:$0xff]  }
 0x803   : > { %16691 = vmatpush1.bf16.msra.mxu1 %v23339_v22  ;;  %v23426_v22 = vld [vmem:[%s32079_s7 + $0x1128] ss:$16 sps:$4 sm:$0xff]  }
 0x804   : > { %17716 = vmatpush1.bf16.msra.mxu0 %v23342_v56  ;;  %16692 = vmatprep.subr.bf16.mxu1 %v23347_v8  ;;  %v23431_v56 = vld [vmem:[%s32079_s7 + $0x1144] ss:$16 sps:$4 sm:$0xff]   ;;  %v23434_v8 = vld [vmem:[%s32079_s7 + $0x114c] ss:$16 sps:$4 sm:$0xff]  }
 0x805   : > { %17717 = vmatprep.subr.bf16.mxu0 %v23350_v1  ;;  %v23429_v1 = vld [vmem:[%s32079_s7 + $0x1140] ss:$16 sps:$4 sm:$0xff]  }
 0x807   : > { %16693 = vmatpush1.bf16.msra.mxu1 %v23345_v9  ;;  %v23432_v9 = vld [vmem:[%s32079_s7 + $0x1148] ss:$16 sps:$4 sm:$0xff]  }
 0x808   : > { %17718 = vmatpush1.bf16.msra.mxu0 %v23348_v62  ;;  %16694 = vmatprep.subr.bf16.mxu1 %v23353_v54  ;;  %v23437_v62 = vld [vmem:[%s32079_s7 + $0x1164] ss:$16 sps:$4 sm:$0xff]   ;;  %v23440_v54 = vld [vmem:[%s32079_s7 + $0x116c] ss:$16 sps:$4 sm:$0xff]  }
 0x809   : > { %17719 = vmatprep.subr.bf16.mxu0 %v23356_v34  ;;  %v23435_v34 = vld [vmem:[%s32079_s7 + $0x1160] ss:$16 sps:$4 sm:$0xff]  }
 0x80b   : > { %16695 = vmatpush1.bf16.msra.mxu1 %v23351_v40  ;;  %v23438_v40 = vld [vmem:[%s32079_s7 + $0x1168] ss:$16 sps:$4 sm:$0xff]  }
 0x80c   : > { %17720 = vmatpush1.bf16.msra.mxu0 %v23354_v7  ;;  %16696 = vmatprep.subr.bf16.mxu1 %v23359_v32  ;;  %v23443_v7 = vld [vmem:[%s32079_s7 + $0x1184] ss:$16 sps:$4 sm:$0xff]   ;;  %v23446_v32 = vld [vmem:[%s32079_s7 + $0x118c] ss:$16 sps:$4 sm:$0xff]  }
 0x80d   : > { %17721 = vmatprep.subr.bf16.mxu0 %v23362_v10  ;;  %v23441_v10 = vld [vmem:[%s32079_s7 + $0x1180] ss:$16 sps:$4 sm:$0xff]  }
 0x80f   : > { %16697 = vmatpush1.bf16.msra.mxu1 %v23357_v58  ;;  %v23444_v58 = vld [vmem:[%s32079_s7 + $0x1188] ss:$16 sps:$4 sm:$0xff]  }
 0x810   : > { %17722 = vmatpush1.bf16.msra.mxu0 %v23360_v0  ;;  %16698 = vmatprep.subr.bf16.mxu1 %v23365_v31  ;;  %v23449_v0 = vld [vmem:[%s32079_s7 + $0x11a4] ss:$16 sps:$4 sm:$0xff]   ;;  %v23452_v31 = vld [vmem:[%s32079_s7 + $0x11ac] ss:$16 sps:$4 sm:$0xff]  }
 0x811   : > { %17723 = vmatprep.subr.bf16.mxu0 %v23368_v13  ;;  %v23447_v13 = vld [vmem:[%s32079_s7 + $0x11a0] ss:$16 sps:$4 sm:$0xff]  }
 0x813   : > { %16699 = vmatpush1.bf16.msra.mxu1 %v23363_v17  ;;  %v23450_v17 = vld [vmem:[%s32079_s7 + $0x11a8] ss:$16 sps:$4 sm:$0xff]  }
 0x814   : > { %17724 = vmatpush1.bf16.msra.mxu0 %v23366_v30  ;;  %16709 = vmatprep.subr.bf16.mxu1 %v23371_v42  ;;  %v23455_v30 = vld [vmem:[%s32079_s7 + $0x11c4] ss:$16 sps:$4 sm:$0xff]   ;;  %v23458_v42 = vld [vmem:[%s32079_s7 + $0x11cc] ss:$16 sps:$4 sm:$0xff]  }
 0x815   : > { %17734 = vmatprep.subr.bf16.mxu0 %v23374_v28  ;;  %v23453_v28 = vld [vmem:[%s32079_s7 + $0x11c0] ss:$16 sps:$4 sm:$0xff]  }
 0x816   : > { %16701 = vmatmul.mubr.bf16.vlgmr.msra.gmra.mrb[32].mxu1 %v8258_v33 }
 0x817   : > { %17726 = vmatmul.mubr.bf16.vlgmr.msra.gmra.mrb[16].mxu0 %v8258_v33  ;;  %16710 = vmatpush1.bf16.msra.mxu1 %v23369_v14  ;;  %v23461_v14 = vld [vmem:[%s32079_s7 + $0x11e4] ss:$16 sps:$4 sm:$0xff]   ;;  %v23464_v33 = vld [vmem:[%s32079_s7 + $0x11ec] ss:$16 sps:$4 sm:$0xff]  }
 0x818   : > { %16741 = vmatprep.mubr.bf16.mxu1 %v28631_v44  ;;  %17735 = vmatpush1.bf16.msra.mxu0 %v23372_v19  ;;  %v23459_v19 = vld [vmem:[%s32079_s7 + $0x11e0] ss:$16 sps:$4 sm:$0xff]  }
 0x819   : > { %17766 = vmatprep.mubr.bf16.mxu0 %v28631_v44  ;;  %16711 = vmatprep.subr.bf16.mxu1 %v23377_v61  ;;  %v23462_v61 = vld [vmem:[%s32079_s7 + $0x11e8] ss:$16 sps:$4 sm:$0xff]  }
 0x81a   : > { %17736 = vmatprep.subr.bf16.mxu0 %v23380_v43  ;;  %v23467_v43 = vld [vmem:[%s32079_s7 + $0x1204] ss:$16 sps:$4 sm:$0xff]  }
 0x81b   : > { %16712 = vmatpush1.bf16.msra.mxu1 %v23375_v6  ;;  %v23470_v6 = vld [vmem:[%s32079_s7 + $0x120c] ss:$16 sps:$4 sm:$0xff]  }
 0x81c   : > { %17737 = vmatpush1.bf16.msra.mxu0 %v23378_v55  ;;  %16713 = vmatprep.subr.bf16.mxu1 %v23383_v20  ;;  %v23465_v55 = vld [vmem:[%s32079_s7 + $0x1200] ss:$16 sps:$4 sm:$0xff]   ;;  %v28823_v20 = vrot.slane %v28603_v48, %v27039_v29  ;;  %v23476_v48 = vld [vmem:[%s32079_s7 + $0x122c] ss:$16 sps:$4 sm:$0xff]  }
 0x81d   : > { %17738 = vmatprep.subr.bf16.mxu0 %v23386_v46  ;;  %v23468_v46 = vld [vmem:[%s32079_s7 + $0x1208] ss:$16 sps:$4 sm:$0xff]  }
 0x81f   : > { %16714 = vmatpush1.bf16.msra.mxu1 %v23381_v59  ;;  %v23473_v59 = vld [vmem:[%s32079_s7 + $0x1224] ss:$16 sps:$4 sm:$0xff]  }
 0x820   : > { %17739 = vmatpush1.bf16.msra.mxu0 %v23384_v51  ;;  %16715 = vmatprep.subr.bf16.mxu1 %v23389_v60  ;;  %v8308_v51 = vcombine.high %v28631_v44, %v28631_v44  ;;  %v23471_v60 = vld [vmem:[%s32079_s7 + $0x1220] ss:$16 sps:$4 sm:$0xff]   ;;  %v23479_v44 = vld [vmem:[%s32079_s7 + $0x1244] ss:$16 sps:$4 sm:$0xff]  }
 0x821   : > { %17740 = vmatprep.subr.bf16.mxu0 %v23392_v41  ;;  %v23474_v41 = vld [vmem:[%s32079_s7 + $0x1228] ss:$16 sps:$4 sm:$0xff]  }
 0x823   : > { %16716 = vmatpush1.bf16.msra.mxu1 %v23387_v35  ;;  %v23482_v35 = vld [vmem:[%s32079_s7 + $0x124c] ss:$16 sps:$4 sm:$0xff]  }
 0x824   : > { %17741 = vmatpush1.bf16.msra.mxu0 %v23390_v21  ;;  %16717 = vmatprep.subr.bf16.mxu1 %v23395_v45  ;;  %v23477_v21 = vld [vmem:[%s32079_s7 + $0x1240] ss:$16 sps:$4 sm:$0xff]   ;;  %v23480_v45 = vld [vmem:[%s32079_s7 + $0x1248] ss:$16 sps:$4 sm:$0xff]  }
 0x825   : > { %17742 = vmatprep.subr.bf16.mxu0 %v23398_v24  ;;  %v23485_v24 = vld [vmem:[%s32079_s7 + $0x1264] ss:$16 sps:$4 sm:$0xff]  }
 0x827   : > { %16718 = vmatpush1.bf16.msra.mxu1 %v23393_v37  ;;  %v23488_v37 = vld [vmem:[%s32079_s7 + $0x126c] ss:$16 sps:$4 sm:$0xff]  }
 0x828   : > { %17743 = vmatpush1.bf16.msra.mxu0 %v23396_v63  ;;  %16719 = vmatprep.subr.bf16.mxu1 %v23401_v3  ;;  %v23483_v63 = vld [vmem:[%s32079_s7 + $0x1260] ss:$16 sps:$4 sm:$0xff]   ;;  %v23486_v3 = vld [vmem:[%s32079_s7 + $0x1268] ss:$16 sps:$4 sm:$0xff]  }
 0x829   : > { %17744 = vmatprep.subr.bf16.mxu0 %v23404_v57  ;;  %v23491_v57 = vld [vmem:[%s32079_s7 + $0x1284] ss:$16 sps:$4 sm:$0xff]  }
 0x82b   : > { %16720 = vmatpush1.bf16.msra.mxu1 %v23399_v18  ;;  %v23494_v18 = vld [vmem:[%s32079_s7 + $0x128c] ss:$16 sps:$4 sm:$0xff]  }
 0x82c   : > { %17745 = vmatpush1.bf16.msra.mxu0 %v23402_v36  ;;  %16721 = vmatprep.subr.bf16.mxu1 %v23407_v11  ;;  %v23489_v36 = vld [vmem:[%s32079_s7 + $0x1280] ss:$16 sps:$4 sm:$0xff]   ;;  %v23492_v11 = vld [vmem:[%s32079_s7 + $0x1288] ss:$16 sps:$4 sm:$0xff]  }
 0x82d   : > { %17746 = vmatprep.subr.bf16.mxu0 %v23410_v47  ;;  %v23497_v47 = vld [vmem:[%s32079_s7 + $0x12a4] ss:$16 sps:$4 sm:$0xff]  }
 0x82f   : > { %16722 = vmatpush1.bf16.msra.mxu1 %v23405_v26  ;;  %v23500_v26 = vld [vmem:[%s32079_s7 + $0x12ac] ss:$16 sps:$4 sm:$0xff]  }
 0x830   : > { %17747 = vmatpush1.bf16.msra.mxu0 %v23408_v49  ;;  %16723 = vmatprep.subr.bf16.mxu1 %v23413_v53  ;;  %v23495_v49 = vld [vmem:[%s32079_s7 + $0x12a0] ss:$16 sps:$4 sm:$0xff]   ;;  %v23498_v53 = vld [vmem:[%s32079_s7 + $0x12a8] ss:$16 sps:$4 sm:$0xff]  }
 0x831   : > { %17748 = vmatprep.subr.bf16.mxu0 %v23416_v16  ;;  %v23503_v16 = vld [vmem:[%s32079_s7 + $0x12c4] ss:$16 sps:$4 sm:$0xff]  }
 0x833   : > { %16724 = vmatpush1.bf16.msra.mxu1 %v23411_v50  ;;  %v23506_v50 = vld [vmem:[%s32079_s7 + $0x12cc] ss:$16 sps:$4 sm:$0xff]  }
 0x834   : > { %17749 = vmatpush1.bf16.msra.mxu0 %v23414_v38  ;;  %16725 = vmatprep.subr.bf16.mxu1 %v23419_v52  ;;  %v23501_v38 = vld [vmem:[%s32079_s7 + $0x12c0] ss:$16 sps:$4 sm:$0xff]   ;;  %v23504_v52 = vld [vmem:[%s32079_s7 + $0x12c8] ss:$16 sps:$4 sm:$0xff]  }
 0x835   : > { %17750 = vmatprep.subr.bf16.mxu0 %v23422_v4  ;;  %v23509_v4 = vld [vmem:[%s32079_s7 + $0x12e4] ss:$16 sps:$4 sm:$0xff]  }
 0x837   : > { %16726 = vmatpush1.bf16.msra.mxu1 %v23417_v15  ;;  %v23512_v15 = vld [vmem:[%s32079_s7 + $0x12ec] ss:$16 sps:$4 sm:$0xff]  }
 0x838   : > { %17751 = vmatpush1.bf16.msra.mxu0 %v23420_v27  ;;  %16727 = vmatprep.subr.bf16.mxu1 %v23425_v39  ;;  %v23507_v27 = vld [vmem:[%s32079_s7 + $0x12e0] ss:$16 sps:$4 sm:$0xff]   ;;  %v23510_v39 = vld [vmem:[%s32079_s7 + $0x12e8] ss:$16 sps:$4 sm:$0xff]  }
 0x839   : > { %17752 = vmatprep.subr.bf16.mxu0 %v23428_v12  ;;  %v23515_v12 = vld [vmem:[%s32079_s7 + $0x1304] ss:$16 sps:$4 sm:$0xff]  }
 0x83b   : > { %16728 = vmatpush1.bf16.msra.mxu1 %v23423_v25  ;;  %v23518_v25 = vld [vmem:[%s32079_s7 + $0x130c] ss:$16 sps:$4 sm:$0xff]  }
 0x83c   : > { %17753 = vmatpush1.bf16.msra.mxu0 %v23426_v22  ;;  %16729 = vmatprep.subr.bf16.mxu1 %v23431_v56  ;;  %v23513_v22 = vld [vmem:[%s32079_s7 + $0x1300] ss:$16 sps:$4 sm:$0xff]   ;;  %v23516_v56 = vld [vmem:[%s32079_s7 + $0x1308] ss:$16 sps:$4 sm:$0xff]  }
 0x83d   : > { %17754 = vmatprep.subr.bf16.mxu0 %v23434_v8  ;;  %v23521_v8 = vld [vmem:[%s32079_s7 + $0x1324] ss:$16 sps:$4 sm:$0xff]  }
 0x83f   : > { %16730 = vmatpush1.bf16.msra.mxu1 %v23429_v1  ;;  %v23524_v1 = vld [vmem:[%s32079_s7 + $0x132c] ss:$16 sps:$4 sm:$0xff]  }
 0x840   : > { %17755 = vmatpush1.bf16.msra.mxu0 %v23432_v9  ;;  %16731 = vmatprep.subr.bf16.mxu1 %v23437_v62  ;;  %v23519_v9 = vld [vmem:[%s32079_s7 + $0x1320] ss:$16 sps:$4 sm:$0xff]   ;;  %v23522_v62 = vld [vmem:[%s32079_s7 + $0x1328] ss:$16 sps:$4 sm:$0xff]  }
 0x841   : > { %17756 = vmatprep.subr.bf16.mxu0 %v23440_v54  ;;  %v23527_v54 = vld [vmem:[%s32079_s7 + $0x1344] ss:$16 sps:$4 sm:$0xff]  }
 0x843   : > { %16732 = vmatpush1.bf16.msra.mxu1 %v23435_v34  ;;  %v23530_v34 = vld [vmem:[%s32079_s7 + $0x134c] ss:$16 sps:$4 sm:$0xff]  }
 0x844   : > { %17757 = vmatpush1.bf16.msra.mxu0 %v23438_v40  ;;  %16733 = vmatprep.subr.bf16.mxu1 %v23443_v7  ;;  %v23525_v40 = vld [vmem:[%s32079_s7 + $0x1340] ss:$16 sps:$4 sm:$0xff]   ;;  %v23528_v7 = vld [vmem:[%s32079_s7 + $0x1348] ss:$16 sps:$4 sm:$0xff]  }
 0x845   : > { %17758 = vmatprep.subr.bf16.mxu0 %v23446_v32  ;;  %v23533_v32 = vld [vmem:[%s32079_s7 + $0x1364] ss:$16 sps:$4 sm:$0xff]  }
 0x847   : > { %16734 = vmatpush1.bf16.msra.mxu1 %v23441_v10  ;;  %v23536_v10 = vld [vmem:[%s32079_s7 + $0x136c] ss:$16 sps:$4 sm:$0xff]  }
 0x848   : > { %17759 = vmatpush1.bf16.msra.mxu0 %v23444_v58  ;;  %16735 = vmatprep.subr.bf16.mxu1 %v23449_v0  ;;  %v23531_v58 = vld [vmem:[%s32079_s7 + $0x1360] ss:$16 sps:$4 sm:$0xff]   ;;  %v23534_v0 = vld [vmem:[%s32079_s7 + $0x1368] ss:$16 sps:$4 sm:$0xff]  }
 0x849   : > { %17760 = vmatprep.subr.bf16.mxu0 %v23452_v31  ;;  %v23539_v31 = vld [vmem:[%s32079_s7 + $0x1384] ss:$16 sps:$4 sm:$0xff]  }
 0x84b   : > { %16736 = vmatpush1.bf16.msra.mxu1 %v23447_v13  ;;  %v23542_v13 = vld [vmem:[%s32079_s7 + $0x138c] ss:$16 sps:$4 sm:$0xff]  }
 0x84c   : > { %17761 = vmatpush1.bf16.msra.mxu0 %v23450_v17  ;;  %16737 = vmatprep.subr.bf16.mxu1 %v23455_v30  ;;  %v23537_v17 = vld [vmem:[%s32079_s7 + $0x1380] ss:$16 sps:$4 sm:$0xff]   ;;  %v23540_v30 = vld [vmem:[%s32079_s7 + $0x1388] ss:$16 sps:$4 sm:$0xff]  }
 0x84d   : > { %17762 = vmatprep.subr.bf16.mxu0 %v23458_v42  ;;  %v23545_v42 = vld [vmem:[%s32079_s7 + $0x13a4] ss:$16 sps:$4 sm:$0xff]  }
 0x84f   : > { %16738 = vmatpush1.bf16.msra.mxu1 %v23453_v28  ;;  %v23548_v28 = vld [vmem:[%s32079_s7 + $0x13ac] ss:$16 sps:$4 sm:$0xff]  }
 0x850   : > { %17763 = vmatpush1.bf16.msra.mxu0 %v23456_v5  ;;  %16739 = vmatprep.subr.bf16.mxu1 %v23461_v14  ;;  %v23543_v5 = vld [vmem:[%s32079_s7 + $0x13a0] ss:$16 sps:$4 sm:$0xff]   ;;  %v23546_v14 = vld [vmem:[%s32079_s7 + $0x13a8] ss:$16 sps:$4 sm:$0xff]  }
 0x851   : > { %17764 = vmatprep.subr.bf16.mxu0 %v23464_v33  ;;  %v23551_v33 = vld [vmem:[%s32079_s7 + $0x13c4] ss:$16 sps:$4 sm:$0xff]  }
 0x853   : > { %16740 = vmatpush1.bf16.msra.mxu1 %v23459_v19  ;;  %v23554_v19 = vld [vmem:[%s32079_s7 + $0x13cc] ss:$16 sps:$4 sm:$0xff]  }
 0x854   : > { %17765 = vmatpush1.bf16.msra.mxu0 %v23462_v61  ;;  %16750 = vmatprep.subr.bf16.mxu1 %v23467_v43  ;;  %v8261_v61 = vcombine.high %v28590_v23, %v28590_v23  ;;  %v23549_v43 = vld [vmem:[%s32079_s7 + $0x13c0] ss:$16 sps:$4 sm:$0xff]   ;;  %v23560_v23 = vld [vmem:[%s32079_s7 + $0x13ec] ss:$16 sps:$4 sm:$0xff]  }
 0x855   : > { %17775 = vmatprep.subr.bf16.mxu0 %v23470_v6  ;;  %v23552_v6 = vld [vmem:[%s32079_s7 + $0x13c8] ss:$16 sps:$4 sm:$0xff]  }
 0x856   : > { %16742 = vmatmul.mubr.bf16.vlgmr.msra.gmra.mrb[32].mxu1 %v28823_v20 }
 0x857   : > { %17767 = vmatmul.mubr.bf16.vlgmr.msra.gmra.mrb[16].mxu0 %v28823_v20  ;;  %16751 = vmatpush1.bf16.msra.mxu1 %v23465_v55  ;;  %v23557_v55 = vld [vmem:[%s32079_s7 + $0x13e4] ss:$16 sps:$4 sm:$0xff]  }
 0x858   : > { %16782 = vmatprep.mubr.bf16.mxu1 %v8308_v51  ;;  %17776 = vmatpush1.bf16.msra.mxu0 %v23468_v46  ;;  %v29009_v46 = vrot.slane %v8261_v61, %v27039_v29  ;;  %v23637_v61 = vld [vmem:[%s32079_s7 + $0x1588] ss:$16 sps:$4 sm:$0xff]  }
 0x859   : > { %17807 = vmatprep.mubr.bf16.mxu0 %v8308_v51  ;;  %16752 = vmatprep.subr.bf16.mxu1 %v23473_v59  ;;  %v23555_v59 = vld [vmem:[%s32079_s7 + $0x13e0] ss:$16 sps:$4 sm:$0xff]   ;;  %v23558_v51 = vld [vmem:[%s32079_s7 + $0x13e8] ss:$16 sps:$4 sm:$0xff]  }
 0x85a   : > { %17777 = vmatprep.subr.bf16.mxu0 %v23476_v48  ;;  %v23563_v48 = vld [vmem:[%s32079_s7 + $0x1404] ss:$16 sps:$4 sm:$0xff]  }
 0x85b   : > { %16753 = vmatpush1.bf16.msra.mxu1 %v23471_v60  ;;  %v23566_v60 = vld [vmem:[%s32079_s7 + $0x140c] ss:$16 sps:$4 sm:$0xff]  }
 0x85c   : > { %17778 = vmatpush1.bf16.msra.mxu0 %v23474_v41  ;;  %16754 = vmatprep.subr.bf16.mxu1 %v23479_v44  ;;  %v8277_v41 = vcombine.high %v29009_v46, %v29009_v46  ;;  %v23561_v44 = vld [vmem:[%s32079_s7 + $0x1400] ss:$16 sps:$4 sm:$0xff]  }
 0x85d   : > { %17779 = vmatprep.subr.bf16.mxu0 %v23482_v35  ;;  %v8306_v35 = vcombine.high %v28823_v20, %v28823_v20  ;;  %v23568_v20 = vld [vmem:[%s32079_s7 + $0x1420] ss:$16 sps:$4 sm:$0xff]  }
 0x85f   : > { %16755 = vmatpush1.bf16.msra.mxu1 %v23477_v21  ;;  %v23564_v21 = vld [vmem:[%s32079_s7 + $0x1408] ss:$16 sps:$4 sm:$0xff]  }
 0x860   : > { %17780 = vmatpush1.bf16.msra.mxu0 %v23480_v45  ;;  %16756 = vmatprep.subr.bf16.mxu1 %v23485_v24  ;;  %v23570_v45 = vld [vmem:[%s32079_s7 + $0x1424] ss:$16 sps:$4 sm:$0xff]   ;;  %v29037_v24 = vrot.slane %v8277_v41, %v27039_v29 }
 0x861   : > { %17781 = vmatprep.subr.bf16.mxu0 %v23488_v37  ;;  %v23573_v37 = vld [vmem:[%s32079_s7 + $0x142c] ss:$16 sps:$4 sm:$0xff]   ;;  %v23654_v41 = vld [vmem:[%s32079_s7 + $0x15e4] ss:$16 sps:$4 sm:$0xff]  }
 0x863   : > { %16757 = vmatpush1.bf16.msra.mxu1 %v23483_v63  ;;  %v23571_v63 = vld [vmem:[%s32079_s7 + $0x1428] ss:$16 sps:$4 sm:$0xff]  }
 0x864   : > { %17782 = vmatpush1.bf16.msra.mxu0 %v23486_v3  ;;  %16758 = vmatprep.subr.bf16.mxu1 %v23491_v57  ;;  %v23576_v3 = vld [vmem:[%s32079_s7 + $0x1444] ss:$16 sps:$4 sm:$0xff]   ;;  %v23579_v57 = vld [vmem:[%s32079_s7 + $0x144c] ss:$16 sps:$4 sm:$0xff]  }
 0x865   : > { %17783 = vmatprep.subr.bf16.mxu0 %v23494_v18  ;;  %v23574_v18 = vld [vmem:[%s32079_s7 + $0x1440] ss:$16 sps:$4 sm:$0xff]  }
 0x867   : > { %16759 = vmatpush1.bf16.msra.mxu1 %v23489_v36  ;;  %v23577_v36 = vld [vmem:[%s32079_s7 + $0x1448] ss:$16 sps:$4 sm:$0xff]  }
 0x868   : > { %17784 = vmatpush1.bf16.msra.mxu0 %v23492_v11  ;;  %16760 = vmatprep.subr.bf16.mxu1 %v23497_v47  ;;  %v23582_v11 = vld [vmem:[%s32079_s7 + $0x1464] ss:$16 sps:$4 sm:$0xff]   ;;  %v23585_v47 = vld [vmem:[%s32079_s7 + $0x146c] ss:$16 sps:$4 sm:$0xff]  }
 0x869   : > { %17785 = vmatprep.subr.bf16.mxu0 %v23500_v26  ;;  %v23580_v26 = vld [vmem:[%s32079_s7 + $0x1460] ss:$16 sps:$4 sm:$0xff]  }
 0x86b   : > { %16761 = vmatpush1.bf16.msra.mxu1 %v23495_v49  ;;  %v23583_v49 = vld [vmem:[%s32079_s7 + $0x1468] ss:$16 sps:$4 sm:$0xff]  }
 0x86c   : > { %17786 = vmatpush1.bf16.msra.mxu0 %v23498_v53  ;;  %16762 = vmatprep.subr.bf16.mxu1 %v23503_v16  ;;  %v23588_v53 = vld [vmem:[%s32079_s7 + $0x1484] ss:$16 sps:$4 sm:$0xff]   ;;  %v23591_v16 = vld [vmem:[%s32079_s7 + $0x148c] ss:$16 sps:$4 sm:$0xff]  }
 0x86d   : > { %17787 = vmatprep.subr.bf16.mxu0 %v23506_v50  ;;  %v23586_v50 = vld [vmem:[%s32079_s7 + $0x1480] ss:$16 sps:$4 sm:$0xff]  }
 0x86f   : > { %16763 = vmatpush1.bf16.msra.mxu1 %v23501_v38  ;;  %v23589_v38 = vld [vmem:[%s32079_s7 + $0x1488] ss:$16 sps:$4 sm:$0xff]  }
 0x870   : > { %17788 = vmatpush1.bf16.msra.mxu0 %v23504_v52  ;;  %16764 = vmatprep.subr.bf16.mxu1 %v23509_v4  ;;  %v23594_v52 = vld [vmem:[%s32079_s7 + $0x14a4] ss:$16 sps:$4 sm:$0xff]   ;;  %v23597_v4 = vld [vmem:[%s32079_s7 + $0x14ac] ss:$16 sps:$4 sm:$0xff]  }
 0x871   : > { %17789 = vmatprep.subr.bf16.mxu0 %v23512_v15  ;;  %v23592_v15 = vld [vmem:[%s32079_s7 + $0x14a0] ss:$16 sps:$4 sm:$0xff]  }
 0x873   : > { %16765 = vmatpush1.bf16.msra.mxu1 %v23507_v27  ;;  %v23595_v27 = vld [vmem:[%s32079_s7 + $0x14a8] ss:$16 sps:$4 sm:$0xff]  }
 0x874   : > { %17790 = vmatpush1.bf16.msra.mxu0 %v23510_v39  ;;  %16766 = vmatprep.subr.bf16.mxu1 %v23515_v12  ;;  %v23600_v39 = vld [vmem:[%s32079_s7 + $0x14c4] ss:$16 sps:$4 sm:$0xff]   ;;  %v23603_v12 = vld [vmem:[%s32079_s7 + $0x14cc] ss:$16 sps:$4 sm:$0xff]  }
 0x875   : > { %17791 = vmatprep.subr.bf16.mxu0 %v23518_v25  ;;  %v23598_v25 = vld [vmem:[%s32079_s7 + $0x14c0] ss:$16 sps:$4 sm:$0xff]  }
 0x877   : > { %16767 = vmatpush1.bf16.msra.mxu1 %v23513_v22  ;;  %v23601_v22 = vld [vmem:[%s32079_s7 + $0x14c8] ss:$16 sps:$4 sm:$0xff]  }
 0x878   : > { %17792 = vmatpush1.bf16.msra.mxu0 %v23516_v56  ;;  %16768 = vmatprep.subr.bf16.mxu1 %v23521_v8  ;;  %v23606_v56 = vld [vmem:[%s32079_s7 + $0x14e4] ss:$16 sps:$4 sm:$0xff]   ;;  %v23609_v8 = vld [vmem:[%s32079_s7 + $0x14ec] ss:$16 sps:$4 sm:$0xff]  }
 0x879   : > { %17793 = vmatprep.subr.bf16.mxu0 %v23524_v1  ;;  %v23604_v1 = vld [vmem:[%s32079_s7 + $0x14e0] ss:$16 sps:$4 sm:$0xff]  }
 0x87b   : > { %16769 = vmatpush1.bf16.msra.mxu1 %v23519_v9  ;;  %v23607_v9 = vld [vmem:[%s32079_s7 + $0x14e8] ss:$16 sps:$4 sm:$0xff]  }
 0x87c   : > { %17794 = vmatpush1.bf16.msra.mxu0 %v23522_v62  ;;  %16770 = vmatprep.subr.bf16.mxu1 %v23527_v54  ;;  %v23612_v62 = vld [vmem:[%s32079_s7 + $0x1504] ss:$16 sps:$4 sm:$0xff]   ;;  %v23615_v54 = vld [vmem:[%s32079_s7 + $0x150c] ss:$16 sps:$4 sm:$0xff]  }
 0x87d   : > { %17795 = vmatprep.subr.bf16.mxu0 %v23530_v34  ;;  %v23610_v34 = vld [vmem:[%s32079_s7 + $0x1500] ss:$16 sps:$4 sm:$0xff]  }
 0x87f   : > { %16771 = vmatpush1.bf16.msra.mxu1 %v23525_v40  ;;  %v23613_v40 = vld [vmem:[%s32079_s7 + $0x1508] ss:$16 sps:$4 sm:$0xff]  }
 0x880   : > { %17796 = vmatpush1.bf16.msra.mxu0 %v23528_v7  ;;  %16772 = vmatprep.subr.bf16.mxu1 %v23533_v32  ;;  %v23618_v7 = vld [vmem:[%s32079_s7 + $0x1524] ss:$16 sps:$4 sm:$0xff]   ;;  %v23621_v32 = vld [vmem:[%s32079_s7 + $0x152c] ss:$16 sps:$4 sm:$0xff]  }
 0x881   : > { %17797 = vmatprep.subr.bf16.mxu0 %v23536_v10  ;;  %v23616_v10 = vld [vmem:[%s32079_s7 + $0x1520] ss:$16 sps:$4 sm:$0xff]  }
 0x883   : > { %16773 = vmatpush1.bf16.msra.mxu1 %v23531_v58  ;;  %v23619_v58 = vld [vmem:[%s32079_s7 + $0x1528] ss:$16 sps:$4 sm:$0xff]  }
 0x884   : > { %17798 = vmatpush1.bf16.msra.mxu0 %v23534_v0  ;;  %16774 = vmatprep.subr.bf16.mxu1 %v23539_v31  ;;  %v23624_v0 = vld [vmem:[%s32079_s7 + $0x1544] ss:$16 sps:$4 sm:$0xff]   ;;  %v23627_v31 = vld [vmem:[%s32079_s7 + $0x154c] ss:$16 sps:$4 sm:$0xff]  }
 0x885   : > { %17799 = vmatprep.subr.bf16.mxu0 %v23542_v13  ;;  %v23622_v13 = vld [vmem:[%s32079_s7 + $0x1540] ss:$16 sps:$4 sm:$0xff]  }
 0x887   : > { %16775 = vmatpush1.bf16.msra.mxu1 %v23537_v17  ;;  %v23625_v17 = vld [vmem:[%s32079_s7 + $0x1548] ss:$16 sps:$4 sm:$0xff]  }
 0x888   : > { %17800 = vmatpush1.bf16.msra.mxu0 %v23540_v30  ;;  %16776 = vmatprep.subr.bf16.mxu1 %v23545_v42  ;;  %v23630_v30 = vld [vmem:[%s32079_s7 + $0x1564] ss:$16 sps:$4 sm:$0xff]   ;;  %v23633_v42 = vld [vmem:[%s32079_s7 + $0x156c] ss:$16 sps:$4 sm:$0xff]  }
 0x889   : > { %17801 = vmatprep.subr.bf16.mxu0 %v23548_v28  ;;  %v23628_v28 = vld [vmem:[%s32079_s7 + $0x1560] ss:$16 sps:$4 sm:$0xff]  }
 0x88b   : > { %16777 = vmatpush1.bf16.msra.mxu1 %v23543_v5  ;;  %v23631_v5 = vld [vmem:[%s32079_s7 + $0x1568] ss:$16 sps:$4 sm:$0xff]  }
 0x88c   : > { %17802 = vmatpush1.bf16.msra.mxu0 %v23546_v14  ;;  %16778 = vmatprep.subr.bf16.mxu1 %v23551_v33  ;;  %v23636_v14 = vld [vmem:[%s32079_s7 + $0x1584] ss:$16 sps:$4 sm:$0xff]   ;;  %v23639_v33 = vld [vmem:[%s32079_s7 + $0x158c] ss:$16 sps:$4 sm:$0xff]  }
 0x88d   : > { %17803 = vmatprep.subr.bf16.mxu0 %v23554_v19  ;;  %v23634_v19 = vld [vmem:[%s32079_s7 + $0x1580] ss:$16 sps:$4 sm:$0xff]  }
 0x88f   : > { %16779 = vmatpush1.bf16.msra.mxu1 %v23549_v43  ;;  %v23642_v43 = vld [vmem:[%s32079_s7 + $0x15a4] ss:$16 sps:$4 sm:$0xff]  }
 0x890   : > { %17804 = vmatpush1.bf16.msra.mxu0 %v23552_v6  ;;  %16780 = vmatprep.subr.bf16.mxu1 %v23557_v55  ;;  %v23645_v6 = vld [vmem:[%s32079_s7 + $0x15ac] ss:$16 sps:$4 sm:$0xff]   ;;  %v23640_v55 = vld [vmem:[%s32079_s7 + $0x15a0] ss:$16 sps:$4 sm:$0xff]  }
 0x891   : > { %17805 = vmatprep.subr.bf16.mxu0 %v23560_v23  ;;  %v23643_v23 = vld [vmem:[%s32079_s7 + $0x15a8] ss:$16 sps:$4 sm:$0xff]  }
 0x893   : > { %16781 = vmatpush1.bf16.msra.mxu1 %v23555_v59  ;;  %v23648_v59 = vld [vmem:[%s32079_s7 + $0x15c4] ss:$16 sps:$4 sm:$0xff]  }
 0x894   : > { %17806 = vmatpush1.bf16.msra.mxu0 %v23558_v51  ;;  %16791 = vmatprep.subr.bf16.mxu1 %v23563_v48  ;;  %v23651_v51 = vld [vmem:[%s32079_s7 + $0x15cc] ss:$16 sps:$4 sm:$0xff]   ;;  %v23646_v48 = vld [vmem:[%s32079_s7 + $0x15c0] ss:$16 sps:$4 sm:$0xff]  }
 0x895   : > { %17816 = vmatprep.subr.bf16.mxu0 %v23566_v60  ;;  %v23649_v60 = vld [vmem:[%s32079_s7 + $0x15c8] ss:$16 sps:$4 sm:$0xff]  }
 0x896   : > { %16783 = vmatmul.mubr.bf16.vlgmr.msra.gmra.mrb[32].mxu1 %v8306_v35 }
 0x897   : > { %17808 = vmatmul.mubr.bf16.vlgmr.msra.gmra.mrb[16].mxu0 %v8306_v35  ;;  %16792 = vmatpush1.bf16.msra.mxu1 %v23561_v44  ;;  %v23657_v44 = vld [vmem:[%s32079_s7 + $0x15ec] ss:$16 sps:$4 sm:$0xff]   ;;  %v23652_v35 = vld [vmem:[%s32079_s7 + $0x15e0] ss:$16 sps:$4 sm:$0xff]  }
 0x898   : > { %16823 = vmatprep.mubr.bf16.mxu1 %v29037_v24  ;;  %17817 = vmatpush1.bf16.msra.mxu0 %v23564_v21  ;;  %v23655_v21 = vld [vmem:[%s32079_s7 + $0x15e8] ss:$16 sps:$4 sm:$0xff]  }
 0x899   : > { %17848 = vmatprep.mubr.bf16.mxu0 %v29037_v24  ;;  %16793 = vmatprep.subr.bf16.mxu1 %v23570_v45  ;;  %v23660_v45 = vld [vmem:[%s32079_s7 + $0x1604] ss:$16 sps:$4 sm:$0xff]  }
 0x89a   : > { %17818 = vmatprep.subr.bf16.mxu0 %v23573_v37  ;;  %v23663_v37 = vld [vmem:[%s32079_s7 + $0x160c] ss:$16 sps:$4 sm:$0xff]  }
 0x89b   : > { %16794 = vmatpush1.bf16.msra.mxu1 %v23568_v20  ;;  %v23658_v20 = vld [vmem:[%s32079_s7 + $0x1600] ss:$16 sps:$4 sm:$0xff]  }
 0x89c   : > { %17819 = vmatpush1.bf16.msra.mxu0 %v23571_v63  ;;  %16795 = vmatprep.subr.bf16.mxu1 %v23576_v3  ;;  %v29229_v63 = vrot.slane %v29009_v46, %v27039_v29  ;;  %v23661_v3 = vld [vmem:[%s32079_s7 + $0x1608] ss:$16 sps:$4 sm:$0xff]   ;;  %v23669_v46 = vld [vmem:[%s32079_s7 + $0x162c] ss:$16 sps:$4 sm:$0xff]  }
 0x89d   : > { %17820 = vmatprep.subr.bf16.mxu0 %v23579_v57  ;;  %v23666_v57 = vld [vmem:[%s32079_s7 + $0x1624] ss:$16 sps:$4 sm:$0xff]  }
 0x89f   : > { %16796 = vmatpush1.bf16.msra.mxu1 %v23574_v18  ;;  %v8309_v18 = vcombine.high %v29037_v24, %v29037_v24  ;;  %v23672_v24 = vld [vmem:[%s32079_s7 + $0x1644] ss:$16 sps:$4 sm:$0xff]  }
 0x8a0   : > { %17821 = vmatpush1.bf16.msra.mxu0 %v23577_v36  ;;  %16797 = vmatprep.subr.bf16.mxu1 %v23582_v11  ;;  %v23664_v36 = vld [vmem:[%s32079_s7 + $0x1620] ss:$16 sps:$4 sm:$0xff]   ;;  %v23667_v11 = vld [vmem:[%s32079_s7 + $0x1628] ss:$16 sps:$4 sm:$0xff]  }
 0x8a1   : > { %17822 = vmatprep.subr.bf16.mxu0 %v23585_v47  ;;  %v23675_v47 = vld [vmem:[%s32079_s7 + $0x164c] ss:$16 sps:$4 sm:$0xff]  }
 0x8a3   : > { %16798 = vmatpush1.bf16.msra.mxu1 %v23580_v26  ;;  %v23670_v26 = vld [vmem:[%s32079_s7 + $0x1640] ss:$16 sps:$4 sm:$0xff]  }
 0x8a4   : > { %17823 = vmatpush1.bf16.msra.mxu0 %v23583_v49  ;;  %16799 = vmatprep.subr.bf16.mxu1 %v23588_v53  ;;  %v23673_v49 = vld [vmem:[%s32079_s7 + $0x1648] ss:$16 sps:$4 sm:$0xff]   ;;  %v23678_v53 = vld [vmem:[%s32079_s7 + $0x1664] ss:$16 sps:$4 sm:$0xff]  }
 0x8a5   : > { %17824 = vmatprep.subr.bf16.mxu0 %v23591_v16  ;;  %v23681_v16 = vld [vmem:[%s32079_s7 + $0x166c] ss:$16 sps:$4 sm:$0xff]  }
 0x8a7   : > { %16800 = vmatpush1.bf16.msra.mxu1 %v23586_v50  ;;  %v23676_v50 = vld [vmem:[%s32079_s7 + $0x1660] ss:$16 sps:$4 sm:$0xff]  }
 0x8a8   : > { %17825 = vmatpush1.bf16.msra.mxu0 %v23589_v38  ;;  %16801 = vmatprep.subr.bf16.mxu1 %v23594_v52  ;;  %v23679_v38 = vld [vmem:[%s32079_s7 + $0x1668] ss:$16 sps:$4 sm:$0xff]   ;;  %v23684_v52 = vld [vmem:[%s32079_s7 + $0x1684] ss:$16 sps:$4 sm:$0xff]  }
 0x8a9   : > { %17826 = vmatprep.subr.bf16.mxu0 %v23597_v4  ;;  %v23687_v4 = vld [vmem:[%s32079_s7 + $0x168c] ss:$16 sps:$4 sm:$0xff]  }
 0x8ab   : > { %16802 = vmatpush1.bf16.msra.mxu1 %v23592_v15  ;;  %v23682_v15 = vld [vmem:[%s32079_s7 + $0x1680] ss:$16 sps:$4 sm:$0xff]  }
 0x8ac   : > { %17827 = vmatpush1.bf16.msra.mxu0 %v23595_v27  ;;  %16803 = vmatprep.subr.bf16.mxu1 %v23600_v39  ;;  %v23685_v27 = vld [vmem:[%s32079_s7 + $0x1688] ss:$16 sps:$4 sm:$0xff]   ;;  %v23690_v39 = vld [vmem:[%s32079_s7 + $0x16a4] ss:$16 sps:$4 sm:$0xff]  }
 0x8ad   : > { %17828 = vmatprep.subr.bf16.mxu0 %v23603_v12  ;;  %v23693_v12 = vld [vmem:[%s32079_s7 + $0x16ac] ss:$16 sps:$4 sm:$0xff]  }
 0x8af   : > { %16804 = vmatpush1.bf16.msra.mxu1 %v23598_v25  ;;  %v23688_v25 = vld [vmem:[%s32079_s7 + $0x16a0] ss:$16 sps:$4 sm:$0xff]  }
 0x8b0   : > { %17829 = vmatpush1.bf16.msra.mxu0 %v23601_v22  ;;  %16805 = vmatprep.subr.bf16.mxu1 %v23606_v56  ;;  %v23691_v22 = vld [vmem:[%s32079_s7 + $0x16a8] ss:$16 sps:$4 sm:$0xff]   ;;  %v23696_v56 = vld [vmem:[%s32079_s7 + $0x16c4] ss:$16 sps:$4 sm:$0xff]  }
 0x8b1   : > { %17830 = vmatprep.subr.bf16.mxu0 %v23609_v8  ;;  %v23699_v8 = vld [vmem:[%s32079_s7 + $0x16cc] ss:$16 sps:$4 sm:$0xff]  }
 0x8b3   : > { %16806 = vmatpush1.bf16.msra.mxu1 %v23604_v1  ;;  %v23694_v1 = vld [vmem:[%s32079_s7 + $0x16c0] ss:$16 sps:$4 sm:$0xff]  }
 0x8b4   : > { %17831 = vmatpush1.bf16.msra.mxu0 %v23607_v9  ;;  %16807 = vmatprep.subr.bf16.mxu1 %v23612_v62  ;;  %v23697_v9 = vld [vmem:[%s32079_s7 + $0x16c8] ss:$16 sps:$4 sm:$0xff]   ;;  %v23702_v62 = vld [vmem:[%s32079_s7 + $0x16e4] ss:$16 sps:$4 sm:$0xff]  }
 0x8b5   : > { %17832 = vmatprep.subr.bf16.mxu0 %v23615_v54  ;;  %v23705_v54 = vld [vmem:[%s32079_s7 + $0x16ec] ss:$16 sps:$4 sm:$0xff]  }
 0x8b7   : > { %16808 = vmatpush1.bf16.msra.mxu1 %v23610_v34  ;;  %v23700_v34 = vld [vmem:[%s32079_s7 + $0x16e0] ss:$16 sps:$4 sm:$0xff]  }
 0x8b8   : > { %17833 = vmatpush1.bf16.msra.mxu0 %v23613_v40  ;;  %16809 = vmatprep.subr.bf16.mxu1 %v23618_v7  ;;  %v23703_v40 = vld [vmem:[%s32079_s7 + $0x16e8] ss:$16 sps:$4 sm:$0xff]   ;;  %v23708_v7 = vld [vmem:[%s32079_s7 + $0x1704] ss:$16 sps:$4 sm:$0xff]  }
 0x8b9   : > { %17834 = vmatprep.subr.bf16.mxu0 %v23621_v32  ;;  %v23711_v32 = vld [vmem:[%s32079_s7 + $0x170c] ss:$16 sps:$4 sm:$0xff]  }
 0x8bb   : > { %16810 = vmatpush1.bf16.msra.mxu1 %v23616_v10  ;;  %v23706_v10 = vld [vmem:[%s32079_s7 + $0x1700] ss:$16 sps:$4 sm:$0xff]  }
 0x8bc   : > { %17835 = vmatpush1.bf16.msra.mxu0 %v23619_v58  ;;  %16811 = vmatprep.subr.bf16.mxu1 %v23624_v0  ;;  %v23709_v58 = vld [vmem:[%s32079_s7 + $0x1708] ss:$16 sps:$4 sm:$0xff]   ;;  %v23714_v0 = vld [vmem:[%s32079_s7 + $0x1724] ss:$16 sps:$4 sm:$0xff]  }
 0x8bd   : > { %17836 = vmatprep.subr.bf16.mxu0 %v23627_v31  ;;  %v23717_v31 = vld [vmem:[%s32079_s7 + $0x172c] ss:$16 sps:$4 sm:$0xff]  }
 0x8bf   : > { %16812 = vmatpush1.bf16.msra.mxu1 %v23622_v13  ;;  %v23712_v13 = vld [vmem:[%s32079_s7 + $0x1720] ss:$16 sps:$4 sm:$0xff]  }
 0x8c0   : > { %17837 = vmatpush1.bf16.msra.mxu0 %v23625_v17  ;;  %16813 = vmatprep.subr.bf16.mxu1 %v23630_v30  ;;  %v23715_v17 = vld [vmem:[%s32079_s7 + $0x1728] ss:$16 sps:$4 sm:$0xff]   ;;  %v23720_v30 = vld [vmem:[%s32079_s7 + $0x1744] ss:$16 sps:$4 sm:$0xff]  }
 0x8c1   : > { %17838 = vmatprep.subr.bf16.mxu0 %v23633_v42  ;;  %v23723_v42 = vld [vmem:[%s32079_s7 + $0x174c] ss:$16 sps:$4 sm:$0xff]  }
 0x8c3   : > { %16814 = vmatpush1.bf16.msra.mxu1 %v23628_v28  ;;  %v23718_v28 = vld [vmem:[%s32079_s7 + $0x1740] ss:$16 sps:$4 sm:$0xff]  }
 0x8c4   : > { %17839 = vmatpush1.bf16.msra.mxu0 %v23631_v5  ;;  %16815 = vmatprep.subr.bf16.mxu1 %v23636_v14  ;;  %v23721_v5 = vld [vmem:[%s32079_s7 + $0x1748] ss:$16 sps:$4 sm:$0xff]   ;;  %v23726_v14 = vld [vmem:[%s32079_s7 + $0x1764] ss:$16 sps:$4 sm:$0xff]  }
 0x8c5   : > { %17840 = vmatprep.subr.bf16.mxu0 %v23639_v33  ;;  %v23729_v33 = vld [vmem:[%s32079_s7 + $0x176c] ss:$16 sps:$4 sm:$0xff]  }
 0x8c7   : > { %16816 = vmatpush1.bf16.msra.mxu1 %v23634_v19  ;;  %v23724_v19 = vld [vmem:[%s32079_s7 + $0x1760] ss:$16 sps:$4 sm:$0xff]  }
 0x8c8   : > { %17841 = vmatpush1.bf16.msra.mxu0 %v23637_v61  ;;  %16817 = vmatprep.subr.bf16.mxu1 %v23642_v43  ;;  %v23727_v61 = vld [vmem:[%s32079_s7 + $0x1768] ss:$16 sps:$4 sm:$0xff]   ;;  %v23732_v43 = vld [vmem:[%s32079_s7 + $0x1784] ss:$16 sps:$4 sm:$0xff]  }
 0x8c9   : > { %17842 = vmatprep.subr.bf16.mxu0 %v23645_v6  ;;  %v23735_v6 = vld [vmem:[%s32079_s7 + $0x178c] ss:$16 sps:$4 sm:$0xff]  }
 0x8cb   : > { %16818 = vmatpush1.bf16.msra.mxu1 %v23640_v55  ;;  %v23730_v55 = vld [vmem:[%s32079_s7 + $0x1780] ss:$16 sps:$4 sm:$0xff]  }
 0x8cc   : > { %17843 = vmatpush1.bf16.msra.mxu0 %v23643_v23  ;;  %16819 = vmatprep.subr.bf16.mxu1 %v23648_v59  ;;  %v23733_v23 = vld [vmem:[%s32079_s7 + $0x1788] ss:$16 sps:$4 sm:$0xff]   ;;  %v23738_v59 = vld [vmem:[%s32079_s7 + $0x17a4] ss:$16 sps:$4 sm:$0xff]  }
 0x8cd   : > { %17844 = vmatprep.subr.bf16.mxu0 %v23651_v51  ;;  %v23741_v51 = vld [vmem:[%s32079_s7 + $0x17ac] ss:$16 sps:$4 sm:$0xff]  }
 0x8cf   : > { %16820 = vmatpush1.bf16.msra.mxu1 %v23646_v48  ;;  %v23736_v48 = vld [vmem:[%s32079_s7 + $0x17a0] ss:$16 sps:$4 sm:$0xff]  }
 0x8d0   : > { %17845 = vmatpush1.bf16.msra.mxu0 %v23649_v60  ;;  %16821 = vmatprep.subr.bf16.mxu1 %v23654_v41  ;;  %v23739_v60 = vld [vmem:[%s32079_s7 + $0x17a8] ss:$16 sps:$4 sm:$0xff]   ;;  %v23744_v41 = vld [vmem:[%s32079_s7 + $0x17c4] ss:$16 sps:$4 sm:$0xff]  }
 0x8d1   : > { %17846 = vmatprep.subr.bf16.mxu0 %v23657_v44  ;;  %v23747_v44 = vld [vmem:[%s32079_s7 + $0x17cc] ss:$16 sps:$4 sm:$0xff]  }
 0x8d3   : > { %16822 = vmatpush1.bf16.msra.mxu1 %v23652_v35  ;;  %v23742_v35 = vld [vmem:[%s32079_s7 + $0x17c0] ss:$16 sps:$4 sm:$0xff]  }
 0x8d4   : > { %17847 = vmatpush1.bf16.msra.mxu0 %v23655_v21  ;;  %16832 = vmatprep.subr.bf16.mxu1 %v23660_v45  ;;  %v29403_v21 = vld [vmem:[#allocation5 + $0x18] sm:$0xff] }
 0x8d5   : > { %17857 = vmatprep.subr.bf16.mxu0 %v23663_v37  ;;  %v23745_v45 = vld [vmem:[%s32079_s7 + $0x17c8] ss:$16 sps:$4 sm:$0xff]   ;;  %v23750_v37 = vld [vmem:[%s32079_s7 + $0x17e4] ss:$16 sps:$4 sm:$0xff]  }
 0x8d6   : > { %16824 = vmatmul.mubr.bf16.vlgmr.msra.gmra.mrb[32].mxu1 %v29229_v63 }
 0x8d7   : > { %17849 = vmatmul.mubr.bf16.vlgmr.msra.gmra.mrb[16].mxu0 %v29229_v63  ;;  %16833 = vmatpush1.bf16.msra.mxu1 %v23658_v20  ;;  %v23753_v20 = vld [vmem:[%s32079_s7 + $0x17ec] ss:$16 sps:$4 sm:$0xff]  }
 0x8d8   : > { %16864 = vmatprep.mubr.bf16.mxu1 %v8309_v18  ;;  %17858 = vmatpush1.bf16.msra.mxu0 %v23661_v3  ;;  %v29416_v3 = vrot.slane %v29403_v21, %v27039_v29 }
 0x8d9   : > { %17889 = vmatprep.mubr.bf16.mxu0 %v8309_v18  ;;  %16834 = vmatprep.subr.bf16.mxu1 %v23666_v57  ;;  %v23748_v57 = vld [vmem:[%s32079_s7 + $0x17e0] ss:$16 sps:$4 sm:$0xff]   ;;  %v23751_v18 = vld [vmem:[%s32079_s7 + $0x17e8] ss:$16 sps:$4 sm:$0xff]  }
 0x8da   : > { %17859 = vmatprep.subr.bf16.mxu0 %v23669_v46  ;;  %v23756_v46 = vld [vmem:[%s32079_s7 + $0x1804] ss:$16 sps:$4 sm:$0xff]  }
 0x8db   : > { %16835 = vmatpush1.bf16.msra.mxu1 %v23664_v36  ;;  %v23759_v36 = vld [vmem:[%s32079_s7 + $0x180c] ss:$16 sps:$4 sm:$0xff]  }
 0x8dc   : > { %17860 = vmatpush1.bf16.msra.mxu0 %v23667_v11  ;;  %16836 = vmatprep.subr.bf16.mxu1 %v23672_v24  ;;  %v8325_v11 = vcombine.high %v29416_v3, %v29416_v3  ;;  %v23754_v24 = vld [vmem:[%s32079_s7 + $0x1800] ss:$16 sps:$4 sm:$0xff]  }
 0x8dd   : > { %17861 = vmatprep.subr.bf16.mxu0 %v23675_v47  ;;  %v8307_v47 = vcombine.high %v29229_v63, %v29229_v63  ;;  %v23760_v63 = vld [vmem:[%s32079_s7 + $0x1820] ss:$16 sps:$4 sm:$0xff]  }
 0x8df   : > { %16837 = vmatpush1.bf16.msra.mxu1 %v23670_v26  ;;  %v23757_v26 = vld [vmem:[%s32079_s7 + $0x1808] ss:$16 sps:$4 sm:$0xff]  }
 0x8e0   : > { %17862 = vmatpush1.bf16.msra.mxu0 %v23673_v49  ;;  %16838 = vmatprep.subr.bf16.mxu1 %v23678_v53  ;;  %v23762_v49 = vld [vmem:[%s32079_s7 + $0x1824] ss:$16 sps:$4 sm:$0xff]   ;;  %v29444_v53 = vrot.slane %v8325_v11, %v27039_v29  ;;  %v23841_v11 = vld [vmem:[%s32079_s7 + $0x19c8] ss:$16 sps:$4 sm:$0xff]  }
 0x8e1   : > { %17863 = vmatprep.subr.bf16.mxu0 %v23681_v16  ;;  %v23765_v16 = vld [vmem:[%s32079_s7 + $0x182c] ss:$16 sps:$4 sm:$0xff]  }
 0x8e3   : > { %16839 = vmatpush1.bf16.msra.mxu1 %v23676_v50  ;;  %v23763_v50 = vld [vmem:[%s32079_s7 + $0x1828] ss:$16 sps:$4 sm:$0xff]  }
 0x8e4   : > { %17864 = vmatpush1.bf16.msra.mxu0 %v23679_v38  ;;  %16840 = vmatprep.subr.bf16.mxu1 %v23684_v52  ;;  %v23768_v38 = vld [vmem:[%s32079_s7 + $0x1844] ss:$16 sps:$4 sm:$0xff]   ;;  %v23771_v52 = vld [vmem:[%s32079_s7 + $0x184c] ss:$16 sps:$4 sm:$0xff]  }
 0x8e5   : > { %17865 = vmatprep.subr.bf16.mxu0 %v23687_v4  ;;  %v23766_v4 = vld [vmem:[%s32079_s7 + $0x1840] ss:$16 sps:$4 sm:$0xff]  }
 0x8e7   : > { %16841 = vmatpush1.bf16.msra.mxu1 %v23682_v15  ;;  %v23769_v15 = vld [vmem:[%s32079_s7 + $0x1848] ss:$16 sps:$4 sm:$0xff]  }
 0x8e8   : > { %17866 = vmatpush1.bf16.msra.mxu0 %v23685_v27  ;;  %16842 = vmatprep.subr.bf16.mxu1 %v23690_v39  ;;  %v23774_v27 = vld [vmem:[%s32079_s7 + $0x1864] ss:$16 sps:$4 sm:$0xff]   ;;  %v23777_v39 = vld [vmem:[%s32079_s7 + $0x186c] ss:$16 sps:$4 sm:$0xff]  }
 0x8e9   : > { %17867 = vmatprep.subr.bf16.mxu0 %v23693_v12  ;;  %v23772_v12 = vld [vmem:[%s32079_s7 + $0x1860] ss:$16 sps:$4 sm:$0xff]  }
 0x8eb   : > { %16843 = vmatpush1.bf16.msra.mxu1 %v23688_v25  ;;  %v23775_v25 = vld [vmem:[%s32079_s7 + $0x1868] ss:$16 sps:$4 sm:$0xff]  }
 0x8ec   : > { %17868 = vmatpush1.bf16.msra.mxu0 %v23691_v22  ;;  %16844 = vmatprep.subr.bf16.mxu1 %v23696_v56  ;;  %v23780_v22 = vld [vmem:[%s32079_s7 + $0x1884] ss:$16 sps:$4 sm:$0xff]   ;;  %v23783_v56 = vld [vmem:[%s32079_s7 + $0x188c] ss:$16 sps:$4 sm:$0xff]  }
 0x8ed   : > { %17869 = vmatprep.subr.bf16.mxu0 %v23699_v8  ;;  %v23778_v8 = vld [vmem:[%s32079_s7 + $0x1880] ss:$16 sps:$4 sm:$0xff]  }
 0x8ef   : > { %16845 = vmatpush1.bf16.msra.mxu1 %v23694_v1  ;;  %v23781_v1 = vld [vmem:[%s32079_s7 + $0x1888] ss:$16 sps:$4 sm:$0xff]  }
 0x8f0   : > { %17870 = vmatpush1.bf16.msra.mxu0 %v23697_v9  ;;  %16846 = vmatprep.subr.bf16.mxu1 %v23702_v62  ;;  %v23786_v9 = vld [vmem:[%s32079_s7 + $0x18a4] ss:$16 sps:$4 sm:$0xff]   ;;  %v23789_v62 = vld [vmem:[%s32079_s7 + $0x18ac] ss:$16 sps:$4 sm:$0xff]  }
 0x8f1   : > { %17871 = vmatprep.subr.bf16.mxu0 %v23705_v54  ;;  %v23784_v54 = vld [vmem:[%s32079_s7 + $0x18a0] ss:$16 sps:$4 sm:$0xff]  }
 0x8f3   : > { %16847 = vmatpush1.bf16.msra.mxu1 %v23700_v34  ;;  %v23787_v34 = vld [vmem:[%s32079_s7 + $0x18a8] ss:$16 sps:$4 sm:$0xff]  }
 0x8f4   : > { %17872 = vmatpush1.bf16.msra.mxu0 %v23703_v40  ;;  %16848 = vmatprep.subr.bf16.mxu1 %v23708_v7  ;;  %v23792_v40 = vld [vmem:[%s32079_s7 + $0x18c4] ss:$16 sps:$4 sm:$0xff]   ;;  %v23795_v7 = vld [vmem:[%s32079_s7 + $0x18cc] ss:$16 sps:$4 sm:$0xff]  }
 0x8f5   : > { %17873 = vmatprep.subr.bf16.mxu0 %v23711_v32  ;;  %v23790_v32 = vld [vmem:[%s32079_s7 + $0x18c0] ss:$16 sps:$4 sm:$0xff]  }
 0x8f7   : > { %16849 = vmatpush1.bf16.msra.mxu1 %v23706_v10  ;;  %v23793_v10 = vld [vmem:[%s32079_s7 + $0x18c8] ss:$16 sps:$4 sm:$0xff]  }
 0x8f8   : > { %17874 = vmatpush1.bf16.msra.mxu0 %v23709_v58  ;;  %16850 = vmatprep.subr.bf16.mxu1 %v23714_v0  ;;  %v23798_v58 = vld [vmem:[%s32079_s7 + $0x18e4] ss:$16 sps:$4 sm:$0xff]   ;;  %v23801_v0 = vld [vmem:[%s32079_s7 + $0x18ec] ss:$16 sps:$4 sm:$0xff]  }
 0x8f9   : > { %17875 = vmatprep.subr.bf16.mxu0 %v23717_v31  ;;  %v23796_v31 = vld [vmem:[%s32079_s7 + $0x18e0] ss:$16 sps:$4 sm:$0xff]  }
 0x8fb   : > { %16851 = vmatpush1.bf16.msra.mxu1 %v23712_v13  ;;  %v23799_v13 = vld [vmem:[%s32079_s7 + $0x18e8] ss:$16 sps:$4 sm:$0xff]  }
 0x8fc   : > { %17876 = vmatpush1.bf16.msra.mxu0 %v23715_v17  ;;  %16852 = vmatprep.subr.bf16.mxu1 %v23720_v30  ;;  %v23804_v17 = vld [vmem:[%s32079_s7 + $0x1904] ss:$16 sps:$4 sm:$0xff]   ;;  %v23807_v30 = vld [vmem:[%s32079_s7 + $0x190c] ss:$16 sps:$4 sm:$0xff]  }
 0x8fd   : > { %17877 = vmatprep.subr.bf16.mxu0 %v23723_v42  ;;  %v23802_v42 = vld [vmem:[%s32079_s7 + $0x1900] ss:$16 sps:$4 sm:$0xff]  }
 0x8ff   : > { %16853 = vmatpush1.bf16.msra.mxu1 %v23718_v28  ;;  %v23805_v28 = vld [vmem:[%s32079_s7 + $0x1908] ss:$16 sps:$4 sm:$0xff]  }
 0x900   : > { %17878 = vmatpush1.bf16.msra.mxu0 %v23721_v5  ;;  %16854 = vmatprep.subr.bf16.mxu1 %v23726_v14  ;;  %v23810_v5 = vld [vmem:[%s32079_s7 + $0x1924] ss:$16 sps:$4 sm:$0xff]   ;;  %v23813_v14 = vld [vmem:[%s32079_s7 + $0x192c] ss:$16 sps:$4 sm:$0xff]  }
 0x901   : > { %17879 = vmatprep.subr.bf16.mxu0 %v23729_v33  ;;  %v23808_v33 = vld [vmem:[%s32079_s7 + $0x1920] ss:$16 sps:$4 sm:$0xff]  }
 0x903   : > { %16855 = vmatpush1.bf16.msra.mxu1 %v23724_v19  ;;  %v23811_v19 = vld [vmem:[%s32079_s7 + $0x1928] ss:$16 sps:$4 sm:$0xff]  }
 0x904   : > { %17880 = vmatpush1.bf16.msra.mxu0 %v23727_v61  ;;  %16856 = vmatprep.subr.bf16.mxu1 %v23732_v43  ;;  %v23816_v61 = vld [vmem:[%s32079_s7 + $0x1944] ss:$16 sps:$4 sm:$0xff]   ;;  %v23819_v43 = vld [vmem:[%s32079_s7 + $0x194c] ss:$16 sps:$4 sm:$0xff]  }
 0x905   : > { %17881 = vmatprep.subr.bf16.mxu0 %v23735_v6  ;;  %v23814_v6 = vld [vmem:[%s32079_s7 + $0x1940] ss:$16 sps:$4 sm:$0xff]  }
 0x907   : > { %16857 = vmatpush1.bf16.msra.mxu1 %v23730_v55  ;;  %v23817_v55 = vld [vmem:[%s32079_s7 + $0x1948] ss:$16 sps:$4 sm:$0xff]  }
 0x908   : > { %17882 = vmatpush1.bf16.msra.mxu0 %v23733_v23  ;;  %16858 = vmatprep.subr.bf16.mxu1 %v23738_v59  ;;  %v23822_v23 = vld [vmem:[%s32079_s7 + $0x1964] ss:$16 sps:$4 sm:$0xff]   ;;  %v23825_v59 = vld [vmem:[%s32079_s7 + $0x196c] ss:$16 sps:$4 sm:$0xff]  }
 0x909   : > { %17883 = vmatprep.subr.bf16.mxu0 %v23741_v51  ;;  %v23820_v51 = vld [vmem:[%s32079_s7 + $0x1960] ss:$16 sps:$4 sm:$0xff]  }
 0x90b   : > { %16859 = vmatpush1.bf16.msra.mxu1 %v23736_v48  ;;  %v23823_v48 = vld [vmem:[%s32079_s7 + $0x1968] ss:$16 sps:$4 sm:$0xff]  }
 0x90c   : > { %17884 = vmatpush1.bf16.msra.mxu0 %v23739_v60  ;;  %16860 = vmatprep.subr.bf16.mxu1 %v23744_v41  ;;  %v23828_v60 = vld [vmem:[%s32079_s7 + $0x1984] ss:$16 sps:$4 sm:$0xff]   ;;  %v23831_v41 = vld [vmem:[%s32079_s7 + $0x198c] ss:$16 sps:$4 sm:$0xff]  }
 0x90d   : > { %17885 = vmatprep.subr.bf16.mxu0 %v23747_v44  ;;  %v23826_v44 = vld [vmem:[%s32079_s7 + $0x1980] ss:$16 sps:$4 sm:$0xff]  }
 0x90f   : > { %16861 = vmatpush1.bf16.msra.mxu1 %v23742_v35  ;;  %v23829_v35 = vld [vmem:[%s32079_s7 + $0x1988] ss:$16 sps:$4 sm:$0xff]  }
 0x910   : > { %17886 = vmatpush1.bf16.msra.mxu0 %v23745_v45  ;;  %16862 = vmatprep.subr.bf16.mxu1 %v23750_v37  ;;  %v23834_v45 = vld [vmem:[%s32079_s7 + $0x19a4] ss:$16 sps:$4 sm:$0xff]   ;;  %v23837_v37 = vld [vmem:[%s32079_s7 + $0x19ac] ss:$16 sps:$4 sm:$0xff]  }
 0x911   : > { %17887 = vmatprep.subr.bf16.mxu0 %v23753_v20  ;;  %v23832_v20 = vld [vmem:[%s32079_s7 + $0x19a0] ss:$16 sps:$4 sm:$0xff]  }
 0x913   : > { %16863 = vmatpush1.bf16.msra.mxu1 %v23748_v57  ;;  %v23835_v57 = vld [vmem:[%s32079_s7 + $0x19a8] ss:$16 sps:$4 sm:$0xff]  }
 0x914   : > { %17888 = vmatpush1.bf16.msra.mxu0 %v23751_v18  ;;  %16873 = vmatprep.subr.bf16.mxu1 %v23756_v46  ;;  %v23840_v18 = vld [vmem:[%s32079_s7 + $0x19c4] ss:$16 sps:$4 sm:$0xff]   ;;  %v23843_v46 = vld [vmem:[%s32079_s7 + $0x19cc] ss:$16 sps:$4 sm:$0xff]  }
 0x915   : > { %17898 = vmatprep.subr.bf16.mxu0 %v23759_v36  ;;  %v23838_v36 = vld [vmem:[%s32079_s7 + $0x19c0] ss:$16 sps:$4 sm:$0xff]  }
 0x916   : > { %16865 = vmatmul.mubr.bf16.vlgmr.msra.gmra.mrb[32].mxu1 %v8307_v47 }
 0x917   : > { %17890 = vmatmul.mubr.bf16.vlgmr.msra.gmra.mrb[16].mxu0 %v8307_v47  ;;  %16874 = vmatpush1.bf16.msra.mxu1 %v23754_v24  ;;  %v23846_v24 = vld [vmem:[%s32079_s7 + $0x19e4] ss:$16 sps:$4 sm:$0xff]   ;;  %v23849_v47 = vld [vmem:[%s32079_s7 + $0x19ec] ss:$16 sps:$4 sm:$0xff]  }
 0x918   : > { %16905 = vmatprep.mubr.bf16.mxu1 %v29444_v53  ;;  %17899 = vmatpush1.bf16.msra.mxu0 %v23757_v26  ;;  %v23844_v26 = vld [vmem:[%s32079_s7 + $0x19e0] ss:$16 sps:$4 sm:$0xff]  }
 0x919   : > { %17930 = vmatprep.mubr.bf16.mxu0 %v29444_v53  ;;  %16875 = vmatprep.subr.bf16.mxu1 %v23762_v49  ;;  %v23847_v49 = vld [vmem:[%s32079_s7 + $0x19e8] ss:$16 sps:$4 sm:$0xff]  }
 0x91a   : > { %17900 = vmatprep.subr.bf16.mxu0 %v23765_v16  ;;  %v23852_v16 = vld [vmem:[%s32079_s7 + $0x1a04] ss:$16 sps:$4 sm:$0xff]  }
 0x91b   : > { %16876 = vmatpush1.bf16.msra.mxu1 %v23760_v63  ;;  %v23855_v63 = vld [vmem:[%s32079_s7 + $0x1a0c] ss:$16 sps:$4 sm:$0xff]  }
 0x91c   : > { %17901 = vmatpush1.bf16.msra.mxu0 %v23763_v50  ;;  %16877 = vmatprep.subr.bf16.mxu1 %v23768_v38  ;;  %v23850_v50 = vld [vmem:[%s32079_s7 + $0x1a00] ss:$16 sps:$4 sm:$0xff]   ;;  %v29636_v38 = vrot.slane %v29416_v3, %v27039_v29  ;;  %v23861_v3 = vld [vmem:[%s32079_s7 + $0x1a2c] ss:$16 sps:$4 sm:$0xff]  }
 0x91d   : > { %17902 = vmatprep.subr.bf16.mxu0 %v23771_v52  ;;  %v23853_v52 = vld [vmem:[%s32079_s7 + $0x1a08] ss:$16 sps:$4 sm:$0xff]  }
 0x91f   : > { %16878 = vmatpush1.bf16.msra.mxu1 %v23766_v4  ;;  %v23858_v4 = vld [vmem:[%s32079_s7 + $0x1a24] ss:$16 sps:$4 sm:$0xff]  }
 0x920   : > { %17903 = vmatpush1.bf16.msra.mxu0 %v23769_v15  ;;  %16879 = vmatprep.subr.bf16.mxu1 %v23774_v27  ;;  %v8357_v15 = vcombine.high %v29444_v53, %v29444_v53  ;;  %v23856_v27 = vld [vmem:[%s32079_s7 + $0x1a20] ss:$16 sps:$4 sm:$0xff]   ;;  %v23864_v53 = vld [vmem:[%s32079_s7 + $0x1a44] ss:$16 sps:$4 sm:$0xff]  }
 0x921   : > { %17904 = vmatprep.subr.bf16.mxu0 %v23777_v39  ;;  %v23859_v39 = vld [vmem:[%s32079_s7 + $0x1a28] ss:$16 sps:$4 sm:$0xff]  }
 0x923   : > { %16880 = vmatpush1.bf16.msra.mxu1 %v23772_v12  ;;  %v23867_v12 = vld [vmem:[%s32079_s7 + $0x1a4c] ss:$16 sps:$4 sm:$0xff]  }
 0x924   : > { %17905 = vmatpush1.bf16.msra.mxu0 %v23775_v25  ;;  %16881 = vmatprep.subr.bf16.mxu1 %v23780_v22  ;;  %v23862_v25 = vld [vmem:[%s32079_s7 + $0x1a40] ss:$16 sps:$4 sm:$0xff]   ;;  %v23865_v22 = vld [vmem:[%s32079_s7 + $0x1a48] ss:$16 sps:$4 sm:$0xff]  }
 0x925   : > { %17906 = vmatprep.subr.bf16.mxu0 %v23783_v56  ;;  %v23870_v56 = vld [vmem:[%s32079_s7 + $0x1a64] ss:$16 sps:$4 sm:$0xff]  }
 0x927   : > { %16882 = vmatpush1.bf16.msra.mxu1 %v23778_v8  ;;  %v23873_v8 = vld [vmem:[%s32079_s7 + $0x1a6c] ss:$16 sps:$4 sm:$0xff]  }
 0x928   : > { %17907 = vmatpush1.bf16.msra.mxu0 %v23781_v1  ;;  %16883 = vmatprep.subr.bf16.mxu1 %v23786_v9  ;;  %v23868_v1 = vld [vmem:[%s32079_s7 + $0x1a60] ss:$16 sps:$4 sm:$0xff]   ;;  %v23871_v9 = vld [vmem:[%s32079_s7 + $0x1a68] ss:$16 sps:$4 sm:$0xff]  }
 0x929   : > { %17908 = vmatprep.subr.bf16.mxu0 %v23789_v62  ;;  %v23876_v62 = vld [vmem:[%s32079_s7 + $0x1a84] ss:$16 sps:$4 sm:$0xff]  }
 0x92b   : > { %16884 = vmatpush1.bf16.msra.mxu1 %v23784_v54  ;;  %v23879_v54 = vld [vmem:[%s32079_s7 + $0x1a8c] ss:$16 sps:$4 sm:$0xff]  }
 0x92c   : > { %17909 = vmatpush1.bf16.msra.mxu0 %v23787_v34  ;;  %16885 = vmatprep.subr.bf16.mxu1 %v23792_v40  ;;  %v23874_v34 = vld [vmem:[%s32079_s7 + $0x1a80] ss:$16 sps:$4 sm:$0xff]   ;;  %v23877_v40 = vld [vmem:[%s32079_s7 + $0x1a88] ss:$16 sps:$4 sm:$0xff]  }
 0x92d   : > { %17910 = vmatprep.subr.bf16.mxu0 %v23795_v7  ;;  %v23882_v7 = vld [vmem:[%s32079_s7 + $0x1aa4] ss:$16 sps:$4 sm:$0xff]  }
 0x92f   : > { %16886 = vmatpush1.bf16.msra.mxu1 %v23790_v32  ;;  %v23885_v32 = vld [vmem:[%s32079_s7 + $0x1aac] ss:$16 sps:$4 sm:$0xff]  }
 0x930   : > { %17911 = vmatpush1.bf16.msra.mxu0 %v23793_v10  ;;  %16887 = vmatprep.subr.bf16.mxu1 %v23798_v58  ;;  %v23880_v10 = vld [vmem:[%s32079_s7 + $0x1aa0] ss:$16 sps:$4 sm:$0xff]   ;;  %v23883_v58 = vld [vmem:[%s32079_s7 + $0x1aa8] ss:$16 sps:$4 sm:$0xff]  }
 0x931   : > { %17912 = vmatprep.subr.bf16.mxu0 %v23801_v0  ;;  %v23888_v0 = vld [vmem:[%s32079_s7 + $0x1ac4] ss:$16 sps:$4 sm:$0xff]  }
 0x933   : > { %16888 = vmatpush1.bf16.msra.mxu1 %v23796_v31  ;;  %v23891_v31 = vld [vmem:[%s32079_s7 + $0x1acc] ss:$16 sps:$4 sm:$0xff]  }
 0x934   : > { %17913 = vmatpush1.bf16.msra.mxu0 %v23799_v13  ;;  %16889 = vmatprep.subr.bf16.mxu1 %v23804_v17  ;;  %v23886_v13 = vld [vmem:[%s32079_s7 + $0x1ac0] ss:$16 sps:$4 sm:$0xff]   ;;  %v23889_v17 = vld [vmem:[%s32079_s7 + $0x1ac8] ss:$16 sps:$4 sm:$0xff]  }
 0x935   : > { %17914 = vmatprep.subr.bf16.mxu0 %v23807_v30  ;;  %v23894_v30 = vld [vmem:[%s32079_s7 + $0x1ae4] ss:$16 sps:$4 sm:$0xff]  }
 0x937   : > { %16890 = vmatpush1.bf16.msra.mxu1 %v23802_v42  ;;  %v23897_v42 = vld [vmem:[%s32079_s7 + $0x1aec] ss:$16 sps:$4 sm:$0xff]  }
 0x938   : > { %17915 = vmatpush1.bf16.msra.mxu0 %v23805_v28  ;;  %16891 = vmatprep.subr.bf16.mxu1 %v23810_v5  ;;  %v23892_v28 = vld [vmem:[%s32079_s7 + $0x1ae0] ss:$16 sps:$4 sm:$0xff]   ;;  %v23895_v5 = vld [vmem:[%s32079_s7 + $0x1ae8] ss:$16 sps:$4 sm:$0xff]  }
 0x939   : > { %17916 = vmatprep.subr.bf16.mxu0 %v23813_v14  ;;  %v23900_v14 = vld [vmem:[%s32079_s7 + $0x1b04] ss:$16 sps:$4 sm:$0xff]  }
 0x93b   : > { %16892 = vmatpush1.bf16.msra.mxu1 %v23808_v33  ;;  %v23903_v33 = vld [vmem:[%s32079_s7 + $0x1b0c] ss:$16 sps:$4 sm:$0xff]  }
 0x93c   : > { %17917 = vmatpush1.bf16.msra.mxu0 %v23811_v19  ;;  %16893 = vmatprep.subr.bf16.mxu1 %v23816_v61  ;;  %v23898_v19 = vld [vmem:[%s32079_s7 + $0x1b00] ss:$16 sps:$4 sm:$0xff]   ;;  %v23901_v61 = vld [vmem:[%s32079_s7 + $0x1b08] ss:$16 sps:$4 sm:$0xff]  }
 0x93d   : > { %17918 = vmatprep.subr.bf16.mxu0 %v23819_v43  ;;  %v23906_v43 = vld [vmem:[%s32079_s7 + $0x1b24] ss:$16 sps:$4 sm:$0xff]  }
 0x93f   : > { %16894 = vmatpush1.bf16.msra.mxu1 %v23814_v6  ;;  %v23909_v6 = vld [vmem:[%s32079_s7 + $0x1b2c] ss:$16 sps:$4 sm:$0xff]  }
 0x940   : > { %17919 = vmatpush1.bf16.msra.mxu0 %v23817_v55  ;;  %16895 = vmatprep.subr.bf16.mxu1 %v23822_v23  ;;  %v23904_v55 = vld [vmem:[%s32079_s7 + $0x1b20] ss:$16 sps:$4 sm:$0xff]   ;;  %v23907_v23 = vld [vmem:[%s32079_s7 + $0x1b28] ss:$16 sps:$4 sm:$0xff]  }
 0x941   : > { %17920 = vmatprep.subr.bf16.mxu0 %v23825_v59  ;;  %v23912_v59 = vld [vmem:[%s32079_s7 + $0x1b44] ss:$16 sps:$4 sm:$0xff]  }
 0x943   : > { %16896 = vmatpush1.bf16.msra.mxu1 %v23820_v51  ;;  %v23915_v51 = vld [vmem:[%s32079_s7 + $0x1b4c] ss:$16 sps:$4 sm:$0xff]  }
 0x944   : > { %17921 = vmatpush1.bf16.msra.mxu0 %v23823_v48  ;;  %16897 = vmatprep.subr.bf16.mxu1 %v23828_v60  ;;  %v23910_v48 = vld [vmem:[%s32079_s7 + $0x1b40] ss:$16 sps:$4 sm:$0xff]   ;;  %v23913_v60 = vld [vmem:[%s32079_s7 + $0x1b48] ss:$16 sps:$4 sm:$0xff]  }
 0x945   : > { %17922 = vmatprep.subr.bf16.mxu0 %v23831_v41  ;;  %v23918_v41 = vld [vmem:[%s32079_s7 + $0x1b64] ss:$16 sps:$4 sm:$0xff]  }
 0x947   : > { %16898 = vmatpush1.bf16.msra.mxu1 %v23826_v44  ;;  %v23921_v44 = vld [vmem:[%s32079_s7 + $0x1b6c] ss:$16 sps:$4 sm:$0xff]  }
 0x948   : > { %17923 = vmatpush1.bf16.msra.mxu0 %v23829_v35  ;;  %16899 = vmatprep.subr.bf16.mxu1 %v23834_v45  ;;  %v23916_v35 = vld [vmem:[%s32079_s7 + $0x1b60] ss:$16 sps:$4 sm:$0xff]   ;;  %v23919_v45 = vld [vmem:[%s32079_s7 + $0x1b68] ss:$16 sps:$4 sm:$0xff]  }
 0x949   : > { %17924 = vmatprep.subr.bf16.mxu0 %v23837_v37  ;;  %v23924_v37 = vld [vmem:[%s32079_s7 + $0x1b84] ss:$16 sps:$4 sm:$0xff]  }
 0x94b   : > { %16900 = vmatpush1.bf16.msra.mxu1 %v23832_v20  ;;  %v23927_v20 = vld [vmem:[%s32079_s7 + $0x1b8c] ss:$16 sps:$4 sm:$0xff]  }
 0x94c   : > { %17925 = vmatpush1.bf16.msra.mxu0 %v23835_v57  ;;  %16901 = vmatprep.subr.bf16.mxu1 %v23840_v18  ;;  %v23922_v57 = vld [vmem:[%s32079_s7 + $0x1b80] ss:$16 sps:$4 sm:$0xff]   ;;  %v23925_v18 = vld [vmem:[%s32079_s7 + $0x1b88] ss:$16 sps:$4 sm:$0xff]  }
 0x94d   : > { %17926 = vmatprep.subr.bf16.mxu0 %v23843_v46  ;;  %v23930_v46 = vld [vmem:[%s32079_s7 + $0x1ba4] ss:$16 sps:$4 sm:$0xff]  }
 0x94f   : > { %16902 = vmatpush1.bf16.msra.mxu1 %v23838_v36  ;;  %v23933_v36 = vld [vmem:[%s32079_s7 + $0x1bac] ss:$16 sps:$4 sm:$0xff]  }
 0x950   : > { %17927 = vmatpush1.bf16.msra.mxu0 %v23841_v11  ;;  %16903 = vmatprep.subr.bf16.mxu1 %v23846_v24  ;;  %v23928_v11 = vld [vmem:[%s32079_s7 + $0x1ba0] ss:$16 sps:$4 sm:$0xff]   ;;  %v23931_v24 = vld [vmem:[%s32079_s7 + $0x1ba8] ss:$16 sps:$4 sm:$0xff]  }
 0x951   : > { %17928 = vmatprep.subr.bf16.mxu0 %v23849_v47  ;;  %v23936_v47 = vld [vmem:[%s32079_s7 + $0x1bc4] ss:$16 sps:$4 sm:$0xff]  }
 0x953   : > { %16904 = vmatpush1.bf16.msra.mxu1 %v23844_v26  ;;  %v23939_v26 = vld [vmem:[%s32079_s7 + $0x1bcc] ss:$16 sps:$4 sm:$0xff]  }
 0x954   : > { %17929 = vmatpush1.bf16.msra.mxu0 %v23847_v49  ;;  %16914 = vmatprep.subr.bf16.mxu1 %v23852_v16  ;;  %v8310_v49 = vcombine.high %v29403_v21, %v29403_v21  ;;  %v23934_v16 = vld [vmem:[%s32079_s7 + $0x1bc0] ss:$16 sps:$4 sm:$0xff]   ;;  %v23945_v21 = vld [vmem:[%s32079_s7 + $0x1bec] ss:$16 sps:$4 sm:$0xff]  }
 0x955   : > { %17939 = vmatprep.subr.bf16.mxu0 %v23855_v63  ;;  %v23937_v63 = vld [vmem:[%s32079_s7 + $0x1bc8] ss:$16 sps:$4 sm:$0xff]  }
 0x956   : > { %16906 = vmatmul.mubr.bf16.vlgmr.msra.gmra.mrb[32].mxu1 %v29636_v38 }
 0x957   : > { %17931 = vmatmul.mubr.bf16.vlgmr.msra.gmra.mrb[16].mxu0 %v29636_v38  ;;  %16915 = vmatpush1.bf16.msra.mxu1 %v23850_v50  ;;  %v23942_v50 = vld [vmem:[%s32079_s7 + $0x1be4] ss:$16 sps:$4 sm:$0xff]  }
 0x958   : > { %16946 = vmatprep.mubr.bf16.mxu1 %v8357_v15  ;;  %17940 = vmatpush1.bf16.msra.mxu0 %v23853_v52  ;;  %v29822_v52 = vrot.slane %v8310_v49, %v27039_v29  ;;  %v24022_v49 = vld [vmem:[%s32079_s7 + $0x1d88] ss:$16 sps:$4 sm:$0xff]  }
 0x959   : > { %17971 = vmatprep.mubr.bf16.mxu0 %v8357_v15  ;;  %16916 = vmatprep.subr.bf16.mxu1 %v23858_v4  ;;  %v23940_v4 = vld [vmem:[%s32079_s7 + $0x1be0] ss:$16 sps:$4 sm:$0xff]   ;;  %v23943_v15 = vld [vmem:[%s32079_s7 + $0x1be8] ss:$16 sps:$4 sm:$0xff]  }
 0x95a   : > { %17941 = vmatprep.subr.bf16.mxu0 %v23861_v3  ;;  %v23948_v3 = vld [vmem:[%s32079_s7 + $0x1c04] ss:$16 sps:$4 sm:$0xff]  }
 0x95b   : > { %16917 = vmatpush1.bf16.msra.mxu1 %v23856_v27  ;;  %v23951_v27 = vld [vmem:[%s32079_s7 + $0x1c0c] ss:$16 sps:$4 sm:$0xff]  }
 0x95c   : > { %17942 = vmatpush1.bf16.msra.mxu0 %v23859_v39  ;;  %16918 = vmatprep.subr.bf16.mxu1 %v23864_v53  ;;  %v8326_v39 = vcombine.high %v29822_v52, %v29822_v52  ;;  %v23946_v53 = vld [vmem:[%s32079_s7 + $0x1c00] ss:$16 sps:$4 sm:$0xff]  }
 0x95d   : > { %17943 = vmatprep.subr.bf16.mxu0 %v23867_v12  ;;  %v8355_v12 = vcombine.high %v29636_v38, %v29636_v38  ;;  %v23953_v38 = vld [vmem:[%s32079_s7 + $0x1c20] ss:$16 sps:$4 sm:$0xff]  }
 0x95f   : > { %16919 = vmatpush1.bf16.msra.mxu1 %v23862_v25  ;;  %v23949_v25 = vld [vmem:[%s32079_s7 + $0x1c08] ss:$16 sps:$4 sm:$0xff]  }
 0x960   : > { %17944 = vmatpush1.bf16.msra.mxu0 %v23865_v22  ;;  %16920 = vmatprep.subr.bf16.mxu1 %v23870_v56  ;;  %v23955_v22 = vld [vmem:[%s32079_s7 + $0x1c24] ss:$16 sps:$4 sm:$0xff]   ;;  %v29850_v56 = vrot.slane %v8326_v39, %v27039_v29 }
 0x961   : > { %17945 = vmatprep.subr.bf16.mxu0 %v23873_v8  ;;  %v23958_v8 = vld [vmem:[%s32079_s7 + $0x1c2c] ss:$16 sps:$4 sm:$0xff]   ;;  %v24039_v39 = vld [vmem:[%s32079_s7 + $0x1de4] ss:$16 sps:$4 sm:$0xff]  }
 0x963   : > { %16921 = vmatpush1.bf16.msra.mxu1 %v23868_v1  ;;  %v23956_v1 = vld [vmem:[%s32079_s7 + $0x1c28] ss:$16 sps:$4 sm:$0xff]  }
 0x964   : > { %17946 = vmatpush1.bf16.msra.mxu0 %v23871_v9  ;;  %16922 = vmatprep.subr.bf16.mxu1 %v23876_v62  ;;  %v23961_v9 = vld [vmem:[%s32079_s7 + $0x1c44] ss:$16 sps:$4 sm:$0xff]   ;;  %v23964_v62 = vld [vmem:[%s32079_s7 + $0x1c4c] ss:$16 sps:$4 sm:$0xff]  }
 0x965   : > { %17947 = vmatprep.subr.bf16.mxu0 %v23879_v54  ;;  %v23959_v54 = vld [vmem:[%s32079_s7 + $0x1c40] ss:$16 sps:$4 sm:$0xff]  }
 0x967   : > { %16923 = vmatpush1.bf16.msra.mxu1 %v23874_v34  ;;  %v23962_v34 = vld [vmem:[%s32079_s7 + $0x1c48] ss:$16 sps:$4 sm:$0xff]  }
 0x968   : > { %17948 = vmatpush1.bf16.msra.mxu0 %v23877_v40  ;;  %16924 = vmatprep.subr.bf16.mxu1 %v23882_v7  ;;  %v23967_v40 = vld [vmem:[%s32079_s7 + $0x1c64] ss:$16 sps:$4 sm:$0xff]   ;;  %v23970_v7 = vld [vmem:[%s32079_s7 + $0x1c6c] ss:$16 sps:$4 sm:$0xff]  }
 0x969   : > { %17949 = vmatprep.subr.bf16.mxu0 %v23885_v32  ;;  %v23965_v32 = vld [vmem:[%s32079_s7 + $0x1c60] ss:$16 sps:$4 sm:$0xff]  }
 0x96b   : > { %16925 = vmatpush1.bf16.msra.mxu1 %v23880_v10  ;;  %v23968_v10 = vld [vmem:[%s32079_s7 + $0x1c68] ss:$16 sps:$4 sm:$0xff]  }
 0x96c   : > { %17950 = vmatpush1.bf16.msra.mxu0 %v23883_v58  ;;  %16926 = vmatprep.subr.bf16.mxu1 %v23888_v0  ;;  %v23973_v58 = vld [vmem:[%s32079_s7 + $0x1c84] ss:$16 sps:$4 sm:$0xff]   ;;  %v23976_v0 = vld [vmem:[%s32079_s7 + $0x1c8c] ss:$16 sps:$4 sm:$0xff]  }
 0x96d   : > { %17951 = vmatprep.subr.bf16.mxu0 %v23891_v31  ;;  %v23971_v31 = vld [vmem:[%s32079_s7 + $0x1c80] ss:$16 sps:$4 sm:$0xff]  }
 0x96f   : > { %16927 = vmatpush1.bf16.msra.mxu1 %v23886_v13  ;;  %v23974_v13 = vld [vmem:[%s32079_s7 + $0x1c88] ss:$16 sps:$4 sm:$0xff]  }
 0x970   : > { %17952 = vmatpush1.bf16.msra.mxu0 %v23889_v17  ;;  %16928 = vmatprep.subr.bf16.mxu1 %v23894_v30  ;;  %v23979_v17 = vld [vmem:[%s32079_s7 + $0x1ca4] ss:$16 sps:$4 sm:$0xff]   ;;  %v23982_v30 = vld [vmem:[%s32079_s7 + $0x1cac] ss:$16 sps:$4 sm:$0xff]  }
 0x971   : > { %17953 = vmatprep.subr.bf16.mxu0 %v23897_v42  ;;  %v23977_v42 = vld [vmem:[%s32079_s7 + $0x1ca0] ss:$16 sps:$4 sm:$0xff]  }
 0x973   : > { %16929 = vmatpush1.bf16.msra.mxu1 %v23892_v28  ;;  %v23980_v28 = vld [vmem:[%s32079_s7 + $0x1ca8] ss:$16 sps:$4 sm:$0xff]  }
 0x974   : > { %17954 = vmatpush1.bf16.msra.mxu0 %v23895_v5  ;;  %16930 = vmatprep.subr.bf16.mxu1 %v23900_v14  ;;  %v23985_v5 = vld [vmem:[%s32079_s7 + $0x1cc4] ss:$16 sps:$4 sm:$0xff]   ;;  %v23988_v14 = vld [vmem:[%s32079_s7 + $0x1ccc] ss:$16 sps:$4 sm:$0xff]  }
 0x975   : > { %17955 = vmatprep.subr.bf16.mxu0 %v23903_v33  ;;  %v23983_v33 = vld [vmem:[%s32079_s7 + $0x1cc0] ss:$16 sps:$4 sm:$0xff]  }
 0x977   : > { %16931 = vmatpush1.bf16.msra.mxu1 %v23898_v19  ;;  %v23986_v19 = vld [vmem:[%s32079_s7 + $0x1cc8] ss:$16 sps:$4 sm:$0xff]  }
 0x978   : > { %17956 = vmatpush1.bf16.msra.mxu0 %v23901_v61  ;;  %16932 = vmatprep.subr.bf16.mxu1 %v23906_v43  ;;  %v23991_v61 = vld [vmem:[%s32079_s7 + $0x1ce4] ss:$16 sps:$4 sm:$0xff]   ;;  %v23994_v43 = vld [vmem:[%s32079_s7 + $0x1cec] ss:$16 sps:$4 sm:$0xff]  }
 0x979   : > { %17957 = vmatprep.subr.bf16.mxu0 %v23909_v6  ;;  %v23989_v6 = vld [vmem:[%s32079_s7 + $0x1ce0] ss:$16 sps:$4 sm:$0xff]  }
 0x97b   : > { %16933 = vmatpush1.bf16.msra.mxu1 %v23904_v55  ;;  %v23992_v55 = vld [vmem:[%s32079_s7 + $0x1ce8] ss:$16 sps:$4 sm:$0xff]  }
 0x97c   : > { %17958 = vmatpush1.bf16.msra.mxu0 %v23907_v23  ;;  %16934 = vmatprep.subr.bf16.mxu1 %v23912_v59  ;;  %v23997_v23 = vld [vmem:[%s32079_s7 + $0x1d04] ss:$16 sps:$4 sm:$0xff]   ;;  %v24000_v59 = vld [vmem:[%s32079_s7 + $0x1d0c] ss:$16 sps:$4 sm:$0xff]  }
 0x97d   : > { %17959 = vmatprep.subr.bf16.mxu0 %v23915_v51  ;;  %v23995_v51 = vld [vmem:[%s32079_s7 + $0x1d00] ss:$16 sps:$4 sm:$0xff]  }
 0x97f   : > { %16935 = vmatpush1.bf16.msra.mxu1 %v23910_v48  ;;  %v23998_v48 = vld [vmem:[%s32079_s7 + $0x1d08] ss:$16 sps:$4 sm:$0xff]  }
 0x980   : > { %17960 = vmatpush1.bf16.msra.mxu0 %v23913_v60  ;;  %16936 = vmatprep.subr.bf16.mxu1 %v23918_v41  ;;  %v24003_v60 = vld [vmem:[%s32079_s7 + $0x1d24] ss:$16 sps:$4 sm:$0xff]   ;;  %v24006_v41 = vld [vmem:[%s32079_s7 + $0x1d2c] ss:$16 sps:$4 sm:$0xff]  }
 0x981   : > { %17961 = vmatprep.subr.bf16.mxu0 %v23921_v44  ;;  %v24001_v44 = vld [vmem:[%s32079_s7 + $0x1d20] ss:$16 sps:$4 sm:$0xff]  }
 0x983   : > { %16937 = vmatpush1.bf16.msra.mxu1 %v23916_v35  ;;  %v24004_v35 = vld [vmem:[%s32079_s7 + $0x1d28] ss:$16 sps:$4 sm:$0xff]  }
 0x984   : > { %17962 = vmatpush1.bf16.msra.mxu0 %v23919_v45  ;;  %16938 = vmatprep.subr.bf16.mxu1 %v23924_v37  ;;  %v24009_v45 = vld [vmem:[%s32079_s7 + $0x1d44] ss:$16 sps:$4 sm:$0xff]   ;;  %v24012_v37 = vld [vmem:[%s32079_s7 + $0x1d4c] ss:$16 sps:$4 sm:$0xff]  }
 0x985   : > { %17963 = vmatprep.subr.bf16.mxu0 %v23927_v20  ;;  %v24007_v20 = vld [vmem:[%s32079_s7 + $0x1d40] ss:$16 sps:$4 sm:$0xff]  }
 0x987   : > { %16939 = vmatpush1.bf16.msra.mxu1 %v23922_v57  ;;  %v24010_v57 = vld [vmem:[%s32079_s7 + $0x1d48] ss:$16 sps:$4 sm:$0xff]  }
 0x988   : > { %17964 = vmatpush1.bf16.msra.mxu0 %v23925_v18  ;;  %16940 = vmatprep.subr.bf16.mxu1 %v23930_v46  ;;  %v24015_v18 = vld [vmem:[%s32079_s7 + $0x1d64] ss:$16 sps:$4 sm:$0xff]   ;;  %v24018_v46 = vld [vmem:[%s32079_s7 + $0x1d6c] ss:$16 sps:$4 sm:$0xff]  }
 0x989   : > { %17965 = vmatprep.subr.bf16.mxu0 %v23933_v36  ;;  %v24013_v36 = vld [vmem:[%s32079_s7 + $0x1d60] ss:$16 sps:$4 sm:$0xff]  }
 0x98b   : > { %16941 = vmatpush1.bf16.msra.mxu1 %v23928_v11  ;;  %v24016_v11 = vld [vmem:[%s32079_s7 + $0x1d68] ss:$16 sps:$4 sm:$0xff]  }
 0x98c   : > { %17966 = vmatpush1.bf16.msra.mxu0 %v23931_v24  ;;  %16942 = vmatprep.subr.bf16.mxu1 %v23936_v47  ;;  %v24021_v24 = vld [vmem:[%s32079_s7 + $0x1d84] ss:$16 sps:$4 sm:$0xff]   ;;  %v24024_v47 = vld [vmem:[%s32079_s7 + $0x1d8c] ss:$16 sps:$4 sm:$0xff]  }
 0x98d   : > { %17967 = vmatprep.subr.bf16.mxu0 %v23939_v26  ;;  %v24019_v26 = vld [vmem:[%s32079_s7 + $0x1d80] ss:$16 sps:$4 sm:$0xff]  }
 0x98f   : > { %16943 = vmatpush1.bf16.msra.mxu1 %v23934_v16  ;;  %v24027_v16 = vld [vmem:[%s32079_s7 + $0x1da4] ss:$16 sps:$4 sm:$0xff]  }
 0x990   : > { %17968 = vmatpush1.bf16.msra.mxu0 %v23937_v63  ;;  %16944 = vmatprep.subr.bf16.mxu1 %v23942_v50  ;;  %v24030_v63 = vld [vmem:[%s32079_s7 + $0x1dac] ss:$16 sps:$4 sm:$0xff]   ;;  %v24025_v50 = vld [vmem:[%s32079_s7 + $0x1da0] ss:$16 sps:$4 sm:$0xff]  }
 0x991   : > { %17969 = vmatprep.subr.bf16.mxu0 %v23945_v21  ;;  %v24028_v21 = vld [vmem:[%s32079_s7 + $0x1da8] ss:$16 sps:$4 sm:$0xff]  }
 0x993   : > { %16945 = vmatpush1.bf16.msra.mxu1 %v23940_v4  ;;  %v24033_v4 = vld [vmem:[%s32079_s7 + $0x1dc4] ss:$16 sps:$4 sm:$0xff]  }
 0x994   : > { %17970 = vmatpush1.bf16.msra.mxu0 %v23943_v15  ;;  %16955 = vmatprep.subr.bf16.mxu1 %v23948_v3  ;;  %v24036_v15 = vld [vmem:[%s32079_s7 + $0x1dcc] ss:$16 sps:$4 sm:$0xff]   ;;  %v24031_v3 = vld [vmem:[%s32079_s7 + $0x1dc0] ss:$16 sps:$4 sm:$0xff]  }
 0x995   : > { %17980 = vmatprep.subr.bf16.mxu0 %v23951_v27  ;;  %v24034_v27 = vld [vmem:[%s32079_s7 + $0x1dc8] ss:$16 sps:$4 sm:$0xff]  }
 0x996   : > { %16947 = vmatmul.mubr.bf16.vlgmr.msra.gmra.mrb[32].mxu1 %v8355_v12 }
 0x997   : > { %17972 = vmatmul.mubr.bf16.vlgmr.msra.gmra.mrb[16].mxu0 %v8355_v12  ;;  %16956 = vmatpush1.bf16.msra.mxu1 %v23946_v53  ;;  %v24042_v53 = vld [vmem:[%s32079_s7 + $0x1dec] ss:$16 sps:$4 sm:$0xff]   ;;  %v24037_v12 = vld [vmem:[%s32079_s7 + $0x1de0] ss:$16 sps:$4 sm:$0xff]  }
 0x998   : > { %16987 = vmatprep.mubr.bf16.mxu1 %v29850_v56  ;;  %17981 = vmatpush1.bf16.msra.mxu0 %v23949_v25  ;;  %v24040_v25 = vld [vmem:[%s32079_s7 + $0x1de8] ss:$16 sps:$4 sm:$0xff]  }
 0x999   : > { %18012 = vmatprep.mubr.bf16.mxu0 %v29850_v56  ;;  %16957 = vmatprep.subr.bf16.mxu1 %v23955_v22  ;;  %v24045_v22 = vld [vmem:[%s32079_s7 + $0x1e04] ss:$16 sps:$4 sm:$0xff]  }
 0x99a   : > { %17982 = vmatprep.subr.bf16.mxu0 %v23958_v8  ;;  %v24048_v8 = vld [vmem:[%s32079_s7 + $0x1e0c] ss:$16 sps:$4 sm:$0xff]  }
 0x99b   : > { %16958 = vmatpush1.bf16.msra.mxu1 %v23953_v38  ;;  %v24043_v38 = vld [vmem:[%s32079_s7 + $0x1e00] ss:$16 sps:$4 sm:$0xff]  }
 0x99c   : > { %17983 = vmatpush1.bf16.msra.mxu0 %v23956_v1  ;;  %16959 = vmatprep.subr.bf16.mxu1 %v23961_v9  ;;  %v30042_v1 = vrot.slane %v29822_v52, %v27039_v29  ;;  %v24046_v9 = vld [vmem:[%s32079_s7 + $0x1e08] ss:$16 sps:$4 sm:$0xff]   ;;  %v24054_v52 = vld [vmem:[%s32079_s7 + $0x1e2c] ss:$16 sps:$4 sm:$0xff]  }
 0x99d   : > { %17984 = vmatprep.subr.bf16.mxu0 %v23964_v62  ;;  %v24051_v62 = vld [vmem:[%s32079_s7 + $0x1e24] ss:$16 sps:$4 sm:$0xff]  }
 0x99f   : > { %16960 = vmatpush1.bf16.msra.mxu1 %v23959_v54  ;;  %v8358_v54 = vcombine.high %v29850_v56, %v29850_v56  ;;  %v24057_v56 = vld [vmem:[%s32079_s7 + $0x1e44] ss:$16 sps:$4 sm:$0xff]  }
 0x9a0   : > { %17985 = vmatpush1.bf16.msra.mxu0 %v23962_v34  ;;  %16961 = vmatprep.subr.bf16.mxu1 %v23967_v40  ;;  %v24049_v34 = vld [vmem:[%s32079_s7 + $0x1e20] ss:$16 sps:$4 sm:$0xff]   ;;  %v24052_v40 = vld [vmem:[%s32079_s7 + $0x1e28] ss:$16 sps:$4 sm:$0xff]  }
 0x9a1   : > { %17986 = vmatprep.subr.bf16.mxu0 %v23970_v7  ;;  %v24060_v7 = vld [vmem:[%s32079_s7 + $0x1e4c] ss:$16 sps:$4 sm:$0xff]  }
 0x9a3   : > { %16962 = vmatpush1.bf16.msra.mxu1 %v23965_v32  ;;  %v24055_v32 = vld [vmem:[%s32079_s7 + $0x1e40] ss:$16 sps:$4 sm:$0xff]  }
 0x9a4   : > { %17987 = vmatpush1.bf16.msra.mxu0 %v23968_v10  ;;  %16963 = vmatprep.subr.bf16.mxu1 %v23973_v58  ;;  %v24058_v10 = vld [vmem:[%s32079_s7 + $0x1e48] ss:$16 sps:$4 sm:$0xff]   ;;  %v24063_v58 = vld [vmem:[%s32079_s7 + $0x1e64] ss:$16 sps:$4 sm:$0xff]  }
 0x9a5   : > { %17988 = vmatprep.subr.bf16.mxu0 %v23976_v0  ;;  %v24066_v0 = vld [vmem:[%s32079_s7 + $0x1e6c] ss:$16 sps:$4 sm:$0xff]  }
 0x9a7   : > { %16964 = vmatpush1.bf16.msra.mxu1 %v23971_v31  ;;  %v24061_v31 = vld [vmem:[%s32079_s7 + $0x1e60] ss:$16 sps:$4 sm:$0xff]  }
 0x9a8   : > { %17989 = vmatpush1.bf16.msra.mxu0 %v23974_v13  ;;  %16965 = vmatprep.subr.bf16.mxu1 %v23979_v17  ;;  %v24064_v13 = vld [vmem:[%s32079_s7 + $0x1e68] ss:$16 sps:$4 sm:$0xff]   ;;  %v24069_v17 = vld [vmem:[%s32079_s7 + $0x1e84] ss:$16 sps:$4 sm:$0xff]  }
 0x9a9   : > { %17990 = vmatprep.subr.bf16.mxu0 %v23982_v30  ;;  %v24072_v30 = vld [vmem:[%s32079_s7 + $0x1e8c] ss:$16 sps:$4 sm:$0xff]  }
 0x9ab   : > { %16966 = vmatpush1.bf16.msra.mxu1 %v23977_v42  ;;  %v24067_v42 = vld [vmem:[%s32079_s7 + $0x1e80] ss:$16 sps:$4 sm:$0xff]  }
 0x9ac   : > { %17991 = vmatpush1.bf16.msra.mxu0 %v23980_v28  ;;  %16967 = vmatprep.subr.bf16.mxu1 %v23985_v5  ;;  %v24070_v28 = vld [vmem:[%s32079_s7 + $0x1e88] ss:$16 sps:$4 sm:$0xff]   ;;  %v24075_v5 = vld [vmem:[%s32079_s7 + $0x1ea4] ss:$16 sps:$4 sm:$0xff]  }
 0x9ad   : > { %17992 = vmatprep.subr.bf16.mxu0 %v23988_v14  ;;  %v24078_v14 = vld [vmem:[%s32079_s7 + $0x1eac] ss:$16 sps:$4 sm:$0xff]  }
 0x9af   : > { %16968 = vmatpush1.bf16.msra.mxu1 %v23983_v33  ;;  %v24073_v33 = vld [vmem:[%s32079_s7 + $0x1ea0] ss:$16 sps:$4 sm:$0xff]  }
 0x9b0   : > { %17993 = vmatpush1.bf16.msra.mxu0 %v23986_v19  ;;  %16969 = vmatprep.subr.bf16.mxu1 %v23991_v61  ;;  %v24076_v19 = vld [vmem:[%s32079_s7 + $0x1ea8] ss:$16 sps:$4 sm:$0xff]   ;;  %v24081_v61 = vld [vmem:[%s32079_s7 + $0x1ec4] ss:$16 sps:$4 sm:$0xff]  }
 0x9b1   : > { %17994 = vmatprep.subr.bf16.mxu0 %v23994_v43  ;;  %v24084_v43 = vld [vmem:[%s32079_s7 + $0x1ecc] ss:$16 sps:$4 sm:$0xff]  }
 0x9b3   : > { %16970 = vmatpush1.bf16.msra.mxu1 %v23989_v6  ;;  %v24079_v6 = vld [vmem:[%s32079_s7 + $0x1ec0] ss:$16 sps:$4 sm:$0xff]  }
 0x9b4   : > { %17995 = vmatpush1.bf16.msra.mxu0 %v23992_v55  ;;  %16971 = vmatprep.subr.bf16.mxu1 %v23997_v23  ;;  %v24082_v55 = vld [vmem:[%s32079_s7 + $0x1ec8] ss:$16 sps:$4 sm:$0xff]   ;;  %v24087_v23 = vld [vmem:[%s32079_s7 + $0x1ee4] ss:$16 sps:$4 sm:$0xff]  }
 0x9b5   : > { %17996 = vmatprep.subr.bf16.mxu0 %v24000_v59  ;;  %v24090_v59 = vld [vmem:[%s32079_s7 + $0x1eec] ss:$16 sps:$4 sm:$0xff]  }
 0x9b7   : > { %16972 = vmatpush1.bf16.msra.mxu1 %v23995_v51  ;;  %v24085_v51 = vld [vmem:[%s32079_s7 + $0x1ee0] ss:$16 sps:$4 sm:$0xff]  }
 0x9b8   : > { %17997 = vmatpush1.bf16.msra.mxu0 %v23998_v48  ;;  %16973 = vmatprep.subr.bf16.mxu1 %v24003_v60  ;;  %v24088_v48 = vld [vmem:[%s32079_s7 + $0x1ee8] ss:$16 sps:$4 sm:$0xff]   ;;  %v24093_v60 = vld [vmem:[%s32079_s7 + $0x1f04] ss:$16 sps:$4 sm:$0xff]  }
 0x9b9   : > { %17998 = vmatprep.subr.bf16.mxu0 %v24006_v41  ;;  %v24096_v41 = vld [vmem:[%s32079_s7 + $0x1f0c] ss:$16 sps:$4 sm:$0xff]  }
 0x9bb   : > { %16974 = vmatpush1.bf16.msra.mxu1 %v24001_v44  ;;  %v24091_v44 = vld [vmem:[%s32079_s7 + $0x1f00] ss:$16 sps:$4 sm:$0xff]  }
 0x9bc   : > { %17999 = vmatpush1.bf16.msra.mxu0 %v24004_v35  ;;  %16975 = vmatprep.subr.bf16.mxu1 %v24009_v45  ;;  %v24094_v35 = vld [vmem:[%s32079_s7 + $0x1f08] ss:$16 sps:$4 sm:$0xff]   ;;  %v24099_v45 = vld [vmem:[%s32079_s7 + $0x1f24] ss:$16 sps:$4 sm:$0xff]  }
 0x9bd   : > { %18000 = vmatprep.subr.bf16.mxu0 %v24012_v37  ;;  %v24102_v37 = vld [vmem:[%s32079_s7 + $0x1f2c] ss:$16 sps:$4 sm:$0xff]  }
 0x9bf   : > { %16976 = vmatpush1.bf16.msra.mxu1 %v24007_v20  ;;  %v24097_v20 = vld [vmem:[%s32079_s7 + $0x1f20] ss:$16 sps:$4 sm:$0xff]  }
 0x9c0   : > { %18001 = vmatpush1.bf16.msra.mxu0 %v24010_v57  ;;  %16977 = vmatprep.subr.bf16.mxu1 %v24015_v18  ;;  %v24100_v57 = vld [vmem:[%s32079_s7 + $0x1f28] ss:$16 sps:$4 sm:$0xff]   ;;  %v24105_v18 = vld [vmem:[%s32079_s7 + $0x1f44] ss:$16 sps:$4 sm:$0xff]  }
 0x9c1   : > { %18002 = vmatprep.subr.bf16.mxu0 %v24018_v46  ;;  %v24108_v46 = vld [vmem:[%s32079_s7 + $0x1f4c] ss:$16 sps:$4 sm:$0xff]  }
 0x9c3   : > { %16978 = vmatpush1.bf16.msra.mxu1 %v24013_v36  ;;  %v24103_v36 = vld [vmem:[%s32079_s7 + $0x1f40] ss:$16 sps:$4 sm:$0xff]  }
 0x9c4   : > { %18003 = vmatpush1.bf16.msra.mxu0 %v24016_v11  ;;  %16979 = vmatprep.subr.bf16.mxu1 %v24021_v24  ;;  %v24106_v11 = vld [vmem:[%s32079_s7 + $0x1f48] ss:$16 sps:$4 sm:$0xff]   ;;  %v24111_v24 = vld [vmem:[%s32079_s7 + $0x1f64] ss:$16 sps:$4 sm:$0xff]  }
 0x9c5   : > { %18004 = vmatprep.subr.bf16.mxu0 %v24024_v47  ;;  %v24114_v47 = vld [vmem:[%s32079_s7 + $0x1f6c] ss:$16 sps:$4 sm:$0xff]  }
 0x9c7   : > { %16980 = vmatpush1.bf16.msra.mxu1 %v24019_v26  ;;  %v24109_v26 = vld [vmem:[%s32079_s7 + $0x1f60] ss:$16 sps:$4 sm:$0xff]  }
 0x9c8   : > { %18005 = vmatpush1.bf16.msra.mxu0 %v24022_v49  ;;  %16981 = vmatprep.subr.bf16.mxu1 %v24027_v16  ;;  %v24112_v49 = vld [vmem:[%s32079_s7 + $0x1f68] ss:$16 sps:$4 sm:$0xff]   ;;  %v24117_v16 = vld [vmem:[%s32079_s7 + $0x1f84] ss:$16 sps:$4 sm:$0xff]  }
 0x9c9   : > { %18006 = vmatprep.subr.bf16.mxu0 %v24030_v63  ;;  %v24120_v63 = vld [vmem:[%s32079_s7 + $0x1f8c] ss:$16 sps:$4 sm:$0xff]  }
 0x9cb   : > { %16982 = vmatpush1.bf16.msra.mxu1 %v24025_v50  ;;  %v24115_v50 = vld [vmem:[%s32079_s7 + $0x1f80] ss:$16 sps:$4 sm:$0xff]  }
 0x9cc   : > { %18007 = vmatpush1.bf16.msra.mxu0 %v24028_v21  ;;  %16983 = vmatprep.subr.bf16.mxu1 %v24033_v4  ;;  %v24118_v21 = vld [vmem:[%s32079_s7 + $0x1f88] ss:$16 sps:$4 sm:$0xff]   ;;  %v24123_v4 = vld [vmem:[%s32079_s7 + $0x1fa4] ss:$16 sps:$4 sm:$0xff]  }
 0x9cd   : > { %18008 = vmatprep.subr.bf16.mxu0 %v24036_v15  ;;  %v24126_v15 = vld [vmem:[%s32079_s7 + $0x1fac] ss:$16 sps:$4 sm:$0xff]  }
 0x9cf   : > { %16984 = vmatpush1.bf16.msra.mxu1 %v24031_v3  ;;  %v24121_v3 = vld [vmem:[%s32079_s7 + $0x1fa0] ss:$16 sps:$4 sm:$0xff]  }
 0x9d0   : > { %18009 = vmatpush1.bf16.msra.mxu0 %v24034_v27  ;;  %16985 = vmatprep.subr.bf16.mxu1 %v24039_v39  ;;  %v24124_v27 = vld [vmem:[%s32079_s7 + $0x1fa8] ss:$16 sps:$4 sm:$0xff]   ;;  %v24129_v39 = vld [vmem:[%s32079_s7 + $0x1fc4] ss:$16 sps:$4 sm:$0xff]  }
 0x9d1   : > { %18010 = vmatprep.subr.bf16.mxu0 %v24042_v53  ;;  %v24132_v53 = vld [vmem:[%s32079_s7 + $0x1fcc] ss:$16 sps:$4 sm:$0xff]  }
 0x9d3   : > { %16986 = vmatpush1.bf16.msra.mxu1 %v24037_v12  ;;  %v24127_v12 = vld [vmem:[%s32079_s7 + $0x1fc0] ss:$16 sps:$4 sm:$0xff]  }
 0x9d4   : > { %18011 = vmatpush1.bf16.msra.mxu0 %v24040_v25  ;;  %16996 = vmatprep.subr.bf16.mxu1 %v24045_v22  ;;  %v30216_v25 = vld [vmem:[#allocation5 + $0x20] sm:$0xff]  ;;  %v24130_v22 = vld [vmem:[%s32079_s7 + $0x1fc8] ss:$16 sps:$4 sm:$0xff]  }
 0x9d5   : > { %18021 = vmatprep.subr.bf16.mxu0 %v24048_v8  ;;  %v24135_v8 = vld [vmem:[%s32079_s7 + $0x1fe4] ss:$16 sps:$4 sm:$0xff]  }
 0x9d6   : > { %16988 = vmatmul.mubr.bf16.vlgmr.msra.gmra.mrb[32].mxu1 %v30042_v1 }
 0x9d7   : > { %18013 = vmatmul.mubr.bf16.vlgmr.msra.gmra.mrb[16].mxu0 %v30042_v1  ;;  %16997 = vmatpush1.bf16.msra.mxu1 %v24043_v38  ;;  %v24138_v38 = vld [vmem:[%s32079_s7 + $0x1fec] ss:$16 sps:$4 sm:$0xff]  }
 0x9d8   : > { %17028 = vmatprep.mubr.bf16.mxu1 %v8358_v54  ;;  %18022 = vmatpush1.bf16.msra.mxu0 %v24046_v9  ;;  %v30229_v9 = vrot.slane %v30216_v25, %v27039_v29 }
 0x9d9   : > { %18053 = vmatprep.mubr.bf16.mxu0 %v8358_v54  ;;  %16998 = vmatprep.subr.bf16.mxu1 %v24051_v62  ;;  %v24133_v62 = vld [vmem:[%s32079_s7 + $0x1fe0] ss:$16 sps:$4 sm:$0xff]   ;;  %v24136_v54 = vld [vmem:[%s32079_s7 + $0x1fe8] ss:$16 sps:$4 sm:$0xff]  }
 0x9da   : > { %18023 = vmatprep.subr.bf16.mxu0 %v24054_v52  ;;  %v24141_v52 = vld [vmem:[%s32079_s7 + $0x2004] ss:$16 sps:$4 sm:$0xff]  }
 0x9db   : > { %16999 = vmatpush1.bf16.msra.mxu1 %v24049_v34  ;;  %v24144_v34 = vld [vmem:[%s32079_s7 + $0x200c] ss:$16 sps:$4 sm:$0xff]  }
 0x9dc   : > { %18024 = vmatpush1.bf16.msra.mxu0 %v24052_v40  ;;  %17000 = vmatprep.subr.bf16.mxu1 %v24057_v56  ;;  %v8374_v40 = vcombine.high %v30229_v9, %v30229_v9  ;;  %v24139_v56 = vld [vmem:[%s32079_s7 + $0x2000] ss:$16 sps:$4 sm:$0xff]  }
 0x9dd   : > { %18025 = vmatprep.subr.bf16.mxu0 %v24060_v7  ;;  %v8356_v7 = vcombine.high %v30042_v1, %v30042_v1  ;;  %v24145_v1 = vld [vmem:[%s32079_s7 + $0x2020] ss:$16 sps:$4 sm:$0xff]  }
 0x9df   : > { %17001 = vmatpush1.bf16.msra.mxu1 %v24055_v32  ;;  %v24142_v32 = vld [vmem:[%s32079_s7 + $0x2008] ss:$16 sps:$4 sm:$0xff]  }
 0x9e0   : > { %18026 = vmatpush1.bf16.msra.mxu0 %v24058_v10  ;;  %17002 = vmatprep.subr.bf16.mxu1 %v24063_v58  ;;  %v24147_v10 = vld [vmem:[%s32079_s7 + $0x2024] ss:$16 sps:$4 sm:$0xff]   ;;  %v30257_v58 = vrot.slane %v8374_v40, %v27039_v29  ;;  %v24226_v40 = vld [vmem:[%s32079_s7 + $0x21c8] ss:$16 sps:$4 sm:$0xff]  }
 0x9e1   : > { %18027 = vmatprep.subr.bf16.mxu0 %v24066_v0  ;;  %v24150_v0 = vld [vmem:[%s32079_s7 + $0x202c] ss:$16 sps:$4 sm:$0xff]  }
 0x9e3   : > { %17003 = vmatpush1.bf16.msra.mxu1 %v24061_v31  ;;  %v24148_v31 = vld [vmem:[%s32079_s7 + $0x2028] ss:$16 sps:$4 sm:$0xff]  }
 0x9e4   : > { %18028 = vmatpush1.bf16.msra.mxu0 %v24064_v13  ;;  %17004 = vmatprep.subr.bf16.mxu1 %v24069_v17  ;;  %v24153_v13 = vld [vmem:[%s32079_s7 + $0x2044] ss:$16 sps:$4 sm:$0xff]   ;;  %v24156_v17 = vld [vmem:[%s32079_s7 + $0x204c] ss:$16 sps:$4 sm:$0xff]  }
 0x9e5   : > { %18029 = vmatprep.subr.bf16.mxu0 %v24072_v30  ;;  %v24151_v30 = vld [vmem:[%s32079_s7 + $0x2040] ss:$16 sps:$4 sm:$0xff]  }
 0x9e7   : > { %17005 = vmatpush1.bf16.msra.mxu1 %v24067_v42  ;;  %v24154_v42 = vld [vmem:[%s32079_s7 + $0x2048] ss:$16 sps:$4 sm:$0xff]  }
 0x9e8   : > { %18030 = vmatpush1.bf16.msra.mxu0 %v24070_v28  ;;  %17006 = vmatprep.subr.bf16.mxu1 %v24075_v5  ;;  %v24159_v28 = vld [vmem:[%s32079_s7 + $0x2064] ss:$16 sps:$4 sm:$0xff]   ;;  %v24162_v5 = vld [vmem:[%s32079_s7 + $0x206c] ss:$16 sps:$4 sm:$0xff]  }
 0x9e9   : > { %18031 = vmatprep.subr.bf16.mxu0 %v24078_v14  ;;  %v24157_v14 = vld [vmem:[%s32079_s7 + $0x2060] ss:$16 sps:$4 sm:$0xff]  }
 0x9eb   : > { %17007 = vmatpush1.bf16.msra.mxu1 %v24073_v33  ;;  %v24160_v33 = vld [vmem:[%s32079_s7 + $0x2068] ss:$16 sps:$4 sm:$0xff]  }
 0x9ec   : > { %18032 = vmatpush1.bf16.msra.mxu0 %v24076_v19  ;;  %17008 = vmatprep.subr.bf16.mxu1 %v24081_v61  ;;  %v24165_v19 = vld [vmem:[%s32079_s7 + $0x2084] ss:$16 sps:$4 sm:$0xff]   ;;  %v24168_v61 = vld [vmem:[%s32079_s7 + $0x208c] ss:$16 sps:$4 sm:$0xff]  }
 0x9ed   : > { %18033 = vmatprep.subr.bf16.mxu0 %v24084_v43  ;;  %v24163_v43 = vld [vmem:[%s32079_s7 + $0x2080] ss:$16 sps:$4 sm:$0xff]  }
 0x9ef   : > { %17009 = vmatpush1.bf16.msra.mxu1 %v24079_v6  ;;  %v24166_v6 = vld [vmem:[%s32079_s7 + $0x2088] ss:$16 sps:$4 sm:$0xff]  }
 0x9f0   : > { %18034 = vmatpush1.bf16.msra.mxu0 %v24082_v55  ;;  %17010 = vmatprep.subr.bf16.mxu1 %v24087_v23  ;;  %v24171_v55 = vld [vmem:[%s32079_s7 + $0x20a4] ss:$16 sps:$4 sm:$0xff]   ;;  %v24174_v23 = vld [vmem:[%s32079_s7 + $0x20ac] ss:$16 sps:$4 sm:$0xff]  }
 0x9f1   : > { %18035 = vmatprep.subr.bf16.mxu0 %v24090_v59  ;;  %v24169_v59 = vld [vmem:[%s32079_s7 + $0x20a0] ss:$16 sps:$4 sm:$0xff]  }
 0x9f3   : > { %17011 = vmatpush1.bf16.msra.mxu1 %v24085_v51  ;;  %v24172_v51 = vld [vmem:[%s32079_s7 + $0x20a8] ss:$16 sps:$4 sm:$0xff]  }
 0x9f4   : > { %18036 = vmatpush1.bf16.msra.mxu0 %v24088_v48  ;;  %17012 = vmatprep.subr.bf16.mxu1 %v24093_v60  ;;  %v24177_v48 = vld [vmem:[%s32079_s7 + $0x20c4] ss:$16 sps:$4 sm:$0xff]   ;;  %v24180_v60 = vld [vmem:[%s32079_s7 + $0x20cc] ss:$16 sps:$4 sm:$0xff]  }
 0x9f5   : > { %18037 = vmatprep.subr.bf16.mxu0 %v24096_v41  ;;  %v24175_v41 = vld [vmem:[%s32079_s7 + $0x20c0] ss:$16 sps:$4 sm:$0xff]  }
 0x9f7   : > { %17013 = vmatpush1.bf16.msra.mxu1 %v24091_v44  ;;  %v24178_v44 = vld [vmem:[%s32079_s7 + $0x20c8] ss:$16 sps:$4 sm:$0xff]  }
 0x9f8   : > { %18038 = vmatpush1.bf16.msra.mxu0 %v24094_v35  ;;  %17014 = vmatprep.subr.bf16.mxu1 %v24099_v45  ;;  %v24183_v35 = vld [vmem:[%s32079_s7 + $0x20e4] ss:$16 sps:$4 sm:$0xff]   ;;  %v24186_v45 = vld [vmem:[%s32079_s7 + $0x20ec] ss:$16 sps:$4 sm:$0xff]  }
 0x9f9   : > { %18039 = vmatprep.subr.bf16.mxu0 %v24102_v37  ;;  %v24181_v37 = vld [vmem:[%s32079_s7 + $0x20e0] ss:$16 sps:$4 sm:$0xff]  }
 0x9fb   : > { %17015 = vmatpush1.bf16.msra.mxu1 %v24097_v20  ;;  %v24184_v20 = vld [vmem:[%s32079_s7 + $0x20e8] ss:$16 sps:$4 sm:$0xff]  }
 0x9fc   : > { %18040 = vmatpush1.bf16.msra.mxu0 %v24100_v57  ;;  %17016 = vmatprep.subr.bf16.mxu1 %v24105_v18  ;;  %v24189_v57 = vld [vmem:[%s32079_s7 + $0x2104] ss:$16 sps:$4 sm:$0xff]   ;;  %v24192_v18 = vld [vmem:[%s32079_s7 + $0x210c] ss:$16 sps:$4 sm:$0xff]  }
 0x9fd   : > { %18041 = vmatprep.subr.bf16.mxu0 %v24108_v46  ;;  %v24187_v46 = vld [vmem:[%s32079_s7 + $0x2100] ss:$16 sps:$4 sm:$0xff]  }
 0x9ff   : > { %17017 = vmatpush1.bf16.msra.mxu1 %v24103_v36  ;;  %v24190_v36 = vld [vmem:[%s32079_s7 + $0x2108] ss:$16 sps:$4 sm:$0xff]  }
 0xa00   : > { %18042 = vmatpush1.bf16.msra.mxu0 %v24106_v11  ;;  %17018 = vmatprep.subr.bf16.mxu1 %v24111_v24  ;;  %v24195_v11 = vld [vmem:[%s32079_s7 + $0x2124] ss:$16 sps:$4 sm:$0xff]   ;;  %v24198_v24 = vld [vmem:[%s32079_s7 + $0x212c] ss:$16 sps:$4 sm:$0xff]  }
 0xa01   : > { %18043 = vmatprep.subr.bf16.mxu0 %v24114_v47  ;;  %v24193_v47 = vld [vmem:[%s32079_s7 + $0x2120] ss:$16 sps:$4 sm:$0xff]  }
 0xa03   : > { %17019 = vmatpush1.bf16.msra.mxu1 %v24109_v26  ;;  %v24196_v26 = vld [vmem:[%s32079_s7 + $0x2128] ss:$16 sps:$4 sm:$0xff]  }
 0xa04   : > { %18044 = vmatpush1.bf16.msra.mxu0 %v24112_v49  ;;  %17020 = vmatprep.subr.bf16.mxu1 %v24117_v16  ;;  %v24201_v49 = vld [vmem:[%s32079_s7 + $0x2144] ss:$16 sps:$4 sm:$0xff]   ;;  %v24204_v16 = vld [vmem:[%s32079_s7 + $0x214c] ss:$16 sps:$4 sm:$0xff]  }
 0xa05   : > { %18045 = vmatprep.subr.bf16.mxu0 %v24120_v63  ;;  %v24199_v63 = vld [vmem:[%s32079_s7 + $0x2140] ss:$16 sps:$4 sm:$0xff]  }
 0xa07   : > { %17021 = vmatpush1.bf16.msra.mxu1 %v24115_v50  ;;  %v24202_v50 = vld [vmem:[%s32079_s7 + $0x2148] ss:$16 sps:$4 sm:$0xff]  }
 0xa08   : > { %18046 = vmatpush1.bf16.msra.mxu0 %v24118_v21  ;;  %17022 = vmatprep.subr.bf16.mxu1 %v24123_v4  ;;  %v24207_v21 = vld [vmem:[%s32079_s7 + $0x2164] ss:$16 sps:$4 sm:$0xff]   ;;  %v24210_v4 = vld [vmem:[%s32079_s7 + $0x216c] ss:$16 sps:$4 sm:$0xff]  }
 0xa09   : > { %18047 = vmatprep.subr.bf16.mxu0 %v24126_v15  ;;  %v24205_v15 = vld [vmem:[%s32079_s7 + $0x2160] ss:$16 sps:$4 sm:$0xff]  }
 0xa0b   : > { %17023 = vmatpush1.bf16.msra.mxu1 %v24121_v3  ;;  %v24208_v3 = vld [vmem:[%s32079_s7 + $0x2168] ss:$16 sps:$4 sm:$0xff]  }
 0xa0c   : > { %18048 = vmatpush1.bf16.msra.mxu0 %v24124_v27  ;;  %17024 = vmatprep.subr.bf16.mxu1 %v24129_v39  ;;  %v24213_v27 = vld [vmem:[%s32079_s7 + $0x2184] ss:$16 sps:$4 sm:$0xff]   ;;  %v24216_v39 = vld [vmem:[%s32079_s7 + $0x218c] ss:$16 sps:$4 sm:$0xff]  }
 0xa0d   : > { %18049 = vmatprep.subr.bf16.mxu0 %v24132_v53  ;;  %v24211_v53 = vld [vmem:[%s32079_s7 + $0x2180] ss:$16 sps:$4 sm:$0xff]  }
 0xa0f   : > { %17025 = vmatpush1.bf16.msra.mxu1 %v24127_v12  ;;  %v24214_v12 = vld [vmem:[%s32079_s7 + $0x2188] ss:$16 sps:$4 sm:$0xff]  }
 0xa10   : > { %18050 = vmatpush1.bf16.msra.mxu0 %v24130_v22  ;;  %17026 = vmatprep.subr.bf16.mxu1 %v24135_v8  ;;  %v24219_v22 = vld [vmem:[%s32079_s7 + $0x21a4] ss:$16 sps:$4 sm:$0xff]   ;;  %v24222_v8 = vld [vmem:[%s32079_s7 + $0x21ac] ss:$16 sps:$4 sm:$0xff]  }
 0xa11   : > { %18051 = vmatprep.subr.bf16.mxu0 %v24138_v38  ;;  %v24217_v38 = vld [vmem:[%s32079_s7 + $0x21a0] ss:$16 sps:$4 sm:$0xff]  }
 0xa13   : > { %17027 = vmatpush1.bf16.msra.mxu1 %v24133_v62  ;;  %v24220_v62 = vld [vmem:[%s32079_s7 + $0x21a8] ss:$16 sps:$4 sm:$0xff]  }
 0xa14   : > { %18052 = vmatpush1.bf16.msra.mxu0 %v24136_v54  ;;  %17037 = vmatprep.subr.bf16.mxu1 %v24141_v52  ;;  %v24225_v54 = vld [vmem:[%s32079_s7 + $0x21c4] ss:$16 sps:$4 sm:$0xff]   ;;  %v24228_v52 = vld [vmem:[%s32079_s7 + $0x21cc] ss:$16 sps:$4 sm:$0xff]  }
 0xa15   : > { %18062 = vmatprep.subr.bf16.mxu0 %v24144_v34  ;;  %v24223_v34 = vld [vmem:[%s32079_s7 + $0x21c0] ss:$16 sps:$4 sm:$0xff]  }
 0xa16   : > { %17029 = vmatmul.mubr.bf16.vlgmr.msra.gmra.mrb[32].mxu1 %v8356_v7 }
 0xa17   : > { %18054 = vmatmul.mubr.bf16.vlgmr.msra.gmra.mrb[16].mxu0 %v8356_v7  ;;  %17038 = vmatpush1.bf16.msra.mxu1 %v24139_v56  ;;  %v24231_v56 = vld [vmem:[%s32079_s7 + $0x21e4] ss:$16 sps:$4 sm:$0xff]   ;;  %v24234_v7 = vld [vmem:[%s32079_s7 + $0x21ec] ss:$16 sps:$4 sm:$0xff]  }
 0xa18   : > { %17069 = vmatprep.mubr.bf16.mxu1 %v30257_v58  ;;  %18063 = vmatpush1.bf16.msra.mxu0 %v24142_v32  ;;  %v24229_v32 = vld [vmem:[%s32079_s7 + $0x21e0] ss:$16 sps:$4 sm:$0xff]  }
 0xa19   : > { %18094 = vmatprep.mubr.bf16.mxu0 %v30257_v58  ;;  %17039 = vmatprep.subr.bf16.mxu1 %v24147_v10  ;;  %v24232_v10 = vld [vmem:[%s32079_s7 + $0x21e8] ss:$16 sps:$4 sm:$0xff]  }
 0xa1a   : > { %18064 = vmatprep.subr.bf16.mxu0 %v24150_v0  ;;  %v24237_v0 = vld [vmem:[%s32079_s7 + $0x2204] ss:$16 sps:$4 sm:$0xff]  }
 0xa1b   : > { %17040 = vmatpush1.bf16.msra.mxu1 %v24145_v1  ;;  %v24240_v1 = vld [vmem:[%s32079_s7 + $0x220c] ss:$16 sps:$4 sm:$0xff]  }
 0xa1c   : > { %18065 = vmatpush1.bf16.msra.mxu0 %v24148_v31  ;;  %17041 = vmatprep.subr.bf16.mxu1 %v24153_v13  ;;  %v24235_v31 = vld [vmem:[%s32079_s7 + $0x2200] ss:$16 sps:$4 sm:$0xff]   ;;  %v30449_v13 = vrot.slane %v30229_v9, %v27039_v29  ;;  %v24246_v9 = vld [vmem:[%s32079_s7 + $0x222c] ss:$16 sps:$4 sm:$0xff]  }
 0xa1d   : > { %18066 = vmatprep.subr.bf16.mxu0 %v24156_v17  ;;  %v24238_v17 = vld [vmem:[%s32079_s7 + $0x2208] ss:$16 sps:$4 sm:$0xff]  }
 0xa1f   : > { %17042 = vmatpush1.bf16.msra.mxu1 %v24151_v30  ;;  %v24243_v30 = vld [vmem:[%s32079_s7 + $0x2224] ss:$16 sps:$4 sm:$0xff]  }
 0xa20   : > { %18067 = vmatpush1.bf16.msra.mxu0 %v24154_v42  ;;  %17043 = vmatprep.subr.bf16.mxu1 %v24159_v28  ;;  %v8406_v42 = vcombine.high %v30257_v58, %v30257_v58  ;;  %v24241_v28 = vld [vmem:[%s32079_s7 + $0x2220] ss:$16 sps:$4 sm:$0xff]   ;;  %v24249_v58 = vld [vmem:[%s32079_s7 + $0x2244] ss:$16 sps:$4 sm:$0xff]  }
 0xa21   : > { %18068 = vmatprep.subr.bf16.mxu0 %v24162_v5  ;;  %v24244_v5 = vld [vmem:[%s32079_s7 + $0x2228] ss:$16 sps:$4 sm:$0xff]  }
 0xa23   : > { %17044 = vmatpush1.bf16.msra.mxu1 %v24157_v14  ;;  %v24252_v14 = vld [vmem:[%s32079_s7 + $0x224c] ss:$16 sps:$4 sm:$0xff]  }
 0xa24   : > { %18069 = vmatpush1.bf16.msra.mxu0 %v24160_v33  ;;  %17045 = vmatprep.subr.bf16.mxu1 %v24165_v19  ;;  %v24247_v33 = vld [vmem:[%s32079_s7 + $0x2240] ss:$16 sps:$4 sm:$0xff]   ;;  %v24250_v19 = vld [vmem:[%s32079_s7 + $0x2248] ss:$16 sps:$4 sm:$0xff]  }
 0xa25   : > { %18070 = vmatprep.subr.bf16.mxu0 %v24168_v61  ;;  %v24255_v61 = vld [vmem:[%s32079_s7 + $0x2264] ss:$16 sps:$4 sm:$0xff]  }
 0xa27   : > { %17046 = vmatpush1.bf16.msra.mxu1 %v24163_v43  ;;  %v24258_v43 = vld [vmem:[%s32079_s7 + $0x226c] ss:$16 sps:$4 sm:$0xff]  }
 0xa28   : > { %18071 = vmatpush1.bf16.msra.mxu0 %v24166_v6  ;;  %17047 = vmatprep.subr.bf16.mxu1 %v24171_v55  ;;  %v24253_v6 = vld [vmem:[%s32079_s7 + $0x2260] ss:$16 sps:$4 sm:$0xff]   ;;  %v24256_v55 = vld [vmem:[%s32079_s7 + $0x2268] ss:$16 sps:$4 sm:$0xff]  }
 0xa29   : > { %18072 = vmatprep.subr.bf16.mxu0 %v24174_v23  ;;  %v24261_v23 = vld [vmem:[%s32079_s7 + $0x2284] ss:$16 sps:$4 sm:$0xff]  }
 0xa2b   : > { %17048 = vmatpush1.bf16.msra.mxu1 %v24169_v59  ;;  %v24264_v59 = vld [vmem:[%s32079_s7 + $0x228c] ss:$16 sps:$4 sm:$0xff]  }
 0xa2c   : > { %18073 = vmatpush1.bf16.msra.mxu0 %v24172_v51  ;;  %17049 = vmatprep.subr.bf16.mxu1 %v24177_v48  ;;  %v24259_v51 = vld [vmem:[%s32079_s7 + $0x2280] ss:$16 sps:$4 sm:$0xff]   ;;  %v24262_v48 = vld [vmem:[%s32079_s7 + $0x2288] ss:$16 sps:$4 sm:$0xff]  }
 0xa2d   : > { %18074 = vmatprep.subr.bf16.mxu0 %v24180_v60  ;;  %v24267_v60 = vld [vmem:[%s32079_s7 + $0x22a4] ss:$16 sps:$4 sm:$0xff]  }
 0xa2f   : > { %17050 = vmatpush1.bf16.msra.mxu1 %v24175_v41  ;;  %v24270_v41 = vld [vmem:[%s32079_s7 + $0x22ac] ss:$16 sps:$4 sm:$0xff]  }
 0xa30   : > { %18075 = vmatpush1.bf16.msra.mxu0 %v24178_v44  ;;  %17051 = vmatprep.subr.bf16.mxu1 %v24183_v35  ;;  %v24265_v44 = vld [vmem:[%s32079_s7 + $0x22a0] ss:$16 sps:$4 sm:$0xff]   ;;  %v24268_v35 = vld [vmem:[%s32079_s7 + $0x22a8] ss:$16 sps:$4 sm:$0xff]  }
 0xa31   : > { %18076 = vmatprep.subr.bf16.mxu0 %v24186_v45  ;;  %v24273_v45 = vld [vmem:[%s32079_s7 + $0x22c4] ss:$16 sps:$4 sm:$0xff]  }
 0xa33   : > { %17052 = vmatpush1.bf16.msra.mxu1 %v24181_v37  ;;  %v24276_v37 = vld [vmem:[%s32079_s7 + $0x22cc] ss:$16 sps:$4 sm:$0xff]  }
 0xa34   : > { %18077 = vmatpush1.bf16.msra.mxu0 %v24184_v20  ;;  %17053 = vmatprep.subr.bf16.mxu1 %v24189_v57  ;;  %v24271_v20 = vld [vmem:[%s32079_s7 + $0x22c0] ss:$16 sps:$4 sm:$0xff]   ;;  %v24274_v57 = vld [vmem:[%s32079_s7 + $0x22c8] ss:$16 sps:$4 sm:$0xff]  }
 0xa35   : > { %18078 = vmatprep.subr.bf16.mxu0 %v24192_v18  ;;  %v24279_v18 = vld [vmem:[%s32079_s7 + $0x22e4] ss:$16 sps:$4 sm:$0xff]  }
 0xa37   : > { %17054 = vmatpush1.bf16.msra.mxu1 %v24187_v46  ;;  %v24282_v46 = vld [vmem:[%s32079_s7 + $0x22ec] ss:$16 sps:$4 sm:$0xff]  }
 0xa38   : > { %18079 = vmatpush1.bf16.msra.mxu0 %v24190_v36  ;;  %17055 = vmatprep.subr.bf16.mxu1 %v24195_v11  ;;  %v24277_v36 = vld [vmem:[%s32079_s7 + $0x22e0] ss:$16 sps:$4 sm:$0xff]   ;;  %v24280_v11 = vld [vmem:[%s32079_s7 + $0x22e8] ss:$16 sps:$4 sm:$0xff]  }
 0xa39   : > { %18080 = vmatprep.subr.bf16.mxu0 %v24198_v24  ;;  %v24285_v24 = vld [vmem:[%s32079_s7 + $0x2304] ss:$16 sps:$4 sm:$0xff]  }
 0xa3b   : > { %17056 = vmatpush1.bf16.msra.mxu1 %v24193_v47  ;;  %v24288_v47 = vld [vmem:[%s32079_s7 + $0x230c] ss:$16 sps:$4 sm:$0xff]  }
 0xa3c   : > { %18081 = vmatpush1.bf16.msra.mxu0 %v24196_v26  ;;  %17057 = vmatprep.subr.bf16.mxu1 %v24201_v49  ;;  %v24283_v26 = vld [vmem:[%s32079_s7 + $0x2300] ss:$16 sps:$4 sm:$0xff]   ;;  %v24286_v49 = vld [vmem:[%s32079_s7 + $0x2308] ss:$16 sps:$4 sm:$0xff]  }
 0xa3d   : > { %18082 = vmatprep.subr.bf16.mxu0 %v24204_v16  ;;  %v24291_v16 = vld [vmem:[%s32079_s7 + $0x2324] ss:$16 sps:$4 sm:$0xff]  }
 0xa3f   : > { %17058 = vmatpush1.bf16.msra.mxu1 %v24199_v63  ;;  %v24294_v63 = vld [vmem:[%s32079_s7 + $0x232c] ss:$16 sps:$4 sm:$0xff]  }
 0xa40   : > { %18083 = vmatpush1.bf16.msra.mxu0 %v24202_v50  ;;  %17059 = vmatprep.subr.bf16.mxu1 %v24207_v21  ;;  %v24289_v50 = vld [vmem:[%s32079_s7 + $0x2320] ss:$16 sps:$4 sm:$0xff]   ;;  %v24292_v21 = vld [vmem:[%s32079_s7 + $0x2328] ss:$16 sps:$4 sm:$0xff]  }
 0xa41   : > { %18084 = vmatprep.subr.bf16.mxu0 %v24210_v4  ;;  %v24297_v4 = vld [vmem:[%s32079_s7 + $0x2344] ss:$16 sps:$4 sm:$0xff]  }
 0xa43   : > { %17060 = vmatpush1.bf16.msra.mxu1 %v24205_v15  ;;  %v24300_v15 = vld [vmem:[%s32079_s7 + $0x234c] ss:$16 sps:$4 sm:$0xff]  }
 0xa44   : > { %18085 = vmatpush1.bf16.msra.mxu0 %v24208_v3  ;;  %17061 = vmatprep.subr.bf16.mxu1 %v24213_v27  ;;  %v24295_v3 = vld [vmem:[%s32079_s7 + $0x2340] ss:$16 sps:$4 sm:$0xff]   ;;  %v24298_v27 = vld [vmem:[%s32079_s7 + $0x2348] ss:$16 sps:$4 sm:$0xff]  }
 0xa45   : > { %18086 = vmatprep.subr.bf16.mxu0 %v24216_v39  ;;  %v24303_v39 = vld [vmem:[%s32079_s7 + $0x2364] ss:$16 sps:$4 sm:$0xff]  }
 0xa47   : > { %17062 = vmatpush1.bf16.msra.mxu1 %v24211_v53  ;;  %v24306_v53 = vld [vmem:[%s32079_s7 + $0x236c] ss:$16 sps:$4 sm:$0xff]  }
 0xa48   : > { %18087 = vmatpush1.bf16.msra.mxu0 %v24214_v12  ;;  %17063 = vmatprep.subr.bf16.mxu1 %v24219_v22  ;;  %v24301_v12 = vld [vmem:[%s32079_s7 + $0x2360] ss:$16 sps:$4 sm:$0xff]   ;;  %v24304_v22 = vld [vmem:[%s32079_s7 + $0x2368] ss:$16 sps:$4 sm:$0xff]  }
 0xa49   : > { %18088 = vmatprep.subr.bf16.mxu0 %v24222_v8  ;;  %v24309_v8 = vld [vmem:[%s32079_s7 + $0x2384] ss:$16 sps:$4 sm:$0xff]  }
 0xa4b   : > { %17064 = vmatpush1.bf16.msra.mxu1 %v24217_v38  ;;  %v24312_v38 = vld [vmem:[%s32079_s7 + $0x238c] ss:$16 sps:$4 sm:$0xff]  }
 0xa4c   : > { %18089 = vmatpush1.bf16.msra.mxu0 %v24220_v62  ;;  %17065 = vmatprep.subr.bf16.mxu1 %v24225_v54  ;;  %v24307_v62 = vld [vmem:[%s32079_s7 + $0x2380] ss:$16 sps:$4 sm:$0xff]   ;;  %v24310_v54 = vld [vmem:[%s32079_s7 + $0x2388] ss:$16 sps:$4 sm:$0xff]  }
 0xa4d   : > { %18090 = vmatprep.subr.bf16.mxu0 %v24228_v52  ;;  %v24315_v52 = vld [vmem:[%s32079_s7 + $0x23a4] ss:$16 sps:$4 sm:$0xff]  }
 0xa4f   : > { %17066 = vmatpush1.bf16.msra.mxu1 %v24223_v34  ;;  %v24318_v34 = vld [vmem:[%s32079_s7 + $0x23ac] ss:$16 sps:$4 sm:$0xff]  }
 0xa50   : > { %18091 = vmatpush1.bf16.msra.mxu0 %v24226_v40  ;;  %17067 = vmatprep.subr.bf16.mxu1 %v24231_v56  ;;  %v24313_v40 = vld [vmem:[%s32079_s7 + $0x23a0] ss:$16 sps:$4 sm:$0xff]   ;;  %v24316_v56 = vld [vmem:[%s32079_s7 + $0x23a8] ss:$16 sps:$4 sm:$0xff]  }
 0xa51   : > { %18092 = vmatprep.subr.bf16.mxu0 %v24234_v7  ;;  %v24321_v7 = vld [vmem:[%s32079_s7 + $0x23c4] ss:$16 sps:$4 sm:$0xff]  }
 0xa53   : > { %17068 = vmatpush1.bf16.msra.mxu1 %v24229_v32  ;;  %v24324_v32 = vld [vmem:[%s32079_s7 + $0x23cc] ss:$16 sps:$4 sm:$0xff]  }
 0xa54   : > { %18093 = vmatpush1.bf16.msra.mxu0 %v24232_v10  ;;  %17078 = vmatprep.subr.bf16.mxu1 %v24237_v0  ;;  %v8359_v10 = vcombine.high %v30216_v25, %v30216_v25  ;;  %v24319_v0 = vld [vmem:[%s32079_s7 + $0x23c0] ss:$16 sps:$4 sm:$0xff]   ;;  %v24330_v25 = vld [vmem:[%s32079_s7 + $0x23ec] ss:$16 sps:$4 sm:$0xff]  }
 0xa55   : > { %18103 = vmatprep.subr.bf16.mxu0 %v24240_v1  ;;  %v24322_v1 = vld [vmem:[%s32079_s7 + $0x23c8] ss:$16 sps:$4 sm:$0xff]  }
 0xa56   : > { %17070 = vmatmul.mubr.bf16.vlgmr.msra.gmra.mrb[32].mxu1 %v30449_v13 }
 0xa57   : > { %18095 = vmatmul.mubr.bf16.vlgmr.msra.gmra.mrb[16].mxu0 %v30449_v13  ;;  %17079 = vmatpush1.bf16.msra.mxu1 %v24235_v31  ;;  %v24327_v31 = vld [vmem:[%s32079_s7 + $0x23e4] ss:$16 sps:$4 sm:$0xff]  }
 0xa58   : > { %17110 = vmatprep.mubr.bf16.mxu1 %v8406_v42  ;;  %18104 = vmatpush1.bf16.msra.mxu0 %v24238_v17  ;;  %v30635_v17 = vrot.slane %v8359_v10, %v27039_v29  ;;  %v24407_v10 = vld [vmem:[%s32079_s7 + $0x2588] ss:$16 sps:$4 sm:$0xff]  }
 0xa59   : > { %18135 = vmatprep.mubr.bf16.mxu0 %v8406_v42  ;;  %17080 = vmatprep.subr.bf16.mxu1 %v24243_v30  ;;  %v24325_v30 = vld [vmem:[%s32079_s7 + $0x23e0] ss:$16 sps:$4 sm:$0xff]   ;;  %v24328_v42 = vld [vmem:[%s32079_s7 + $0x23e8] ss:$16 sps:$4 sm:$0xff]  }
 0xa5a   : > { %18105 = vmatprep.subr.bf16.mxu0 %v24246_v9  ;;  %v24333_v9 = vld [vmem:[%s32079_s7 + $0x2404] ss:$16 sps:$4 sm:$0xff]  }
 0xa5b   : > { %17081 = vmatpush1.bf16.msra.mxu1 %v24241_v28  ;;  %v24336_v28 = vld [vmem:[%s32079_s7 + $0x240c] ss:$16 sps:$4 sm:$0xff]  }
 0xa5c   : > { %18106 = vmatpush1.bf16.msra.mxu0 %v24244_v5  ;;  %17082 = vmatprep.subr.bf16.mxu1 %v24249_v58  ;;  %v8375_v5 = vcombine.high %v30635_v17, %v30635_v17  ;;  %v24331_v58 = vld [vmem:[%s32079_s7 + $0x2400] ss:$16 sps:$4 sm:$0xff]  }
 0xa5d   : > { %18107 = vmatprep.subr.bf16.mxu0 %v24252_v14  ;;  %v8404_v14 = vcombine.high %v30449_v13, %v30449_v13  ;;  %v24338_v13 = vld [vmem:[%s32079_s7 + $0x2420] ss:$16 sps:$4 sm:$0xff]  }
 0xa5f   : > { %17083 = vmatpush1.bf16.msra.mxu1 %v24247_v33  ;;  %v24334_v33 = vld [vmem:[%s32079_s7 + $0x2408] ss:$16 sps:$4 sm:$0xff]  }
 0xa60   : > { %18108 = vmatpush1.bf16.msra.mxu0 %v24250_v19  ;;  %17084 = vmatprep.subr.bf16.mxu1 %v24255_v61  ;;  %v24340_v19 = vld [vmem:[%s32079_s7 + $0x2424] ss:$16 sps:$4 sm:$0xff]   ;;  %v30663_v61 = vrot.slane %v8375_v5, %v27039_v29 }
 0xa61   : > { %18109 = vmatprep.subr.bf16.mxu0 %v24258_v43  ;;  %v24343_v43 = vld [vmem:[%s32079_s7 + $0x242c] ss:$16 sps:$4 sm:$0xff]   ;;  %v24424_v5 = vld [vmem:[%s32079_s7 + $0x25e4] ss:$16 sps:$4 sm:$0xff]  }
 0xa63   : > { %17085 = vmatpush1.bf16.msra.mxu1 %v24253_v6  ;;  %v24341_v6 = vld [vmem:[%s32079_s7 + $0x2428] ss:$16 sps:$4 sm:$0xff]  }
 0xa64   : > { %18110 = vmatpush1.bf16.msra.mxu0 %v24256_v55  ;;  %17086 = vmatprep.subr.bf16.mxu1 %v24261_v23  ;;  %v24346_v55 = vld [vmem:[%s32079_s7 + $0x2444] ss:$16 sps:$4 sm:$0xff]   ;;  %v24349_v23 = vld [vmem:[%s32079_s7 + $0x244c] ss:$16 sps:$4 sm:$0xff]  }
 0xa65   : > { %18111 = vmatprep.subr.bf16.mxu0 %v24264_v59  ;;  %v24344_v59 = vld [vmem:[%s32079_s7 + $0x2440] ss:$16 sps:$4 sm:$0xff]  }
 0xa67   : > { %17087 = vmatpush1.bf16.msra.mxu1 %v24259_v51  ;;  %v24347_v51 = vld [vmem:[%s32079_s7 + $0x2448] ss:$16 sps:$4 sm:$0xff]  }
 0xa68   : > { %18112 = vmatpush1.bf16.msra.mxu0 %v24262_v48  ;;  %17088 = vmatprep.subr.bf16.mxu1 %v24267_v60  ;;  %v24352_v48 = vld [vmem:[%s32079_s7 + $0x2464] ss:$16 sps:$4 sm:$0xff]   ;;  %v24355_v60 = vld [vmem:[%s32079_s7 + $0x246c] ss:$16 sps:$4 sm:$0xff]  }
 0xa69   : > { %18113 = vmatprep.subr.bf16.mxu0 %v24270_v41  ;;  %v24350_v41 = vld [vmem:[%s32079_s7 + $0x2460] ss:$16 sps:$4 sm:$0xff]  }
 0xa6b   : > { %17089 = vmatpush1.bf16.msra.mxu1 %v24265_v44  ;;  %v24353_v44 = vld [vmem:[%s32079_s7 + $0x2468] ss:$16 sps:$4 sm:$0xff]  }
 0xa6c   : > { %18114 = vmatpush1.bf16.msra.mxu0 %v24268_v35  ;;  %17090 = vmatprep.subr.bf16.mxu1 %v24273_v45  ;;  %v24358_v35 = vld [vmem:[%s32079_s7 + $0x2484] ss:$16 sps:$4 sm:$0xff]   ;;  %v24361_v45 = vld [vmem:[%s32079_s7 + $0x248c] ss:$16 sps:$4 sm:$0xff]  }
 0xa6d   : > { %18115 = vmatprep.subr.bf16.mxu0 %v24276_v37  ;;  %v24356_v37 = vld [vmem:[%s32079_s7 + $0x2480] ss:$16 sps:$4 sm:$0xff]  }
 0xa6f   : > { %17091 = vmatpush1.bf16.msra.mxu1 %v24271_v20  ;;  %v24359_v20 = vld [vmem:[%s32079_s7 + $0x2488] ss:$16 sps:$4 sm:$0xff]  }
 0xa70   : > { %18116 = vmatpush1.bf16.msra.mxu0 %v24274_v57  ;;  %17092 = vmatprep.subr.bf16.mxu1 %v24279_v18  ;;  %v24364_v57 = vld [vmem:[%s32079_s7 + $0x24a4] ss:$16 sps:$4 sm:$0xff]   ;;  %v24367_v18 = vld [vmem:[%s32079_s7 + $0x24ac] ss:$16 sps:$4 sm:$0xff]  }
 0xa71   : > { %18117 = vmatprep.subr.bf16.mxu0 %v24282_v46  ;;  %v24362_v46 = vld [vmem:[%s32079_s7 + $0x24a0] ss:$16 sps:$4 sm:$0xff]  }
 0xa73   : > { %17093 = vmatpush1.bf16.msra.mxu1 %v24277_v36  ;;  %v24365_v36 = vld [vmem:[%s32079_s7 + $0x24a8] ss:$16 sps:$4 sm:$0xff]  }
 0xa74   : > { %18118 = vmatpush1.bf16.msra.mxu0 %v24280_v11  ;;  %17094 = vmatprep.subr.bf16.mxu1 %v24285_v24  ;;  %v24370_v11 = vld [vmem:[%s32079_s7 + $0x24c4] ss:$16 sps:$4 sm:$0xff]   ;;  %v24373_v24 = vld [vmem:[%s32079_s7 + $0x24cc] ss:$16 sps:$4 sm:$0xff]  }
 0xa75   : > { %18119 = vmatprep.subr.bf16.mxu0 %v24288_v47  ;;  %v24368_v47 = vld [vmem:[%s32079_s7 + $0x24c0] ss:$16 sps:$4 sm:$0xff]  }
 0xa77   : > { %17095 = vmatpush1.bf16.msra.mxu1 %v24283_v26  ;;  %v24371_v26 = vld [vmem:[%s32079_s7 + $0x24c8] ss:$16 sps:$4 sm:$0xff]  }
 0xa78   : > { %18120 = vmatpush1.bf16.msra.mxu0 %v24286_v49  ;;  %17096 = vmatprep.subr.bf16.mxu1 %v24291_v16  ;;  %v24376_v49 = vld [vmem:[%s32079_s7 + $0x24e4] ss:$16 sps:$4 sm:$0xff]   ;;  %v24379_v16 = vld [vmem:[%s32079_s7 + $0x24ec] ss:$16 sps:$4 sm:$0xff]  }
 0xa79   : > { %18121 = vmatprep.subr.bf16.mxu0 %v24294_v63  ;;  %v24374_v63 = vld [vmem:[%s32079_s7 + $0x24e0] ss:$16 sps:$4 sm:$0xff]  }
 0xa7b   : > { %17097 = vmatpush1.bf16.msra.mxu1 %v24289_v50  ;;  %v24377_v50 = vld [vmem:[%s32079_s7 + $0x24e8] ss:$16 sps:$4 sm:$0xff]  }
 0xa7c   : > { %18122 = vmatpush1.bf16.msra.mxu0 %v24292_v21  ;;  %17098 = vmatprep.subr.bf16.mxu1 %v24297_v4  ;;  %v24382_v21 = vld [vmem:[%s32079_s7 + $0x2504] ss:$16 sps:$4 sm:$0xff]   ;;  %v24385_v4 = vld [vmem:[%s32079_s7 + $0x250c] ss:$16 sps:$4 sm:$0xff]  }
 0xa7d   : > { %18123 = vmatprep.subr.bf16.mxu0 %v24300_v15  ;;  %v24380_v15 = vld [vmem:[%s32079_s7 + $0x2500] ss:$16 sps:$4 sm:$0xff]  }
 0xa7f   : > { %17099 = vmatpush1.bf16.msra.mxu1 %v24295_v3  ;;  %v24383_v3 = vld [vmem:[%s32079_s7 + $0x2508] ss:$16 sps:$4 sm:$0xff]  }
 0xa80   : > { %18124 = vmatpush1.bf16.msra.mxu0 %v24298_v27  ;;  %17100 = vmatprep.subr.bf16.mxu1 %v24303_v39  ;;  %v24388_v27 = vld [vmem:[%s32079_s7 + $0x2524] ss:$16 sps:$4 sm:$0xff]   ;;  %v24391_v39 = vld [vmem:[%s32079_s7 + $0x252c] ss:$16 sps:$4 sm:$0xff]  }
 0xa81   : > { %18125 = vmatprep.subr.bf16.mxu0 %v24306_v53  ;;  %v24386_v53 = vld [vmem:[%s32079_s7 + $0x2520] ss:$16 sps:$4 sm:$0xff]  }
 0xa83   : > { %17101 = vmatpush1.bf16.msra.mxu1 %v24301_v12  ;;  %v24389_v12 = vld [vmem:[%s32079_s7 + $0x2528] ss:$16 sps:$4 sm:$0xff]  }
 0xa84   : > { %18126 = vmatpush1.bf16.msra.mxu0 %v24304_v22  ;;  %17102 = vmatprep.subr.bf16.mxu1 %v24309_v8  ;;  %v24394_v22 = vld [vmem:[%s32079_s7 + $0x2544] ss:$16 sps:$4 sm:$0xff]   ;;  %v24397_v8 = vld [vmem:[%s32079_s7 + $0x254c] ss:$16 sps:$4 sm:$0xff]  }
 0xa85   : > { %18127 = vmatprep.subr.bf16.mxu0 %v24312_v38  ;;  %v24392_v38 = vld [vmem:[%s32079_s7 + $0x2540] ss:$16 sps:$4 sm:$0xff]  }
 0xa87   : > { %17103 = vmatpush1.bf16.msra.mxu1 %v24307_v62  ;;  %v24395_v62 = vld [vmem:[%s32079_s7 + $0x2548] ss:$16 sps:$4 sm:$0xff]  }
 0xa88   : > { %18128 = vmatpush1.bf16.msra.mxu0 %v24310_v54  ;;  %17104 = vmatprep.subr.bf16.mxu1 %v24315_v52  ;;  %v24400_v54 = vld [vmem:[%s32079_s7 + $0x2564] ss:$16 sps:$4 sm:$0xff]   ;;  %v24403_v52 = vld [vmem:[%s32079_s7 + $0x256c] ss:$16 sps:$4 sm:$0xff]  }
 0xa89   : > { %18129 = vmatprep.subr.bf16.mxu0 %v24318_v34  ;;  %v24398_v34 = vld [vmem:[%s32079_s7 + $0x2560] ss:$16 sps:$4 sm:$0xff]  }
 0xa8b   : > { %17105 = vmatpush1.bf16.msra.mxu1 %v24313_v40  ;;  %v24401_v40 = vld [vmem:[%s32079_s7 + $0x2568] ss:$16 sps:$4 sm:$0xff]  }
 0xa8c   : > { %18130 = vmatpush1.bf16.msra.mxu0 %v24316_v56  ;;  %17106 = vmatprep.subr.bf16.mxu1 %v24321_v7  ;;  %v24406_v56 = vld [vmem:[%s32079_s7 + $0x2584] ss:$16 sps:$4 sm:$0xff]   ;;  %v24409_v7 = vld [vmem:[%s32079_s7 + $0x258c] ss:$16 sps:$4 sm:$0xff]  }
 0xa8d   : > { %18131 = vmatprep.subr.bf16.mxu0 %v24324_v32  ;;  %v24404_v32 = vld [vmem:[%s32079_s7 + $0x2580] ss:$16 sps:$4 sm:$0xff]  }
 0xa8f   : > { %17107 = vmatpush1.bf16.msra.mxu1 %v24319_v0  ;;  %v24412_v0 = vld [vmem:[%s32079_s7 + $0x25a4] ss:$16 sps:$4 sm:$0xff]  }
 0xa90   : > { %18132 = vmatpush1.bf16.msra.mxu0 %v24322_v1  ;;  %17108 = vmatprep.subr.bf16.mxu1 %v24327_v31  ;;  %v24415_v1 = vld [vmem:[%s32079_s7 + $0x25ac] ss:$16 sps:$4 sm:$0xff]   ;;  %v24410_v31 = vld [vmem:[%s32079_s7 + $0x25a0] ss:$16 sps:$4 sm:$0xff]  }
 0xa91   : > { %18133 = vmatprep.subr.bf16.mxu0 %v24330_v25  ;;  %v24413_v25 = vld [vmem:[%s32079_s7 + $0x25a8] ss:$16 sps:$4 sm:$0xff]  }
 0xa93   : > { %17109 = vmatpush1.bf16.msra.mxu1 %v24325_v30  ;;  %v24418_v30 = vld [vmem:[%s32079_s7 + $0x25c4] ss:$16 sps:$4 sm:$0xff]  }
 0xa94   : > { %18134 = vmatpush1.bf16.msra.mxu0 %v24328_v42  ;;  %17119 = vmatprep.subr.bf16.mxu1 %v24333_v9  ;;  %v24421_v42 = vld [vmem:[%s32079_s7 + $0x25cc] ss:$16 sps:$4 sm:$0xff]   ;;  %v24416_v9 = vld [vmem:[%s32079_s7 + $0x25c0] ss:$16 sps:$4 sm:$0xff]  }
 0xa95   : > { %18144 = vmatprep.subr.bf16.mxu0 %v24336_v28  ;;  %v24419_v28 = vld [vmem:[%s32079_s7 + $0x25c8] ss:$16 sps:$4 sm:$0xff]  }
 0xa96   : > { %17111 = vmatmul.mubr.bf16.vlgmr.msra.gmra.mrb[32].mxu1 %v8404_v14 }
 0xa97   : > { %18136 = vmatmul.mubr.bf16.vlgmr.msra.gmra.mrb[16].mxu0 %v8404_v14  ;;  %17120 = vmatpush1.bf16.msra.mxu1 %v24331_v58  ;;  %v24427_v58 = vld [vmem:[%s32079_s7 + $0x25ec] ss:$16 sps:$4 sm:$0xff]   ;;  %v24422_v14 = vld [vmem:[%s32079_s7 + $0x25e0] ss:$16 sps:$4 sm:$0xff]  }
 0xa98   : > { %17151 = vmatprep.mubr.bf16.mxu1 %v30663_v61  ;;  %18145 = vmatpush1.bf16.msra.mxu0 %v24334_v33  ;;  %v24425_v33 = vld [vmem:[%s32079_s7 + $0x25e8] ss:$16 sps:$4 sm:$0xff]  }
 0xa99   : > { %18176 = vmatprep.mubr.bf16.mxu0 %v30663_v61  ;;  %17121 = vmatprep.subr.bf16.mxu1 %v24340_v19  ;;  %v24430_v19 = vld [vmem:[%s32079_s7 + $0x2604] ss:$16 sps:$4 sm:$0xff]  }
 0xa9a   : > { %18146 = vmatprep.subr.bf16.mxu0 %v24343_v43  ;;  %v24433_v43 = vld [vmem:[%s32079_s7 + $0x260c] ss:$16 sps:$4 sm:$0xff]  }
 0xa9b   : > { %17122 = vmatpush1.bf16.msra.mxu1 %v24338_v13  ;;  %v24428_v13 = vld [vmem:[%s32079_s7 + $0x2600] ss:$16 sps:$4 sm:$0xff]  }
 0xa9c   : > { %18147 = vmatpush1.bf16.msra.mxu0 %v24341_v6  ;;  %17123 = vmatprep.subr.bf16.mxu1 %v24346_v55  ;;  %v30855_v6 = vrot.slane %v30635_v17, %v27039_v29  ;;  %v24431_v55 = vld [vmem:[%s32079_s7 + $0x2608] ss:$16 sps:$4 sm:$0xff]   ;;  %v24439_v17 = vld [vmem:[%s32079_s7 + $0x262c] ss:$16 sps:$4 sm:$0xff]  }
 0xa9d   : > { %18148 = vmatprep.subr.bf16.mxu0 %v24349_v23  ;;  %v24436_v23 = vld [vmem:[%s32079_s7 + $0x2624] ss:$16 sps:$4 sm:$0xff]  }
 0xa9f   : > { %17124 = vmatpush1.bf16.msra.mxu1 %v24344_v59  ;;  %v8407_v59 = vcombine.high %v30663_v61, %v30663_v61  ;;  %v24442_v61 = vld [vmem:[%s32079_s7 + $0x2644] ss:$16 sps:$4 sm:$0xff]  }
 0xaa0   : > { %18149 = vmatpush1.bf16.msra.mxu0 %v24347_v51  ;;  %17125 = vmatprep.subr.bf16.mxu1 %v24352_v48  ;;  %v24434_v51 = vld [vmem:[%s32079_s7 + $0x2620] ss:$16 sps:$4 sm:$0xff]   ;;  %v24437_v48 = vld [vmem:[%s32079_s7 + $0x2628] ss:$16 sps:$4 sm:$0xff]  }
 0xaa1   : > { %18150 = vmatprep.subr.bf16.mxu0 %v24355_v60  ;;  %v24445_v60 = vld [vmem:[%s32079_s7 + $0x264c] ss:$16 sps:$4 sm:$0xff]  }
 0xaa3   : > { %17126 = vmatpush1.bf16.msra.mxu1 %v24350_v41  ;;  %v24440_v41 = vld [vmem:[%s32079_s7 + $0x2640] ss:$16 sps:$4 sm:$0xff]  }
 0xaa4   : > { %18151 = vmatpush1.bf16.msra.mxu0 %v24353_v44  ;;  %17127 = vmatprep.subr.bf16.mxu1 %v24358_v35  ;;  %v24443_v44 = vld [vmem:[%s32079_s7 + $0x2648] ss:$16 sps:$4 sm:$0xff]   ;;  %v24448_v35 = vld [vmem:[%s32079_s7 + $0x2664] ss:$16 sps:$4 sm:$0xff]  }
 0xaa5   : > { %18152 = vmatprep.subr.bf16.mxu0 %v24361_v45  ;;  %v24451_v45 = vld [vmem:[%s32079_s7 + $0x266c] ss:$16 sps:$4 sm:$0xff]  }
 0xaa7   : > { %17128 = vmatpush1.bf16.msra.mxu1 %v24356_v37  ;;  %v24446_v37 = vld [vmem:[%s32079_s7 + $0x2660] ss:$16 sps:$4 sm:$0xff]  }
 0xaa8   : > { %18153 = vmatpush1.bf16.msra.mxu0 %v24359_v20  ;;  %17129 = vmatprep.subr.bf16.mxu1 %v24364_v57  ;;  %v24449_v20 = vld [vmem:[%s32079_s7 + $0x2668] ss:$16 sps:$4 sm:$0xff]   ;;  %v24454_v57 = vld [vmem:[%s32079_s7 + $0x2684] ss:$16 sps:$4 sm:$0xff]  }
 0xaa9   : > { %18154 = vmatprep.subr.bf16.mxu0 %v24367_v18  ;;  %v24457_v18 = vld [vmem:[%s32079_s7 + $0x268c] ss:$16 sps:$4 sm:$0xff]  }
 0xaab   : > { %17130 = vmatpush1.bf16.msra.mxu1 %v24362_v46  ;;  %v24452_v46 = vld [vmem:[%s32079_s7 + $0x2680] ss:$16 sps:$4 sm:$0xff]  }
 0xaac   : > { %18155 = vmatpush1.bf16.msra.mxu0 %v24365_v36  ;;  %17131 = vmatprep.subr.bf16.mxu1 %v24370_v11  ;;  %v24455_v36 = vld [vmem:[%s32079_s7 + $0x2688] ss:$16 sps:$4 sm:$0xff]   ;;  %v24460_v11 = vld [vmem:[%s32079_s7 + $0x26a4] ss:$16 sps:$4 sm:$0xff]  }
 0xaad   : > { %18156 = vmatprep.subr.bf16.mxu0 %v24373_v24  ;;  %v24463_v24 = vld [vmem:[%s32079_s7 + $0x26ac] ss:$16 sps:$4 sm:$0xff]  }
 0xaaf   : > { %17132 = vmatpush1.bf16.msra.mxu1 %v24368_v47  ;;  %v24458_v47 = vld [vmem:[%s32079_s7 + $0x26a0] ss:$16 sps:$4 sm:$0xff]  }
 0xab0   : > { %18157 = vmatpush1.bf16.msra.mxu0 %v24371_v26  ;;  %17133 = vmatprep.subr.bf16.mxu1 %v24376_v49  ;;  %v24461_v26 = vld [vmem:[%s32079_s7 + $0x26a8] ss:$16 sps:$4 sm:$0xff]   ;;  %v24466_v49 = vld [vmem:[%s32079_s7 + $0x26c4] ss:$16 sps:$4 sm:$0xff]  }
 0xab1   : > { %18158 = vmatprep.subr.bf16.mxu0 %v24379_v16  ;;  %v24469_v16 = vld [vmem:[%s32079_s7 + $0x26cc] ss:$16 sps:$4 sm:$0xff]  }
 0xab3   : > { %17134 = vmatpush1.bf16.msra.mxu1 %v24374_v63  ;;  %v24464_v63 = vld [vmem:[%s32079_s7 + $0x26c0] ss:$16 sps:$4 sm:$0xff]  }
 0xab4   : > { %18159 = vmatpush1.bf16.msra.mxu0 %v24377_v50  ;;  %17135 = vmatprep.subr.bf16.mxu1 %v24382_v21  ;;  %v24467_v50 = vld [vmem:[%s32079_s7 + $0x26c8] ss:$16 sps:$4 sm:$0xff]   ;;  %v24472_v21 = vld [vmem:[%s32079_s7 + $0x26e4] ss:$16 sps:$4 sm:$0xff]  }
 0xab5   : > { %18160 = vmatprep.subr.bf16.mxu0 %v24385_v4  ;;  %v24475_v4 = vld [vmem:[%s32079_s7 + $0x26ec] ss:$16 sps:$4 sm:$0xff]  }
 0xab7   : > { %17136 = vmatpush1.bf16.msra.mxu1 %v24380_v15  ;;  %v24470_v15 = vld [vmem:[%s32079_s7 + $0x26e0] ss:$16 sps:$4 sm:$0xff]  }
 0xab8   : > { %18161 = vmatpush1.bf16.msra.mxu0 %v24383_v3  ;;  %17137 = vmatprep.subr.bf16.mxu1 %v24388_v27  ;;  %v24473_v3 = vld [vmem:[%s32079_s7 + $0x26e8] ss:$16 sps:$4 sm:$0xff]   ;;  %v24478_v27 = vld [vmem:[%s32079_s7 + $0x2704] ss:$16 sps:$4 sm:$0xff]  }
 0xab9   : > { %18162 = vmatprep.subr.bf16.mxu0 %v24391_v39  ;;  %v24481_v39 = vld [vmem:[%s32079_s7 + $0x270c] ss:$16 sps:$4 sm:$0xff]  }
 0xabb   : > { %17138 = vmatpush1.bf16.msra.mxu1 %v24386_v53  ;;  %v24476_v53 = vld [vmem:[%s32079_s7 + $0x2700] ss:$16 sps:$4 sm:$0xff]  }
 0xabc   : > { %18163 = vmatpush1.bf16.msra.mxu0 %v24389_v12  ;;  %17139 = vmatprep.subr.bf16.mxu1 %v24394_v22  ;;  %v24479_v12 = vld [vmem:[%s32079_s7 + $0x2708] ss:$16 sps:$4 sm:$0xff]   ;;  %v24484_v22 = vld [vmem:[%s32079_s7 + $0x2724] ss:$16 sps:$4 sm:$0xff]  }
 0xabd   : > { %18164 = vmatprep.subr.bf16.mxu0 %v24397_v8  ;;  %v24487_v8 = vld [vmem:[%s32079_s7 + $0x272c] ss:$16 sps:$4 sm:$0xff]  }
 0xabf   : > { %17140 = vmatpush1.bf16.msra.mxu1 %v24392_v38  ;;  %v24482_v38 = vld [vmem:[%s32079_s7 + $0x2720] ss:$16 sps:$4 sm:$0xff]  }
 0xac0   : > { %18165 = vmatpush1.bf16.msra.mxu0 %v24395_v62  ;;  %17141 = vmatprep.subr.bf16.mxu1 %v24400_v54  ;;  %v24485_v62 = vld [vmem:[%s32079_s7 + $0x2728] ss:$16 sps:$4 sm:$0xff]   ;;  %v24490_v54 = vld [vmem:[%s32079_s7 + $0x2744] ss:$16 sps:$4 sm:$0xff]  }
 0xac1   : > { %18166 = vmatprep.subr.bf16.mxu0 %v24403_v52  ;;  %v24493_v52 = vld [vmem:[%s32079_s7 + $0x274c] ss:$16 sps:$4 sm:$0xff]  }
 0xac3   : > { %17142 = vmatpush1.bf16.msra.mxu1 %v24398_v34  ;;  %v24488_v34 = vld [vmem:[%s32079_s7 + $0x2740] ss:$16 sps:$4 sm:$0xff]  }
 0xac4   : > { %18167 = vmatpush1.bf16.msra.mxu0 %v24401_v40  ;;  %17143 = vmatprep.subr.bf16.mxu1 %v24406_v56  ;;  %v24491_v40 = vld [vmem:[%s32079_s7 + $0x2748] ss:$16 sps:$4 sm:$0xff]   ;;  %v24496_v56 = vld [vmem:[%s32079_s7 + $0x2764] ss:$16 sps:$4 sm:$0xff]  }
 0xac5   : > { %18168 = vmatprep.subr.bf16.mxu0 %v24409_v7  ;;  %v24499_v7 = vld [vmem:[%s32079_s7 + $0x276c] ss:$16 sps:$4 sm:$0xff]  }
 0xac7   : > { %17144 = vmatpush1.bf16.msra.mxu1 %v24404_v32  ;;  %v24494_v32 = vld [vmem:[%s32079_s7 + $0x2760] ss:$16 sps:$4 sm:$0xff]  }
 0xac8   : > { %18169 = vmatpush1.bf16.msra.mxu0 %v24407_v10  ;;  %17145 = vmatprep.subr.bf16.mxu1 %v24412_v0  ;;  %v24497_v10 = vld [vmem:[%s32079_s7 + $0x2768] ss:$16 sps:$4 sm:$0xff]   ;;  %v24502_v0 = vld [vmem:[%s32079_s7 + $0x2784] ss:$16 sps:$4 sm:$0xff]  }
 0xac9   : > { %18170 = vmatprep.subr.bf16.mxu0 %v24415_v1  ;;  %v24505_v1 = vld [vmem:[%s32079_s7 + $0x278c] ss:$16 sps:$4 sm:$0xff]  }
 0xacb   : > { %17146 = vmatpush1.bf16.msra.mxu1 %v24410_v31  ;;  %v24500_v31 = vld [vmem:[%s32079_s7 + $0x2780] ss:$16 sps:$4 sm:$0xff]  }
 0xacc   : > { %18171 = vmatpush1.bf16.msra.mxu0 %v24413_v25  ;;  %17147 = vmatprep.subr.bf16.mxu1 %v24418_v30  ;;  %v24503_v25 = vld [vmem:[%s32079_s7 + $0x2788] ss:$16 sps:$4 sm:$0xff]   ;;  %v24508_v30 = vld [vmem:[%s32079_s7 + $0x27a4] ss:$16 sps:$4 sm:$0xff]  }
 0xacd   : > { %18172 = vmatprep.subr.bf16.mxu0 %v24421_v42  ;;  %v24511_v42 = vld [vmem:[%s32079_s7 + $0x27ac] ss:$16 sps:$4 sm:$0xff]  }
 0xacf   : > { %17148 = vmatpush1.bf16.msra.mxu1 %v24416_v9  ;;  %v24506_v9 = vld [vmem:[%s32079_s7 + $0x27a0] ss:$16 sps:$4 sm:$0xff]  }
 0xad0   : > { %18173 = vmatpush1.bf16.msra.mxu0 %v24419_v28  ;;  %17149 = vmatprep.subr.bf16.mxu1 %v24424_v5  ;;  %v24509_v28 = vld [vmem:[%s32079_s7 + $0x27a8] ss:$16 sps:$4 sm:$0xff]   ;;  %v24514_v5 = vld [vmem:[%s32079_s7 + $0x27c4] ss:$16 sps:$4 sm:$0xff]  }
 0xad1   : > { %18174 = vmatprep.subr.bf16.mxu0 %v24427_v58  ;;  %v24517_v58 = vld [vmem:[%s32079_s7 + $0x27cc] ss:$16 sps:$4 sm:$0xff]  }
 0xad3   : > { %17150 = vmatpush1.bf16.msra.mxu1 %v24422_v14  ;;  %v24512_v14 = vld [vmem:[%s32079_s7 + $0x27c0] ss:$16 sps:$4 sm:$0xff]  }
 0xad4   : > { %18175 = vmatpush1.bf16.msra.mxu0 %v24425_v33  ;;  %17160 = vmatprep.subr.bf16.mxu1 %v24430_v19  ;;  %v31029_v33 = vld [vmem:[#allocation5 + $0x28] sm:$0xff] }
 0xad5   : > { %18185 = vmatprep.subr.bf16.mxu0 %v24433_v43  ;;  %v24515_v19 = vld [vmem:[%s32079_s7 + $0x27c8] ss:$16 sps:$4 sm:$0xff]   ;;  %v24520_v43 = vld [vmem:[%s32079_s7 + $0x27e4] ss:$16 sps:$4 sm:$0xff]  }
 0xad6   : > { %17152 = vmatmul.mubr.bf16.vlgmr.msra.gmra.mrb[32].mxu1 %v30855_v6 }
 0xad7   : > { %18177 = vmatmul.mubr.bf16.vlgmr.msra.gmra.mrb[16].mxu0 %v30855_v6  ;;  %17161 = vmatpush1.bf16.msra.mxu1 %v24428_v13  ;;  %v24523_v13 = vld [vmem:[%s32079_s7 + $0x27ec] ss:$16 sps:$4 sm:$0xff]  }
 0xad8   : > { %17192 = vmatprep.mubr.bf16.mxu1 %v8407_v59  ;;  %18186 = vmatpush1.bf16.msra.mxu0 %v24431_v55  ;;  %v31042_v55 = vrot.slane %v31029_v33, %v27039_v29 }
 0xad9   : > { %18217 = vmatprep.mubr.bf16.mxu0 %v8407_v59  ;;  %17162 = vmatprep.subr.bf16.mxu1 %v24436_v23  ;;  %v24518_v23 = vld [vmem:[%s32079_s7 + $0x27e0] ss:$16 sps:$4 sm:$0xff]   ;;  %v24521_v59 = vld [vmem:[%s32079_s7 + $0x27e8] ss:$16 sps:$4 sm:$0xff]  }
 0xada   : > { %18187 = vmatprep.subr.bf16.mxu0 %v24439_v17  ;;  %v24526_v17 = vld [vmem:[%s32079_s7 + $0x2804] ss:$16 sps:$4 sm:$0xff]  }
 0xadb   : > { %17163 = vmatpush1.bf16.msra.mxu1 %v24434_v51  ;;  %v24529_v51 = vld [vmem:[%s32079_s7 + $0x280c] ss:$16 sps:$4 sm:$0xff]  }
 0xadc   : > { %18188 = vmatpush1.bf16.msra.mxu0 %v24437_v48  ;;  %17164 = vmatprep.subr.bf16.mxu1 %v24442_v61  ;;  %v8423_v48 = vcombine.high %v31042_v55, %v31042_v55  ;;  %v24524_v61 = vld [vmem:[%s32079_s7 + $0x2800] ss:$16 sps:$4 sm:$0xff]  }
 0xadd   : > { %18189 = vmatprep.subr.bf16.mxu0 %v24445_v60  ;;  %v8405_v60 = vcombine.high %v30855_v6, %v30855_v6  ;;  %v24530_v6 = vld [vmem:[%s32079_s7 + $0x2820] ss:$16 sps:$4 sm:$0xff]  }
 0xadf   : > { %17165 = vmatpush1.bf16.msra.mxu1 %v24440_v41  ;;  %v24527_v41 = vld [vmem:[%s32079_s7 + $0x2808] ss:$16 sps:$4 sm:$0xff]  }
 0xae0   : > { %18190 = vmatpush1.bf16.msra.mxu0 %v24443_v44  ;;  %17166 = vmatprep.subr.bf16.mxu1 %v24448_v35  ;;  %v24532_v44 = vld [vmem:[%s32079_s7 + $0x2824] ss:$16 sps:$4 sm:$0xff]   ;;  %v31070_v35 = vrot.slane %v8423_v48, %v27039_v29  ;;  %v24611_v48 = vld [vmem:[%s32079_s7 + $0x29c8] ss:$16 sps:$4 sm:$0xff]  }
 0xae1   : > { %18191 = vmatprep.subr.bf16.mxu0 %v24451_v45  ;;  %v24535_v45 = vld [vmem:[%s32079_s7 + $0x282c] ss:$16 sps:$4 sm:$0xff]  }
 0xae3   : > { %17167 = vmatpush1.bf16.msra.mxu1 %v24446_v37  ;;  %v24533_v37 = vld [vmem:[%s32079_s7 + $0x2828] ss:$16 sps:$4 sm:$0xff]  }
 0xae4   : > { %18192 = vmatpush1.bf16.msra.mxu0 %v24449_v20  ;;  %17168 = vmatprep.subr.bf16.mxu1 %v24454_v57  ;;  %v24538_v20 = vld [vmem:[%s32079_s7 + $0x2844] ss:$16 sps:$4 sm:$0xff]   ;;  %v24541_v57 = vld [vmem:[%s32079_s7 + $0x284c] ss:$16 sps:$4 sm:$0xff]  }
 0xae5   : > { %18193 = vmatprep.subr.bf16.mxu0 %v24457_v18  ;;  %v24536_v18 = vld [vmem:[%s32079_s7 + $0x2840] ss:$16 sps:$4 sm:$0xff]  }
 0xae7   : > { %17169 = vmatpush1.bf16.msra.mxu1 %v24452_v46  ;;  %v24539_v46 = vld [vmem:[%s32079_s7 + $0x2848] ss:$16 sps:$4 sm:$0xff]  }
 0xae8   : > { %18194 = vmatpush1.bf16.msra.mxu0 %v24455_v36  ;;  %17170 = vmatprep.subr.bf16.mxu1 %v24460_v11  ;;  %v24544_v36 = vld [vmem:[%s32079_s7 + $0x2864] ss:$16 sps:$4 sm:$0xff]   ;;  %v24547_v11 = vld [vmem:[%s32079_s7 + $0x286c] ss:$16 sps:$4 sm:$0xff]  }
 0xae9   : > { %18195 = vmatprep.subr.bf16.mxu0 %v24463_v24  ;;  %v24542_v24 = vld [vmem:[%s32079_s7 + $0x2860] ss:$16 sps:$4 sm:$0xff]  }
 0xaeb   : > { %17171 = vmatpush1.bf16.msra.mxu1 %v24458_v47  ;;  %v24545_v47 = vld [vmem:[%s32079_s7 + $0x2868] ss:$16 sps:$4 sm:$0xff]  }
 0xaec   : > { %18196 = vmatpush1.bf16.msra.mxu0 %v24461_v26  ;;  %17172 = vmatprep.subr.bf16.mxu1 %v24466_v49  ;;  %v24550_v26 = vld [vmem:[%s32079_s7 + $0x2884] ss:$16 sps:$4 sm:$0xff]   ;;  %v24553_v49 = vld [vmem:[%s32079_s7 + $0x288c] ss:$16 sps:$4 sm:$0xff]  }
 0xaed   : > { %18197 = vmatprep.subr.bf16.mxu0 %v24469_v16  ;;  %v24548_v16 = vld [vmem:[%s32079_s7 + $0x2880] ss:$16 sps:$4 sm:$0xff]  }
 0xaef   : > { %17173 = vmatpush1.bf16.msra.mxu1 %v24464_v63  ;;  %v24551_v63 = vld [vmem:[%s32079_s7 + $0x2888] ss:$16 sps:$4 sm:$0xff]  }
 0xaf0   : > { %18198 = vmatpush1.bf16.msra.mxu0 %v24467_v50  ;;  %17174 = vmatprep.subr.bf16.mxu1 %v24472_v21  ;;  %v24556_v50 = vld [vmem:[%s32079_s7 + $0x28a4] ss:$16 sps:$4 sm:$0xff]   ;;  %v24559_v21 = vld [vmem:[%s32079_s7 + $0x28ac] ss:$16 sps:$4 sm:$0xff]  }
 0xaf1   : > { %18199 = vmatprep.subr.bf16.mxu0 %v24475_v4  ;;  %v24554_v4 = vld [vmem:[%s32079_s7 + $0x28a0] ss:$16 sps:$4 sm:$0xff]  }
 0xaf3   : > { %17175 = vmatpush1.bf16.msra.mxu1 %v24470_v15  ;;  %v24557_v15 = vld [vmem:[%s32079_s7 + $0x28a8] ss:$16 sps:$4 sm:$0xff]  }
 0xaf4   : > { %18200 = vmatpush1.bf16.msra.mxu0 %v24473_v3  ;;  %17176 = vmatprep.subr.bf16.mxu1 %v24478_v27  ;;  %v24562_v3 = vld [vmem:[%s32079_s7 + $0x28c4] ss:$16 sps:$4 sm:$0xff]   ;;  %v24565_v27 = vld [vmem:[%s32079_s7 + $0x28cc] ss:$16 sps:$4 sm:$0xff]  }
 0xaf5   : > { %18201 = vmatprep.subr.bf16.mxu0 %v24481_v39  ;;  %v24560_v39 = vld [vmem:[%s32079_s7 + $0x28c0] ss:$16 sps:$4 sm:$0xff]  }
 0xaf7   : > { %17177 = vmatpush1.bf16.msra.mxu1 %v24476_v53  ;;  %v24563_v53 = vld [vmem:[%s32079_s7 + $0x28c8] ss:$16 sps:$4 sm:$0xff]  }
 0xaf8   : > { %18202 = vmatpush1.bf16.msra.mxu0 %v24479_v12  ;;  %17178 = vmatprep.subr.bf16.mxu1 %v24484_v22  ;;  %v24568_v12 = vld [vmem:[%s32079_s7 + $0x28e4] ss:$16 sps:$4 sm:$0xff]   ;;  %v24571_v22 = vld [vmem:[%s32079_s7 + $0x28ec] ss:$16 sps:$4 sm:$0xff]  }
 0xaf9   : > { %18203 = vmatprep.subr.bf16.mxu0 %v24487_v8  ;;  %v24566_v8 = vld [vmem:[%s32079_s7 + $0x28e0] ss:$16 sps:$4 sm:$0xff]  }
 0xafb   : > { %17179 = vmatpush1.bf16.msra.mxu1 %v24482_v38  ;;  %v24569_v38 = vld [vmem:[%s32079_s7 + $0x28e8] ss:$16 sps:$4 sm:$0xff]  }
 0xafc   : > { %18204 = vmatpush1.bf16.msra.mxu0 %v24485_v62  ;;  %17180 = vmatprep.subr.bf16.mxu1 %v24490_v54  ;;  %v24574_v62 = vld [vmem:[%s32079_s7 + $0x2904] ss:$16 sps:$4 sm:$0xff]   ;;  %v24577_v54 = vld [vmem:[%s32079_s7 + $0x290c] ss:$16 sps:$4 sm:$0xff]  }
 0xafd   : > { %18205 = vmatprep.subr.bf16.mxu0 %v24493_v52  ;;  %v24572_v52 = vld [vmem:[%s32079_s7 + $0x2900] ss:$16 sps:$4 sm:$0xff]  }
 0xaff   : > { %17181 = vmatpush1.bf16.msra.mxu1 %v24488_v34  ;;  %v24575_v34 = vld [vmem:[%s32079_s7 + $0x2908] ss:$16 sps:$4 sm:$0xff]  }
 0xb00   : > { %18206 = vmatpush1.bf16.msra.mxu0 %v24491_v40  ;;  %17182 = vmatprep.subr.bf16.mxu1 %v24496_v56  ;;  %v24580_v40 = vld [vmem:[%s32079_s7 + $0x2924] ss:$16 sps:$4 sm:$0xff]   ;;  %v24583_v56 = vld [vmem:[%s32079_s7 + $0x292c] ss:$16 sps:$4 sm:$0xff]  }
 0xb01   : > { %18207 = vmatprep.subr.bf16.mxu0 %v24499_v7  ;;  %v24578_v7 = vld [vmem:[%s32079_s7 + $0x2920] ss:$16 sps:$4 sm:$0xff]  }
 0xb03   : > { %17183 = vmatpush1.bf16.msra.mxu1 %v24494_v32  ;;  %v24581_v32 = vld [vmem:[%s32079_s7 + $0x2928] ss:$16 sps:$4 sm:$0xff]  }
 0xb04   : > { %18208 = vmatpush1.bf16.msra.mxu0 %v24497_v10  ;;  %17184 = vmatprep.subr.bf16.mxu1 %v24502_v0  ;;  %v24586_v10 = vld [vmem:[%s32079_s7 + $0x2944] ss:$16 sps:$4 sm:$0xff]   ;;  %v24589_v0 = vld [vmem:[%s32079_s7 + $0x294c] ss:$16 sps:$4 sm:$0xff]  }
 0xb05   : > { %18209 = vmatprep.subr.bf16.mxu0 %v24505_v1  ;;  %v24584_v1 = vld [vmem:[%s32079_s7 + $0x2940] ss:$16 sps:$4 sm:$0xff]  }
 0xb07   : > { %17185 = vmatpush1.bf16.msra.mxu1 %v24500_v31  ;;  %v24587_v31 = vld [vmem:[%s32079_s7 + $0x2948] ss:$16 sps:$4 sm:$0xff]  }
 0xb08   : > { %18210 = vmatpush1.bf16.msra.mxu0 %v24503_v25  ;;  %17186 = vmatprep.subr.bf16.mxu1 %v24508_v30  ;;  %v24592_v25 = vld [vmem:[%s32079_s7 + $0x2964] ss:$16 sps:$4 sm:$0xff]   ;;  %v24595_v30 = vld [vmem:[%s32079_s7 + $0x296c] ss:$16 sps:$4 sm:$0xff]  }
 0xb09   : > { %18211 = vmatprep.subr.bf16.mxu0 %v24511_v42  ;;  %v24590_v42 = vld [vmem:[%s32079_s7 + $0x2960] ss:$16 sps:$4 sm:$0xff]  }
 0xb0b   : > { %17187 = vmatpush1.bf16.msra.mxu1 %v24506_v9  ;;  %v24593_v9 = vld [vmem:[%s32079_s7 + $0x2968] ss:$16 sps:$4 sm:$0xff]  }
 0xb0c   : > { %18212 = vmatpush1.bf16.msra.mxu0 %v24509_v28  ;;  %17188 = vmatprep.subr.bf16.mxu1 %v24514_v5  ;;  %v24598_v28 = vld [vmem:[%s32079_s7 + $0x2984] ss:$16 sps:$4 sm:$0xff]   ;;  %v24601_v5 = vld [vmem:[%s32079_s7 + $0x298c] ss:$16 sps:$4 sm:$0xff]  }
 0xb0d   : > { %18213 = vmatprep.subr.bf16.mxu0 %v24517_v58  ;;  %v24596_v58 = vld [vmem:[%s32079_s7 + $0x2980] ss:$16 sps:$4 sm:$0xff]  }
 0xb0f   : > { %17189 = vmatpush1.bf16.msra.mxu1 %v24512_v14  ;;  %v24599_v14 = vld [vmem:[%s32079_s7 + $0x2988] ss:$16 sps:$4 sm:$0xff]  }
 0xb10   : > { %18214 = vmatpush1.bf16.msra.mxu0 %v24515_v19  ;;  %17190 = vmatprep.subr.bf16.mxu1 %v24520_v43  ;;  %v24604_v19 = vld [vmem:[%s32079_s7 + $0x29a4] ss:$16 sps:$4 sm:$0xff]   ;;  %v24607_v43 = vld [vmem:[%s32079_s7 + $0x29ac] ss:$16 sps:$4 sm:$0xff]  }
 0xb11   : > { %18215 = vmatprep.subr.bf16.mxu0 %v24523_v13  ;;  %v24602_v13 = vld [vmem:[%s32079_s7 + $0x29a0] ss:$16 sps:$4 sm:$0xff]  }
 0xb13   : > { %17191 = vmatpush1.bf16.msra.mxu1 %v24518_v23  ;;  %v24605_v23 = vld [vmem:[%s32079_s7 + $0x29a8] ss:$16 sps:$4 sm:$0xff]  }
 0xb14   : > { %18216 = vmatpush1.bf16.msra.mxu0 %v24521_v59  ;;  %17201 = vmatprep.subr.bf16.mxu1 %v24526_v17  ;;  %v24610_v59 = vld [vmem:[%s32079_s7 + $0x29c4] ss:$16 sps:$4 sm:$0xff]   ;;  %v24613_v17 = vld [vmem:[%s32079_s7 + $0x29cc] ss:$16 sps:$4 sm:$0xff]  }
 0xb15   : > { %18226 = vmatprep.subr.bf16.mxu0 %v24529_v51  ;;  %v24608_v51 = vld [vmem:[%s32079_s7 + $0x29c0] ss:$16 sps:$4 sm:$0xff]  }
 0xb16   : > { %17193 = vmatmul.mubr.bf16.vlgmr.msra.gmra.mrb[32].mxu1 %v8405_v60 }
 0xb17   : > { %18218 = vmatmul.mubr.bf16.vlgmr.msra.gmra.mrb[16].mxu0 %v8405_v60  ;;  %17202 = vmatpush1.bf16.msra.mxu1 %v24524_v61  ;;  %v24616_v61 = vld [vmem:[%s32079_s7 + $0x29e4] ss:$16 sps:$4 sm:$0xff]   ;;  %v24619_v60 = vld [vmem:[%s32079_s7 + $0x29ec] ss:$16 sps:$4 sm:$0xff]  }
 0xb18   : > { %17233 = vmatprep.mubr.bf16.mxu1 %v31070_v35  ;;  %18227 = vmatpush1.bf16.msra.mxu0 %v24527_v41  ;;  %v24614_v41 = vld [vmem:[%s32079_s7 + $0x29e0] ss:$16 sps:$4 sm:$0xff]  }
 0xb19   : > { %18258 = vmatprep.mubr.bf16.mxu0 %v31070_v35  ;;  %17203 = vmatprep.subr.bf16.mxu1 %v24532_v44  ;;  %v24617_v44 = vld [vmem:[%s32079_s7 + $0x29e8] ss:$16 sps:$4 sm:$0xff]  }
 0xb1a   : > { %18228 = vmatprep.subr.bf16.mxu0 %v24535_v45  ;;  %v24622_v45 = vld [vmem:[%s32079_s7 + $0x2a04] ss:$16 sps:$4 sm:$0xff]  }
 0xb1b   : > { %17204 = vmatpush1.bf16.msra.mxu1 %v24530_v6  ;;  %v24625_v6 = vld [vmem:[%s32079_s7 + $0x2a0c] ss:$16 sps:$4 sm:$0xff]  }
 0xb1c   : > { %18229 = vmatpush1.bf16.msra.mxu0 %v24533_v37  ;;  %17205 = vmatprep.subr.bf16.mxu1 %v24538_v20  ;;  %v24620_v37 = vld [vmem:[%s32079_s7 + $0x2a00] ss:$16 sps:$4 sm:$0xff]   ;;  %v31262_v20 = vrot.slane %v31042_v55, %v27039_v29  ;;  %v24631_v55 = vld [vmem:[%s32079_s7 + $0x2a2c] ss:$16 sps:$4 sm:$0xff]  }
 0xb1d   : > { %18230 = vmatprep.subr.bf16.mxu0 %v24541_v57  ;;  %v24623_v57 = vld [vmem:[%s32079_s7 + $0x2a08] ss:$16 sps:$4 sm:$0xff]  }
 0xb1f   : > { %17206 = vmatpush1.bf16.msra.mxu1 %v24536_v18  ;;  %v24628_v18 = vld [vmem:[%s32079_s7 + $0x2a24] ss:$16 sps:$4 sm:$0xff]  }
 0xb20   : > { %18231 = vmatpush1.bf16.msra.mxu0 %v24539_v46  ;;  %17207 = vmatprep.subr.bf16.mxu1 %v24544_v36  ;;  %v8455_v46 = vcombine.high %v31070_v35, %v31070_v35  ;;  %v24626_v36 = vld [vmem:[%s32079_s7 + $0x2a20] ss:$16 sps:$4 sm:$0xff]   ;;  %v24634_v35 = vld [vmem:[%s32079_s7 + $0x2a44] ss:$16 sps:$4 sm:$0xff]  }
 0xb21   : > { %18232 = vmatprep.subr.bf16.mxu0 %v24547_v11  ;;  %v24629_v11 = vld [vmem:[%s32079_s7 + $0x2a28] ss:$16 sps:$4 sm:$0xff]  }
 0xb23   : > { %17208 = vmatpush1.bf16.msra.mxu1 %v24542_v24  ;;  %v24637_v24 = vld [vmem:[%s32079_s7 + $0x2a4c] ss:$16 sps:$4 sm:$0xff]  }
 0xb24   : > { %18233 = vmatpush1.bf16.msra.mxu0 %v24545_v47  ;;  %17209 = vmatprep.subr.bf16.mxu1 %v24550_v26  ;;  %v24632_v47 = vld [vmem:[%s32079_s7 + $0x2a40] ss:$16 sps:$4 sm:$0xff]   ;;  %v24635_v26 = vld [vmem:[%s32079_s7 + $0x2a48] ss:$16 sps:$4 sm:$0xff]  }
 0xb25   : > { %18234 = vmatprep.subr.bf16.mxu0 %v24553_v49  ;;  %v24640_v49 = vld [vmem:[%s32079_s7 + $0x2a64] ss:$16 sps:$4 sm:$0xff]  }
 0xb27   : > { %17210 = vmatpush1.bf16.msra.mxu1 %v24548_v16  ;;  %v24643_v16 = vld [vmem:[%s32079_s7 + $0x2a6c] ss:$16 sps:$4 sm:$0xff]  }
 0xb28   : > { %18235 = vmatpush1.bf16.msra.mxu0 %v24551_v63  ;;  %17211 = vmatprep.subr.bf16.mxu1 %v24556_v50  ;;  %v24638_v63 = vld [vmem:[%s32079_s7 + $0x2a60] ss:$16 sps:$4 sm:$0xff]   ;;  %v24641_v50 = vld [vmem:[%s32079_s7 + $0x2a68] ss:$16 sps:$4 sm:$0xff]  }
 0xb29   : > { %18236 = vmatprep.subr.bf16.mxu0 %v24559_v21  ;;  %v24646_v21 = vld [vmem:[%s32079_s7 + $0x2a84] ss:$16 sps:$4 sm:$0xff]  }
 0xb2b   : > { %17212 = vmatpush1.bf16.msra.mxu1 %v24554_v4  ;;  %v24649_v4 = vld [vmem:[%s32079_s7 + $0x2a8c] ss:$16 sps:$4 sm:$0xff]  }
 0xb2c   : > { %18237 = vmatpush1.bf16.msra.mxu0 %v24557_v15  ;;  %17213 = vmatprep.subr.bf16.mxu1 %v24562_v3  ;;  %v24644_v15 = vld [vmem:[%s32079_s7 + $0x2a80] ss:$16 sps:$4 sm:$0xff]   ;;  %v24647_v3 = vld [vmem:[%s32079_s7 + $0x2a88] ss:$16 sps:$4 sm:$0xff]  }
 0xb2d   : > { %18238 = vmatprep.subr.bf16.mxu0 %v24565_v27  ;;  %v24652_v27 = vld [vmem:[%s32079_s7 + $0x2aa4] ss:$16 sps:$4 sm:$0xff]  }
 0xb2f   : > { %17214 = vmatpush1.bf16.msra.mxu1 %v24560_v39  ;;  %v24655_v39 = vld [vmem:[%s32079_s7 + $0x2aac] ss:$16 sps:$4 sm:$0xff]  }
 0xb30   : > { %18239 = vmatpush1.bf16.msra.mxu0 %v24563_v53  ;;  %17215 = vmatprep.subr.bf16.mxu1 %v24568_v12  ;;  %v24650_v53 = vld [vmem:[%s32079_s7 + $0x2aa0] ss:$16 sps:$4 sm:$0xff]   ;;  %v24653_v12 = vld [vmem:[%s32079_s7 + $0x2aa8] ss:$16 sps:$4 sm:$0xff]  }
 0xb31   : > { %18240 = vmatprep.subr.bf16.mxu0 %v24571_v22  ;;  %v24658_v22 = vld [vmem:[%s32079_s7 + $0x2ac4] ss:$16 sps:$4 sm:$0xff]  }
 0xb33   : > { %17216 = vmatpush1.bf16.msra.mxu1 %v24566_v8  ;;  %v24661_v8 = vld [vmem:[%s32079_s7 + $0x2acc] ss:$16 sps:$4 sm:$0xff]  }
 0xb34   : > { %18241 = vmatpush1.bf16.msra.mxu0 %v24569_v38  ;;  %17217 = vmatprep.subr.bf16.mxu1 %v24574_v62  ;;  %v24656_v38 = vld [vmem:[%s32079_s7 + $0x2ac0] ss:$16 sps:$4 sm:$0xff]   ;;  %v24659_v62 = vld [vmem:[%s32079_s7 + $0x2ac8] ss:$16 sps:$4 sm:$0xff]  }
 0xb35   : > { %18242 = vmatprep.subr.bf16.mxu0 %v24577_v54  ;;  %v24664_v54 = vld [vmem:[%s32079_s7 + $0x2ae4] ss:$16 sps:$4 sm:$0xff]  }
 0xb37   : > { %17218 = vmatpush1.bf16.msra.mxu1 %v24572_v52  ;;  %v24667_v52 = vld [vmem:[%s32079_s7 + $0x2aec] ss:$16 sps:$4 sm:$0xff]  }
 0xb38   : > { %18243 = vmatpush1.bf16.msra.mxu0 %v24575_v34  ;;  %17219 = vmatprep.subr.bf16.mxu1 %v24580_v40  ;;  %v24662_v34 = vld [vmem:[%s32079_s7 + $0x2ae0] ss:$16 sps:$4 sm:$0xff]   ;;  %v24665_v40 = vld [vmem:[%s32079_s7 + $0x2ae8] ss:$16 sps:$4 sm:$0xff]  }
 0xb39   : > { %18244 = vmatprep.subr.bf16.mxu0 %v24583_v56  ;;  %v24670_v56 = vld [vmem:[%s32079_s7 + $0x2b04] ss:$16 sps:$4 sm:$0xff]  }
 0xb3b   : > { %17220 = vmatpush1.bf16.msra.mxu1 %v24578_v7  ;;  %v24673_v7 = vld [vmem:[%s32079_s7 + $0x2b0c] ss:$16 sps:$4 sm:$0xff]  }
 0xb3c   : > { %18245 = vmatpush1.bf16.msra.mxu0 %v24581_v32  ;;  %17221 = vmatprep.subr.bf16.mxu1 %v24586_v10  ;;  %v24668_v32 = vld [vmem:[%s32079_s7 + $0x2b00] ss:$16 sps:$4 sm:$0xff]   ;;  %v24671_v10 = vld [vmem:[%s32079_s7 + $0x2b08] ss:$16 sps:$4 sm:$0xff]  }
 0xb3d   : > { %18246 = vmatprep.subr.bf16.mxu0 %v24589_v0  ;;  %v24676_v0 = vld [vmem:[%s32079_s7 + $0x2b24] ss:$16 sps:$4 sm:$0xff]  }
 0xb3f   : > { %17222 = vmatpush1.bf16.msra.mxu1 %v24584_v1  ;;  %v24679_v1 = vld [vmem:[%s32079_s7 + $0x2b2c] ss:$16 sps:$4 sm:$0xff]  }
 0xb40   : > { %18247 = vmatpush1.bf16.msra.mxu0 %v24587_v31  ;;  %17223 = vmatprep.subr.bf16.mxu1 %v24592_v25  ;;  %v24674_v31 = vld [vmem:[%s32079_s7 + $0x2b20] ss:$16 sps:$4 sm:$0xff]   ;;  %v24677_v25 = vld [vmem:[%s32079_s7 + $0x2b28] ss:$16 sps:$4 sm:$0xff]  }
 0xb41   : > { %18248 = vmatprep.subr.bf16.mxu0 %v24595_v30  ;;  %v24682_v30 = vld [vmem:[%s32079_s7 + $0x2b44] ss:$16 sps:$4 sm:$0xff]  }
 0xb43   : > { %17224 = vmatpush1.bf16.msra.mxu1 %v24590_v42  ;;  %v24685_v42 = vld [vmem:[%s32079_s7 + $0x2b4c] ss:$16 sps:$4 sm:$0xff]  }
 0xb44   : > { %18249 = vmatpush1.bf16.msra.mxu0 %v24593_v9  ;;  %17225 = vmatprep.subr.bf16.mxu1 %v24598_v28  ;;  %v24680_v9 = vld [vmem:[%s32079_s7 + $0x2b40] ss:$16 sps:$4 sm:$0xff]   ;;  %v24683_v28 = vld [vmem:[%s32079_s7 + $0x2b48] ss:$16 sps:$4 sm:$0xff]  }
 0xb45   : > { %18250 = vmatprep.subr.bf16.mxu0 %v24601_v5  ;;  %v24688_v5 = vld [vmem:[%s32079_s7 + $0x2b64] ss:$16 sps:$4 sm:$0xff]  }
 0xb47   : > { %17226 = vmatpush1.bf16.msra.mxu1 %v24596_v58  ;;  %v24691_v58 = vld [vmem:[%s32079_s7 + $0x2b6c] ss:$16 sps:$4 sm:$0xff]  }
 0xb48   : > { %18251 = vmatpush1.bf16.msra.mxu0 %v24599_v14  ;;  %17227 = vmatprep.subr.bf16.mxu1 %v24604_v19  ;;  %v24686_v14 = vld [vmem:[%s32079_s7 + $0x2b60] ss:$16 sps:$4 sm:$0xff]   ;;  %v24689_v19 = vld [vmem:[%s32079_s7 + $0x2b68] ss:$16 sps:$4 sm:$0xff]  }
 0xb49   : > { %18252 = vmatprep.subr.bf16.mxu0 %v24607_v43  ;;  %v24694_v43 = vld [vmem:[%s32079_s7 + $0x2b84] ss:$16 sps:$4 sm:$0xff]  }
 0xb4b   : > { %17228 = vmatpush1.bf16.msra.mxu1 %v24602_v13  ;;  %v24697_v13 = vld [vmem:[%s32079_s7 + $0x2b8c] ss:$16 sps:$4 sm:$0xff]  }
 0xb4c   : > { %18253 = vmatpush1.bf16.msra.mxu0 %v24605_v23  ;;  %17229 = vmatprep.subr.bf16.mxu1 %v24610_v59  ;;  %v24692_v23 = vld [vmem:[%s32079_s7 + $0x2b80] ss:$16 sps:$4 sm:$0xff]   ;;  %v24695_v59 = vld [vmem:[%s32079_s7 + $0x2b88] ss:$16 sps:$4 sm:$0xff]  }
 0xb4d   : > { %18254 = vmatprep.subr.bf16.mxu0 %v24613_v17  ;;  %v24700_v17 = vld [vmem:[%s32079_s7 + $0x2ba4] ss:$16 sps:$4 sm:$0xff]  }
 0xb4f   : > { %17230 = vmatpush1.bf16.msra.mxu1 %v24608_v51  ;;  %v24703_v51 = vld [vmem:[%s32079_s7 + $0x2bac] ss:$16 sps:$4 sm:$0xff]  }
 0xb50   : > { %18255 = vmatpush1.bf16.msra.mxu0 %v24611_v48  ;;  %17231 = vmatprep.subr.bf16.mxu1 %v24616_v61  ;;  %v24698_v48 = vld [vmem:[%s32079_s7 + $0x2ba0] ss:$16 sps:$4 sm:$0xff]   ;;  %v24701_v61 = vld [vmem:[%s32079_s7 + $0x2ba8] ss:$16 sps:$4 sm:$0xff]  }
 0xb51   : > { %18256 = vmatprep.subr.bf16.mxu0 %v24619_v60  ;;  %v24706_v60 = vld [vmem:[%s32079_s7 + $0x2bc4] ss:$16 sps:$4 sm:$0xff]  }
 0xb53   : > { %17232 = vmatpush1.bf16.msra.mxu1 %v24614_v41  ;;  %v24709_v41 = vld [vmem:[%s32079_s7 + $0x2bcc] ss:$16 sps:$4 sm:$0xff]  }
 0xb54   : > { %18257 = vmatpush1.bf16.msra.mxu0 %v24617_v44  ;;  %17242 = vmatprep.subr.bf16.mxu1 %v24622_v45  ;;  %v8408_v44 = vcombine.high %v31029_v33, %v31029_v33  ;;  %v24704_v45 = vld [vmem:[%s32079_s7 + $0x2bc0] ss:$16 sps:$4 sm:$0xff]   ;;  %v24715_v33 = vld [vmem:[%s32079_s7 + $0x2bec] ss:$16 sps:$4 sm:$0xff]  }
 0xb55   : > { %18267 = vmatprep.subr.bf16.mxu0 %v24625_v6  ;;  %v24707_v6 = vld [vmem:[%s32079_s7 + $0x2bc8] ss:$16 sps:$4 sm:$0xff]  }
 0xb56   : > { %17234 = vmatmul.mubr.bf16.vlgmr.msra.gmra.mrb[32].mxu1 %v31262_v20 }
 0xb57   : > { %18259 = vmatmul.mubr.bf16.vlgmr.msra.gmra.mrb[16].mxu0 %v31262_v20  ;;  %17243 = vmatpush1.bf16.msra.mxu1 %v24620_v37  ;;  %v24712_v37 = vld [vmem:[%s32079_s7 + $0x2be4] ss:$16 sps:$4 sm:$0xff]  }
 0xb58   : > { %17274 = vmatprep.mubr.bf16.mxu1 %v8455_v46  ;;  %18268 = vmatpush1.bf16.msra.mxu0 %v24623_v57  ;;  %v31448_v57 = vrot.slane %v8408_v44, %v27039_v29  ;;  %v24792_v44 = vld [vmem:[%s32079_s7 + $0x2d88] ss:$16 sps:$4 sm:$0xff]  }
 0xb59   : > { %18299 = vmatprep.mubr.bf16.mxu0 %v8455_v46  ;;  %17244 = vmatprep.subr.bf16.mxu1 %v24628_v18  ;;  %v24710_v18 = vld [vmem:[%s32079_s7 + $0x2be0] ss:$16 sps:$4 sm:$0xff]   ;;  %v24713_v46 = vld [vmem:[%s32079_s7 + $0x2be8] ss:$16 sps:$4 sm:$0xff]  }
 0xb5a   : > { %18269 = vmatprep.subr.bf16.mxu0 %v24631_v55  ;;  %v24718_v55 = vld [vmem:[%s32079_s7 + $0x2c04] ss:$16 sps:$4 sm:$0xff]  }
 0xb5b   : > { %17245 = vmatpush1.bf16.msra.mxu1 %v24626_v36  ;;  %v24721_v36 = vld [vmem:[%s32079_s7 + $0x2c0c] ss:$16 sps:$4 sm:$0xff]  }
 0xb5c   : > { %18270 = vmatpush1.bf16.msra.mxu0 %v24629_v11  ;;  %17246 = vmatprep.subr.bf16.mxu1 %v24634_v35  ;;  %v8424_v11 = vcombine.high %v31448_v57, %v31448_v57  ;;  %v24716_v35 = vld [vmem:[%s32079_s7 + $0x2c00] ss:$16 sps:$4 sm:$0xff]  }
 0xb5d   : > { %18271 = vmatprep.subr.bf16.mxu0 %v24637_v24  ;;  %v8453_v24 = vcombine.high %v31262_v20, %v31262_v20  ;;  %v24723_v20 = vld [vmem:[%s32079_s7 + $0x2c20] ss:$16 sps:$4 sm:$0xff]  }
 0xb5f   : > { %17247 = vmatpush1.bf16.msra.mxu1 %v24632_v47  ;;  %v24719_v47 = vld [vmem:[%s32079_s7 + $0x2c08] ss:$16 sps:$4 sm:$0xff]  }
 0xb60   : > { %18272 = vmatpush1.bf16.msra.mxu0 %v24635_v26  ;;  %17248 = vmatprep.subr.bf16.mxu1 %v24640_v49  ;;  %v24725_v26 = vld [vmem:[%s32079_s7 + $0x2c24] ss:$16 sps:$4 sm:$0xff]   ;;  %v31476_v49 = vrot.slane %v8424_v11, %v27039_v29 }
 0xb61   : > { %18273 = vmatprep.subr.bf16.mxu0 %v24643_v16  ;;  %v24728_v16 = vld [vmem:[%s32079_s7 + $0x2c2c] ss:$16 sps:$4 sm:$0xff]   ;;  %v24809_v11 = vld [vmem:[%s32079_s7 + $0x2de4] ss:$16 sps:$4 sm:$0xff]  }
 0xb63   : > { %17249 = vmatpush1.bf16.msra.mxu1 %v24638_v63  ;;  %v24726_v63 = vld [vmem:[%s32079_s7 + $0x2c28] ss:$16 sps:$4 sm:$0xff]  }
 0xb64   : > { %18274 = vmatpush1.bf16.msra.mxu0 %v24641_v50  ;;  %17250 = vmatprep.subr.bf16.mxu1 %v24646_v21  ;;  %v24731_v50 = vld [vmem:[%s32079_s7 + $0x2c44] ss:$16 sps:$4 sm:$0xff]   ;;  %v24734_v21 = vld [vmem:[%s32079_s7 + $0x2c4c] ss:$16 sps:$4 sm:$0xff]  }
 0xb65   : > { %18275 = vmatprep.subr.bf16.mxu0 %v24649_v4  ;;  %v24729_v4 = vld [vmem:[%s32079_s7 + $0x2c40] ss:$16 sps:$4 sm:$0xff]  }
 0xb67   : > { %17251 = vmatpush1.bf16.msra.mxu1 %v24644_v15  ;;  %v24732_v15 = vld [vmem:[%s32079_s7 + $0x2c48] ss:$16 sps:$4 sm:$0xff]  }
 0xb68   : > { %18276 = vmatpush1.bf16.msra.mxu0 %v24647_v3  ;;  %17252 = vmatprep.subr.bf16.mxu1 %v24652_v27  ;;  %v24737_v3 = vld [vmem:[%s32079_s7 + $0x2c64] ss:$16 sps:$4 sm:$0xff]   ;;  %v24740_v27 = vld [vmem:[%s32079_s7 + $0x2c6c] ss:$16 sps:$4 sm:$0xff]  }
 0xb69   : > { %18277 = vmatprep.subr.bf16.mxu0 %v24655_v39  ;;  %v24735_v39 = vld [vmem:[%s32079_s7 + $0x2c60] ss:$16 sps:$4 sm:$0xff]  }
 0xb6b   : > { %17253 = vmatpush1.bf16.msra.mxu1 %v24650_v53  ;;  %v24738_v53 = vld [vmem:[%s32079_s7 + $0x2c68] ss:$16 sps:$4 sm:$0xff]  }
 0xb6c   : > { %18278 = vmatpush1.bf16.msra.mxu0 %v24653_v12  ;;  %17254 = vmatprep.subr.bf16.mxu1 %v24658_v22  ;;  %v24743_v12 = vld [vmem:[%s32079_s7 + $0x2c84] ss:$16 sps:$4 sm:$0xff]   ;;  %v24746_v22 = vld [vmem:[%s32079_s7 + $0x2c8c] ss:$16 sps:$4 sm:$0xff]  }
 0xb6d   : > { %18279 = vmatprep.subr.bf16.mxu0 %v24661_v8  ;;  %v24741_v8 = vld [vmem:[%s32079_s7 + $0x2c80] ss:$16 sps:$4 sm:$0xff]  }
 0xb6f   : > { %17255 = vmatpush1.bf16.msra.mxu1 %v24656_v38  ;;  %v24744_v38 = vld [vmem:[%s32079_s7 + $0x2c88] ss:$16 sps:$4 sm:$0xff]  }
 0xb70   : > { %18280 = vmatpush1.bf16.msra.mxu0 %v24659_v62  ;;  %17256 = vmatprep.subr.bf16.mxu1 %v24664_v54  ;;  %v24749_v62 = vld [vmem:[%s32079_s7 + $0x2ca4] ss:$16 sps:$4 sm:$0xff]   ;;  %v24752_v54 = vld [vmem:[%s32079_s7 + $0x2cac] ss:$16 sps:$4 sm:$0xff]  }
 0xb71   : > { %18281 = vmatprep.subr.bf16.mxu0 %v24667_v52  ;;  %v24747_v52 = vld [vmem:[%s32079_s7 + $0x2ca0] ss:$16 sps:$4 sm:$0xff]  }
 0xb73   : > { %17257 = vmatpush1.bf16.msra.mxu1 %v24662_v34  ;;  %v24750_v34 = vld [vmem:[%s32079_s7 + $0x2ca8] ss:$16 sps:$4 sm:$0xff]  }
 0xb74   : > { %18282 = vmatpush1.bf16.msra.mxu0 %v24665_v40  ;;  %17258 = vmatprep.subr.bf16.mxu1 %v24670_v56  ;;  %v24755_v40 = vld [vmem:[%s32079_s7 + $0x2cc4] ss:$16 sps:$4 sm:$0xff]   ;;  %v24758_v56 = vld [vmem:[%s32079_s7 + $0x2ccc] ss:$16 sps:$4 sm:$0xff]  }
 0xb75   : > { %18283 = vmatprep.subr.bf16.mxu0 %v24673_v7  ;;  %v24753_v7 = vld [vmem:[%s32079_s7 + $0x2cc0] ss:$16 sps:$4 sm:$0xff]  }
 0xb77   : > { %17259 = vmatpush1.bf16.msra.mxu1 %v24668_v32  ;;  %v24756_v32 = vld [vmem:[%s32079_s7 + $0x2cc8] ss:$16 sps:$4 sm:$0xff]  }
 0xb78   : > { %18284 = vmatpush1.bf16.msra.mxu0 %v24671_v10  ;;  %17260 = vmatprep.subr.bf16.mxu1 %v24676_v0  ;;  %v24761_v10 = vld [vmem:[%s32079_s7 + $0x2ce4] ss:$16 sps:$4 sm:$0xff]   ;;  %v24764_v0 = vld [vmem:[%s32079_s7 + $0x2cec] ss:$16 sps:$4 sm:$0xff]  }
 0xb79   : > { %18285 = vmatprep.subr.bf16.mxu0 %v24679_v1  ;;  %v24759_v1 = vld [vmem:[%s32079_s7 + $0x2ce0] ss:$16 sps:$4 sm:$0xff]  }
 0xb7b   : > { %17261 = vmatpush1.bf16.msra.mxu1 %v24674_v31  ;;  %v24762_v31 = vld [vmem:[%s32079_s7 + $0x2ce8] ss:$16 sps:$4 sm:$0xff]  }
 0xb7c   : > { %18286 = vmatpush1.bf16.msra.mxu0 %v24677_v25  ;;  %17262 = vmatprep.subr.bf16.mxu1 %v24682_v30  ;;  %v24767_v25 = vld [vmem:[%s32079_s7 + $0x2d04] ss:$16 sps:$4 sm:$0xff]   ;;  %v24770_v30 = vld [vmem:[%s32079_s7 + $0x2d0c] ss:$16 sps:$4 sm:$0xff]  }
 0xb7d   : > { %18287 = vmatprep.subr.bf16.mxu0 %v24685_v42  ;;  %v24765_v42 = vld [vmem:[%s32079_s7 + $0x2d00] ss:$16 sps:$4 sm:$0xff]  }
 0xb7f   : > { %17263 = vmatpush1.bf16.msra.mxu1 %v24680_v9  ;;  %v24768_v9 = vld [vmem:[%s32079_s7 + $0x2d08] ss:$16 sps:$4 sm:$0xff]  }
 0xb80   : > { %18288 = vmatpush1.bf16.msra.mxu0 %v24683_v28  ;;  %17264 = vmatprep.subr.bf16.mxu1 %v24688_v5  ;;  %v24773_v28 = vld [vmem:[%s32079_s7 + $0x2d24] ss:$16 sps:$4 sm:$0xff]   ;;  %v24776_v5 = vld [vmem:[%s32079_s7 + $0x2d2c] ss:$16 sps:$4 sm:$0xff]  }
 0xb81   : > { %18289 = vmatprep.subr.bf16.mxu0 %v24691_v58  ;;  %v24771_v58 = vld [vmem:[%s32079_s7 + $0x2d20] ss:$16 sps:$4 sm:$0xff]  }
 0xb83   : > { %17265 = vmatpush1.bf16.msra.mxu1 %v24686_v14  ;;  %v24774_v14 = vld [vmem:[%s32079_s7 + $0x2d28] ss:$16 sps:$4 sm:$0xff]  }
 0xb84   : > { %18290 = vmatpush1.bf16.msra.mxu0 %v24689_v19  ;;  %17266 = vmatprep.subr.bf16.mxu1 %v24694_v43  ;;  %v24779_v19 = vld [vmem:[%s32079_s7 + $0x2d44] ss:$16 sps:$4 sm:$0xff]   ;;  %v24782_v43 = vld [vmem:[%s32079_s7 + $0x2d4c] ss:$16 sps:$4 sm:$0xff]  }
 0xb85   : > { %18291 = vmatprep.subr.bf16.mxu0 %v24697_v13  ;;  %v24777_v13 = vld [vmem:[%s32079_s7 + $0x2d40] ss:$16 sps:$4 sm:$0xff]  }
 0xb87   : > { %17267 = vmatpush1.bf16.msra.mxu1 %v24692_v23  ;;  %v24780_v23 = vld [vmem:[%s32079_s7 + $0x2d48] ss:$16 sps:$4 sm:$0xff]  }
 0xb88   : > { %18292 = vmatpush1.bf16.msra.mxu0 %v24695_v59  ;;  %17268 = vmatprep.subr.bf16.mxu1 %v24700_v17  ;;  %v24785_v59 = vld [vmem:[%s32079_s7 + $0x2d64] ss:$16 sps:$4 sm:$0xff]   ;;  %v24788_v17 = vld [vmem:[%s32079_s7 + $0x2d6c] ss:$16 sps:$4 sm:$0xff]  }
 0xb89   : > { %18293 = vmatprep.subr.bf16.mxu0 %v24703_v51  ;;  %v24783_v51 = vld [vmem:[%s32079_s7 + $0x2d60] ss:$16 sps:$4 sm:$0xff]  }
 0xb8b   : > { %17269 = vmatpush1.bf16.msra.mxu1 %v24698_v48  ;;  %v24786_v48 = vld [vmem:[%s32079_s7 + $0x2d68] ss:$16 sps:$4 sm:$0xff]  }
 0xb8c   : > { %18294 = vmatpush1.bf16.msra.mxu0 %v24701_v61  ;;  %17270 = vmatprep.subr.bf16.mxu1 %v24706_v60  ;;  %v24791_v61 = vld [vmem:[%s32079_s7 + $0x2d84] ss:$16 sps:$4 sm:$0xff]   ;;  %v24794_v60 = vld [vmem:[%s32079_s7 + $0x2d8c] ss:$16 sps:$4 sm:$0xff]  }
 0xb8d   : > { %18295 = vmatprep.subr.bf16.mxu0 %v24709_v41  ;;  %v24789_v41 = vld [vmem:[%s32079_s7 + $0x2d80] ss:$16 sps:$4 sm:$0xff]  }
 0xb8f   : > { %17271 = vmatpush1.bf16.msra.mxu1 %v24704_v45  ;;  %v24797_v45 = vld [vmem:[%s32079_s7 + $0x2da4] ss:$16 sps:$4 sm:$0xff]  }
 0xb90   : > { %18296 = vmatpush1.bf16.msra.mxu0 %v24707_v6  ;;  %17272 = vmatprep.subr.bf16.mxu1 %v24712_v37  ;;  %v24800_v6 = vld [vmem:[%s32079_s7 + $0x2dac] ss:$16 sps:$4 sm:$0xff]   ;;  %v24795_v37 = vld [vmem:[%s32079_s7 + $0x2da0] ss:$16 sps:$4 sm:$0xff]  }
 0xb91   : > { %18297 = vmatprep.subr.bf16.mxu0 %v24715_v33  ;;  %v24798_v33 = vld [vmem:[%s32079_s7 + $0x2da8] ss:$16 sps:$4 sm:$0xff]  }
 0xb93   : > { %17273 = vmatpush1.bf16.msra.mxu1 %v24710_v18  ;;  %v24803_v18 = vld [vmem:[%s32079_s7 + $0x2dc4] ss:$16 sps:$4 sm:$0xff]  }
 0xb94   : > { %18298 = vmatpush1.bf16.msra.mxu0 %v24713_v46  ;;  %17283 = vmatprep.subr.bf16.mxu1 %v24718_v55  ;;  %v24806_v46 = vld [vmem:[%s32079_s7 + $0x2dcc] ss:$16 sps:$4 sm:$0xff]   ;;  %v24801_v55 = vld [vmem:[%s32079_s7 + $0x2dc0] ss:$16 sps:$4 sm:$0xff]  }
 0xb95   : > { %18308 = vmatprep.subr.bf16.mxu0 %v24721_v36  ;;  %v24804_v36 = vld [vmem:[%s32079_s7 + $0x2dc8] ss:$16 sps:$4 sm:$0xff]  }
 0xb96   : > { %17275 = vmatmul.mubr.bf16.vlgmr.msra.gmra.mrb[32].mxu1 %v8453_v24 }
 0xb97   : > { %18300 = vmatmul.mubr.bf16.vlgmr.msra.gmra.mrb[16].mxu0 %v8453_v24  ;;  %17284 = vmatpush1.bf16.msra.mxu1 %v24716_v35  ;;  %v24812_v35 = vld [vmem:[%s32079_s7 + $0x2dec] ss:$16 sps:$4 sm:$0xff]   ;;  %v24807_v24 = vld [vmem:[%s32079_s7 + $0x2de0] ss:$16 sps:$4 sm:$0xff]  }
 0xb98   : > { %17315 = vmatprep.mubr.bf16.mxu1 %v31476_v49  ;;  %18309 = vmatpush1.bf16.msra.mxu0 %v24719_v47  ;;  %v24810_v47 = vld [vmem:[%s32079_s7 + $0x2de8] ss:$16 sps:$4 sm:$0xff]  }
 0xb99   : > { %18340 = vmatprep.mubr.bf16.mxu0 %v31476_v49  ;;  %17285 = vmatprep.subr.bf16.mxu1 %v24725_v26  ;;  %v24815_v26 = vld [vmem:[%s32079_s7 + $0x2e04] ss:$16 sps:$4 sm:$0xff]  }
 0xb9a   : > { %18310 = vmatprep.subr.bf16.mxu0 %v24728_v16  ;;  %v24818_v16 = vld [vmem:[%s32079_s7 + $0x2e0c] ss:$16 sps:$4 sm:$0xff]  }
 0xb9b   : > { %17286 = vmatpush1.bf16.msra.mxu1 %v24723_v20  ;;  %v24813_v20 = vld [vmem:[%s32079_s7 + $0x2e00] ss:$16 sps:$4 sm:$0xff]  }
 0xb9c   : > { %18311 = vmatpush1.bf16.msra.mxu0 %v24726_v63  ;;  %17287 = vmatprep.subr.bf16.mxu1 %v24731_v50  ;;  %v31668_v63 = vrot.slane %v31448_v57, %v27039_v29  ;;  %v24816_v50 = vld [vmem:[%s32079_s7 + $0x2e08] ss:$16 sps:$4 sm:$0xff]   ;;  %v24824_v57 = vld [vmem:[%s32079_s7 + $0x2e2c] ss:$16 sps:$4 sm:$0xff]  }
 0xb9d   : > { %18312 = vmatprep.subr.bf16.mxu0 %v24734_v21  ;;  %v24821_v21 = vld [vmem:[%s32079_s7 + $0x2e24] ss:$16 sps:$4 sm:$0xff]  }
 0xb9f   : > { %17288 = vmatpush1.bf16.msra.mxu1 %v24729_v4  ;;  %v8456_v4 = vcombine.high %v31476_v49, %v31476_v49  ;;  %v24827_v49 = vld [vmem:[%s32079_s7 + $0x2e44] ss:$16 sps:$4 sm:$0xff]  }
 0xba0   : > { %18313 = vmatpush1.bf16.msra.mxu0 %v24732_v15  ;;  %17289 = vmatprep.subr.bf16.mxu1 %v24737_v3  ;;  %v24819_v15 = vld [vmem:[%s32079_s7 + $0x2e20] ss:$16 sps:$4 sm:$0xff]   ;;  %v24822_v3 = vld [vmem:[%s32079_s7 + $0x2e28] ss:$16 sps:$4 sm:$0xff]  }
 0xba1   : > { %18314 = vmatprep.subr.bf16.mxu0 %v24740_v27  ;;  %v24830_v27 = vld [vmem:[%s32079_s7 + $0x2e4c] ss:$16 sps:$4 sm:$0xff]  }
 0xba3   : > { %17290 = vmatpush1.bf16.msra.mxu1 %v24735_v39  ;;  %v24825_v39 = vld [vmem:[%s32079_s7 + $0x2e40] ss:$16 sps:$4 sm:$0xff]  }
 0xba4   : > { %18315 = vmatpush1.bf16.msra.mxu0 %v24738_v53  ;;  %17291 = vmatprep.subr.bf16.mxu1 %v24743_v12  ;;  %v24828_v53 = vld [vmem:[%s32079_s7 + $0x2e48] ss:$16 sps:$4 sm:$0xff]   ;;  %v24833_v12 = vld [vmem:[%s32079_s7 + $0x2e64] ss:$16 sps:$4 sm:$0xff]  }
 0xba5   : > { %18316 = vmatprep.subr.bf16.mxu0 %v24746_v22  ;;  %v24836_v22 = vld [vmem:[%s32079_s7 + $0x2e6c] ss:$16 sps:$4 sm:$0xff]  }
 0xba7   : > { %17292 = vmatpush1.bf16.msra.mxu1 %v24741_v8  ;;  %v24831_v8 = vld [vmem:[%s32079_s7 + $0x2e60] ss:$16 sps:$4 sm:$0xff]  }
 0xba8   : > { %18317 = vmatpush1.bf16.msra.mxu0 %v24744_v38  ;;  %17293 = vmatprep.subr.bf16.mxu1 %v24749_v62  ;;  %v24834_v38 = vld [vmem:[%s32079_s7 + $0x2e68] ss:$16 sps:$4 sm:$0xff]   ;;  %v24839_v62 = vld [vmem:[%s32079_s7 + $0x2e84] ss:$16 sps:$4 sm:$0xff]  }
 0xba9   : > { %18318 = vmatprep.subr.bf16.mxu0 %v24752_v54  ;;  %v24842_v54 = vld [vmem:[%s32079_s7 + $0x2e8c] ss:$16 sps:$4 sm:$0xff]  }
 0xbab   : > { %17294 = vmatpush1.bf16.msra.mxu1 %v24747_v52  ;;  %v24837_v52 = vld [vmem:[%s32079_s7 + $0x2e80] ss:$16 sps:$4 sm:$0xff]  }
 0xbac   : > { %18319 = vmatpush1.bf16.msra.mxu0 %v24750_v34  ;;  %17295 = vmatprep.subr.bf16.mxu1 %v24755_v40  ;;  %v24840_v34 = vld [vmem:[%s32079_s7 + $0x2e88] ss:$16 sps:$4 sm:$0xff]   ;;  %v24845_v40 = vld [vmem:[%s32079_s7 + $0x2ea4] ss:$16 sps:$4 sm:$0xff]  }
 0xbad   : > { %18320 = vmatprep.subr.bf16.mxu0 %v24758_v56  ;;  %v24848_v56 = vld [vmem:[%s32079_s7 + $0x2eac] ss:$16 sps:$4 sm:$0xff]  }
 0xbaf   : > { %17296 = vmatpush1.bf16.msra.mxu1 %v24753_v7  ;;  %v24843_v7 = vld [vmem:[%s32079_s7 + $0x2ea0] ss:$16 sps:$4 sm:$0xff]  }
 0xbb0   : > { %18321 = vmatpush1.bf16.msra.mxu0 %v24756_v32  ;;  %17297 = vmatprep.subr.bf16.mxu1 %v24761_v10  ;;  %v24846_v32 = vld [vmem:[%s32079_s7 + $0x2ea8] ss:$16 sps:$4 sm:$0xff]   ;;  %v24851_v10 = vld [vmem:[%s32079_s7 + $0x2ec4] ss:$16 sps:$4 sm:$0xff]  }
 0xbb1   : > { %18322 = vmatprep.subr.bf16.mxu0 %v24764_v0  ;;  %v24854_v0 = vld [vmem:[%s32079_s7 + $0x2ecc] ss:$16 sps:$4 sm:$0xff]  }
 0xbb3   : > { %17298 = vmatpush1.bf16.msra.mxu1 %v24759_v1  ;;  %v24849_v1 = vld [vmem:[%s32079_s7 + $0x2ec0] ss:$16 sps:$4 sm:$0xff]  }
 0xbb4   : > { %18323 = vmatpush1.bf16.msra.mxu0 %v24762_v31  ;;  %17299 = vmatprep.subr.bf16.mxu1 %v24767_v25  ;;  %v24852_v31 = vld [vmem:[%s32079_s7 + $0x2ec8] ss:$16 sps:$4 sm:$0xff]   ;;  %v24857_v25 = vld [vmem:[%s32079_s7 + $0x2ee4] ss:$16 sps:$4 sm:$0xff]  }
 0xbb5   : > { %18324 = vmatprep.subr.bf16.mxu0 %v24770_v30  ;;  %v24860_v30 = vld [vmem:[%s32079_s7 + $0x2eec] ss:$16 sps:$4 sm:$0xff]  }
 0xbb7   : > { %17300 = vmatpush1.bf16.msra.mxu1 %v24765_v42  ;;  %v24855_v42 = vld [vmem:[%s32079_s7 + $0x2ee0] ss:$16 sps:$4 sm:$0xff]  }
 0xbb8   : > { %18325 = vmatpush1.bf16.msra.mxu0 %v24768_v9  ;;  %17301 = vmatprep.subr.bf16.mxu1 %v24773_v28  ;;  %v24858_v9 = vld [vmem:[%s32079_s7 + $0x2ee8] ss:$16 sps:$4 sm:$0xff]   ;;  %v24863_v28 = vld [vmem:[%s32079_s7 + $0x2f04] ss:$16 sps:$4 sm:$0xff]  }
 0xbb9   : > { %18326 = vmatprep.subr.bf16.mxu0 %v24776_v5  ;;  %v24866_v5 = vld [vmem:[%s32079_s7 + $0x2f0c] ss:$16 sps:$4 sm:$0xff]  }
 0xbbb   : > { %17302 = vmatpush1.bf16.msra.mxu1 %v24771_v58  ;;  %v24861_v58 = vld [vmem:[%s32079_s7 + $0x2f00] ss:$16 sps:$4 sm:$0xff]  }
 0xbbc   : > { %18327 = vmatpush1.bf16.msra.mxu0 %v24774_v14  ;;  %17303 = vmatprep.subr.bf16.mxu1 %v24779_v19  ;;  %v24864_v14 = vld [vmem:[%s32079_s7 + $0x2f08] ss:$16 sps:$4 sm:$0xff]   ;;  %v24869_v19 = vld [vmem:[%s32079_s7 + $0x2f24] ss:$16 sps:$4 sm:$0xff]  }
 0xbbd   : > { %18328 = vmatprep.subr.bf16.mxu0 %v24782_v43  ;;  %v24872_v43 = vld [vmem:[%s32079_s7 + $0x2f2c] ss:$16 sps:$4 sm:$0xff]  }
 0xbbf   : > { %17304 = vmatpush1.bf16.msra.mxu1 %v24777_v13  ;;  %v24867_v13 = vld [vmem:[%s32079_s7 + $0x2f20] ss:$16 sps:$4 sm:$0xff]  }
 0xbc0   : > { %18329 = vmatpush1.bf16.msra.mxu0 %v24780_v23  ;;  %17305 = vmatprep.subr.bf16.mxu1 %v24785_v59  ;;  %v24870_v23 = vld [vmem:[%s32079_s7 + $0x2f28] ss:$16 sps:$4 sm:$0xff]   ;;  %v24875_v59 = vld [vmem:[%s32079_s7 + $0x2f44] ss:$16 sps:$4 sm:$0xff]  }
 0xbc1   : > { %18330 = vmatprep.subr.bf16.mxu0 %v24788_v17  ;;  %v24878_v17 = vld [vmem:[%s32079_s7 + $0x2f4c] ss:$16 sps:$4 sm:$0xff]  }
 0xbc3   : > { %17306 = vmatpush1.bf16.msra.mxu1 %v24783_v51  ;;  %v24873_v51 = vld [vmem:[%s32079_s7 + $0x2f40] ss:$16 sps:$4 sm:$0xff]  }
 0xbc4   : > { %18331 = vmatpush1.bf16.msra.mxu0 %v24786_v48  ;;  %17307 = vmatprep.subr.bf16.mxu1 %v24791_v61  ;;  %v24876_v48 = vld [vmem:[%s32079_s7 + $0x2f48] ss:$16 sps:$4 sm:$0xff]   ;;  %v24881_v61 = vld [vmem:[%s32079_s7 + $0x2f64] ss:$16 sps:$4 sm:$0xff]  }
 0xbc5   : > { %18332 = vmatprep.subr.bf16.mxu0 %v24794_v60  ;;  %v24884_v60 = vld [vmem:[%s32079_s7 + $0x2f6c] ss:$16 sps:$4 sm:$0xff]  }
 0xbc7   : > { %17308 = vmatpush1.bf16.msra.mxu1 %v24789_v41  ;;  %v24879_v41 = vld [vmem:[%s32079_s7 + $0x2f60] ss:$16 sps:$4 sm:$0xff]  }
 0xbc8   : > { %18333 = vmatpush1.bf16.msra.mxu0 %v24792_v44  ;;  %17309 = vmatprep.subr.bf16.mxu1 %v24797_v45  ;;  %v24882_v44 = vld [vmem:[%s32079_s7 + $0x2f68] ss:$16 sps:$4 sm:$0xff]   ;;  %v24887_v45 = vld [vmem:[%s32079_s7 + $0x2f84] ss:$16 sps:$4 sm:$0xff]  }
 0xbc9   : > { %18334 = vmatprep.subr.bf16.mxu0 %v24800_v6  ;;  %v24890_v6 = vld [vmem:[%s32079_s7 + $0x2f8c] ss:$16 sps:$4 sm:$0xff]  }
 0xbcb   : > { %17310 = vmatpush1.bf16.msra.mxu1 %v24795_v37  ;;  %v24885_v37 = vld [vmem:[%s32079_s7 + $0x2f80] ss:$16 sps:$4 sm:$0xff]  }
 0xbcc   : > { %18335 = vmatpush1.bf16.msra.mxu0 %v24798_v33  ;;  %17311 = vmatprep.subr.bf16.mxu1 %v24803_v18  ;;  %v24888_v33 = vld [vmem:[%s32079_s7 + $0x2f88] ss:$16 sps:$4 sm:$0xff]   ;;  %v24893_v18 = vld [vmem:[%s32079_s7 + $0x2fa4] ss:$16 sps:$4 sm:$0xff]  }
 0xbcd   : > { %18336 = vmatprep.subr.bf16.mxu0 %v24806_v46  ;;  %v24896_v46 = vld [vmem:[%s32079_s7 + $0x2fac] ss:$16 sps:$4 sm:$0xff]  }
 0xbcf   : > { %17312 = vmatpush1.bf16.msra.mxu1 %v24801_v55  ;;  %v24891_v55 = vld [vmem:[%s32079_s7 + $0x2fa0] ss:$16 sps:$4 sm:$0xff]  }
 0xbd0   : > { %18337 = vmatpush1.bf16.msra.mxu0 %v24804_v36  ;;  %17313 = vmatprep.subr.bf16.mxu1 %v24809_v11  ;;  %v24894_v36 = vld [vmem:[%s32079_s7 + $0x2fa8] ss:$16 sps:$4 sm:$0xff]   ;;  %v24899_v11 = vld [vmem:[%s32079_s7 + $0x2fc4] ss:$16 sps:$4 sm:$0xff]  }
 0xbd1   : > { %18338 = vmatprep.subr.bf16.mxu0 %v24812_v35  ;;  %v24902_v35 = vld [vmem:[%s32079_s7 + $0x2fcc] ss:$16 sps:$4 sm:$0xff]  }
 0xbd3   : > { %17314 = vmatpush1.bf16.msra.mxu1 %v24807_v24  ;;  %v24897_v24 = vld [vmem:[%s32079_s7 + $0x2fc0] ss:$16 sps:$4 sm:$0xff]  }
 0xbd4   : > { %18339 = vmatpush1.bf16.msra.mxu0 %v24810_v47  ;;  %17324 = vmatprep.subr.bf16.mxu1 %v24815_v26  ;;  %v24900_v47 = vld [vmem:[%s32079_s7 + $0x2fc8] ss:$16 sps:$4 sm:$0xff]   ;;  %v24905_v26 = vld [vmem:[%s32079_s7 + $0x2fe4] ss:$16 sps:$4 sm:$0xff]  }
 0xbd5   : > { %18349 = vmatprep.subr.bf16.mxu0 %v24818_v16  ;;  %v24908_v16 = vld [vmem:[%s32079_s7 + $0x2fec] ss:$16 sps:$4 sm:$0xff]  }
 0xbd6   : > { %17316 = vmatmul.mubr.bf16.vlgmr.msra.gmra.mrb[32].mxu1 %v31668_v63 }
 0xbd7   : > { %18341 = vmatmul.mubr.bf16.vlgmr.msra.gmra.mrb[16].mxu0 %v31668_v63  ;;  %17325 = vmatpush1.bf16.msra.mxu1 %v24813_v20  ;;  %v24903_v20 = vld [vmem:[%s32079_s7 + $0x2fe0] ss:$16 sps:$4 sm:$0xff]  }
 0xbd8   : > { %17356 = vmatprep.mubr.bf16.mxu1 %v8456_v4  ;;  %18350 = vmatpush1.bf16.msra.mxu0 %v24816_v50  ;;  %v24906_v50 = vld [vmem:[%s32079_s7 + $0x2fe8] ss:$16 sps:$4 sm:$0xff]  }
 0xbd9   : > { %18381 = vmatprep.mubr.bf16.mxu0 %v8456_v4  ;;  %17326 = vmatprep.subr.bf16.mxu1 %v24821_v21  ;;  %v24911_v21 = vld [vmem:[%s32079_s7 + $0x3004] ss:$16 sps:$4 sm:$0xff]   ;;  %v24914_v4 = vld [vmem:[%s32079_s7 + $0x300c] ss:$16 sps:$4 sm:$0xff]  }
 0xbda   : > { %18351 = vmatprep.subr.bf16.mxu0 %v24824_v57  ;;  %v24909_v57 = vld [vmem:[%s32079_s7 + $0x3000] ss:$16 sps:$4 sm:$0xff]  }
 0xbdb   : > { %17327 = vmatpush1.bf16.msra.mxu1 %v24819_v15  ;;  %v8454_v15 = vcombine.high %v31668_v63, %v31668_v63  ;;  %v24915_v63 = vld [vmem:[%s32079_s7 + $0x3020] ss:$16 sps:$4 sm:$0xff]  }
 0xbdc   : > { %18352 = vmatpush1.bf16.msra.mxu0 %v24822_v3  ;;  %17328 = vmatprep.subr.bf16.mxu1 %v24827_v49  ;;  %v24912_v3 = vld [vmem:[%s32079_s7 + $0x3008] ss:$16 sps:$4 sm:$0xff]   ;;  %v24917_v49 = vld [vmem:[%s32079_s7 + $0x3024] ss:$16 sps:$4 sm:$0xff]  }
 0xbdd   : > { %18353 = vmatprep.subr.bf16.mxu0 %v24830_v27  ;;  %v24920_v27 = vld [vmem:[%s32079_s7 + $0x302c] ss:$16 sps:$4 sm:$0xff]  }
 0xbdf   : > { %17329 = vmatpush1.bf16.msra.mxu1 %v24825_v39  ;;  %v24918_v39 = vld [vmem:[%s32079_s7 + $0x3028] ss:$16 sps:$4 sm:$0xff]  }
 0xbe0   : > { %18354 = vmatpush1.bf16.msra.mxu0 %v24828_v53  ;;  %17330 = vmatprep.subr.bf16.mxu1 %v24833_v12  ;;  %v24923_v53 = vld [vmem:[%s32079_s7 + $0x3044] ss:$16 sps:$4 sm:$0xff]   ;;  %v24926_v12 = vld [vmem:[%s32079_s7 + $0x304c] ss:$16 sps:$4 sm:$0xff]  }
 0xbe1   : > { %18355 = vmatprep.subr.bf16.mxu0 %v24836_v22  ;;  %v32120_v22 = vmov 0  }
 0xbe3   : > { %17331 = vmatpush1.bf16.msra.mxu1 %v24831_v8  ;;  %v24921_v8 = vld [vmem:[%s32079_s7 + $0x3040] ss:$16 sps:$4 sm:$0xff]  }
 0xbe4   : > { %18356 = vmatpush1.bf16.msra.mxu0 %v24834_v38  ;;  %17332 = vmatprep.subr.bf16.mxu1 %v24839_v62  ;;  %v24924_v38 = vld [vmem:[%s32079_s7 + $0x3048] ss:$16 sps:$4 sm:$0xff]   ;;  %v24929_v62 = vld [vmem:[%s32079_s7 + $0x3064] ss:$16 sps:$4 sm:$0xff]  }
 0xbe5   : > { %18357 = vmatprep.subr.bf16.mxu0 %v24842_v54  ;;  %v24932_v54 = vld [vmem:[%s32079_s7 + $0x306c] ss:$16 sps:$4 sm:$0xff]  }
 0xbe7   : > { %17333 = vmatpush1.bf16.msra.mxu1 %v24837_v52  ;;  %v24927_v52 = vld [vmem:[%s32079_s7 + $0x3060] ss:$16 sps:$4 sm:$0xff]  }
 0xbe8   : > { %18358 = vmatpush1.bf16.msra.mxu0 %v24840_v34  ;;  %17334 = vmatprep.subr.bf16.mxu1 %v24845_v40  ;;  %v24930_v34 = vld [vmem:[%s32079_s7 + $0x3068] ss:$16 sps:$4 sm:$0xff]   ;;  %v24935_v40 = vld [vmem:[%s32079_s7 + $0x3084] ss:$16 sps:$4 sm:$0xff]  }
 0xbe9   : > { %18359 = vmatprep.subr.bf16.mxu0 %v24848_v56  ;;  %v24938_v56 = vld [vmem:[%s32079_s7 + $0x308c] ss:$16 sps:$4 sm:$0xff]  }
 0xbeb   : > { %17335 = vmatpush1.bf16.msra.mxu1 %v24843_v7  ;;  %v24933_v7 = vld [vmem:[%s32079_s7 + $0x3080] ss:$16 sps:$4 sm:$0xff]  }
 0xbec   : > { %18360 = vmatpush1.bf16.msra.mxu0 %v24846_v32  ;;  %17336 = vmatprep.subr.bf16.mxu1 %v24851_v10  ;;  %v24936_v32 = vld [vmem:[%s32079_s7 + $0x3088] ss:$16 sps:$4 sm:$0xff]   ;;  %v24941_v10 = vld [vmem:[%s32079_s7 + $0x30a4] ss:$16 sps:$4 sm:$0xff]  }
 0xbed   : > { %18361 = vmatprep.subr.bf16.mxu0 %v24854_v0  ;;  %v24944_v0 = vld [vmem:[%s32079_s7 + $0x30ac] ss:$16 sps:$4 sm:$0xff]  }
 0xbef   : > { %17337 = vmatpush1.bf16.msra.mxu1 %v24849_v1  ;;  %v24939_v1 = vld [vmem:[%s32079_s7 + $0x30a0] ss:$16 sps:$4 sm:$0xff]  }
 0xbf0   : > { %18362 = vmatpush1.bf16.msra.mxu0 %v24852_v31  ;;  %17338 = vmatprep.subr.bf16.mxu1 %v24857_v25  ;;  %v24942_v31 = vld [vmem:[%s32079_s7 + $0x30a8] ss:$16 sps:$4 sm:$0xff]   ;;  %v24947_v25 = vld [vmem:[%s32079_s7 + $0x30c4] ss:$16 sps:$4 sm:$0xff]  }
 0xbf1   : > { %18363 = vmatprep.subr.bf16.mxu0 %v24860_v30  ;;  %v24950_v30 = vld [vmem:[%s32079_s7 + $0x30cc] ss:$16 sps:$4 sm:$0xff]  }
 0xbf3   : > { %17339 = vmatpush1.bf16.msra.mxu1 %v24855_v42  ;;  %v24945_v42 = vld [vmem:[%s32079_s7 + $0x30c0] ss:$16 sps:$4 sm:$0xff]  }
 0xbf4   : > { %18364 = vmatpush1.bf16.msra.mxu0 %v24858_v9  ;;  %17340 = vmatprep.subr.bf16.mxu1 %v24863_v28  ;;  %v24948_v9 = vld [vmem:[%s32079_s7 + $0x30c8] ss:$16 sps:$4 sm:$0xff]   ;;  %v24953_v28 = vld [vmem:[%s32079_s7 + $0x30e4] ss:$16 sps:$4 sm:$0xff]  }
 0xbf5   : > { %18365 = vmatprep.subr.bf16.mxu0 %v24866_v5  ;;  %v24956_v5 = vld [vmem:[%s32079_s7 + $0x30ec] ss:$16 sps:$4 sm:$0xff]  }
 0xbf7   : > { %17341 = vmatpush1.bf16.msra.mxu1 %v24861_v58  ;;  %v24951_v58 = vld [vmem:[%s32079_s7 + $0x30e0] ss:$16 sps:$4 sm:$0xff]  }
 0xbf8   : > { %18366 = vmatpush1.bf16.msra.mxu0 %v24864_v14  ;;  %17342 = vmatprep.subr.bf16.mxu1 %v24869_v19  ;;  %v24954_v14 = vld [vmem:[%s32079_s7 + $0x30e8] ss:$16 sps:$4 sm:$0xff]   ;;  %v24957_v19 = vld [vmem:[%s32081_s9 + $0x40] sm:$0xff]  }
 0xbf9   : > { %18367 = vmatprep.subr.bf16.mxu0 %v24872_v43  ;;  %v19150_v43 = vld.sshfl [vmem:[#allocation5 + $0x30] sm:$0x1 pattern:$0x75316420] }
 0xbfb   : > { %17343 = vmatpush1.bf16.msra.mxu1 %v24867_v13  ;;  %v24958_v13 = vld [vmem:[%s32081_s9 + $0xc0] sm:$0xff]  }
 0xbfc   : > { %18368 = vmatpush1.bf16.msra.mxu0 %v24870_v23  ;;  %17344 = vmatprep.subr.bf16.mxu1 %v24875_v59  ;;  %v24959_v23 = vld [vmem:[%s32081_s9] sm:$0xff]   ;;  %v8470_v59 = vrot.slane %v19150_v43, %v27039_v29  ;;  %v24963_v29 = vld [vmem:[%s32081_s9 + $0x8] sm:$0xff]  }
 0xbfd   : > { %18369 = vmatprep.subr.bf16.mxu0 %v24878_v17  ;;  %v24960_v17 = vld [vmem:[%s32081_s9 + $0x80] sm:$0xff]  }
 0xbff   : > { %17345 = vmatpush1.bf16.msra.mxu1 %v24873_v51  ;;  %v24961_v51 = vld [vmem:[%s32081_s9 + $0x48] sm:$0xff]  }
 0xc00   : > { %18370 = vmatpush1.bf16.msra.mxu0 %v24876_v48  ;;  %17346 = vmatprep.subr.bf16.mxu1 %v24881_v61  ;;  %v24962_v48 = vld [vmem:[%s32081_s9 + $0xc8] sm:$0xff]  }
 0xc01   : > { %18371 = vmatprep.subr.bf16.mxu0 %v24884_v60  ;;  %v24964_v61 = vld [vmem:[%s32081_s9 + $0x88] sm:$0xff]   ;;  %v24965_v60 = vld [vmem:[%s32081_s9 + $0x50] sm:$0xff]  }
 0xc03   : > { %17347 = vmatpush1.bf16.msra.mxu1 %v24879_v41  ;;  %v24966_v41 = vld [vmem:[%s32081_s9 + $0xd0] sm:$0xff]  }
 0xc04   : > { %18372 = vmatpush1.bf16.msra.mxu0 %v24882_v44  ;;  %17348 = vmatprep.subr.bf16.mxu1 %v24887_v45  ;;  %v24967_v44 = vld [vmem:[%s32081_s9 + $0x10] sm:$0xff]  }
 0xc05   : > { %18373 = vmatprep.subr.bf16.mxu0 %v24890_v6  ;;  %v24968_v45 = vld [vmem:[%s32081_s9 + $0x90] sm:$0xff]   ;;  %v24969_v6 = vld [vmem:[%s32081_s9 + $0x58] sm:$0xff]  }
 0xc07   : > { %17349 = vmatpush1.bf16.msra.mxu1 %v24885_v37  ;;  %v24970_v37 = vld [vmem:[%s32081_s9 + $0xd8] sm:$0xff]  }
 0xc08   : > { %18374 = vmatpush1.bf16.msra.mxu0 %v24888_v33  ;;  %17350 = vmatprep.subr.bf16.mxu1 %v24893_v18  ;;  %v24971_v33 = vld [vmem:[%s32081_s9 + $0x18] sm:$0xff]  }
 0xc09   : > { %18375 = vmatprep.subr.bf16.mxu0 %v24896_v46  ;;  %v24972_v18 = vld [vmem:[%s32081_s9 + $0x98] sm:$0xff]   ;;  %v24973_v46 = vld [vmem:[%s32081_s9 + $0x60] sm:$0xff]  }
 0xc0b   : > { %17351 = vmatpush1.bf16.msra.mxu1 %v24891_v55  ;;  %v24974_v55 = vld [vmem:[%s32081_s9 + $0xe0] sm:$0xff]  }
 0xc0c   : > { %18376 = vmatpush1.bf16.msra.mxu0 %v24894_v36  ;;  %17352 = vmatprep.subr.bf16.mxu1 %v24899_v11  ;;  %v24975_v36 = vld [vmem:[%s32081_s9 + $0x20] sm:$0xff]  }
 0xc0d   : > { %18377 = vmatprep.subr.bf16.mxu0 %v24902_v35  ;;  %v24976_v11 = vld [vmem:[%s32081_s9 + $0xa0] sm:$0xff]   ;;  %v24977_v35 = vld [vmem:[%s32081_s9 + $0x68] sm:$0xff]  }
 0xc0f   : > { %17353 = vmatpush1.bf16.msra.mxu1 %v24897_v24  ;;  %v24978_v24 = vld [vmem:[%s32081_s9 + $0xe8] sm:$0xff]  }
 0xc10   : > { %18378 = vmatpush1.bf16.msra.mxu0 %v24900_v47  ;;  %17354 = vmatprep.subr.bf16.mxu1 %v24905_v26  ;;  %v24979_v47 = vld [vmem:[%s32081_s9 + $0x28] sm:$0xff]  }
 0xc11   : > { %18379 = vmatprep.subr.bf16.mxu0 %v24908_v16  ;;  %v24980_v26 = vld [vmem:[%s32081_s9 + $0xa8] sm:$0xff]   ;;  %v24981_v16 = vld [vmem:[%s32081_s9 + $0x70] sm:$0xff]  }
 0xc13   : > { %17355 = vmatpush1.bf16.msra.mxu1 %v24903_v20  ;;  %v24982_v20 = vld [vmem:[%s32081_s9 + $0xf0] sm:$0xff]  }
 0xc14   : > { %18380 = vmatpush1.bf16.msra.mxu0 %v24906_v50  ;;  %17365 = vmatprep.subr.bf16.mxu1 %v24911_v21  ;;  %v24983_v50 = vld [vmem:[%s32081_s9 + $0x30] sm:$0xff]  }
 0xc15   : > { %18390 = vmatprep.subr.bf16.mxu0 %v24914_v4  ;;  %v24984_v21 = vld [vmem:[%s32081_s9 + $0xb0] sm:$0xff]   ;;  %v24985_v4 = vld [vmem:[%s32081_s9 + $0x78] sm:$0xff]  }
 0xc16   : > { %17357 = vmatmul.mubr.bf16.vlgmr.msra.gmra.mrb[32].mxu1 %v8454_v15 }
 0xc17   : > { %18382 = vmatmul.mubr.bf16.vlgmr.msra.gmra.mrb[16].mxu0 %v8454_v15  ;;  %17366 = vmatpush1.bf16.msra.mxu1 %v24909_v57  ;;  %v24986_v57 = vld [vmem:[%s32081_s9 + $0xf8] sm:$0xff]  }
 0xc18   : > { %18391 = vmatpush1.bf16.msra.mxu0 %v24912_v3  ;;  %17367 = vmatprep.subr.bf16.mxu1 %v24917_v49  ;;  %v24987_v15 = vld [vmem:[%s32081_s9 + $0x38] sm:$0xff]   ;;  %v16363_v49 = vsub.s32 0, %v27035_v2 }
 0xc19   : > { %18392 = vmatprep.subr.bf16.mxu0 %v24920_v27  ;;  %17397 = vmatprep.mubr.bf16.mxu1 %v32120_v22  ;;  %v24988_v3 = vld [vmem:[%s32081_s9 + $0xb8] sm:$0xff]   ;;  %v8155_v27 = vld [vmem:[%s32080_s8] sm:$0xf] }
 0xc1a   : > { %18422 = vmatprep.mubr.bf16.mxu0 %v32120_v22 }
 0xc1b   : > { %17368 = vmatpush1.bf16.msra.mxu1 %v24915_v63  ;;  %v16371_v63 = vsub.s32 2, %v27035_v2 }
 0xc1c   : > { %18393 = vmatpush1.bf16.msra.mxu0 %v24918_v39  ;;  %17369 = vmatprep.subr.bf16.mxu1 %v24923_v53  ;;  %v16367_v39 = vsub.s32 1, %v27035_v2  ;;  %v16375_v53 = vsub.s32 3, %v27035_v2 }
 0xc1d   : > { %18394 = vmatprep.subr.bf16.mxu0 %v24926_v12  ;;  %v16364_v12 = vrot.slane %v8155_v27, %v16363_v49  ;;  %v16372_v22 = vrot.slane %v8155_v27, %v16371_v63 }
 0xc1f   : > { %17370 = vmatpush1.bf16.msra.mxu1 %v24921_v8  ;;  %v16368_v8 = vrot.slane %v8155_v27, %v16367_v39 }
 0xc20   : > { %18395 = vmatpush1.bf16.msra.mxu0 %v24924_v38  ;;  %17371 = vmatprep.subr.bf16.mxu1 %v24929_v62  ;;  %v16376_v38 = vrot.slane %v8155_v27, %v16375_v53 }
 0xc21   : > { %18396 = vmatprep.subr.bf16.mxu0 %v24932_v54 }
 0xc23   : > { %17372 = vmatpush1.bf16.msra.mxu1 %v24927_v52 }
 0xc24   : > { %18397 = vmatpush1.bf16.msra.mxu0 %v24930_v34  ;;  %17373 = vmatprep.subr.bf16.mxu1 %v24935_v40 }
 0xc25   : > { %18398 = vmatprep.subr.bf16.mxu0 %v24938_v56 }
 0xc27   : > { %17374 = vmatpush1.bf16.msra.mxu1 %v24933_v7 }
 0xc28   : > { %18399 = vmatpush1.bf16.msra.mxu0 %v24936_v32  ;;  %17375 = vmatprep.subr.bf16.mxu1 %v24941_v10 }
 0xc29   : > { %18400 = vmatprep.subr.bf16.mxu0 %v24944_v0 }
 0xc2b   : > { %17376 = vmatpush1.bf16.msra.mxu1 %v24939_v1 }
 0xc2c   : > { %18401 = vmatpush1.bf16.msra.mxu0 %v24942_v31  ;;  %17377 = vmatprep.subr.bf16.mxu1 %v24947_v25 }
 0xc2d   : > { %18402 = vmatprep.subr.bf16.mxu0 %v24950_v30 }
 0xc2f   : > { %17378 = vmatpush1.bf16.msra.mxu1 %v24945_v42 }
 0xc30   : > { %18403 = vmatpush1.bf16.msra.mxu0 %v24948_v9  ;;  %17379 = vmatprep.subr.bf16.mxu1 %v24953_v28 }
 0xc31   : > { %18404 = vmatprep.subr.bf16.mxu0 %v24956_v5 }
 0xc33   : > { %17380 = vmatpush1.bf16.msra.mxu1 %v24951_v58 }
 0xc34   : > { %18405 = vmatpush1.bf16.msra.mxu0 %v24954_v14  ;;  %21095 = vmatprep.subr.bf16.mxu1 %v24957_v19 }
 0xc35   : > { %21117 = vmatprep.subr.bf16.mxu0 %v24958_v13 }
 0xc36   : > { %17398 = vmatmul.mubr.bf16.vlgmr.msra.gmra.mrb[32].mxu1 %v8470_v59 }
 0xc37   : > { %18423 = vmatmul.mubr.bf16.vlgmr.msra.gmra.mrb[16].mxu0 %v8470_v59  ;;  %21096 = vmatpush3.bf16.msra.mxu1 %v24959_v23 }
 0xc38   : > { %21118 = vmatpush3.bf16.msra.mxu0 %v24960_v17  ;;  %21097 = vmatprep.subr.bf16.mxu1 %v24961_v51  ;;  %v18511_v17 = vld [vmem:[%s32082_s10] sm:$0x1] }
 0xc39   : > { %21119 = vmatprep.subr.bf16.mxu0 %v24962_v48 }
 0xc3b   : > { %21098 = vmatpush3.bf16.msra.mxu1 %v24963_v29 }
 0xc3c   : > { %21120 = vmatpush3.bf16.msra.mxu0 %v24964_v61  ;;  %21099 = vmatprep.subr.bf16.mxu1 %v24965_v60 }
 0xc3d   : > { %21121 = vmatprep.subr.bf16.mxu0 %v24966_v41 }
 0xc3f   : > { %21100 = vmatpush3.bf16.msra.mxu1 %v24967_v44 }
 0xc40   : > { %21122 = vmatpush3.bf16.msra.mxu0 %v24968_v45  ;;  %21101 = vmatprep.subr.bf16.mxu1 %v24969_v6 }
 0xc41   : > { %21123 = vmatprep.subr.bf16.mxu0 %v24970_v37 }
 0xc43   : > { %21102 = vmatpush3.bf16.msra.mxu1 %v24971_v33 }
 0xc44   : > { %21124 = vmatpush3.bf16.msra.mxu0 %v24972_v18  ;;  %21103 = vmatprep.subr.bf16.mxu1 %v24973_v46 }
 0xc45   : > { %21125 = vmatprep.subr.bf16.mxu0 %v24974_v55 }
 0xc47   : > { %21104 = vmatpush3.bf16.msra.mxu1 %v24975_v36 }
 0xc48   : > { %21126 = vmatpush3.bf16.msra.mxu0 %v24976_v11  ;;  %21105 = vmatprep.subr.bf16.mxu1 %v24977_v35 }
 0xc49   : > { %21127 = vmatprep.subr.bf16.mxu0 %v24978_v24 }
 0xc4b   : > { %21106 = vmatpush3.bf16.msra.mxu1 %v24979_v47 }
 0xc4c   : > { %21128 = vmatpush3.bf16.msra.mxu0 %v24980_v26  ;;  %21107 = vmatprep.subr.bf16.mxu1 %v24981_v16 }
 0xc4d   : > { %21129 = vmatprep.subr.bf16.mxu0 %v24982_v20 }
 0xc4f   : > { %21108 = vmatpush3.bf16.msra.mxu1 %v24983_v50 }
 0xc50   : > { %21130 = vmatpush3.bf16.msra.mxu0 %v24984_v21  ;;  %21109 = vmatprep.subr.bf16.mxu1 %v24985_v4 }
 0xc51   : > { %21131 = vmatprep.subr.bf16.mxu0 %v24986_v57 }
 0xc53   : > { %21110 = vmatpush3.bf16.msra.mxu1 %v24987_v15 }
 0xc54   : > { %21132 = vmatpush3.bf16.msra.mxu0 %v24988_v3 }
 0xd09   : > { %v17399_v62 = vpop.f32.mrb[32].mxu1 }
 0xd0a   : > { %v21911_v54 = vadd.f32 %v17399_v62, %v16364_v12  ;;  %v18424_v52 = vpop.f32.mrb[16].mxu0  ;;  %v17401_v34 = vpop.f32.mrb[33].mxu1 }
 0xd0b   : > { %v21913_v40 = vadd.f32 %v18424_v52, %v16372_v22  ;;  %v21912_v56 = vadd.f32 %v17401_v34, %v16368_v8  ;;  %v18426_v7 = vpop.f32.mrb[17].mxu0  ;;  %v17403_v32 = vpop.f32.mrb[34].mxu1 }
 0xd0c   : > { %vm18431_vm5 = vcmp.gt.f32.partialorder %v21911_v54, 0.0  ;;  %v18435_v10 = vmul.f32 0.01, %v21911_v54  ;;  %v21914_v0 = vadd.f32 %v18426_v7, %v16376_v38  ;;  %v18428_v1 = vpop.f32.mrb[18].mxu0  ;;  %v17404_v31 = vpop.f32.mrb[35].mxu1 }
 0xd0d   : > { %vm18433_vm7 = vcmp.gt.f32.partialorder %v21913_v40, 0.0  ;;  %v18437_v25 = vmul.f32 0.01, %v21913_v40  ;;  %vm18432_vm3 = vcmp.gt.f32.partialorder %v21912_v56, 0.0  ;;  %v18436_v2 = vmul.f32 0.01, %v21912_v56 }
 0xd0e   : > { %v18439_v30 = vsel %vm18431_vm5, %v21911_v54, %v18435_v10  ;;  %vm18434_vm9 = vcmp.gt.f32.partialorder %v21914_v0, 0.0  ;;  %v18438_v42 = vmul.f32 0.01, %v21914_v0  ;;  %v18429_v9 = vpop.f32.mrb[19].mxu0 }
 0xd0f   : > { %v18441_v28 = vsel %vm18433_vm7, %v21913_v40, %v18437_v25  ;;  %v18440_v5 = vsel %vm18432_vm3, %v21912_v56, %v18436_v2  ;;  %v18443_v19 = vpack.c.bf16 %v18439_v30, %v18439_v30 }
 0xd10   : > { %v18444_v58 = vpack.c.bf16 %v18440_v5, %v18440_v5  ;;  %v18442_v14 = vsel %vm18434_vm9, %v21914_v0, %v18438_v42  ;;  %v18445_v13 = vpack.c.bf16 %v18441_v28, %v18441_v28 }
 0xd11   : > { %v18446_v43 = vpack.c.bf16 %v18442_v14, %v18442_v14 }
 0xd12   : > { %18736 = vmatprep.mubr.bf16.mxu1 %v18444_v58 }
 0xd13   : > { %18776 = vmatprep.mubr.bf16.mxu0 %v18446_v43  ;;  %18737 = vmatmul.mubr.bf16.vlgmr.msra.gmra.mrb[36].mxu1 %v18443_v19 }
 0xd14   : > { %18777 = vmatmul.mubr.bf16.vlgmr.msra.gmra.mrb[20].mxu0 %v18445_v13 }
 0xde6   : > { %v21111_v23 = vpop.f32.mrb[36].mxu1 }
 0xde7   : > { %v21133_v59 = vpop.f32.mrb[20].mxu0  ;;  %v21112_v51 = vpop.f32.mrb[37].mxu1 }
 0xde8   : > { %v21113_v48 = vadd.f32 %v21112_v51, %v21111_v23  ;;  %v21134_v29 = vpop.f32.mrb[21].mxu0  ;;  %v21114_v61 = vpop.f32.mrb[38].mxu1 }
 0xde9   : > { %v21135_v60 = vadd.f32 %v21134_v29, %v21133_v59  ;;  %v21136_v41 = vpop.f32.mrb[22].mxu0  ;;  %v21115_v44 = vpop.f32.mrb[39].mxu1 }
 0xdea   : > { %v18739_v45 = vadd.f32 %v21113_v48, %v18511_v17  ;;  %v21137_v6 = vpop.f32.mrb[23].mxu0 }
 0xdec   : > { %v18779_v37 = vadd.f32 %v21135_v60, %v18739_v45 }
 0xdee   : > { %v18787_v33 = vrot.slane %v18779_v37, %v16363_v49 }
 0xdf0   : > { %18788 = vst [vmem:[%s389_s22] sm:$0xff] %v18787_v33 }
 0xdf1 PF: > { %s21_s17 = sadd.s32 1, %s25011_s17  }
 0xdf2   : > { %p18_p5 = scmp.ge.s32.totalorder %s21_s17, 4  }
 0xdf4   :  { %20 = sbr.rel (!%p18_p5) target bundleno = 1 (0x1), region = 94 }

</bundles_post_ra>
